<compile_context>
chip_gen: v7x
topology: tpu7x:2x2x1
jax: 0.10.0
libtpu: 0.0.40
codegen_flags: <defaults>
</compile_context>

<pallas_src>
import jax
import jax.numpy as jnp
from jax.experimental import pallas as pl
from jax.experimental.pallas import tpu as pltpu

NUM_HEADS = 12
LN_EPS = 1e-5
NEG_INF = -1e30          # finite "minus infinity" (HF finfo-min convention)

TARGET_BLOCK_ROWS = 256  # pack sequences until each grid step has ~256 rows
Q_TILE_MAX = 256         # flash-attention query tile
KV_TILE_MAX = 512        # flash-attention key/value tile


def _layernorm(x, w, b):
    mu = jnp.mean(x, axis=-1, keepdims=True)
    var = jnp.mean(jnp.square(x - mu), axis=-1, keepdims=True)
    return (x - mu) * jax.lax.rsqrt(var + LN_EPS) * w + b


def _tile(n, cap):
    """Largest sublane-aligned divisor of n that is <= cap (n is a multiple of 8)."""
    if n <= cap:
        return n
    t = cap - (cap % 8)
    while n % t:
        t -= 8
    return t


# ---------------------------------------------------------------------------
# Fused decoder-layer kernel: one grid step per packed block of sequences.
# ---------------------------------------------------------------------------
def decoder_layer_kernel(hs_ref, qcode_ref, kcode_ref,
                         ln1_w_ref, ln1_b_ref, wqkv_ref, bqkv_ref,
                         wo_ref, bo_ref,
                         ln2_w_ref, ln2_b_ref, w1_ref, b1_ref, w2_ref, b2_ref,
                         out_ref):
    M, E = hs_ref.shape
    H = NUM_HEADS
    D = E // H

    x = hs_ref[...]                                        # (M, E) f32 residual

    # -------------------- attention block (pre-LN) --------------------
    ln1 = _layernorm(x, ln1_w_ref[...], ln1_b_ref[...])

    # Fused QKV projection: one MXU pass, bf16 operands, f32 accumulation.
    # 1/sqrt(D) is already folded into Wq / bq in pack_params.
    qkv = jnp.dot(ln1.astype(jnp.bfloat16), wqkv_ref[...],
                  preferred_element_type=jnp.float32) + bqkv_ref[...]   # (M, 3E)

    # Head split: cast to bf16 BEFORE the relayout (half the XLU/VMEM traffic).
    def split_heads(z):                                    # (M, E) -> (H, M, D) bf16
        return jnp.transpose(z.astype(jnp.bfloat16).reshape(M, H, D), (1, 0, 2))

    q_b = split_heads(qkv[:, :E])
    k_b = split_heads(qkv[:, E:2 * E])
    v_b = split_heads(qkv[:, 2 * E:])

    q_code = qcode_ref[...]                                # (M, 1) i32 sequence id
    k_code = kcode_ref[...]                                # (1, M) i32 seq id, -1 = pad

    # Flash-style attention over the packed block: per-tile scores only, online
    # softmax, causal + padding + cross-sequence masking in one jnp.where.
    tq = _tile(M, Q_TILE_MAX)
    tk = _tile(M, KV_TILE_MAX)

    ctx_tiles = []
    for qi in range(M // tq):
        q0 = qi * tq
        q_t = q_b[:, q0:q0 + tq, :]                        # (H, tq, D) bf16
        qc = q_code[q0:q0 + tq, :]                         # (tq, 1)
        rows = q0 + jax.lax.broadcasted_iota(jnp.int32, (tq, tk), 0)
        m_i = jnp.full((H, tq, 1), NEG_INF, jnp.float32)
        l_i = jnp.zeros((H, tq, 1), jnp.float32)
        acc = jnp.zeros((H, tq, D), jnp.float32)
        for ki in range(M // tk):
            k0 = ki * tk
            if k0 > q0 + tq - 1:
                continue                                   # entirely above the causal diagonal
            k_t = k_b[:, k0:k0 + tk, :]                    # (H, tk, D) bf16
            v_t = v_b[:, k0:k0 + tk, :]
            kc = k_code[:, k0:k0 + tk]                     # (1, tk)
            cols = k0 + jax.lax.broadcasted_iota(jnp.int32, (tq, tk), 1)
            allowed = (cols <= rows) & (kc == qc)          # causal & same-seq & not-pad
            s = jnp.einsum('hqd,hkd->hqk', q_t, k_t,
                           preferred_element_type=jnp.float32)           # (H, tq, tk)
            s = jnp.where(allowed[None, :, :], s, NEG_INF)
            m_new = jnp.maximum(m_i, jnp.max(s, axis=-1, keepdims=True))
            alpha = jnp.exp(m_i - m_new)
            p = jnp.exp(s - m_new)
            l_i = alpha * l_i + jnp.sum(p, axis=-1, keepdims=True)
            acc = alpha * acc + jnp.einsum('hqk,hkd->hqd', p.astype(jnp.bfloat16),
                                           v_t, preferred_element_type=jnp.float32)
            m_i = m_new
        ctx_tiles.append((acc * pl.reciprocal(l_i, approx=True)).astype(jnp.bfloat16))

    ctx = ctx_tiles[0] if len(ctx_tiles) == 1 else jnp.concatenate(ctx_tiles, axis=1)
    # Merge heads (bf16 relayout) and project; output (M, E) is lane-dense.
    attn = jnp.transpose(ctx, (1, 0, 2)).reshape(M, E)     # (M, E) bf16
    proj = jnp.dot(attn, wo_ref[...],
                   preferred_element_type=jnp.float32) + bo_ref[...]
    h1 = x + proj                                  # dropout = identity (eval mode)

    # -------------------- FFN block (pre-LN) --------------------
    ln2 = _layernorm(h1, ln2_w_ref[...], ln2_b_ref[...])
    f = jnp.dot(ln2.astype(jnp.bfloat16), w1_ref[...],
                preferred_element_type=jnp.float32) + b1_ref[...]
    f = jnp.maximum(f, 0.0)                        # OPT activation_fn = relu
    y = jnp.dot(f.astype(jnp.bfloat16), w2_ref[...],
                preferred_element_type=jnp.float32) + b2_ref[...]
    out_ref[...] = h1 + y                          # dropout = identity (eval mode)


# ---------------------------------------------------------------------------
# Wrapper
# ---------------------------------------------------------------------------
def orca_opt_decoder_layer(hidden_states, attention_mask, params, seq_len):
    """hidden_states: (total_tokens, E); attention_mask: (n_seq, seq_len), nonzero = keep."""
    T, E = hidden_states.shape
    F = params["w1"].shape[1]
    assert E % NUM_HEADS == 0
    assert seq_len % 8 == 0, "seq_len must be a multiple of 8 (f32 sublane tile)"
    n_seq = T // seq_len
    assert n_seq * seq_len == T
    # TODO(synk): ragged sequence_lengths (true Orca selective batching) not handled.

    # Pack several short sequences per grid step so the projection / FFN matmuls
    # see M ~ TARGET_BLOCK_ROWS rows; attention stays per-sequence via seq ids.
    pack = max(1, min(n_seq, TARGET_BLOCK_ROWS // seq_len))
    while n_seq % pack:
        pack -= 1
    n_blocks = n_seq // pack
    M = pack * seq_len

    # Per-query sequence ids and per-key codes (seq id, or -1 for padding):
    # block-diagonal + key-padding masking becomes one integer compare per tile.
    seq_ids = jnp.repeat(jnp.arange(pack, dtype=jnp.int32), seq_len)       # (M,)
    mask_blocks = attention_mask.reshape(n_blocks, M)
    q_code = jnp.broadcast_to(seq_ids, (n_blocks, M)).astype(jnp.int32)[:, :, None]
    key_code = jnp.where(mask_blocks != 0, seq_ids[None, :], -1).astype(jnp.int32)[:, None, :]

    def const(shape):
        return pl.BlockSpec(shape, lambda i, _n=len(shape): (0,) * _n)

    return pl.pallas_call(
        decoder_layer_kernel,
        out_shape=jax.ShapeDtypeStruct((T, E), jnp.float32),
        grid=(n_blocks,),
        in_specs=[
            pl.BlockSpec((M, E), lambda i: (i, 0)),                 # hidden states
            pl.BlockSpec((None, M, 1), lambda i: (i, 0, 0)),        # query seq ids
            pl.BlockSpec((None, 1, M), lambda i: (i, 0, 0)),        # key codes
            const((1, E)), const((1, E)),                           # ln1 w, b
            const((E, 3 * E)), const((1, 3 * E)),                   # fused Wqkv, bqkv
            const((E, E)), const((1, E)),                           # Wo, bo
            const((1, E)), const((1, E)),                           # ln2 w, b
            const((E, F)), const((1, F)),                           # fc1
            const((F, E)), const((1, E)),                           # fc2
        ],
        out_specs=pl.BlockSpec((M, E), lambda i: (i, 0)),
        compiler_params=pltpu.CompilerParams(
            dimension_semantics=("parallel",),
            vmem_limit_bytes=48 * 1024 * 1024),
    )(hidden_states, q_code, key_code,
      params["ln1_w"], params["ln1_b"], params["wqkv"], params["bqkv"],
      params["wo"], params["bo"],
      params["ln2_w"], params["ln2_b"], params["w1"], params["b1"],
      params["w2"], params["b2"])


def pack_params(raw, num_heads=NUM_HEADS):
    """Pack torch-layout weights: fuse QKV, fold 1/sqrt(D), cast matmul weights to bf16."""
    E = raw["out_proj_w"].shape[0]
    D = E // num_heads
    scale = 1.0 / (D ** 0.5)
    wq = raw["in_proj_w"][:E].T * scale
    wk = raw["in_proj_w"][E:2 * E].T
    wv = raw["in_proj_w"][2 * E:].T
    bq = raw["in_proj_b"][:E] * scale
    bk = raw["in_proj_b"][E:2 * E]
    bv = raw["in_proj_b"][2 * E:]
    F = raw["fc1_w"].shape[0]
    return {
        "wqkv": jnp.concatenate([wq, wk, wv], axis=1).astype(jnp.bfloat16),   # (E, 3E)
        "bqkv": jnp.concatenate([bq, bk, bv]).reshape(1, 3 * E).astype(jnp.float32),
        "wo": raw["out_proj_w"].T.astype(jnp.bfloat16),
        "bo": raw["out_proj_b"].reshape(1, E).astype(jnp.float32),
        "w1": raw["fc1_w"].T.astype(jnp.bfloat16),
        "b1": raw["fc1_b"].reshape(1, F).astype(jnp.float32),
        "w2": raw["fc2_w"].T.astype(jnp.bfloat16),
        "b2": raw["fc2_b"].reshape(1, E).astype(jnp.float32),
        "ln1_w": raw["ln1_w"].reshape(1, E).astype(jnp.float32),
        "ln1_b": raw["ln1_b"].reshape(1, E).astype(jnp.float32),
        "ln2_w": raw["ln2_w"].reshape(1, E).astype(jnp.float32),
        "ln2_b": raw["ln2_b"].reshape(1, E).astype(jnp.float32),
    }


# ---------------------------------------------------------------------------
# Pure-JAX f32 reference (mirrors the PyTorch forward, eval mode, no cache)
# ---------------------------------------------------------------------------
def reference(hidden_states, attention_mask, raw, seq_len):
    T, E = hidden_states.shape
    H, D = NUM_HEADS, E // NUM_HEADS
    n_seq = T // seq_len

    def ln(x, w, b):
        mu = x.mean(-1, keepdims=True)
        var = ((x - mu) ** 2).mean(-1, keepdims=True)
        return (x - mu) / jnp.sqrt(var + LN_EPS) * w + b

    wq, wk, wv = (raw["in_proj_w"][:E].T, raw["in_proj_w"][E:2 * E].T,
                  raw["in_proj_w"][2 * E:].T)
    bq, bk, bv = (raw["in_proj_b"][:E], raw["in_proj_b"][E:2 * E],
                  raw["in_proj_b"][2 * E:])
    wo, bo = raw["out_proj_w"].T, raw["out_proj_b"]
    w1, b1 = raw["fc1_w"].T, raw["fc1_b"]
    w2, b2 = raw["fc2_w"].T, raw["fc2_b"]

    residual = hidden_states
    x = ln(hidden_states, raw["ln1_w"], raw["ln1_b"])
    outs = []
    for i in range(n_seq):
        hs = x[i * seq_len:(i + 1) * seq_len]
        q = (hs @ wq + bq).reshape(seq_len, H, D).transpose(1, 0, 2)
        k = (hs @ wk + bk).reshape(seq_len, H, D).transpose(1, 0, 2)
        v = (hs @ wv + bv).reshape(seq_len, H, D).transpose(1, 0, 2)
        s = (q / jnp.sqrt(D)) @ k.transpose(0, 2, 1)
        row = jnp.arange(seq_len)[:, None]
        col = jnp.arange(seq_len)[None, :]
        causal = jnp.where(col > row, -jnp.inf, 0.0)
        pad = jnp.where(attention_mask[i] == 0, -jnp.inf, 0.0)[None, :]
        a = jax.nn.softmax(s + causal + pad, axis=-1)
        o = (a @ v).transpose(1, 0, 2).reshape(seq_len, E)
        outs.append(o @ wo + bo)
    h = residual + jnp.concatenate(outs, axis=0)
    residual = h
    y = ln(h, raw["ln2_w"], raw["ln2_b"])
    y = jnp.maximum(y @ w1 + b1, 0.0)
    y = y @ w2 + b2
    return residual + y


# ---------------------------------------------------------------------------
if __name__ == "__main__":
    E = 384               # 12 heads x head_dim 32; lane-aligned (3 * 128)
    F = 4 * E             # OPT ffn_dim = 4 * hidden_size
    S, NSEQ = 16, 2       # two sequences of length 16 (selective batching)
    T = S * NSEQ

    key = jax.random.PRNGKey(0)
    ks = jax.random.split(key, 13)

    raw = {
        "in_proj_w": 0.02 * jax.random.normal(ks[0], (3 * E, E), jnp.float32),
        "in_proj_b": 0.02 * jax.random.normal(ks[1], (3 * E,), jnp.float32),
        "out_proj_w": 0.02 * jax.random.normal(ks[2], (E, E), jnp.float32),
        "out_proj_b": 0.02 * jax.random.normal(ks[3], (E,), jnp.float32),
        "fc1_w": 0.02 * jax.random.normal(ks[4], (F, E), jnp.float32),
        "fc1_b": 0.02 * jax.random.normal(ks[5], (F,), jnp.float32),
        "fc2_w": 0.02 * jax.random.normal(ks[6], (E, F), jnp.float32),
        "fc2_b": 0.02 * jax.random.normal(ks[7], (E,), jnp.float32),
        "ln1_w": 1.0 + 0.02 * jax.random.normal(ks[8], (E,), jnp.float32),
        "ln1_b": 0.02 * jax.random.normal(ks[9], (E,), jnp.float32),
        "ln2_w": 1.0 + 0.02 * jax.random.normal(ks[10], (E,), jnp.float32),
        "ln2_b": 0.02 * jax.random.normal(ks[11], (E,), jnp.float32),
    }
    params = pack_params(raw)

    hidden_states = jax.random.normal(ks[12], (T, E), jnp.float32)
    # padding at the tail of the 2nd sequence exercises the key-padding path
    attention_mask = jnp.ones((NSEQ, S), jnp.float32).at[1, S - 3:].set(0.0)

    out = orca_opt_decoder_layer(hidden_states, attention_mask, params, S)
    out = jax.block_until_ready(out)

    ref = reference(hidden_states, attention_mask, raw, S)
    assert out.shape == (T, E)
    assert not bool(jnp.any(jnp.isnan(out)))
    max_err = float(jnp.max(jnp.abs(out - ref)))
    assert bool(jnp.allclose(out, ref, atol=3e-2, rtol=3e-2)), (
        f"mismatch vs reference (max abs err {max_err:.4e})")

    print("KERNEL_OK")
</pallas_src>

<mosaic_0001>
module attributes {stable_mosaic.version = 11 : i64} {
  func.func @decoder_layer_kernel(%arg0: i32, %arg1: memref<32x384xf32, #tpu.memory_space<vmem>>, %arg2: memref<1x32x1xi32, #tpu.memory_space<vmem>>, %arg3: memref<1x1x32xi32, #tpu.memory_space<vmem>>, %arg4: memref<1x384xf32, #tpu.memory_space<vmem>>, %arg5: memref<1x384xf32, #tpu.memory_space<vmem>>, %arg6: memref<384x1152xbf16, #tpu.memory_space<vmem>>, %arg7: memref<1x1152xf32, #tpu.memory_space<vmem>>, %arg8: memref<384x384xbf16, #tpu.memory_space<vmem>>, %arg9: memref<1x384xf32, #tpu.memory_space<vmem>>, %arg10: memref<1x384xf32, #tpu.memory_space<vmem>>, %arg11: memref<1x384xf32, #tpu.memory_space<vmem>>, %arg12: memref<384x1536xbf16, #tpu.memory_space<vmem>>, %arg13: memref<1x1536xf32, #tpu.memory_space<vmem>>, %arg14: memref<1536x384xbf16, #tpu.memory_space<vmem>>, %arg15: memref<1x384xf32, #tpu.memory_space<vmem>>, %arg16: memref<32x384xf32, #tpu.memory_space<vmem>>) attributes {dimension_semantics = [#tpu.dimension_semantics<parallel>], iteration_bounds = array<i64: 1>, scalar_prefetch = 0 : i64, scratch_operands = 0 : i64, tpu.core_type = #tpu.core_type<tc>, window_params = [{transform_indices = @transform_0, window_bounds = array<i64: 32, 384>}, {transform_indices = @transform_1, window_bounds = array<i64: 1, 32, 1>}, {transform_indices = @transform_2, window_bounds = array<i64: 1, 1, 32>}, {pipeline_mode = #tpu.pipeline_mode<synchronous>, transform_indices = @transform_3, window_bounds = array<i64: 1, 384>}, {pipeline_mode = #tpu.pipeline_mode<synchronous>, transform_indices = @transform_4, window_bounds = array<i64: 1, 384>}, {pipeline_mode = #tpu.pipeline_mode<synchronous>, transform_indices = @transform_5, window_bounds = array<i64: 384, 1152>}, {pipeline_mode = #tpu.pipeline_mode<synchronous>, transform_indices = @transform_6, window_bounds = array<i64: 1, 1152>}, {pipeline_mode = #tpu.pipeline_mode<synchronous>, transform_indices = @transform_7, window_bounds = array<i64: 384, 384>}, {pipeline_mode = #tpu.pipeline_mode<synchronous>, transform_indices = @transform_8, window_bounds = array<i64: 1, 384>}, {pipeline_mode = #tpu.pipeline_mode<synchronous>, transform_indices = @transform_9, window_bounds = array<i64: 1, 384>}, {pipeline_mode = #tpu.pipeline_mode<synchronous>, transform_indices = @transform_10, window_bounds = array<i64: 1, 384>}, {pipeline_mode = #tpu.pipeline_mode<synchronous>, transform_indices = @transform_11, window_bounds = array<i64: 384, 1536>}, {pipeline_mode = #tpu.pipeline_mode<synchronous>, transform_indices = @transform_12, window_bounds = array<i64: 1, 1536>}, {pipeline_mode = #tpu.pipeline_mode<synchronous>, transform_indices = @transform_13, window_bounds = array<i64: 1536, 384>}, {pipeline_mode = #tpu.pipeline_mode<synchronous>, transform_indices = @transform_14, window_bounds = array<i64: 1, 384>}, {transform_indices = @transform_15, window_bounds = array<i64: 32, 384>}]} {
    %c0 = arith.constant 0 : index
    %c0_0 = arith.constant 0 : index
    %0 = vector.load %arg1[%c0, %c0_0] : memref<32x384xf32, #tpu.memory_space<vmem>>, vector<32x384xf32>
    %c0_1 = arith.constant 0 : index
    %c0_2 = arith.constant 0 : index
    %1 = vector.load %arg4[%c0_1, %c0_2] : memref<1x384xf32, #tpu.memory_space<vmem>>, vector<1x384xf32>
    %c0_3 = arith.constant 0 : index
    %c0_4 = arith.constant 0 : index
    %2 = vector.load %arg5[%c0_3, %c0_4] : memref<1x384xf32, #tpu.memory_space<vmem>>, vector<1x384xf32>
    %cst = arith.constant dense<0.000000e+00> : vector<32xf32>
    %3 = vector.multi_reduction <add>, %0, %cst [1] : vector<32x384xf32> to vector<32xf32>
    %4 = vector.shape_cast %3 : vector<32xf32> to vector<32x1xf32>
    %cst_5 = arith.constant 3.840000e+02 : f32
    %5 = vector.broadcast %cst_5 : f32 to vector<32x1xf32>
    %6 = arith.divf %4, %5 : vector<32x1xf32>
    %7 = vector.broadcast %6 : vector<32x1xf32> to vector<32x384xf32>
    %8 = arith.subf %0, %7 : vector<32x384xf32>
    %9 = arith.mulf %8, %8 : vector<32x384xf32>
    %cst_6 = arith.constant dense<0.000000e+00> : vector<32xf32>
    %10 = vector.multi_reduction <add>, %9, %cst_6 [1] : vector<32x384xf32> to vector<32xf32>
    %11 = vector.shape_cast %10 : vector<32xf32> to vector<32x1xf32>
    %cst_7 = arith.constant 3.840000e+02 : f32
    %12 = vector.broadcast %cst_7 : f32 to vector<32x1xf32>
    %13 = arith.divf %11, %12 : vector<32x1xf32>
    %14 = vector.broadcast %6 : vector<32x1xf32> to vector<32x384xf32>
    %15 = arith.subf %0, %14 : vector<32x384xf32>
    %cst_8 = arith.constant 9.99999974E-6 : f32
    %16 = vector.broadcast %cst_8 : f32 to vector<32x1xf32>
    %17 = arith.addf %13, %16 : vector<32x1xf32>
    %18 = math.rsqrt %17 : vector<32x1xf32>
    %19 = vector.broadcast %18 : vector<32x1xf32> to vector<32x384xf32>
    %20 = arith.mulf %15, %19 : vector<32x384xf32>
    %21 = vector.broadcast %1 : vector<1x384xf32> to vector<32x384xf32>
    %22 = arith.mulf %20, %21 : vector<32x384xf32>
    %23 = vector.broadcast %2 : vector<1x384xf32> to vector<32x384xf32>
    %24 = arith.addf %22, %23 : vector<32x384xf32>
    %25 = arith.truncf %24 : vector<32x384xf32> to vector<32x384xbf16>
    %c0_9 = arith.constant 0 : index
    %c0_10 = arith.constant 0 : index
    %26 = vector.load %arg6[%c0_9, %c0_10] : memref<384x1152xbf16, #tpu.memory_space<vmem>>, vector<384x1152xbf16>
    %cst_11 = arith.constant dense<0.000000e+00> : vector<32x1152xf32>
    %27 = tpu.matmul %25, %26, %cst_11 {dimension_numbers = #tpu.dot_dimension_numbers<[1], [0], [0], [1], [0, 0, 1, 1], [], []>} : vector<32x384xbf16>, vector<384x1152xbf16>, vector<32x1152xf32> -> vector<32x1152xf32>
    %c0_12 = arith.constant 0 : index
    %c0_13 = arith.constant 0 : index
    %28 = vector.load %arg7[%c0_12, %c0_13] : memref<1x1152xf32, #tpu.memory_space<vmem>>, vector<1x1152xf32>
    %29 = vector.broadcast %28 : vector<1x1152xf32> to vector<32x1152xf32>
    %30 = arith.addf %27, %29 : vector<32x1152xf32>
    %31 = vector.extract_strided_slice %30 {offsets = [0, 0], sizes = [32, 384], strides = [1, 1]} : vector<32x1152xf32> to vector<32x384xf32>
    %32 = arith.truncf %31 : vector<32x384xf32> to vector<32x384xbf16>
    %33 = vector.shape_cast %32 : vector<32x384xbf16> to vector<32x12x32xbf16>
    %34 = tpu.transpose %33, [1, 0, 2] : vector<32x12x32xbf16> -> vector<12x32x32xbf16>
    %35 = vector.extract_strided_slice %30 {offsets = [0, 384], sizes = [32, 384], strides = [1, 1]} : vector<32x1152xf32> to vector<32x384xf32>
    %36 = arith.truncf %35 : vector<32x384xf32> to vector<32x384xbf16>
    %37 = vector.shape_cast %36 : vector<32x384xbf16> to vector<32x12x32xbf16>
    %38 = tpu.transpose %37, [1, 0, 2] : vector<32x12x32xbf16> -> vector<12x32x32xbf16>
    %39 = vector.extract_strided_slice %30 {offsets = [0, 768], sizes = [32, 384], strides = [1, 1]} : vector<32x1152xf32> to vector<32x384xf32>
    %40 = arith.truncf %39 : vector<32x384xf32> to vector<32x384xbf16>
    %41 = vector.shape_cast %40 : vector<32x384xbf16> to vector<32x12x32xbf16>
    %42 = tpu.transpose %41, [1, 0, 2] : vector<32x12x32xbf16> -> vector<12x32x32xbf16>
    %c0_14 = arith.constant 0 : index
    %c0_15 = arith.constant 0 : index
    %c0_16 = arith.constant 0 : index
    %43 = vector.load %arg2[%c0_14, %c0_15, %c0_16] : memref<1x32x1xi32, #tpu.memory_space<vmem>>, vector<1x32x1xi32>
    %44 = vector.shape_cast %43 : vector<1x32x1xi32> to vector<32x1xi32>
    %c0_17 = arith.constant 0 : index
    %c0_18 = arith.constant 0 : index
    %c0_19 = arith.constant 0 : index
    %45 = vector.load %arg3[%c0_17, %c0_18, %c0_19] : memref<1x1x32xi32, #tpu.memory_space<vmem>>, vector<1x1x32xi32>
    %46 = vector.shape_cast %45 : vector<1x1x32xi32> to vector<1x32xi32>
    %47 = tpu.iota {dimensions = array<i32: 0>} : vector<32x32xi32>
    %c0_i32 = arith.constant 0 : i32
    %48 = vector.broadcast %c0_i32 : i32 to vector<32x32xi32>
    %49 = arith.addi %48, %47 : vector<32x32xi32>
    %cst_20 = arith.constant -1.000000e+30 : f32
    %50 = vector.broadcast %cst_20 : f32 to vector<12x32x1xf32>
    %cst_21 = arith.constant 0.000000e+00 : f32
    %51 = vector.broadcast %cst_21 : f32 to vector<12x32x1xf32>
    %cst_22 = arith.constant 0.000000e+00 : f32
    %52 = vector.broadcast %cst_22 : f32 to vector<12x32x32xf32>
    %53 = tpu.iota {dimensions = array<i32: 1>} : vector<32x32xi32>
    %c0_i32_23 = arith.constant 0 : i32
    %54 = vector.broadcast %c0_i32_23 : i32 to vector<32x32xi32>
    %55 = arith.addi %54, %53 : vector<32x32xi32>
    %56 = arith.cmpi sle, %55, %49 : vector<32x32xi32>
    %57 = vector.broadcast %46 : vector<1x32xi32> to vector<32x32xi32>
    %58 = vector.broadcast %44 : vector<32x1xi32> to vector<32x32xi32>
    %59 = arith.cmpi eq, %57, %58 : vector<32x32xi32>
    %60 = arith.andi %56, %59 : vector<32x32xi1>
    "tpu.trace_start"() <{level = 10 : i32, message = "hqd,hkd->hqk"}> : () -> ()
    %cst_24 = arith.constant dense<0.000000e+00> : vector<12x32x32xf32>
    %61 = tpu.matmul %34, %38, %cst_24 {dimension_numbers = #tpu.dot_dimension_numbers<[2], [2], [1], [1], [0, 0, 0, 1, 1, 1], [0], [0]>} : vector<12x32x32xbf16>, vector<12x32x32xbf16>, vector<12x32x32xf32> -> vector<12x32x32xf32>
    "tpu.trace_stop"() : () -> ()
    %62 = vector.shape_cast %60 : vector<32x32xi1> to vector<1x32x32xi1>
    %cst_25 = arith.constant -1.000000e+30 : f32
    %63 = vector.shape_cast %62 : vector<1x32x32xi1> to vector<1x32x32xi1>
    %64 = vector.broadcast %63 : vector<1x32x32xi1> to vector<12x32x32xi1>
    %65 = vector.broadcast %cst_25 : f32 to vector<12x32x32xf32>
    %66 = arith.select %64, %61, %65 : vector<12x32x32xi1>, vector<12x32x32xf32>
    %cst_26 = arith.constant dense<0xFF800000> : vector<12x32xf32>
    %67 = vector.multi_reduction <maximumf>, %66, %cst_26 [2] : vector<12x32x32xf32> to vector<12x32xf32>
    %68 = vector.shape_cast %67 : vector<12x32xf32> to vector<12x32x1xf32>
    %69 = arith.maximumf %50, %68 : vector<12x32x1xf32>
    %70 = arith.subf %50, %69 : vector<12x32x1xf32>
    %71 = math.exp %70 : vector<12x32x1xf32>
    %72 = vector.broadcast %69 : vector<12x32x1xf32> to vector<12x32x32xf32>
    %73 = arith.subf %66, %72 : vector<12x32x32xf32>
    %74 = math.exp %73 : vector<12x32x32xf32>
    %75 = arith.mulf %71, %51 : vector<12x32x1xf32>
    %cst_27 = arith.constant dense<0.000000e+00> : vector<12x32xf32>
    %76 = vector.multi_reduction <add>, %74, %cst_27 [2] : vector<12x32x32xf32> to vector<12x32xf32>
    %77 = vector.shape_cast %76 : vector<12x32xf32> to vector<12x32x1xf32>
    %78 = arith.addf %75, %77 : vector<12x32x1xf32>
    %79 = vector.broadcast %71 : vector<12x32x1xf32> to vector<12x32x32xf32>
    %80 = arith.mulf %79, %52 : vector<12x32x32xf32>
    %81 = arith.truncf %74 : vector<12x32x32xf32> to vector<12x32x32xbf16>
    "tpu.trace_start"() <{level = 10 : i32, message = "hqk,hkd->hqd"}> : () -> ()
    %cst_28 = arith.constant dense<0.000000e+00> : vector<12x32x32xf32>
    %82 = tpu.matmul %81, %42, %cst_28 {dimension_numbers = #tpu.dot_dimension_numbers<[2], [1], [1], [2], [0, 0, 0, 1, 1, 2], [0], [0]>} : vector<12x32x32xbf16>, vector<12x32x32xbf16>, vector<12x32x32xf32> -> vector<12x32x32xf32>
    "tpu.trace_stop"() : () -> ()
    %83 = arith.addf %80, %82 : vector<12x32x32xf32>
    %84 = tpu.reciprocal %78 {approx = true} : vector<12x32x1xf32> -> vector<12x32x1xf32>
    %85 = vector.broadcast %84 : vector<12x32x1xf32> to vector<12x32x32xf32>
    %86 = arith.mulf %83, %85 : vector<12x32x32xf32>
    %87 = arith.truncf %86 : vector<12x32x32xf32> to vector<12x32x32xbf16>
    %88 = tpu.transpose %87, [1, 0, 2] : vector<12x32x32xbf16> -> vector<32x12x32xbf16>
    %89 = vector.shape_cast %88 : vector<32x12x32xbf16> to vector<32x384xbf16>
    %c0_29 = arith.constant 0 : index
    %c0_30 = arith.constant 0 : index
    %90 = vector.load %arg8[%c0_29, %c0_30] : memref<384x384xbf16, #tpu.memory_space<vmem>>, vector<384x384xbf16>
    %cst_31 = arith.constant dense<0.000000e+00> : vector<32x384xf32>
    %91 = tpu.matmul %89, %90, %cst_31 {dimension_numbers = #tpu.dot_dimension_numbers<[1], [0], [0], [1], [0, 0, 1, 1], [], []>} : vector<32x384xbf16>, vector<384x384xbf16>, vector<32x384xf32> -> vector<32x384xf32>
    %c0_32 = arith.constant 0 : index
    %c0_33 = arith.constant 0 : index
    %92 = vector.load %arg9[%c0_32, %c0_33] : memref<1x384xf32, #tpu.memory_space<vmem>>, vector<1x384xf32>
    %93 = vector.broadcast %92 : vector<1x384xf32> to vector<32x384xf32>
    %94 = arith.addf %91, %93 : vector<32x384xf32>
    %95 = arith.addf %0, %94 : vector<32x384xf32>
    %c0_34 = arith.constant 0 : index
    %c0_35 = arith.constant 0 : index
    %96 = vector.load %arg10[%c0_34, %c0_35] : memref<1x384xf32, #tpu.memory_space<vmem>>, vector<1x384xf32>
    %c0_36 = arith.constant 0 : index
    %c0_37 = arith.constant 0 : index
    %97 = vector.load %arg11[%c0_36, %c0_37] : memref<1x384xf32, #tpu.memory_space<vmem>>, vector<1x384xf32>
    %cst_38 = arith.constant dense<0.000000e+00> : vector<32xf32>
    %98 = vector.multi_reduction <add>, %95, %cst_38 [1] : vector<32x384xf32> to vector<32xf32>
    %99 = vector.shape_cast %98 : vector<32xf32> to vector<32x1xf32>
    %cst_39 = arith.constant 3.840000e+02 : f32
    %100 = vector.broadcast %cst_39 : f32 to vector<32x1xf32>
    %101 = arith.divf %99, %100 : vector<32x1xf32>
    %102 = vector.broadcast %101 : vector<32x1xf32> to vector<32x384xf32>
    %103 = arith.subf %95, %102 : vector<32x384xf32>
    %104 = arith.mulf %103, %103 : vector<32x384xf32>
    %cst_40 = arith.constant dense<0.000000e+00> : vector<32xf32>
    %105 = vector.multi_reduction <add>, %104, %cst_40 [1] : vector<32x384xf32> to vector<32xf32>
    %106 = vector.shape_cast %105 : vector<32xf32> to vector<32x1xf32>
    %cst_41 = arith.constant 3.840000e+02 : f32
    %107 = vector.broadcast %cst_41 : f32 to vector<32x1xf32>
    %108 = arith.divf %106, %107 : vector<32x1xf32>
    %109 = vector.broadcast %101 : vector<32x1xf32> to vector<32x384xf32>
    %110 = arith.subf %95, %109 : vector<32x384xf32>
    %cst_42 = arith.constant 9.99999974E-6 : f32
    %111 = vector.broadcast %cst_42 : f32 to vector<32x1xf32>
    %112 = arith.addf %108, %111 : vector<32x1xf32>
    %113 = math.rsqrt %112 : vector<32x1xf32>
    %114 = vector.broadcast %113 : vector<32x1xf32> to vector<32x384xf32>
    %115 = arith.mulf %110, %114 : vector<32x384xf32>
    %116 = vector.broadcast %96 : vector<1x384xf32> to vector<32x384xf32>
    %117 = arith.mulf %115, %116 : vector<32x384xf32>
    %118 = vector.broadcast %97 : vector<1x384xf32> to vector<32x384xf32>
    %119 = arith.addf %117, %118 : vector<32x384xf32>
    %120 = arith.truncf %119 : vector<32x384xf32> to vector<32x384xbf16>
    %c0_43 = arith.constant 0 : index
    %c0_44 = arith.constant 0 : index
    %121 = vector.load %arg12[%c0_43, %c0_44] : memref<384x1536xbf16, #tpu.memory_space<vmem>>, vector<384x1536xbf16>
    %cst_45 = arith.constant dense<0.000000e+00> : vector<32x1536xf32>
    %122 = tpu.matmul %120, %121, %cst_45 {dimension_numbers = #tpu.dot_dimension_numbers<[1], [0], [0], [1], [0, 0, 1, 1], [], []>} : vector<32x384xbf16>, vector<384x1536xbf16>, vector<32x1536xf32> -> vector<32x1536xf32>
    %c0_46 = arith.constant 0 : index
    %c0_47 = arith.constant 0 : index
    %123 = vector.load %arg13[%c0_46, %c0_47] : memref<1x1536xf32, #tpu.memory_space<vmem>>, vector<1x1536xf32>
    %124 = vector.broadcast %123 : vector<1x1536xf32> to vector<32x1536xf32>
    %125 = arith.addf %122, %124 : vector<32x1536xf32>
    %cst_48 = arith.constant 0.000000e+00 : f32
    %126 = vector.broadcast %cst_48 : f32 to vector<32x1536xf32>
    %127 = arith.maximumf %125, %126 : vector<32x1536xf32>
    %128 = arith.truncf %127 : vector<32x1536xf32> to vector<32x1536xbf16>
    %c0_49 = arith.constant 0 : index
    %c0_50 = arith.constant 0 : index
    %129 = vector.load %arg14[%c0_49, %c0_50] : memref<1536x384xbf16, #tpu.memory_space<vmem>>, vector<1536x384xbf16>
    %cst_51 = arith.constant dense<0.000000e+00> : vector<32x384xf32>
    %130 = tpu.matmul %128, %129, %cst_51 {dimension_numbers = #tpu.dot_dimension_numbers<[1], [0], [0], [1], [0, 0, 1, 1], [], []>} : vector<32x1536xbf16>, vector<1536x384xbf16>, vector<32x384xf32> -> vector<32x384xf32>
    %c0_52 = arith.constant 0 : index
    %c0_53 = arith.constant 0 : index
    %131 = vector.load %arg15[%c0_52, %c0_53] : memref<1x384xf32, #tpu.memory_space<vmem>>, vector<1x384xf32>
    %132 = vector.broadcast %131 : vector<1x384xf32> to vector<32x384xf32>
    %133 = arith.addf %130, %132 : vector<32x384xf32>
    %134 = arith.addf %95, %133 : vector<32x384xf32>
    %c0_54 = arith.constant 0 : index
    %c0_55 = arith.constant 0 : index
    %135 = vector.load %arg16[%c0_54, %c0_55] : memref<32x384xf32, #tpu.memory_space<vmem>>, vector<32x384xf32>
    tpu.vector_store %arg16[%c0_54, %c0_55], %134 {strides = array<i32>} : memref<32x384xf32, #tpu.memory_space<vmem>>, vector<32x384xf32>,
    return
  }
  func.func @transform_0(%arg0: i32) -> (i32, i32) {
    %c0_i32 = arith.constant 0 : i32
    %c0_i32_0 = arith.constant 0 : i32
    return %arg0, %c0_i32 : i32, i32
  }
  func.func @transform_1(%arg0: i32) -> (i32, i32, i32) {
    %c0_i32 = arith.constant 0 : i32
    %c0_i32_0 = arith.constant 0 : i32
    %c0_i32_1 = arith.constant 0 : i32
    return %arg0, %c0_i32, %c0_i32_0 : i32, i32, i32
  }
  func.func @transform_2(%arg0: i32) -> (i32, i32, i32) {
    %c0_i32 = arith.constant 0 : i32
    %c0_i32_0 = arith.constant 0 : i32
    %c0_i32_1 = arith.constant 0 : i32
    return %arg0, %c0_i32, %c0_i32_0 : i32, i32, i32
  }
  func.func @transform_3(%arg0: i32) -> (i32, i32) {
    %c0_i32 = arith.constant 0 : i32
    %c0_i32_0 = arith.constant 0 : i32
    %c0_i32_1 = arith.constant 0 : i32
    return %c0_i32, %c0_i32_0 : i32, i32
  }
  func.func @transform_4(%arg0: i32) -> (i32, i32) {
    %c0_i32 = arith.constant 0 : i32
    %c0_i32_0 = arith.constant 0 : i32
    %c0_i32_1 = arith.constant 0 : i32
    return %c0_i32, %c0_i32_0 : i32, i32
  }
  func.func @transform_5(%arg0: i32) -> (i32, i32) {
    %c0_i32 = arith.constant 0 : i32
    %c0_i32_0 = arith.constant 0 : i32
    %c0_i32_1 = arith.constant 0 : i32
    return %c0_i32, %c0_i32_0 : i32, i32
  }
  func.func @transform_6(%arg0: i32) -> (i32, i32) {
    %c0_i32 = arith.constant 0 : i32
    %c0_i32_0 = arith.constant 0 : i32
    %c0_i32_1 = arith.constant 0 : i32
    return %c0_i32, %c0_i32_0 : i32, i32
  }
  func.func @transform_7(%arg0: i32) -> (i32, i32) {
    %c0_i32 = arith.constant 0 : i32
    %c0_i32_0 = arith.constant 0 : i32
    %c0_i32_1 = arith.constant 0 : i32
    return %c0_i32, %c0_i32_0 : i32, i32
  }
  func.func @transform_8(%arg0: i32) -> (i32, i32) {
    %c0_i32 = arith.constant 0 : i32
    %c0_i32_0 = arith.constant 0 : i32
    %c0_i32_1 = arith.constant 0 : i32
    return %c0_i32, %c0_i32_0 : i32, i32
  }
  func.func @transform_9(%arg0: i32) -> (i32, i32) {
    %c0_i32 = arith.constant 0 : i32
    %c0_i32_0 = arith.constant 0 : i32
    %c0_i32_1 = arith.constant 0 : i32
    return %c0_i32, %c0_i32_0 : i32, i32
  }
  func.func @transform_10(%arg0: i32) -> (i32, i32) {
    %c0_i32 = arith.constant 0 : i32
    %c0_i32_0 = arith.constant 0 : i32
    %c0_i32_1 = arith.constant 0 : i32
    return %c0_i32, %c0_i32_0 : i32, i32
  }
  func.func @transform_11(%arg0: i32) -> (i32, i32) {
    %c0_i32 = arith.constant 0 : i32
    %c0_i32_0 = arith.constant 0 : i32
    %c0_i32_1 = arith.constant 0 : i32
    return %c0_i32, %c0_i32_0 : i32, i32
  }
  func.func @transform_12(%arg0: i32) -> (i32, i32) {
    %c0_i32 = arith.constant 0 : i32
    %c0_i32_0 = arith.constant 0 : i32
    %c0_i32_1 = arith.constant 0 : i32
    return %c0_i32, %c0_i32_0 : i32, i32
  }
  func.func @transform_13(%arg0: i32) -> (i32, i32) {
    %c0_i32 = arith.constant 0 : i32
    %c0_i32_0 = arith.constant 0 : i32
    %c0_i32_1 = arith.constant 0 : i32
    return %c0_i32, %c0_i32_0 : i32, i32
  }
  func.func @transform_14(%arg0: i32) -> (i32, i32) {
    %c0_i32 = arith.constant 0 : i32
    %c0_i32_0 = arith.constant 0 : i32
    %c0_i32_1 = arith.constant 0 : i32
    return %c0_i32, %c0_i32_0 : i32, i32
  }
  func.func @transform_15(%arg0: i32) -> (i32, i32) {
    %c0_i32 = arith.constant 0 : i32
    %c0_i32_0 = arith.constant 0 : i32
    return %arg0, %c0_i32 : i32, i32
  }
}

</mosaic_0001>

<bundles_post_ra>
// kernel: tpu_custom_call.1
= control target key start
LH: loop header
LB: loop body
LE: loop exit
PB: predicated region body
PF: predicated region fallthrough
CT: control target
= control target key end

     0   :  { %20 = vsyncpa [#allocation3], 0  ;;  %s23874_s0 = inlined_call_operand.hbm [shape: f32[32,384], index: 0, kind: input, shape index: {}]   ;;  %s23875_s1 = inlined_call_operand.vmem [shape: s32[1,32,1], index: 1, kind: input, shape index: {}]   ;;  %s23876_s2 = inlined_call_operand.hbm [shape: s32[1,1,32], index: 2, kind: input, shape index: {}]   ;;  %s23877_s3 = inlined_call_operand.hbm [shape: f32[1,384], index: 3, kind: input, shape index: {}]   ;;  %s23878_s4 = inlined_call_operand.hbm [shape: f32[1,384], index: 4, kind: input, shape index: {}]   ;;  %s23879_s5 = inlined_call_operand.hbm [shape: bf16[384,1152], index: 5, kind: input, shape index: {}]   ;;  %s23880_s6 = inlined_call_operand.hbm [shape: f32[1,1152], index: 6, kind: input, shape index: {}]   ;;  %s23881_s7 = inlined_call_operand.hbm [shape: bf16[384,384], index: 7, kind: input, shape index: {}]   ;;  %s23882_s8 = inlined_call_operand.hbm [shape: f32[1,384], index: 8, kind: input, shape index: {}]   ;;  %s23883_s9 = inlined_call_operand.hbm [shape: f32[1,384], index: 9, kind: input, shape index: {}]   ;;  %s23884_s10 = inlined_call_operand.hbm [shape: f32[1,384], index: 10, kind: input, shape index: {}]   ;;  %s23885_s11 = inlined_call_operand.hbm [shape: bf16[384,1536], index: 11, kind: input, shape index: {}]   ;;  %s23886_s12 = inlined_call_operand.hbm [shape: f32[1,1536], index: 12, kind: input, shape index: {}]   ;;  %s23887_s13 = inlined_call_operand.hbm [shape: bf16[1536,384], index: 13, kind: input, shape index: {}]   ;;  %s23888_s14 = inlined_call_operand.hbm [shape: f32[1,384], index: 14, kind: input, shape index: {}]   ;;  %s23889_s15 = inlined_call_operand.hbm [shape: f32[32,384], index: 15, kind: output, shape index: {}]  }
   0x1   :  { %21 = vsyncpa [#allocation6], 0 }
   0x2   :  { %22 = vsyncpa [#allocation9], 0 }
   0x3   :  { %23 = vsyncpa [#allocation12], 0 }
   0x4   :  { %24 = vsyncpa [#allocation15], 0 }
   0x5   :  { %25 = vsyncpa [#allocation18], 0 }
   0x6   :  { %26 = vsyncpa [#allocation21], 0 }
   0x7   :  { %27 = vsyncpa [#allocation24], 0 }
   0x8   :  { %28 = vsyncpa [#allocation4], 0  ;;  %s19404_s18 = smov [#allocation5]   ;;  %s19405_s20 = smov [#allocation8]  }
   0x9   :  { %s49_s19 = sshll.u32 %s19404_s18, 4  ;;  %s69_s21 = sshll.u32 %s19405_s20, 4  ;;  %s50_s19 = int_to_ptr.vmem [resolvable:$true] %s49_s19  ;;  %s70_s21 = int_to_ptr.vmem [resolvable:$true] %s69_s21 }
   0xa   :  { %s19056_s24 = scalar_lea.hbm %s23876_s2, 16 }
   0xb   :  { %p19057_p0 = scmp.ne.s32.totalorder %s23876_s2, %s19056_s24  ;;  %p19060_p1 = scmp.lt.u32.totalorder %s19056_s24, %s23876_s2 }
   0xd   :  { %p19062_p2 = pnand %p19060_p1, %p19057_p0 }
   0xf   :  { %19065 = shalt.err (!%p19062_p2)
}
  0x10   :  { %s19066_s29 = scalar_lea.vmem %s50_s19, 16  ;;  %s19070_s30 = scalar_lea.vmem %s50_s19, 32 }
  0x11   :  { %p19067_p3 = scmp.ne.s32.totalorder %s50_s19, %s19066_s29  ;;  %p19071_p4 = scmp.lt.s32.totalorder %s50_s19, %s50_s19 }
  0x12   :  { %p19072_p5 = scmp.lt.s32.totalorder %s19070_s30, %s19066_s29 }
  0x14   :  { %p19073_p6 = por %p19072_p5, %p19071_p4 }
  0x16   :  { %p19074_p7 = pnand %p19073_p6, %p19067_p3 }
  0x18   :  { %19077 = shalt.err (!%p19074_p7)
}
  0x19   :  { %52 = dma.hbm_to_vmem [thread:$0]  %s23876_s2, 16, %s50_s19, [#allocation6]  }
  0x1a   :  { %s19078_s22 = scalar_lea.hbm %s23878_s4, 48 }
  0x1b   :  { %p19079_p8 = scmp.ne.s32.totalorder %s23878_s4, %s19078_s22  ;;  %p19082_p9 = scmp.lt.u32.totalorder %s19078_s22, %s23878_s4 }
  0x1d   :  { %p19084_p10 = pnand %p19082_p9, %p19079_p8 }
  0x1f   :  { %19087 = shalt.err (!%p19084_p10)
}
  0x20   :  { %s19088_s27 = scalar_lea.vmem %s70_s21, 48  ;;  %s19092_s28 = scalar_lea.vmem %s70_s21, 64 }
  0x21   :  { %p19089_p11 = scmp.ne.s32.totalorder %s70_s21, %s19088_s27  ;;  %p19093_p12 = scmp.lt.s32.totalorder %s70_s21, %s70_s21 }
  0x22   :  { %p19094_p13 = scmp.lt.s32.totalorder %s19092_s28, %s19088_s27 }
  0x24   :  { %p19095_p0 = por %p19094_p13, %p19093_p12 }
  0x26   :  { %p19096_p1 = pnand %p19095_p0, %p19089_p11 }
  0x28   :  { %19099 = shalt.err (!%p19096_p1)
}
  0x29   :  { %72 = dma.hbm_to_vmem [thread:$0]  %s23878_s4, 48, %s70_s21, [#allocation9]  }
  0x2a   :  { %s19406_s29 = smov [#allocation11]   ;;  %s19407_s16 = smov [#allocation14]  }
  0x2b   :  { %s91_s30 = sshll.u32 %s19406_s29, 4  ;;  %s113_s17 = sshll.u32 %s19407_s16, 4  ;;  %s92_s30 = int_to_ptr.vmem [resolvable:$true] %s91_s30  ;;  %s114_s17 = int_to_ptr.vmem [resolvable:$true] %s113_s17 }
  0x2c   :  { %s19100_s22 = scalar_lea.hbm %s23880_s6, 144 }
  0x2d   :  { %p19101_p2 = scmp.ne.s32.totalorder %s23880_s6, %s19100_s22  ;;  %p19104_p3 = scmp.lt.u32.totalorder %s19100_s22, %s23880_s6 }
  0x2f   :  { %p19106_p4 = pnand %p19104_p3, %p19101_p2 }
  0x31   :  { %19109 = shalt.err (!%p19106_p4)
}
  0x32   :  { %s19110_s4 = scalar_lea.vmem %s92_s30, 144  ;;  %s19114_s21 = scalar_lea.vmem %s92_s30, 160 }
  0x33   :  { %p19111_p5 = scmp.ne.s32.totalorder %s92_s30, %s19110_s4  ;;  %p19115_p6 = scmp.lt.s32.totalorder %s92_s30, %s92_s30 }
  0x34   :  { %p19116_p7 = scmp.lt.s32.totalorder %s19114_s21, %s19110_s4 }
  0x36   :  { %p19117_p8 = por %p19116_p7, %p19115_p6 }
  0x38   :  { %p19118_p9 = pnand %p19117_p8, %p19111_p5 }
  0x3a   :  { %19121 = shalt.err (!%p19118_p9)
}
  0x3b   :  { %94 = dma.hbm_to_vmem [thread:$0]  %s23880_s6, 144, %s92_s30, [#allocation12]  }
  0x3c   :  { %s19122_s29 = scalar_lea.hbm %s23882_s8, 48 }
  0x3d   :  { %p19123_p10 = scmp.ne.s32.totalorder %s23882_s8, %s19122_s29  ;;  %p19126_p11 = scmp.lt.u32.totalorder %s19122_s29, %s23882_s8 }
  0x3f   :  { %p19128_p12 = pnand %p19126_p11, %p19123_p10 }
  0x41   :  { %19131 = shalt.err (!%p19128_p12)
}
  0x42   :  { %s19132_s23 = scalar_lea.vmem %s114_s17, 48  ;;  %s19136_s24 = scalar_lea.vmem %s114_s17, 64 }
  0x43   :  { %p19133_p13 = scmp.ne.s32.totalorder %s114_s17, %s19132_s23  ;;  %p19137_p0 = scmp.lt.s32.totalorder %s114_s17, %s114_s17 }
  0x44   :  { %p19138_p1 = scmp.lt.s32.totalorder %s19136_s24, %s19132_s23 }
  0x46   :  { %p19139_p2 = por %p19138_p1, %p19137_p0 }
  0x48   :  { %p19140_p3 = pnand %p19139_p2, %p19133_p13 }
  0x4a   :  { %19143 = shalt.err (!%p19140_p3)
}
  0x4b   :  { %116 = dma.hbm_to_vmem [thread:$0]  %s23882_s8, 48, %s114_s17, [#allocation15]  }
  0x4c   :  { %s19408_s25 = smov [#allocation17]   ;;  %s19409_s4 = smov [#allocation20]  }
  0x4d   :  { %s133_s26 = sshll.u32 %s19408_s25, 4  ;;  %s155_s21 = sshll.u32 %s19409_s4, 4  ;;  %s134_s26 = int_to_ptr.vmem [resolvable:$true] %s133_s26  ;;  %s156_s21 = int_to_ptr.vmem [resolvable:$true] %s155_s21 }
  0x4e   :  { %s19144_s2 = scalar_lea.hbm %s23884_s10, 48 }
  0x4f   :  { %p19145_p4 = scmp.ne.s32.totalorder %s23884_s10, %s19144_s2  ;;  %p19148_p5 = scmp.lt.u32.totalorder %s19144_s2, %s23884_s10 }
  0x51   :  { %p19150_p6 = pnand %p19148_p5, %p19145_p4 }
  0x53   :  { %19153 = shalt.err (!%p19150_p6)
}
  0x54   :  { %s19154_s8 = scalar_lea.vmem %s134_s26, 48  ;;  %s19158_s17 = scalar_lea.vmem %s134_s26, 64 }
  0x55   :  { %p19155_p7 = scmp.ne.s32.totalorder %s134_s26, %s19154_s8  ;;  %p19159_p8 = scmp.lt.s32.totalorder %s134_s26, %s134_s26 }
  0x56   :  { %p19160_p9 = scmp.lt.s32.totalorder %s19158_s17, %s19154_s8 }
  0x58   :  { %p19161_p10 = por %p19160_p9, %p19159_p8 }
  0x5a   :  { %p19162_p11 = pnand %p19161_p10, %p19155_p7 }
  0x5c   :  { %19165 = shalt.err (!%p19162_p11)
}
  0x5d   :  { %136 = dma.hbm_to_vmem [thread:$0]  %s23884_s10, 48, %s134_s26, [#allocation18]  }
  0x5e   :  { %s19166_s6 = scalar_lea.hbm %s23886_s12, 192 }
  0x5f   :  { %p19167_p12 = scmp.ne.s32.totalorder %s23886_s12, %s19166_s6  ;;  %p19170_p13 = scmp.lt.u32.totalorder %s19166_s6, %s23886_s12 }
  0x61   :  { %p19172_p0 = pnand %p19170_p13, %p19167_p12 }
  0x63   :  { %19175 = shalt.err (!%p19172_p0)
}
  0x64   :  { %s19176_s28 = scalar_lea.vmem %s156_s21, 192  ;;  %p19181_p2 = scmp.lt.s32.totalorder %s156_s21, %s156_s21 }
  0x65   :  { %p19177_p1 = scmp.ne.s32.totalorder %s156_s21, %s19176_s28  ;;  %p19182_p3 = scmp.lt.s32.totalorder %s19176_s28, %s19176_s28 }
  0x67   :  { %p19183_p4 = por %p19182_p3, %p19181_p2 }
  0x69   :  { %p19184_p5 = pnand %p19183_p4, %p19177_p1 }
  0x6b   :  { %19187 = shalt.err (!%p19184_p5)
}
  0x6c   :  { %158 = dma.hbm_to_vmem [thread:$0]  %s23886_s12, 192, %s156_s21, [#allocation21]  }
  0x6d   :  { %s19410_s2 = smov [#allocation2]   ;;  %s19188_s18 = scalar_lea.hbm %s23874_s0, 1536 }
  0x6e   :  { %s34_s19 = sshll.u32 %s19410_s2, 4  ;;  %p19189_p6 = scmp.ne.s32.totalorder %s23874_s0, %s19188_s18  ;;  %s35_s19 = int_to_ptr.vmem [resolvable:$true] %s34_s19 }
  0x6f   :  { %p19192_p7 = scmp.lt.u32.totalorder %s19188_s18, %s23874_s0 }
  0x71   :  { %p19194_p8 = pnand %p19192_p7, %p19189_p6 }
  0x73   :  { %19197 = shalt.err (!%p19194_p8)
}
  0x74   :  { %s19198_s23 = scalar_lea.vmem %s35_s19, 1536  ;;  %p19203_p10 = scmp.lt.s32.totalorder %s35_s19, %s35_s19 }
  0x75   :  { %p19199_p9 = scmp.ne.s32.totalorder %s35_s19, %s19198_s23  ;;  %p19204_p11 = scmp.lt.s32.totalorder %s19198_s23, %s19198_s23 }
  0x77   :  { %p19205_p12 = por %p19204_p11, %p19203_p10 }
  0x79   :  { %p19206_p13 = pnand %p19205_p12, %p19199_p9 }
  0x7b   :  { %19209 = shalt.err (!%p19206_p13)
}
  0x7c   :  { %s19411_s12 = smov 384   ;;  %s19412_s21 = smov 24  }
  0x7d   :  { %40 = dma.hbm_to_vmem [thread:$0]  %s23874_s0, 1536, %s35_s19, [#allocation3], %s19411_s12, %s19411_s12, %s19412_s21  }
  0x7e   :  { %s19413_s30 = smov [#allocation7]   ;;  %s19414_s4 = smov [#allocation10]  }
  0x7f   :  { %s59_s25 = sshll.u32 %s19413_s30, 4  ;;  %s78_s27 = sshll.u32 %s19414_s4, 4  ;;  %s60_s25 = int_to_ptr.vmem [resolvable:$true] %s59_s25  ;;  %s79_s27 = int_to_ptr.vmem [resolvable:$true] %s78_s27 }
  0x80   :  { %s19210_s26 = scalar_lea.hbm %s23877_s3, 48 }
  0x81   :  { %p19211_p0 = scmp.ne.s32.totalorder %s23877_s3, %s19210_s26  ;;  %p19214_p1 = scmp.lt.u32.totalorder %s19210_s26, %s23877_s3 }
  0x83   :  { %p19216_p2 = pnand %p19214_p1, %p19211_p0 }
  0x85   :  { %19219 = shalt.err (!%p19216_p2)
}
  0x86   :  { %s19220_s0 = scalar_lea.vmem %s60_s25, 48  ;;  %s19224_s19 = scalar_lea.vmem %s60_s25, 64 }
  0x87   :  { %p19221_p3 = scmp.ne.s32.totalorder %s60_s25, %s19220_s0  ;;  %p19225_p4 = scmp.lt.s32.totalorder %s60_s25, %s60_s25 }
  0x88   :  { %p19226_p5 = scmp.lt.s32.totalorder %s19224_s19, %s19220_s0 }
  0x8a   :  { %p19227_p6 = por %p19226_p5, %p19225_p4 }
  0x8c   :  { %p19228_p7 = pnand %p19227_p6, %p19221_p3 }
  0x8e   :  { %19231 = shalt.err (!%p19228_p7)
}
  0x8f   :  { %62 = dma.hbm_to_vmem [thread:$0]  %s23877_s3, 48, %s60_s25, [#allocation6]  }
  0x90   :  { %s19232_s23 = scalar_lea.hbm %s23879_s5, 27648 }
  0x91   :  { %p19233_p8 = scmp.ne.s32.totalorder %s23879_s5, %s19232_s23  ;;  %p19236_p9 = scmp.lt.u32.totalorder %s19232_s23, %s23879_s5 }
  0x93   :  { %p19238_p10 = pnand %p19236_p9, %p19233_p8 }
  0x95   :  { %19241 = shalt.err (!%p19238_p10)
}
  0x96   :  { %s19242_s28 = scalar_lea.vmem %s79_s27, 27648  ;;  %p19247_p12 = scmp.lt.s32.totalorder %s79_s27, %s79_s27 }
  0x97   :  { %p19243_p11 = scmp.ne.s32.totalorder %s79_s27, %s19242_s28  ;;  %p19248_p13 = scmp.lt.s32.totalorder %s19242_s28, %s19242_s28 }
  0x99   :  { %p19249_p0 = por %p19248_p13, %p19247_p12 }
  0x9b   :  { %p19250_p1 = pnand %p19249_p0, %p19243_p11 }
  0x9d   :  { %19253 = shalt.err (!%p19250_p1)
}
  0x9e   :  { %s19415_s3 = smov 576   ;;  %s19416_s25 = smov 36  }
  0x9f   :  { %84 = dma.hbm_to_vmem [thread:$0]  %s23879_s5, 27648, %s79_s27, [#allocation9], %s19415_s3, %s19415_s3, %s19416_s25  }
  0xa0   :  { %s19417_s2 = smov [#allocation13]   ;;  %s19254_s0 = scalar_lea.hbm %s23881_s7, 9216 }
  0xa1   :  { %s100_s29 = sshll.u32 %s19417_s2, 4  ;;  %p19255_p2 = scmp.ne.s32.totalorder %s23881_s7, %s19254_s0  ;;  %s101_s29 = int_to_ptr.vmem [resolvable:$true] %s100_s29 }
  0xa2   :  { %p19258_p3 = scmp.lt.u32.totalorder %s19254_s0, %s23881_s7 }
  0xa4   :  { %p19260_p4 = pnand %p19258_p3, %p19255_p2 }
  0xa6   :  { %19263 = shalt.err (!%p19260_p4)
}
  0xa7   :  { %s19264_s22 = scalar_lea.vmem %s101_s29, 9216  ;;  %p19269_p6 = scmp.lt.s32.totalorder %s101_s29, %s101_s29 }
  0xa8   :  { %p19265_p5 = scmp.ne.s32.totalorder %s101_s29, %s19264_s22  ;;  %p19270_p7 = scmp.lt.s32.totalorder %s19264_s22, %s19264_s22 }
  0xaa   :  { %p19271_p8 = por %p19270_p7, %p19269_p6 }
  0xac   :  { %p19272_p9 = pnand %p19271_p8, %p19265_p5 }
  0xae   :  { %19275 = shalt.err (!%p19272_p9)
}
  0xaf   :  { %s19418_s5 = smov 192   ;;  %s19419_s27 = smov 12  }
  0xb0   :  { %106 = dma.hbm_to_vmem [thread:$0]  %s23881_s7, 9216, %s101_s29, [#allocation12], %s19418_s5, %s19418_s5, %s19419_s27  }
  0xb1   :  { %s19420_s6 = smov [#allocation16]   ;;  %s19421_s4 = smov [#allocation19]  }
  0xb2   :  { %s123_s30 = sshll.u32 %s19420_s6, 4  ;;  %s142_s28 = sshll.u32 %s19421_s4, 4  ;;  %s124_s30 = int_to_ptr.vmem [resolvable:$true] %s123_s30  ;;  %s19639_s28 = int_to_ptr.vmem [resolvable:$true] %s142_s28 }
  0xb3   :  { %s19276_s10 = scalar_lea.hbm %s23883_s9, 48 }
  0xb4   :  { %p19277_p10 = scmp.ne.s32.totalorder %s23883_s9, %s19276_s10  ;;  %p19280_p11 = scmp.lt.u32.totalorder %s19276_s10, %s23883_s9 }
  0xb6   :  { %p19282_p12 = pnand %p19280_p11, %p19277_p10 }
  0xb8   :  { %19285 = shalt.err (!%p19282_p12)
}
  0xb9   :  { %s19286_s7 = scalar_lea.vmem %s124_s30, 48  ;;  %s19290_s29 = scalar_lea.vmem %s124_s30, 64 }
  0xba   :  { %p19287_p13 = scmp.ne.s32.totalorder %s124_s30, %s19286_s7  ;;  %p19291_p0 = scmp.lt.s32.totalorder %s124_s30, %s124_s30 }
  0xbb   :  { %p19292_p1 = scmp.lt.s32.totalorder %s19290_s29, %s19286_s7 }
  0xbd   :  { %p19293_p2 = por %p19292_p1, %p19291_p0 }
  0xbf   :  { %p19294_p3 = pnand %p19293_p2, %p19287_p13 }
  0xc1   :  { %19297 = shalt.err (!%p19294_p3)
}
  0xc2   :  { %126 = dma.hbm_to_vmem [thread:$0]  %s23883_s9, 48, %s124_s30, [#allocation15]  }
  0xc3   :  { %s19298_s20 = scalar_lea.hbm %s23885_s11, 36864 }
  0xc4   :  { %p19299_p4 = scmp.ne.s32.totalorder %s23885_s11, %s19298_s20  ;;  %p19302_p5 = scmp.lt.u32.totalorder %s19298_s20, %s23885_s11 }
  0xc6   :  { %p19304_p6 = pnand %p19302_p5, %p19299_p4 }
  0xc8   :  { %19307 = shalt.err (!%p19304_p6)
}
  0xc9   :  { %s19308_s4 = scalar_lea.vmem %s19639_s28, 36864  ;;  %p19313_p8 = scmp.lt.s32.totalorder %s19639_s28, %s19639_s28 }
  0xca   :  { %p19309_p7 = scmp.ne.s32.totalorder %s19639_s28, %s19308_s4  ;;  %p19314_p9 = scmp.lt.s32.totalorder %s19308_s4, %s19308_s4 }
  0xcc   :  { %p19315_p10 = por %p19314_p9, %p19313_p8 }
  0xce   :  { %p19316_p11 = pnand %p19315_p10, %p19309_p7 }
  0xd0   :  { %19319 = shalt.err (!%p19316_p11)
}
  0xd1   :  { %s19422_s9 = smov 768   ;;  %s19423_s30 = smov 48  }
  0xd2   :  { %148 = dma.hbm_to_vmem [thread:$0]  %s23885_s11, 36864, %s19639_s28, [#allocation18], %s19422_s9, %s19422_s9, %s19423_s30  }
  0xd3   :  { %s19424_s10 = smov [#allocation22]   ;;  %s19425_s2 = smov [#allocation23]  }
  0xd4   :  { %s164_s26 = sshll.u32 %s19424_s10, 4  ;;  %s177_s16 = sshll.u32 %s19425_s2, 4  ;;  %s165_s26 = int_to_ptr.vmem [resolvable:$true] %s164_s26  ;;  %s178_s16 = int_to_ptr.vmem [resolvable:$true] %s177_s16 }
  0xd5   :  { %s19320_s29 = scalar_lea.hbm %s23887_s13, 36864 }
  0xd6   :  { %p19321_p12 = scmp.ne.s32.totalorder %s23887_s13, %s19320_s29  ;;  %p19324_p13 = scmp.lt.u32.totalorder %s19320_s29, %s23887_s13 }
  0xd8   :  { %p19326_p0 = pnand %p19324_p13, %p19321_p12 }
  0xda   :  { %19329 = shalt.err (!%p19326_p0)
}
  0xdb   :  { %s19330_s11 = scalar_lea.vmem %s165_s26, 36864  ;;  %p19335_p2 = scmp.lt.s32.totalorder %s165_s26, %s165_s26 }
  0xdc   :  { %p19331_p1 = scmp.ne.s32.totalorder %s165_s26, %s19330_s11  ;;  %p19336_p3 = scmp.lt.s32.totalorder %s19330_s11, %s19330_s11 }
  0xde   :  { %p19337_p4 = por %p19336_p3, %p19335_p2 }
  0xe0   :  { %p19338_p5 = pnand %p19337_p4, %p19331_p1 }
  0xe2   :  { %19341 = shalt.err (!%p19338_p5)
}
  0xe3   :  { %170 = dma.hbm_to_vmem [thread:$0]  %s23887_s13, 36864, %s165_s26, [#allocation21], %s19418_s5, %s19418_s5, %s19419_s27  }
  0xe4   :  { %s19342_s24 = scalar_lea.hbm %s23888_s14, 48 }
  0xe5   :  { %p19343_p6 = scmp.ne.s32.totalorder %s23888_s14, %s19342_s24  ;;  %p19346_p7 = scmp.lt.u32.totalorder %s19342_s24, %s23888_s14 }
  0xe7   :  { %p19348_p8 = pnand %p19346_p7, %p19343_p6 }
  0xe9   :  { %19351 = shalt.err (!%p19348_p8)
}
  0xea   :  { %s19352_s3 = scalar_lea.vmem %s178_s16, 48  ;;  %s19356_s25 = scalar_lea.vmem %s178_s16, 64 }
  0xeb   :  { %p19353_p9 = scmp.ne.s32.totalorder %s178_s16, %s19352_s3  ;;  %p19357_p10 = scmp.lt.s32.totalorder %s178_s16, %s178_s16 }
  0xec   :  { %p19358_p11 = scmp.lt.s32.totalorder %s19356_s25, %s19352_s3 }
  0xee   :  { %p19359_p12 = por %p19358_p11, %p19357_p10 }
  0xf0   :  { %p19360_p13 = pnand %p19359_p12, %p19353_p9 }
  0xf2   :  { %19363 = shalt.err (!%p19360_p13)
}
  0xf3   :  { %180 = dma.hbm_to_vmem [thread:$0]  %s23888_s14, 48, %s178_s16, [#allocation24]  }
  0xf4   :  { %19386 = dma.done.wait [#allocation3], 1536  }
  0xf5   :  { %19387 = vsyncadd [#allocation3], 4294965760 }
  0xf6   :  { %19388 = dma.done.wait [#allocation6], 64  }
  0xf7   :  { %19389 = vsyncadd [#allocation6], 4294967232 }
  0xf8   :  { %19390 = dma.done.wait [#allocation9], 27696  }
  0xf9   :  { %19391 = vsyncadd [#allocation9], 4294939600 }
  0xfa   :  { %19392 = dma.done.wait [#allocation12], 9360  }
  0xfb   :  { %19393 = vsyncadd [#allocation12], 4294957936 }
  0xfc   :  { %19394 = dma.done.wait [#allocation15], 96  }
  0xfd   :  { %19395 = vsyncadd [#allocation15], 4294967200 }
  0xfe   :  { %19396 = dma.done.wait [#allocation18], 36912  }
  0xff   :  { %19397 = vsyncadd [#allocation18], 4294930384 }
 0x100   :  { %19398 = dma.done.wait [#allocation21], 37056  }
 0x101   :  { %19399 = vsyncadd [#allocation21], 4294930240 }
 0x102   :  { %19400 = dma.done.wait [#allocation24], 48  }
 0x103   :  { %19401 = vsyncadd [#allocation24], 4294967248  ;;  %v19697_v0 = vld [vmem:[#allocation2] sm:$0xff]  ;;  %v19699_v1 = vld [vmem:[#allocation2 + $0x8] sm:$0xff]  ;;  %s19427_s14 = smov 64   ;;  %s19428_s27 = smov 96  }
 0x104   :  { %v19701_v2 = vld [vmem:[#allocation2 + $0x10] sm:$0xff]  ;;  %v238_v3 = vadd.f32 %v19699_v1, %v19697_v0  ;;  %v19707_v5 = vld [vmem:[#allocation2 + $0x38] sm:$0xff]  ;;  %v19709_v6 = vld [vmem:[#allocation2 + $0x40] sm:$0xff]  ;;  %s19429_s10 = smov 32   ;;  %vm6042_vm0 = vcmask 261120   ;;  %vm9621_vm13 = vcmask 523264  }
 0x105   :  { %v19705_v4 = vld [vmem:[#allocation2 + $0x30] sm:$0xff]  ;;  %v19713_v8 = vld [vmem:[#allocation2 + $0x18] sm:$0xff]  ;;  %v19715_v9 = vld [vmem:[#allocation2 + $0x20] sm:$0xff]  ;;  %vm9626_vm14 = vcmask 785408  }
 0x106   :  { %v246_v7 = vadd.f32 %v19707_v5, %v19705_v4  ;;  %v19717_v10 = vld [vmem:[#allocation2 + $0x28] sm:$0xff]  ;;  %v239_v11 = vadd.f32 %v238_v3, %v19701_v2  ;;  %v242_v12 = vadd.f32 %v19715_v9, %v19713_v8  ;;  %v19724_v14 = vld [vmem:[#allocation2 + $0x50] sm:$0xff]  ;;  %v19726_v15 = vld [vmem:[#allocation2 + $0x58] sm:$0xff] }
 0x107   :  { %v19722_v13 = vld [vmem:[#allocation2 + $0x48] sm:$0xff]  ;;  %v17519_v22 = vld [vmem:[#allocation10 + $0x4c] ss:$36 sps:$4 sm:$0xff]   ;;  %v17522_v24 = vld [vmem:[#allocation10 + $0x94] ss:$36 sps:$4 sm:$0xff]  }
 0x108   :  { %v247_v16 = vadd.f32 %v246_v7, %v19709_v6  ;;  %v250_v17 = vadd.f32 %v19724_v14, %v19722_v13  ;;  %240 = vadd.xlane.f32.xlu0 %v239_v11  ;;  %v243_v18 = vadd.f32 %v242_v12, %v19717_v10  ;;  %v17516_v20 = vld [vmem:[#allocation10 + $0x4] ss:$36 sps:$4 sm:$0xff]   ;;  %v17540_v25 = vld [vmem:[#allocation10 + $0x48c] ss:$36 sps:$4 sm:$0xff]   ;;  %v17546_v28 = vld [vmem:[#allocation10 + $0x4d4] ss:$36 sps:$4 sm:$0xff]  }
 0x109   :  { %v17518_v21 = vld [vmem:[#allocation10] ss:$36 sps:$4 sm:$0xff]   ;;  %1778 = vmatprep.subr.bf16.mxu0 %v17516_v20  ;;  %v17521_v23 = vld [vmem:[#allocation10 + $0x48] ss:$36 sps:$4 sm:$0xff]   ;;  %v17524_v26 = vld [vmem:[#allocation10 + $0x90] ss:$36 sps:$4 sm:$0xff]   ;;  %1937 = vmatprep.subr.bf16.mxu1 %v17540_v25 }
 0x10a   :  { %248 = vadd.xlane.f32.xlu1 %v247_v16  ;;  %v251_v19 = vadd.f32 %v250_v17, %v19726_v15  ;;  %1779 = vmatpush1.bf16.msra.mxu0 %v17518_v21  ;;  %v17544_v27 = vld [vmem:[#allocation10 + $0x488] ss:$36 sps:$4 sm:$0xff]   ;;  %v17525_v29 = vld [vmem:[#allocation10 + $0xdc] ss:$36 sps:$4 sm:$0xff]   ;;  %v17550_v30 = vld [vmem:[#allocation10 + $0x4d0] ss:$36 sps:$4 sm:$0xff]  }
 0x10b   :  { %1780 = vmatprep.subr.bf16.mxu0 %v17519_v22  ;;  %1938 = vmatpush1.bf16.msra.mxu1 %v17544_v27  ;;  %v17527_v31 = vld [vmem:[#allocation10 + $0xd8] ss:$36 sps:$4 sm:$0xff]   ;;  %v17528_v32 = vld [vmem:[#allocation10 + $0x124] ss:$36 sps:$4 sm:$0xff]   ;;  %v17531_v34 = vld [vmem:[#allocation10 + $0x16c] ss:$36 sps:$4 sm:$0xff]  }
 0x10c   :  { %244 = vadd.xlane.f32.xlu0 %v243_v18  ;;  %1939 = vmatprep.subr.bf16.mxu1 %v17546_v28  ;;  %v17530_v33 = vld [vmem:[#allocation10 + $0x120] ss:$36 sps:$4 sm:$0xff]   ;;  %v17533_v35 = vld [vmem:[#allocation10 + $0x168] ss:$36 sps:$4 sm:$0xff]   ;;  %v17534_v36 = vld [vmem:[#allocation10 + $0x1b4] ss:$36 sps:$4 sm:$0xff]  }
 0x10d   :  { %v17536_v37 = vld [vmem:[#allocation10 + $0x1b0] ss:$36 sps:$4 sm:$0xff]   ;;  %v17537_v38 = vld [vmem:[#allocation10 + $0x1fc] ss:$36 sps:$4 sm:$0xff]   ;;  %v17542_v40 = vld [vmem:[#allocation10 + $0x244] ss:$36 sps:$4 sm:$0xff]  }
 0x10e   :  { %252 = vadd.xlane.f32.xlu1 %v251_v19  ;;  %1781 = vmatpush1.bf16.msra.mxu0 %v17521_v23  ;;  %v17539_v39 = vld [vmem:[#allocation10 + $0x1f8] ss:$36 sps:$4 sm:$0xff]   ;;  %v17545_v41 = vld [vmem:[#allocation10 + $0x240] ss:$36 sps:$4 sm:$0xff]   ;;  %v17548_v42 = vld [vmem:[#allocation10 + $0x28c] ss:$36 sps:$4 sm:$0xff]  }
 0x10f   :  { %1782 = vmatprep.subr.bf16.mxu0 %v17522_v24  ;;  %1940 = vmatpush1.bf16.msra.mxu1 %v17550_v30  ;;  %v17551_v19 = vld [vmem:[#allocation10 + $0x288] ss:$36 sps:$4 sm:$0xff]   ;;  %v17552_v20 = vld [vmem:[#allocation10 + $0x51c] ss:$36 sps:$4 sm:$0xff]   ;;  %v17554_v21 = vld [vmem:[#allocation10 + $0x2d4] ss:$36 sps:$4 sm:$0xff]  }
 0x110   :  { %v17556_v22 = vld [vmem:[#allocation10 + $0x518] ss:$36 sps:$4 sm:$0xff]   ;;  %1941 = vmatprep.subr.bf16.mxu1 %v17552_v20  ;;  %v17557_v23 = vld [vmem:[#allocation10 + $0x2d0] ss:$36 sps:$4 sm:$0xff]   ;;  %v17558_v24 = vld [vmem:[#allocation10 + $0x564] ss:$36 sps:$4 sm:$0xff]  }
 0x111   :  { %v17560_v25 = vld [vmem:[#allocation10 + $0x31c] ss:$36 sps:$4 sm:$0xff]   ;;  %v17564_v28 = vld [vmem:[#allocation10 + $0x5ac] ss:$36 sps:$4 sm:$0xff]  }
 0x112   :  { %1783 = vmatpush1.bf16.msra.mxu0 %v17524_v26  ;;  %v17562_v26 = vld [vmem:[#allocation10 + $0x560] ss:$36 sps:$4 sm:$0xff]   ;;  %v17563_v27 = vld [vmem:[#allocation10 + $0x318] ss:$36 sps:$4 sm:$0xff]   ;;  %v17568_v30 = vld [vmem:[#allocation10 + $0x5a8] ss:$36 sps:$4 sm:$0xff]  }
 0x113   :  { %1784 = vmatprep.subr.bf16.mxu0 %v17525_v29  ;;  %1942 = vmatpush1.bf16.msra.mxu1 %v17556_v22  ;;  %v17566_v29 = vld [vmem:[#allocation10 + $0x364] ss:$36 sps:$4 sm:$0xff]  }
 0x114   :  { %1943 = vmatprep.subr.bf16.mxu1 %v17558_v24 }
 0x116   :  { %1785 = vmatpush1.bf16.msra.mxu0 %v17527_v31  ;;  %v17569_v31 = vld [vmem:[#allocation10 + $0x360] ss:$36 sps:$4 sm:$0xff]  }
 0x117   :  { %1786 = vmatprep.subr.bf16.mxu0 %v17528_v32  ;;  %1944 = vmatpush1.bf16.msra.mxu1 %v17562_v26  ;;  %v17570_v32 = vld [vmem:[#allocation10 + $0x5f4] ss:$36 sps:$4 sm:$0xff]  }
 0x118   :  { %1945 = vmatprep.subr.bf16.mxu1 %v17564_v28 }
 0x11a   :  { %1787 = vmatpush1.bf16.msra.mxu0 %v17530_v33  ;;  %v17572_v33 = vld [vmem:[#allocation10 + $0x3ac] ss:$36 sps:$4 sm:$0xff]  }
 0x11b   :  { %1788 = vmatprep.subr.bf16.mxu0 %v17531_v34  ;;  %1946 = vmatpush1.bf16.msra.mxu1 %v17568_v30  ;;  %v17574_v34 = vld [vmem:[#allocation10 + $0x5f0] ss:$36 sps:$4 sm:$0xff]  }
 0x11c   :  { %1947 = vmatprep.subr.bf16.mxu1 %v17570_v32 }
 0x11e   :  { %1789 = vmatpush1.bf16.msra.mxu0 %v17533_v35  ;;  %v17575_v35 = vld [vmem:[#allocation10 + $0x3a8] ss:$36 sps:$4 sm:$0xff]  }
 0x11f   :  { %1790 = vmatprep.subr.bf16.mxu0 %v17534_v36  ;;  %v17576_v36 = vld [vmem:[#allocation10 + $0x63c] ss:$36 sps:$4 sm:$0xff]   ;;  %1948 = vmatpush1.bf16.msra.mxu1 %v17574_v34 }
 0x120   :  { %1949 = vmatprep.subr.bf16.mxu1 %v17576_v36  ;;  %v17588_v34 = vld [vmem:[#allocation10 + $0x18] ss:$36 sps:$4 sm:$0xff]  }
 0x122   :  { %1791 = vmatpush1.bf16.msra.mxu0 %v17536_v37  ;;  %v17578_v37 = vld [vmem:[#allocation10 + $0x3f4] ss:$36 sps:$4 sm:$0xff]  }
 0x123   :  { %1792 = vmatprep.subr.bf16.mxu0 %v17537_v38  ;;  %v17580_v38 = vld [vmem:[#allocation10 + $0x638] ss:$36 sps:$4 sm:$0xff]  }
 0x124   :  { %1950 = vmatpush1.bf16.msra.mxu1 %v17580_v38 }
 0x126   :  { %1793 = vmatpush1.bf16.msra.mxu0 %v17539_v39  ;;  %v17581_v39 = vld [vmem:[#allocation10 + $0x3f0] ss:$36 sps:$4 sm:$0xff]  }
 0x127   :  { %1794 = vmatprep.subr.bf16.mxu0 %v17542_v40  ;;  %v17582_v40 = vld [vmem:[#allocation10 + $0x684] ss:$36 sps:$4 sm:$0xff]  }
 0x128   :  { %1951 = vmatprep.subr.bf16.mxu1 %v17582_v40  ;;  %v17596_v40 = vld [vmem:[#allocation10 + $0x64] ss:$36 sps:$4 sm:$0xff]  }
 0x12a   :  { %1795 = vmatpush1.bf16.msra.mxu0 %v17545_v41  ;;  %v17584_v41 = vld [vmem:[#allocation10 + $0x43c] ss:$36 sps:$4 sm:$0xff]  }
 0x12b   :  { %1796 = vmatprep.subr.bf16.mxu0 %v17548_v42  ;;  %v17586_v42 = vld [vmem:[#allocation10 + $0x680] ss:$36 sps:$4 sm:$0xff]  }
 0x12c   :  { %1952 = vmatpush1.bf16.msra.mxu1 %v17586_v42 }
 0x12e   :  { %1797 = vmatpush1.bf16.msra.mxu0 %v17551_v19 }
 0x12f   :  { %1798 = vmatprep.subr.bf16.mxu0 %v17554_v21 }
 0x132   :  { %1799 = vmatpush1.bf16.msra.mxu0 %v17557_v23 }
 0x133   :  { %1800 = vmatprep.subr.bf16.mxu0 %v17560_v25 }
 0x136   :  { %1801 = vmatpush1.bf16.msra.mxu0 %v17563_v27 }
 0x137   :  { %1802 = vmatprep.subr.bf16.mxu0 %v17566_v29 }
 0x13a   :  { %1803 = vmatpush1.bf16.msra.mxu0 %v17569_v31 }
 0x13b   :  { %1804 = vmatprep.subr.bf16.mxu0 %v17572_v33 }
 0x13e   :  { %1805 = vmatpush1.bf16.msra.mxu0 %v17575_v35 }
 0x13f   :  { %1806 = vmatprep.subr.bf16.mxu0 %v17578_v37 }
 0x142   :  { %1807 = vmatpush1.bf16.msra.mxu0 %v17581_v39  ;;  %v17591_v39 = vld [vmem:[#allocation10 + $0x480] ss:$36 sps:$4 sm:$0xff]  }
 0x143   :  { %1808 = vmatprep.subr.bf16.mxu0 %v17584_v41 }
 0x195   :  { %v241_v43 = vpop.xlane.xlu0 %240 }
 0x196   :  { %v255_v44 = vmul.f32 0.0026041667, %v241_v43  ;;  %v23894_v43 = vmov 0  }
 0x197   :  { %v249_v45 = vpop.xlane.xlu1 %248  ;;  %1969 = vmatprep.mubr.bf16.mxu1 %v23894_v43  ;;  %17514 = vset.pattern.permute.xlu0 %v23894_v43 }
 0x198   :  { %v257_v46 = vmul.f32 0.0026041667, %v249_v45  ;;  %v19734_v47 = vsub.f32 %v19697_v0, %v255_v44  ;;  %v19737_v48 = vsub.f32 %v19699_v1, %v255_v44  ;;  %v19740_v49 = vsub.f32 %v19701_v2, %v255_v44  ;;  %v17587_v44 = vld [vmem:[#allocation10 + $0x438] ss:$36 sps:$4 sm:$0xff]   ;;  %17515 = vset.pattern.permute.xlu1 %v23894_v43 }
 0x199   :  { %v245_v52 = vpop.xlane.xlu0 %244  ;;  %v17590_v45 = vld [vmem:[#allocation10 + $0x1c] ss:$36 sps:$4 sm:$0xff]   ;;  %1809 = vmatpush1.bf16.msra.mxu0 %v17587_v44  ;;  %v17599_v44 = vld [vmem:[#allocation10 + $0x4cc] ss:$36 sps:$4 sm:$0xff]  }
 0x19a   :  { %v19743_v50 = vsub.f32 %v19705_v4, %v257_v46  ;;  %v19746_v51 = vsub.f32 %v19707_v5, %v257_v46  ;;  %v19749_v53 = vsub.f32 %v19709_v6, %v257_v46  ;;  %v256_v54 = vmul.f32 0.0026041667, %v245_v52  ;;  %2096 = vmatprep.subr.bf16.mxu1 %v17590_v45  ;;  %v17593_v46 = vld [vmem:[#allocation10 + $0x484] ss:$36 sps:$4 sm:$0xff]  }
 0x19b   :  { %v253_v55 = vpop.xlane.xlu1 %252  ;;  %v271_v56 = vmul.f32 %v19734_v47, %v19734_v47  ;;  %v272_v57 = vmul.f32 %v19737_v48, %v19737_v48  ;;  %v273_v58 = vmul.f32 %v19740_v49, %v19740_v49  ;;  %1831 = vmatprep.subr.bf16.mxu0 %v17593_v46 }
 0x19c   :  { %v258_v59 = vmul.f32 0.0026041667, %v253_v55  ;;  %v277_v60 = vmul.f32 %v19743_v50, %v19743_v50  ;;  %v278_v61 = vmul.f32 %v19746_v51, %v19746_v51  ;;  %v279_v62 = vmul.f32 %v19749_v53, %v19749_v53 }
 0x19d   :  { %v19764_v63 = vsub.f32 %v19713_v8, %v256_v54  ;;  %v19767_v0 = vsub.f32 %v19715_v9, %v256_v54  ;;  %v283_v1 = vadd.f32 %v272_v57, %v271_v56  ;;  %v19770_v2 = vsub.f32 %v19717_v10, %v256_v54 }
 0x19e   :  { %v19773_v3 = vsub.f32 %v19722_v13, %v258_v59  ;;  %v19776_v4 = vsub.f32 %v19724_v14, %v258_v59  ;;  %v291_v5 = vadd.f32 %v278_v61, %v277_v60  ;;  %v19779_v6 = vsub.f32 %v19726_v15, %v258_v59 }
 0x19f   :  { %v284_v7 = vadd.f32 %v283_v1, %v273_v58  ;;  %v274_v8 = vmul.f32 %v19764_v63, %v19764_v63  ;;  %v275_v9 = vmul.f32 %v19767_v0, %v19767_v0  ;;  %v276_v13 = vmul.f32 %v19770_v2, %v19770_v2 }
 0x1a0   :  { %v280_v10 = vmul.f32 %v19773_v3, %v19773_v3  ;;  %v281_v11 = vmul.f32 %v19776_v4, %v19776_v4  ;;  %v292_v12 = vadd.f32 %v291_v5, %v279_v62  ;;  %v282_v15 = vmul.f32 %v19779_v6, %v19779_v6 }
 0x1a1   :  { %285 = vadd.xlane.f32.xlu0 %v284_v7  ;;  %v287_v14 = vadd.f32 %v275_v9, %v274_v8  ;;  %v23896_v55 = vlaneseq  ;;  %v236_v8 = vld [vmem:[#allocation7] sm:$0x7] }
 0x1a2   :  { %v295_v16 = vadd.f32 %v281_v11, %v280_v10 }
 0x1a3   :  { %v288_v17 = vadd.f32 %v287_v14, %v276_v13  ;;  %v19797_v61 = vshrl.u32 %v23896_v55, 7  ;;  %v237_v13 = vld [vmem:[#allocation8] sm:$0x7] }
 0x1a4   :  { %v296_v18 = vadd.f32 %v295_v16, %v282_v15 }
 0x1a5   :  { %293 = vadd.xlane.f32.xlu0 %v292_v12  ;;  %289 = vadd.xlane.f32.xlu1 %v288_v17  ;;  %24043 = vst [vmem:[#allocation35_spill] sm:$0xff] %v19797_v61  ;;  %v19800_v9 = vsub.s32 1, %v19797_v61  ;;  %v19803_v10 = vsub.s32 2, %v19797_v61  ;;  %v19806_v12 = vsub.s32 0, %v19797_v61 }
 0x1a7   :  { %24044 = vst [vmem:[#allocation36_spill] sm:$0xff] %v19800_v9  ;;  %24045 = vst [vmem:[#allocation37_spill] sm:$0xff] %v19803_v10  ;;  %v331_v14 = vrot.slane %v236_v8, %v19800_v9  ;;  %v335_v16 = vrot.slane %v236_v8, %v19803_v10  ;;  %v327_v20 = vrot.slane %v236_v8, %v19806_v12  ;;  %v17600_v8 = vld [vmem:[#allocation10 + $0xa8] ss:$36 sps:$4 sm:$0xff]  }
 0x1a8   :  { %24046 = vst [vmem:[#allocation38_spill] sm:$0xff] %v19806_v12  ;;  %v359_v22 = vrot.slane %v237_v13, %v19800_v9  ;;  %v363_v25 = vrot.slane %v237_v13, %v19803_v10 }
 0x1a9   :  { %297 = vadd.xlane.f32.xlu1 %v296_v18 }
 0x22e   :  { %v286_v52 = vpop.xlane.xlu0 %285 }
 0x22f   :  { %v299_v54 = vmul.f32 0.0026041667, %v286_v52 }
 0x231   :  { %v303_v56 = vadd.f32 1e-05, %v299_v54 }
 0x232   :  { %v290_v57 = vpop.xlane.xlu1 %289  ;;  %v294_v58 = vpop.xlane.xlu0 %293 }
 0x233   :  { %18740 = vrsqrt.f32 %v303_v56  ;;  %v300_v59 = vmul.f32 0.0026041667, %v290_v57  ;;  %v301_v60 = vmul.f32 0.0026041667, %v294_v58 }
 0x235   :  { %v304_v62 = vadd.f32 1e-05, %v300_v59  ;;  %v305_v1 = vadd.f32 1e-05, %v301_v60  ;;  %v17597_v60 = vld [vmem:[#allocation10 + $0x4c8] ss:$36 sps:$4 sm:$0xff]  }
 0x236   :  { %v298_v5 = vpop.xlane.xlu1 %297 }
 0x237   :  { %18742 = vrsqrt.f32 %v304_v62  ;;  %v302_v7 = vmul.f32 0.0026041667, %v298_v5  ;;  %v17605_v5 = vld [vmem:[#allocation10 + $0x514] ss:$36 sps:$4 sm:$0xff]  }
 0x238   :  { %18744 = vrsqrt.f32 %v305_v1  ;;  %v17602_v1 = vld [vmem:[#allocation10 + $0xac] ss:$36 sps:$4 sm:$0xff]  }
 0x239   :  { %v306_v11 = vadd.f32 1e-05, %v302_v7 }
 0x23b   :  { %18746 = vrsqrt.f32 %v306_v11 }
 0x23d   :  { %v18741_v15 = vpop.eup %18740 }
 0x23e   :  { %v312_v17 = vmul.f32 %v18741_v15, %v19737_v48  ;;  %v313_v18 = vmul.f32 %v18741_v15, %v19740_v49  ;;  %v311_v19 = vmul.f32 %v18741_v15, %v19734_v47  ;;  %v355_v49 = vrot.slane %v237_v13, %v19806_v12  ;;  %v17603_v13 = vld [vmem:[#allocation10 + $0x510] ss:$36 sps:$4 sm:$0xff]  }
 0x240   :  { %v340_v21 = vmul.f32 %v331_v14, %v312_v17  ;;  %v341_v24 = vmul.f32 %v335_v16, %v313_v18  ;;  %v339_v29 = vmul.f32 %v327_v20, %v311_v19  ;;  %v17608_v17 = vld [vmem:[#allocation10 + $0xf4] ss:$36 sps:$4 sm:$0xff]   ;;  %v17611_v18 = vld [vmem:[#allocation10 + $0x55c] ss:$36 sps:$4 sm:$0xff]  }
 0x241   :  { %v18743_v23 = vpop.eup %18742 }
 0x242   :  { %v18745_v26 = vpop.eup %18744  ;;  %v315_v27 = vmul.f32 %v18743_v23, %v19767_v0  ;;  %v316_v28 = vmul.f32 %v18743_v23, %v19770_v2  ;;  %v314_v48 = vmul.f32 %v18743_v23, %v19764_v63  ;;  %v368_v31 = vadd.f32 %v359_v22, %v340_v21  ;;  %v17609_v21 = vld [vmem:[#allocation10 + $0x558] ss:$36 sps:$4 sm:$0xff]   ;;  %v17617_v23 = vld [vmem:[#allocation10 + $0x5a4] ss:$36 sps:$4 sm:$0xff]  }
 0x243   :  { %v318_v47 = vmul.f32 %v18745_v26, %v19746_v51  ;;  %v369_v35 = vadd.f32 %v363_v25, %v341_v24  ;;  %v319_v38 = vmul.f32 %v18745_v26, %v19749_v53  ;;  %v367_v42 = vadd.f32 %v355_v49, %v339_v29  ;;  %v17612_v24 = vld [vmem:[#allocation10 + $0x138] ss:$36 sps:$4 sm:$0xff]   ;;  %v17626_v29 = vld [vmem:[#allocation10 + $0x1cc] ss:$36 sps:$4 sm:$0xff]  }
 0x244   :  { %v343_v30 = vmul.f32 %v331_v14, %v315_v27  ;;  %v344_v32 = vmul.f32 %v335_v16, %v316_v28  ;;  %v342_v36 = vmul.f32 %v327_v20, %v314_v48  ;;  %v317_v45 = vmul.f32 %v18745_v26, %v19743_v50  ;;  %v17620_v26 = vld [vmem:[#allocation10 + $0x184] ss:$36 sps:$4 sm:$0xff]   ;;  %v17623_v27 = vld [vmem:[#allocation10 + $0x5ec] ss:$36 sps:$4 sm:$0xff]  }
 0x245   :  { %v18747_v33 = vpop.eup %18746  ;;  %v346_v37 = vmul.f32 %v331_v14, %v318_v47  ;;  %v347_v50 = vmul.f32 %v335_v16, %v319_v38  ;;  %v17618_v28 = vld [vmem:[#allocation10 + $0x180] ss:$36 sps:$4 sm:$0xff]   ;;  %v17621_v48 = vld [vmem:[#allocation10 + $0x5e8] ss:$36 sps:$4 sm:$0xff]  }
 0x246   :  { %v371_v0 = vadd.f32 %v359_v22, %v343_v30  ;;  %v372_v2 = vadd.f32 %v363_v25, %v344_v32  ;;  %v321_v63 = vmul.f32 %v18747_v33, %v19776_v4  ;;  %v322_v41 = vmul.f32 %v18747_v33, %v19779_v6  ;;  %v17594_v4 = vld [vmem:[#allocation10 + $0x60] ss:$36 sps:$4 sm:$0xff]   ;;  %v17624_v47 = vld [vmem:[#allocation10 + $0x1c8] ss:$36 sps:$4 sm:$0xff]   ;;  %v17627_v30 = vld [vmem:[#allocation10 + $0x630] ss:$36 sps:$4 sm:$0xff]  }
 0x247   :  { %v370_v51 = vadd.f32 %v355_v49, %v342_v36  ;;  %v320_v46 = vmul.f32 %v18747_v33, %v19773_v3  ;;  %v374_v6 = vadd.f32 %v359_v22, %v346_v37  ;;  %v345_v3 = vmul.f32 %v327_v20, %v317_v45  ;;  %v17635_v32 = vld [vmem:[#allocation10 + $0x67c] ss:$36 sps:$4 sm:$0xff]   ;;  %v17630_v33 = vld [vmem:[#allocation10 + $0x210] ss:$36 sps:$4 sm:$0xff]   ;;  %v17639_v38 = vld [vmem:[#allocation10 + $0x8] ss:$36 sps:$4 sm:$0xff]  }
 0x248   :  { %v19826_v52 = vpack.c.bf16 %v371_v0, %v368_v31  ;;  %v19828_v54 = vpack.c.bf16 %v372_v2, %v369_v35  ;;  %v349_v53 = vmul.f32 %v331_v14, %v321_v63  ;;  %v350_v56 = vmul.f32 %v335_v16, %v322_v41  ;;  %v17632_v31 = vld [vmem:[#allocation10 + $0x214] ss:$36 sps:$4 sm:$0xff]   ;;  %v17638_v35 = vld [vmem:[#allocation10 + $0x25c] ss:$36 sps:$4 sm:$0xff]   ;;  %v17641_v36 = vld [vmem:[#allocation10 + $0xc] ss:$36 sps:$4 sm:$0xff]  }
 0x249   :  { %v19830_v57 = vpack.c.bf16 %v370_v51, %v367_v42  ;;  %v348_v58 = vmul.f32 %v327_v20, %v320_v46  ;;  %v375_v14 = vadd.f32 %v363_v25, %v347_v50  ;;  %v373_v15 = vadd.f32 %v355_v49, %v345_v3  ;;  %v17606_v20 = vld [vmem:[#allocation10 + $0xf0] ss:$36 sps:$4 sm:$0xff]   ;;  %v17636_v37 = vld [vmem:[#allocation10 + $0x258] ss:$36 sps:$4 sm:$0xff]   ;;  %v17644_v0 = vld [vmem:[#allocation10 + $0x2a4] ss:$36 sps:$4 sm:$0xff]  }
 0x24a   :  { %1810 = vmatprep.mubr.bf16.mxu0 %v19826_v52  ;;  %1970 = vmatmul.mubr.bf16.vlgmr.msra.gmra.mrb[0].mxu1 %v19828_v54  ;;  %v377_v59 = vadd.f32 %v359_v22, %v349_v53  ;;  %v378_v7 = vadd.f32 %v363_v25, %v350_v56  ;;  %v17614_v22 = vld [vmem:[#allocation10 + $0x13c] ss:$36 sps:$4 sm:$0xff]   ;;  %v17650_v63 = vld [vmem:[#allocation10 + $0x2ec] ss:$36 sps:$4 sm:$0xff]   ;;  %v17659_v45 = vld [vmem:[#allocation10 + $0xe4] ss:$36 sps:$4 sm:$0xff]  }
 0x24b   :  { %2097 = vmatpush1.bf16.msra.mxu1 %v17588_v34  ;;  %1811 = vmatmul.mubr.bf16.vlgmr.msra.gmra.mrb[0].mxu0 %v19830_v57  ;;  %v376_v11 = vadd.f32 %v355_v49, %v348_v58  ;;  %v17615_v25 = vld [vmem:[#allocation10 + $0x5a0] ss:$36 sps:$4 sm:$0xff]   ;;  %v17629_v49 = vld [vmem:[#allocation10 + $0x634] ss:$36 sps:$4 sm:$0xff]   ;;  %v17648_v42 = vld [vmem:[#allocation10 + $0x2e8] ss:$36 sps:$4 sm:$0xff]  }
 0x24c   :  { %1832 = vmatpush1.bf16.msra.mxu0 %v17591_v39  ;;  %2098 = vmatprep.subr.bf16.mxu1 %v17596_v40  ;;  %v19835_v62 = vpack.c.bf16 %v377_v59, %v374_v6  ;;  %v19839_v16 = vpack.c.bf16 %v378_v7, %v375_v14  ;;  %v17633_v34 = vld [vmem:[#allocation10 + $0x678] ss:$36 sps:$4 sm:$0xff]   ;;  %v17642_v2 = vld [vmem:[#allocation10 + $0x2a0] ss:$36 sps:$4 sm:$0xff]   ;;  %v17645_v40 = vld [vmem:[#allocation10 + $0x50] ss:$36 sps:$4 sm:$0xff]  }
 0x24d   :  { %1833 = vmatprep.subr.bf16.mxu0 %v17599_v44  ;;  %1979 = vmatprep.mubr.bf16.mxu1 %v23894_v43  ;;  %v19841_v19 = vpack.c.bf16 %v376_v11, %v373_v15  ;;  %v17647_v39 = vld [vmem:[#allocation10 + $0x54] ss:$36 sps:$4 sm:$0xff]   ;;  %v17653_v41 = vld [vmem:[#allocation10 + $0x9c] ss:$36 sps:$4 sm:$0xff]   ;;  %v17665_v58 = vld [vmem:[#allocation10 + $0x12c] ss:$36 sps:$4 sm:$0xff]  }
 0x24e   :  { %1820 = vmatprep.mubr.bf16.mxu0 %v19835_v62  ;;  %v17651_v51 = vld [vmem:[#allocation10 + $0x98] ss:$36 sps:$4 sm:$0xff]   ;;  %v17654_v46 = vld [vmem:[#allocation10 + $0x330] ss:$36 sps:$4 sm:$0xff]   ;;  %v17657_v53 = vld [vmem:[#allocation10 + $0xe0] ss:$36 sps:$4 sm:$0xff]  }
 0x24f   :  { %2099 = vmatpush1.bf16.msra.mxu1 %v17594_v4  ;;  %v17656_v44 = vld [vmem:[#allocation10 + $0x334] ss:$36 sps:$4 sm:$0xff]   ;;  %v17662_v56 = vld [vmem:[#allocation10 + $0x37c] ss:$36 sps:$4 sm:$0xff]   ;;  %v17663_v6 = vld [vmem:[#allocation10 + $0x128] ss:$36 sps:$4 sm:$0xff]  }
 0x250   :  { %1834 = vmatpush1.bf16.msra.mxu0 %v17597_v60  ;;  %2100 = vmatprep.subr.bf16.mxu1 %v17602_v1  ;;  %v17660_v4 = vld [vmem:[#allocation10 + $0x378] ss:$36 sps:$4 sm:$0xff]   ;;  %v17668_v59 = vld [vmem:[#allocation10 + $0x3c4] ss:$36 sps:$4 sm:$0xff]   ;;  %v17669_v3 = vld [vmem:[#allocation10 + $0x170] ss:$36 sps:$4 sm:$0xff]  }
 0x251   :  { %1835 = vmatprep.subr.bf16.mxu0 %v17605_v5  ;;  %v17671_v60 = vld [vmem:[#allocation10 + $0x174] ss:$36 sps:$4 sm:$0xff]   ;;  %v17666_v50 = vld [vmem:[#allocation10 + $0x3c0] ss:$36 sps:$4 sm:$0xff]   ;;  %v17674_v1 = vld [vmem:[#allocation10 + $0x40c] ss:$36 sps:$4 sm:$0xff]  }
 0x252   :  { %1980 = vmatmul.mubr.bf16.gmra.mrb[4].mxu1 %v19839_v16  ;;  %v17677_v5 = vld [vmem:[#allocation10 + $0x1bc] ss:$36 sps:$4 sm:$0xff]   ;;  %v17672_v7 = vld [vmem:[#allocation10 + $0x408] ss:$36 sps:$4 sm:$0xff]   ;;  %v17680_v11 = vld [vmem:[#allocation10 + $0x454] ss:$36 sps:$4 sm:$0xff]  }
 0x253   :  { %2101 = vmatpush1.bf16.msra.mxu1 %v17600_v8  ;;  %1821 = vmatmul.mubr.bf16.gmra.mrb[4].mxu0 %v19841_v19  ;;  %v17675_v8 = vld [vmem:[#allocation10 + $0x1b8] ss:$36 sps:$4 sm:$0xff]   ;;  %v17678_v14 = vld [vmem:[#allocation10 + $0x450] ss:$36 sps:$4 sm:$0xff]   ;;  %v17681_v15 = vld [vmem:[#allocation10 + $0x200] ss:$36 sps:$4 sm:$0xff]  }
 0x254   :  { %1836 = vmatpush1.bf16.msra.mxu0 %v17603_v13  ;;  %2128 = vmatprep.mubr.bf16.mxu1 %v19826_v52  ;;  %v17683_v13 = vld [vmem:[#allocation10 + $0x204] ss:$36 sps:$4 sm:$0xff]  }
 0x255   :  { %2102 = vmatprep.subr.bf16.mxu1 %v17608_v17  ;;  %1837 = vmatprep.subr.bf16.mxu0 %v17611_v18  ;;  %v17686_v17 = vld [vmem:[#allocation10 + $0x49c] ss:$36 sps:$4 sm:$0xff]   ;;  %v17689_v18 = vld [vmem:[#allocation10 + $0x24c] ss:$36 sps:$4 sm:$0xff]  }
 0x256   :  { %1863 = vmatprep.mubr.bf16.mxu0 %v23894_v43 }
 0x257   :  { %2103 = vmatpush1.bf16.msra.mxu1 %v17606_v20  ;;  %v17684_v20 = vld [vmem:[#allocation10 + $0x498] ss:$36 sps:$4 sm:$0xff]  }
 0x258   :  { %1838 = vmatpush1.bf16.msra.mxu0 %v17609_v21  ;;  %2104 = vmatprep.subr.bf16.mxu1 %v17614_v22  ;;  %v17687_v21 = vld [vmem:[#allocation10 + $0x248] ss:$36 sps:$4 sm:$0xff]  }
 0x259   :  { %1839 = vmatprep.subr.bf16.mxu0 %v17617_v23  ;;  %v17692_v22 = vld [vmem:[#allocation10 + $0x4e4] ss:$36 sps:$4 sm:$0xff]   ;;  %v17695_v23 = vld [vmem:[#allocation10 + $0x294] ss:$36 sps:$4 sm:$0xff]  }
 0x25b   :  { %2105 = vmatpush1.bf16.msra.mxu1 %v17612_v24  ;;  %v17690_v24 = vld [vmem:[#allocation10 + $0x4e0] ss:$36 sps:$4 sm:$0xff]  }
 0x25c   :  { %1840 = vmatpush1.bf16.msra.mxu0 %v17615_v25  ;;  %2106 = vmatprep.subr.bf16.mxu1 %v17620_v26  ;;  %v17693_v25 = vld [vmem:[#allocation10 + $0x290] ss:$36 sps:$4 sm:$0xff]  }
 0x25d   :  { %1841 = vmatprep.subr.bf16.mxu0 %v17623_v27  ;;  %v17698_v26 = vld [vmem:[#allocation10 + $0x52c] ss:$36 sps:$4 sm:$0xff]  }
 0x25e   :  { %v17696_v27 = vld [vmem:[#allocation10 + $0x528] ss:$36 sps:$4 sm:$0xff]  }
 0x25f   :  { %2107 = vmatpush1.bf16.msra.mxu1 %v17618_v28  ;;  %v17701_v28 = vld [vmem:[#allocation10 + $0x2dc] ss:$36 sps:$4 sm:$0xff]  }
 0x260   :  { %1842 = vmatpush1.bf16.msra.mxu0 %v17621_v48  ;;  %2108 = vmatprep.subr.bf16.mxu1 %v17626_v29  ;;  %v17699_v48 = vld [vmem:[#allocation10 + $0x2d8] ss:$36 sps:$4 sm:$0xff]  }
 0x261   :  { %1843 = vmatprep.subr.bf16.mxu0 %v17629_v49  ;;  %v17704_v29 = vld [vmem:[#allocation10 + $0x574] ss:$36 sps:$4 sm:$0xff]   ;;  %v17707_v49 = vld [vmem:[#allocation10 + $0x324] ss:$36 sps:$4 sm:$0xff]  }
 0x263   :  { %2109 = vmatpush1.bf16.msra.mxu1 %v17624_v47  ;;  %v17702_v47 = vld [vmem:[#allocation10 + $0x570] ss:$36 sps:$4 sm:$0xff]  }
 0x264   :  { %1844 = vmatpush1.bf16.msra.mxu0 %v17627_v30  ;;  %2110 = vmatprep.subr.bf16.mxu1 %v17632_v31  ;;  %v17705_v30 = vld [vmem:[#allocation10 + $0x320] ss:$36 sps:$4 sm:$0xff]  }
 0x265   :  { %1845 = vmatprep.subr.bf16.mxu0 %v17635_v32  ;;  %v17710_v31 = vld [vmem:[#allocation10 + $0x5bc] ss:$36 sps:$4 sm:$0xff]  }
 0x266   :  { %v17708_v32 = vld [vmem:[#allocation10 + $0x5b8] ss:$36 sps:$4 sm:$0xff]  }
 0x267   :  { %2111 = vmatpush1.bf16.msra.mxu1 %v17630_v33  ;;  %v17713_v33 = vld [vmem:[#allocation10 + $0x36c] ss:$36 sps:$4 sm:$0xff]  }
 0x268   :  { %1846 = vmatpush1.bf16.msra.mxu0 %v17633_v34  ;;  %2112 = vmatprep.subr.bf16.mxu1 %v17638_v35  ;;  %v17711_v34 = vld [vmem:[#allocation10 + $0x368] ss:$36 sps:$4 sm:$0xff]  }
 0x269   :  { %1884 = vmatprep.subr.bf16.mxu0 %v17641_v36  ;;  %v17716_v35 = vld [vmem:[#allocation10 + $0x604] ss:$36 sps:$4 sm:$0xff]  }
 0x26a   :  { %v17714_v36 = vld [vmem:[#allocation10 + $0x600] ss:$36 sps:$4 sm:$0xff]  }
 0x26b   :  { %1864 = vmatmul.mubr.bf16.vlgmr.msra.gmra.mrb[0].mxu0 %v19828_v54  ;;  %2113 = vmatpush1.bf16.msra.mxu1 %v17636_v37  ;;  %v17719_v37 = vld [vmem:[#allocation10 + $0x3b4] ss:$36 sps:$4 sm:$0xff]  }
 0x26c   :  { %1885 = vmatpush1.bf16.msra.mxu0 %v17639_v38  ;;  %2114 = vmatprep.subr.bf16.mxu1 %v17644_v0  ;;  %v17717_v38 = vld [vmem:[#allocation10 + $0x3b0] ss:$36 sps:$4 sm:$0xff]  }
 0x26d   :  { %1886 = vmatprep.subr.bf16.mxu0 %v17647_v39  ;;  %1873 = vmatprep.mubr.bf16.mxu0 %v23894_v43  ;;  %v17722_v0 = vld [vmem:[#allocation10 + $0x64c] ss:$36 sps:$4 sm:$0xff]   ;;  %v17725_v39 = vld [vmem:[#allocation10 + $0x3fc] ss:$36 sps:$4 sm:$0xff]  }
 0x26f   :  { %2115 = vmatpush1.bf16.msra.mxu1 %v17642_v2  ;;  %v17720_v2 = vld [vmem:[#allocation10 + $0x648] ss:$36 sps:$4 sm:$0xff]  }
 0x270   :  { %1887 = vmatpush1.bf16.msra.mxu0 %v17645_v40  ;;  %2116 = vmatprep.subr.bf16.mxu1 %v17650_v63  ;;  %v17723_v40 = vld [vmem:[#allocation10 + $0x3f8] ss:$36 sps:$4 sm:$0xff]  }
 0x271   :  { %1888 = vmatprep.subr.bf16.mxu0 %v17653_v41  ;;  %v17728_v63 = vld [vmem:[#allocation10 + $0x694] ss:$36 sps:$4 sm:$0xff]   ;;  %v17731_v41 = vld [vmem:[#allocation10 + $0x444] ss:$36 sps:$4 sm:$0xff]  }
 0x273   :  { %1874 = vmatmul.mubr.bf16.gmra.mrb[4].mxu0 %v19839_v16  ;;  %2117 = vmatpush1.bf16.msra.mxu1 %v17648_v42  ;;  %v17726_v42 = vld [vmem:[#allocation10 + $0x690] ss:$36 sps:$4 sm:$0xff]  }
 0x274   :  { %1889 = vmatpush1.bf16.msra.mxu0 %v17651_v51  ;;  %1916 = vmatprep.mubr.bf16.mxu0 %v19826_v52  ;;  %v17729_v51 = vld [vmem:[#allocation10 + $0x440] ss:$36 sps:$4 sm:$0xff]  }
 0x275   :  { %2118 = vmatprep.subr.bf16.mxu1 %v17656_v44  ;;  %1890 = vmatprep.subr.bf16.mxu0 %v17659_v45  ;;  %v17732_v44 = vld [vmem:[#allocation10 + $0x4a0] ss:$36 sps:$4 sm:$0xff]   ;;  %v17735_v45 = vld [vmem:[#allocation10 + $0x14] ss:$36 sps:$4 sm:$0xff]  }
 0x277   :  { %2119 = vmatpush1.bf16.msra.mxu1 %v17654_v46  ;;  %v17733_v46 = vld [vmem:[#allocation10 + $0x10] ss:$36 sps:$4 sm:$0xff]  }
 0x278   :  { %1891 = vmatpush1.bf16.msra.mxu0 %v17657_v53  ;;  %2120 = vmatprep.subr.bf16.mxu1 %v17662_v56  ;;  %v17736_v53 = vld [vmem:[#allocation10 + $0x4e8] ss:$36 sps:$4 sm:$0xff]   ;;  %v17739_v56 = vld [vmem:[#allocation10 + $0x5c] ss:$36 sps:$4 sm:$0xff]  }
 0x279   :  { %1892 = vmatprep.subr.bf16.mxu0 %v17665_v58  ;;  %v17737_v58 = vld [vmem:[#allocation10 + $0x58] ss:$36 sps:$4 sm:$0xff]  }
 0x27b   :  { %2121 = vmatpush1.bf16.msra.mxu1 %v17660_v4  ;;  %v17740_v4 = vld [vmem:[#allocation10 + $0x530] ss:$36 sps:$4 sm:$0xff]  }
 0x27c   :  { %1893 = vmatpush1.bf16.msra.mxu0 %v17663_v6  ;;  %2122 = vmatprep.subr.bf16.mxu1 %v17668_v59  ;;  %v17743_v6 = vld [vmem:[#allocation10 + $0xa4] ss:$36 sps:$4 sm:$0xff]  }
 0x27d   :  { %1894 = vmatprep.subr.bf16.mxu0 %v17671_v60  ;;  %v17741_v59 = vld [vmem:[#allocation10 + $0xa0] ss:$36 sps:$4 sm:$0xff]   ;;  %v17744_v60 = vld [vmem:[#allocation10 + $0x578] ss:$36 sps:$4 sm:$0xff]  }
 0x27f   :  { %2123 = vmatpush1.bf16.msra.mxu1 %v17666_v50  ;;  %v17747_v50 = vld [vmem:[#allocation10 + $0xec] ss:$36 sps:$4 sm:$0xff]  }
 0x280   :  { %1895 = vmatpush1.bf16.msra.mxu0 %v17669_v3  ;;  %2124 = vmatprep.subr.bf16.mxu1 %v17674_v1  ;;  %v17745_v3 = vld [vmem:[#allocation10 + $0xe8] ss:$36 sps:$4 sm:$0xff]   ;;  %v17748_v1 = vld [vmem:[#allocation10 + $0x5c0] ss:$36 sps:$4 sm:$0xff]  }
 0x281   :  { %1896 = vmatprep.subr.bf16.mxu0 %v17677_v5  ;;  %v17751_v5 = vld [vmem:[#allocation10 + $0x134] ss:$36 sps:$4 sm:$0xff]  }
 0x283   :  { %2125 = vmatpush1.bf16.msra.mxu1 %v17672_v7  ;;  %v17749_v7 = vld [vmem:[#allocation10 + $0x130] ss:$36 sps:$4 sm:$0xff]  }
 0x284   :  { %1897 = vmatpush1.bf16.msra.mxu0 %v17675_v8  ;;  %2126 = vmatprep.subr.bf16.mxu1 %v17680_v11  ;;  %v17752_v8 = vld [vmem:[#allocation10 + $0x608] ss:$36 sps:$4 sm:$0xff]   ;;  %v17755_v11 = vld [vmem:[#allocation10 + $0x17c] ss:$36 sps:$4 sm:$0xff]  }
 0x285   :  { %1898 = vmatprep.subr.bf16.mxu0 %v17683_v13  ;;  %v17753_v13 = vld [vmem:[#allocation10 + $0x178] ss:$36 sps:$4 sm:$0xff]  }
 0x287   :  { %2127 = vmatpush1.bf16.msra.mxu1 %v17678_v14  ;;  %v17756_v14 = vld [vmem:[#allocation10 + $0x650] ss:$36 sps:$4 sm:$0xff]  }
 0x288   :  { %1899 = vmatpush1.bf16.msra.mxu0 %v17681_v15  ;;  %2149 = vmatprep.subr.bf16.mxu1 %v17686_v17  ;;  %v17759_v15 = vld [vmem:[#allocation10 + $0x1c4] ss:$36 sps:$4 sm:$0xff]  }
 0x289   :  { %1900 = vmatprep.subr.bf16.mxu0 %v17689_v18  ;;  %v17757_v17 = vld [vmem:[#allocation10 + $0x1c0] ss:$36 sps:$4 sm:$0xff]   ;;  %v17760_v18 = vld [vmem:[#allocation10 + $0x698] ss:$36 sps:$4 sm:$0xff]  }
 0x28a   :  { %2129 = vmatmul.mubr.bf16.vlgmr.msra.gmra.mrb[8].mxu1 %v19830_v57 }
 0x28b   :  { %2138 = vmatprep.mubr.bf16.mxu1 %v19835_v62  ;;  %2150 = vmatpush1.bf16.msra.mxu1 %v17684_v20  ;;  %v17763_v20 = vld [vmem:[#allocation10 + $0x20c] ss:$36 sps:$4 sm:$0xff]  }
 0x28c   :  { %1901 = vmatpush1.bf16.msra.mxu0 %v17687_v21  ;;  %2151 = vmatprep.subr.bf16.mxu1 %v17692_v22  ;;  %v17761_v21 = vld [vmem:[#allocation10 + $0x208] ss:$36 sps:$4 sm:$0xff]   ;;  %v17766_v22 = vld [vmem:[#allocation10 + $0x254] ss:$36 sps:$4 sm:$0xff]  }
 0x28d   :  { %1902 = vmatprep.subr.bf16.mxu0 %v17695_v23  ;;  %v17764_v23 = vld [vmem:[#allocation10 + $0x250] ss:$36 sps:$4 sm:$0xff]  }
 0x28f   :  { %2152 = vmatpush1.bf16.msra.mxu1 %v17690_v24  ;;  %v17769_v24 = vld [vmem:[#allocation10 + $0x29c] ss:$36 sps:$4 sm:$0xff]  }
 0x290   :  { %1903 = vmatpush1.bf16.msra.mxu0 %v17693_v25  ;;  %2153 = vmatprep.subr.bf16.mxu1 %v17698_v26  ;;  %v17767_v25 = vld [vmem:[#allocation10 + $0x298] ss:$36 sps:$4 sm:$0xff]   ;;  %v17772_v26 = vld [vmem:[#allocation10 + $0x2e4] ss:$36 sps:$4 sm:$0xff]  }
 0x291   :  { %1904 = vmatprep.subr.bf16.mxu0 %v17701_v28  ;;  %v17775_v28 = vld [vmem:[#allocation10 + $0x32c] ss:$36 sps:$4 sm:$0xff]  }
 0x292   :  { %2139 = vmatmul.mubr.bf16.gmra.mrb[12].mxu1 %v19841_v19 }
 0x293   :  { %2154 = vmatpush1.bf16.msra.mxu1 %v17696_v27  ;;  %2181 = vmatprep.mubr.bf16.mxu1 %v23894_v43  ;;  %v17770_v27 = vld [vmem:[#allocation10 + $0x2e0] ss:$36 sps:$4 sm:$0xff]  }
 0x294   :  { %1905 = vmatpush1.bf16.msra.mxu0 %v17699_v48  ;;  %2155 = vmatprep.subr.bf16.mxu1 %v17704_v29  ;;  %v17773_v48 = vld [vmem:[#allocation10 + $0x328] ss:$36 sps:$4 sm:$0xff]   ;;  %v17778_v29 = vld [vmem:[#allocation10 + $0x374] ss:$36 sps:$4 sm:$0xff]  }
 0x295   :  { %1906 = vmatprep.subr.bf16.mxu0 %v17707_v49  ;;  %v17776_v49 = vld [vmem:[#allocation10 + $0x370] ss:$36 sps:$4 sm:$0xff]  }
 0x297   :  { %2156 = vmatpush1.bf16.msra.mxu1 %v17702_v47  ;;  %v17781_v47 = vld [vmem:[#allocation10 + $0x3bc] ss:$36 sps:$4 sm:$0xff]  }
 0x298   :  { %1907 = vmatpush1.bf16.msra.mxu0 %v17705_v30  ;;  %2157 = vmatprep.subr.bf16.mxu1 %v17710_v31  ;;  %v17779_v30 = vld [vmem:[#allocation10 + $0x3b8] ss:$36 sps:$4 sm:$0xff]   ;;  %v17784_v31 = vld [vmem:[#allocation10 + $0x404] ss:$36 sps:$4 sm:$0xff]  }
 0x299   :  { %1908 = vmatprep.subr.bf16.mxu0 %v17713_v33  ;;  %v17787_v33 = vld [vmem:[#allocation10 + $0x44c] ss:$36 sps:$4 sm:$0xff]  }
 0x29b   :  { %2158 = vmatpush1.bf16.msra.mxu1 %v17708_v32  ;;  %v17782_v32 = vld [vmem:[#allocation10 + $0x400] ss:$36 sps:$4 sm:$0xff]  }
 0x29c   :  { %1909 = vmatpush1.bf16.msra.mxu0 %v17711_v34  ;;  %2159 = vmatprep.subr.bf16.mxu1 %v17716_v35  ;;  %v17785_v34 = vld [vmem:[#allocation10 + $0x448] ss:$36 sps:$4 sm:$0xff]   ;;  %v17790_v35 = vld [vmem:[#allocation10 + $0x494] ss:$36 sps:$4 sm:$0xff]  }
 0x29d   :  { %1910 = vmatprep.subr.bf16.mxu0 %v17719_v37  ;;  %v17793_v37 = vld [vmem:[#allocation10 + $0x4dc] ss:$36 sps:$4 sm:$0xff]  }
 0x29f   :  { %2160 = vmatpush1.bf16.msra.mxu1 %v17714_v36  ;;  %v17788_v36 = vld [vmem:[#allocation10 + $0x490] ss:$36 sps:$4 sm:$0xff]  }
 0x2a0   :  { %1911 = vmatpush1.bf16.msra.mxu0 %v17717_v38  ;;  %2161 = vmatprep.subr.bf16.mxu1 %v17722_v0  ;;  %v17791_v38 = vld [vmem:[#allocation10 + $0x4d8] ss:$36 sps:$4 sm:$0xff]   ;;  %v17796_v0 = vld [vmem:[#allocation10 + $0x524] ss:$36 sps:$4 sm:$0xff]  }
 0x2a1   :  { %1912 = vmatprep.subr.bf16.mxu0 %v17725_v39  ;;  %v17794_v39 = vld [vmem:[#allocation10 + $0x520] ss:$36 sps:$4 sm:$0xff]  }
 0x2a3   :  { %2162 = vmatpush1.bf16.msra.mxu1 %v17720_v2  ;;  %v17799_v2 = vld [vmem:[#allocation10 + $0x56c] ss:$36 sps:$4 sm:$0xff]  }
 0x2a4   :  { %1913 = vmatpush1.bf16.msra.mxu0 %v17723_v40  ;;  %2163 = vmatprep.subr.bf16.mxu1 %v17728_v63  ;;  %v17797_v40 = vld [vmem:[#allocation10 + $0x568] ss:$36 sps:$4 sm:$0xff]   ;;  %v17802_v63 = vld [vmem:[#allocation10 + $0x5b4] ss:$36 sps:$4 sm:$0xff]  }
 0x2a5   :  { %1914 = vmatprep.subr.bf16.mxu0 %v17731_v41  ;;  %v17800_v41 = vld [vmem:[#allocation10 + $0x5b0] ss:$36 sps:$4 sm:$0xff]  }
 0x2a7   :  { %2164 = vmatpush1.bf16.msra.mxu1 %v17726_v42  ;;  %v17805_v42 = vld [vmem:[#allocation10 + $0x5fc] ss:$36 sps:$4 sm:$0xff]  }
 0x2a8   :  { %1915 = vmatpush1.bf16.msra.mxu0 %v17729_v51  ;;  %17005 = vmatprep.subr.bf16.mxu1 %v17732_v44  ;;  %v17803_v51 = vld [vmem:[#allocation10 + $0x5f8] ss:$36 sps:$4 sm:$0xff]  }
 0x2a9   :  { %1990 = vmatprep.subr.bf16.mxu0 %v17735_v45  ;;  %v17806_v45 = vld [vmem:[#allocation10 + $0x640] ss:$36 sps:$4 sm:$0xff]  }
 0x2aa   :  { %2182 = vmatmul.mubr.bf16.vlgmr.msra.gmra.mrb[8].mxu1 %v19828_v54 }
 0x2ab   :  { %1917 = vmatmul.mubr.bf16.vlgmr.msra.gmra.mrb[8].mxu0 %v19830_v57  ;;  %17006 = vmatpush3.bf16.msra.mxu1 %v17732_v44  ;;  %v17808_v44 = vld [vmem:[#allocation10 + $0x644] ss:$36 sps:$4 sm:$0xff]  }
 0x2ac   :  { %1926 = vmatprep.mubr.bf16.mxu0 %v19835_v62  ;;  %1991 = vmatpush1.bf16.msra.mxu0 %v17733_v46  ;;  %v17811_v46 = vld [vmem:[#allocation10 + $0x68c] ss:$36 sps:$4 sm:$0xff]  }
 0x2ad   :  { %17007 = vmatprep.subr.bf16.mxu1 %v17736_v53  ;;  %1992 = vmatprep.subr.bf16.mxu0 %v17739_v56  ;;  %v17812_v56 = vld [vmem:[#allocation10 + $0x260] ss:$36 sps:$4 sm:$0xff]  }
 0x2ae   :  { %2191 = vmatprep.mubr.bf16.mxu1 %v23894_v43 }
 0x2af   :  { %17008 = vmatpush3.bf16.msra.mxu1 %v17736_v53  ;;  %v17809_v53 = vld [vmem:[#allocation10 + $0x688] ss:$36 sps:$4 sm:$0xff]  }
 0x2b0   :  { %1993 = vmatpush1.bf16.msra.mxu0 %v17737_v58  ;;  %17009 = vmatprep.subr.bf16.mxu1 %v17740_v4  ;;  %v17813_v58 = vld [vmem:[#allocation10 + $0x20] ss:$36 sps:$4 sm:$0xff]  }
 0x2b1   :  { %1994 = vmatprep.subr.bf16.mxu0 %v17743_v6  ;;  %v17815_v6 = vld [vmem:[#allocation10 + $0x68] ss:$36 sps:$4 sm:$0xff]  }
 0x2b2   :  { %2192 = vmatmul.mubr.bf16.gmra.mrb[12].mxu1 %v19839_v16 }
 0x2b3   :  { %1927 = vmatmul.mubr.bf16.gmra.mrb[12].mxu0 %v19841_v19  ;;  %17010 = vmatpush3.bf16.msra.mxu1 %v17740_v4  ;;  %v17814_v4 = vld [vmem:[#allocation10 + $0x2a8] ss:$36 sps:$4 sm:$0xff]  }
 0x2b4   :  { %17021 = vmatprep.mubr.bf16.mxu1 %v19828_v54  ;;  %1995 = vmatpush1.bf16.msra.mxu0 %v17741_v59  ;;  %v17816_v59 = vld [vmem:[#allocation10 + $0x2f0] ss:$36 sps:$4 sm:$0xff]  }
 0x2b5   :  { %2022 = vmatprep.mubr.bf16.mxu0 %v19826_v52  ;;  %17011 = vmatprep.subr.bf16.mxu1 %v17744_v60 }
 0x2b6   :  { %1996 = vmatprep.subr.bf16.mxu0 %v17747_v50  ;;  %v17818_v50 = vld [vmem:[#allocation10 + $0x338] ss:$36 sps:$4 sm:$0xff]  }
 0x2b7   :  { %17012 = vmatpush3.bf16.msra.mxu1 %v17744_v60  ;;  %v17817_v60 = vld [vmem:[#allocation10 + $0xb0] ss:$36 sps:$4 sm:$0xff]  }
 0x2b8   :  { %1997 = vmatpush1.bf16.msra.mxu0 %v17745_v3  ;;  %17013 = vmatprep.subr.bf16.mxu1 %v17748_v1  ;;  %v17819_v3 = vld [vmem:[#allocation10 + $0xf8] ss:$36 sps:$4 sm:$0xff]  }
 0x2b9   :  { %1998 = vmatprep.subr.bf16.mxu0 %v17751_v5  ;;  %v17822_v5 = vld [vmem:[#allocation10 + $0x3c8] ss:$36 sps:$4 sm:$0xff]  }
 0x2bb   :  { %17014 = vmatpush3.bf16.msra.mxu1 %v17748_v1  ;;  %v17820_v1 = vld [vmem:[#allocation10 + $0x380] ss:$36 sps:$4 sm:$0xff]  }
 0x2bc   :  { %1999 = vmatpush1.bf16.msra.mxu0 %v17749_v7  ;;  %17015 = vmatprep.subr.bf16.mxu1 %v17752_v8  ;;  %v17823_v7 = vld [vmem:[#allocation10 + $0x188] ss:$36 sps:$4 sm:$0xff]  }
 0x2bd   :  { %2000 = vmatprep.subr.bf16.mxu0 %v17755_v11  ;;  %v17824_v11 = vld [vmem:[#allocation10 + $0x410] ss:$36 sps:$4 sm:$0xff]  }
 0x2bf   :  { %17016 = vmatpush3.bf16.msra.mxu1 %v17752_v8 }
 0x2c0   :  { %2001 = vmatpush1.bf16.msra.mxu0 %v17753_v13  ;;  %17017 = vmatprep.subr.bf16.mxu1 %v17756_v14 }
 0x2c1   :  { %2002 = vmatprep.subr.bf16.mxu0 %v17759_v15  ;;  %v17826_v15 = vld [vmem:[#allocation10 + $0x458] ss:$36 sps:$4 sm:$0xff]  }
 0x2c3   :  { %17018 = vmatpush3.bf16.msra.mxu1 %v17756_v14 }
 0x2c4   :  { %2003 = vmatpush1.bf16.msra.mxu0 %v17757_v17  ;;  %17019 = vmatprep.subr.bf16.mxu1 %v17760_v18  ;;  %v17827_v17 = vld [vmem:[#allocation10 + $0x218] ss:$36 sps:$4 sm:$0xff]  }
 0x2c5   :  { %2004 = vmatprep.subr.bf16.mxu0 %v17763_v20 }
 0x2c7   :  { %17020 = vmatpush3.bf16.msra.mxu1 %v17760_v18 }
 0x2c8   :  { %2005 = vmatpush1.bf16.msra.mxu0 %v17761_v21 }
 0x2c9   :  { %2006 = vmatprep.subr.bf16.mxu0 %v17766_v22 }
 0x2ca   :  { %17022 = vmatmul.mubr.bf16.vlgmr.msra.gmra.mrb[16].mxu1 %v19839_v16 }
 0x2cc   :  { %2007 = vmatpush1.bf16.msra.mxu0 %v17764_v23  ;;  %v19891_v23 = vld [vmem:[#allocation11] sm:$0xff] }
 0x2cd   :  { %2008 = vmatprep.subr.bf16.mxu0 %v17769_v24  ;;  %v632_v24 = vrot.slane %v19891_v23, %v19806_v12 }
 0x2d0   :  { %2009 = vmatpush1.bf16.msra.mxu0 %v17767_v25 }
 0x2d1   :  { %2010 = vmatprep.subr.bf16.mxu0 %v17772_v26  ;;  %v636_v26 = vrot.slane %v19891_v23, %v19800_v9 }
 0x2d4   :  { %2011 = vmatpush1.bf16.msra.mxu0 %v17770_v27 }
 0x2d5   :  { %2012 = vmatprep.subr.bf16.mxu0 %v17775_v28 }
 0x2d8   :  { %2013 = vmatpush1.bf16.msra.mxu0 %v17773_v48 }
 0x2d9   :  { %2014 = vmatprep.subr.bf16.mxu0 %v17778_v29 }
 0x2dc   :  { %2015 = vmatpush1.bf16.msra.mxu0 %v17776_v49 }
 0x2dd   :  { %2016 = vmatprep.subr.bf16.mxu0 %v17781_v47 }
 0x2e0   :  { %2017 = vmatpush1.bf16.msra.mxu0 %v17779_v30 }
 0x2e1   :  { %2018 = vmatprep.subr.bf16.mxu0 %v17784_v31 }
 0x2e4   :  { %2019 = vmatpush1.bf16.msra.mxu0 %v17782_v32 }
 0x2e5   :  { %2020 = vmatprep.subr.bf16.mxu0 %v17787_v33 }
 0x2e8   :  { %2021 = vmatpush1.bf16.msra.mxu0 %v17785_v34 }
 0x2e9   :  { %2043 = vmatprep.subr.bf16.mxu0 %v17790_v35 }
 0x2eb   :  { %2023 = vmatmul.mubr.bf16.vlgmr.msra.gmra.mrb[16].mxu0 %v19830_v57 }
 0x2ec   :  { %2032 = vmatprep.mubr.bf16.mxu0 %v19835_v62  ;;  %2044 = vmatpush1.bf16.msra.mxu0 %v17788_v36 }
 0x2ed   :  { %2045 = vmatprep.subr.bf16.mxu0 %v17793_v37 }
 0x2f0   :  { %2046 = vmatpush1.bf16.msra.mxu0 %v17791_v38 }
 0x2f1   :  { %2047 = vmatprep.subr.bf16.mxu0 %v17796_v0 }
 0x2f3   :  { %2033 = vmatmul.mubr.bf16.gmra.mrb[20].mxu0 %v19841_v19 }
 0x2f4   :  { %2048 = vmatpush1.bf16.msra.mxu0 %v17794_v39  ;;  %2075 = vmatprep.mubr.bf16.mxu0 %v23894_v43  ;;  %v23892_v39 = vsub.s32 6, %v19797_v61 }
 0x2f5   :  { %2049 = vmatprep.subr.bf16.mxu0 %v17799_v2  ;;  %v19915_v2 = vsub.s32 3, %v19797_v61 }
 0x2f7   :  { %24047 = vst [vmem:[#allocation39_spill] sm:$0xff] %v19915_v2 }
 0x2f8   :  { %2050 = vmatpush1.bf16.msra.mxu0 %v17797_v40  ;;  %v23890_v40 = vsub.s32 7, %v19797_v61 }
 0x2f9   :  { %2051 = vmatprep.subr.bf16.mxu0 %v17802_v63  ;;  %v640_v63 = vrot.slane %v19891_v23, %v19803_v10 }
 0x2fc   :  { %2052 = vmatpush1.bf16.msra.mxu0 %v17800_v41  ;;  %v656_v41 = vrot.slane %v19891_v23, %v23892_v39 }
 0x2fd   :  { %2053 = vmatprep.subr.bf16.mxu0 %v17805_v42  ;;  %v644_v42 = vrot.slane %v19891_v23, %v19915_v2 }
 0x300   :  { %2054 = vmatpush1.bf16.msra.mxu0 %v17803_v51 }
 0x301   :  { %2055 = vmatprep.subr.bf16.mxu0 %v17808_v44  ;;  %v660_v44 = vrot.slane %v19891_v23, %v23890_v40 }
 0x304   :  { %2056 = vmatpush1.bf16.msra.mxu0 %v17806_v45 }
 0x305   :  { %2057 = vmatprep.subr.bf16.mxu0 %v17811_v46 }
 0x308   :  { %2058 = vmatpush1.bf16.msra.mxu0 %v17809_v53 }
 0x309   :  { %16665 = vmatprep.subr.bf16.mxu0 %v17812_v56 }
 0x30b   :  { %2076 = vmatmul.mubr.bf16.vlgmr.msra.gmra.mrb[16].mxu0 %v19828_v54  ;;  %v17821_v54 = vld [vmem:[#allocation10 + $0x140] ss:$36 sps:$4 sm:$0xff]  }
 0x30c   :  { %16666 = vmatpush3.bf16.msra.mxu0 %v17813_v58  ;;  %2085 = vmatprep.mubr.bf16.mxu0 %v23894_v43 }
 0x30d   :  { %16667 = vmatprep.subr.bf16.mxu0 %v17814_v4 }
 0x310   :  { %16668 = vmatpush3.bf16.msra.mxu0 %v17815_v6 }
 0x311   :  { %16669 = vmatprep.subr.bf16.mxu0 %v17816_v59 }
 0x313   :  { %2086 = vmatmul.mubr.bf16.gmra.mrb[20].mxu0 %v19839_v16 }
 0x314   :  { %16670 = vmatpush3.bf16.msra.mxu0 %v17817_v60  ;;  %2234 = vmatprep.mubr.bf16.mxu0 %v19826_v52  ;;  %v17825_v52 = vld [vmem:[#allocation10 + $0x1d0] ss:$36 sps:$4 sm:$0xff]  }
 0x315   :  { %16671 = vmatprep.subr.bf16.mxu0 %v17818_v50 }
 0x318   :  { %16672 = vmatpush3.bf16.msra.mxu0 %v17819_v3 }
 0x319   :  { %16673 = vmatprep.subr.bf16.mxu0 %v17820_v1 }
 0x31c   :  { %16674 = vmatpush3.bf16.msra.mxu0 %v17821_v54 }
 0x31d   :  { %v19872_v8 = vpop.f32.mrb[0].mxu1  ;;  %16675 = vmatprep.subr.bf16.mxu0 %v17822_v5 }
 0x31e   :  { %v19874_v13 = vpop.f32.mrb[1].mxu1 }
 0x31f   :  { %v19876_v14 = vpop.f32.mrb[2].mxu1 }
 0x320   :  { %16676 = vmatpush3.bf16.msra.mxu0 %v17823_v7  ;;  %v19878_v16 = vpop.f32.mrb[3].mxu1 }
 0x321   :  { %16677 = vmatprep.subr.bf16.mxu0 %v17824_v11 }
 0x324   :  { %16678 = vmatpush3.bf16.msra.mxu0 %v17825_v52 }
 0x325   :  { %v19880_v18 = vpop.f32.mrb[4].mxu1  ;;  %16679 = vmatprep.subr.bf16.mxu0 %v17826_v15 }
 0x326   :  { %v19882_v20 = vpop.f32.mrb[5].mxu1 }
 0x327   :  { %v19884_v21 = vpop.f32.mrb[6].mxu1 }
 0x328   :  { %16680 = vmatpush3.bf16.msra.mxu0 %v17827_v17  ;;  %v19886_v22 = vpop.f32.mrb[7].mxu1 }
 0x32b   :  { %2235 = vmatmul.mubr.bf16.vlgmr.msra.gmra.mrb[24].mxu0 %v19830_v57 }
 0x32c   :  { %2242 = vmatprep.mubr.bf16.mxu0 %v19835_v62 }
 0x333   :  { %2243 = vmatmul.mubr.bf16.gmra.mrb[28].mxu0 %v19841_v19 }
 0x33e   :  { %v1865_v25 = vpop.f32.mrb[0].mxu0 }
 0x33f   :  { %v1867_v27 = vpop.f32.mrb[1].mxu0  ;;  %v17237_v48 = vadd.f32 %v1865_v25, %v632_v24 }
 0x340   :  { %v1869_v28 = vpop.f32.mrb[2].mxu0  ;;  %v17238_v47 = vadd.f32 %v1867_v27, %v636_v26 }
 0x341   :  { %v17239_v29 = vadd.f32 %v1869_v28, %v632_v24  ;;  %v1871_v49 = vpop.f32.mrb[3].mxu0 }
 0x342   :  { %v17240_v57 = vadd.f32 %v1871_v49, %v636_v26 }
 0x343   :  { %v19897_v30 = vpack.c.bf16 %v17239_v29, %v17237_v48 }
 0x344   :  { %v19899_v62 = vpack.c.bf16 %v17240_v57, %v17238_v47 }
 0x345   :  { %2312 = vrot.lane.b32.xlu1 %v19897_v30, %s19427_s14  ;;  %2308 = vrot.lane.b32.xlu0 %v19897_v30, %s19428_s27 }
 0x346   :  { %v1875_v19 = vpop.f32.mrb[4].mxu0 }
 0x347   :  { %v17241_v31 = vadd.f32 %v1875_v19, %v632_v24  ;;  %v1877_v32 = vpop.f32.mrb[5].mxu0 }
 0x348   :  { %v17242_v33 = vadd.f32 %v1877_v32, %v636_v26  ;;  %v1879_v34 = vpop.f32.mrb[6].mxu0 }
 0x349   :  { %v17243_v35 = vadd.f32 %v1879_v34, %v632_v24  ;;  %v1881_v36 = vpop.f32.mrb[7].mxu0  ;;  %2322 = vrot.lane.b32.xlu1 %v19899_v62, %s19428_s27  ;;  %2316 = vrot.lane.b32.xlu0 %v19897_v30, %s19429_s10 }
 0x34a   :  { %v17244_v37 = vadd.f32 %v1881_v36, %v636_v26 }
 0x34b   :  { %v19909_v38 = vpack.c.bf16 %v17243_v35, %v17241_v31 }
 0x34c   :  { %v19911_v0 = vpack.c.bf16 %v17244_v37, %v17242_v33 }
 0x34e   :  { %v24057_v2 = vshrl.u32 %v19911_v0, 16 }
 0x37d   :  { %v2183_v51 = vpop.f32.mrb[8].mxu1 }
 0x37e   :  { %v1918_v45 = vpop.f32.mrb[8].mxu0  ;;  %v2185_v46 = vpop.f32.mrb[9].mxu1  ;;  %v17269_v4 = vadd.f32 %v2183_v51, %v656_v41 }
 0x37f   :  { %v1919_v53 = vadd.f32 %v1918_v45, %v640_v63  ;;  %v1920_v56 = vpop.f32.mrb[9].mxu0  ;;  %v2187_v58 = vpop.f32.mrb[10].mxu1  ;;  %v17270_v1 = vadd.f32 %v2185_v46, %v660_v44 }
 0x380   :  { %v1921_v6 = vadd.f32 %v1920_v56, %v644_v42  ;;  %v17271_v59 = vadd.f32 %v2187_v58, %v656_v41  ;;  %v1922_v60 = vpop.f32.mrb[10].mxu0  ;;  %v2189_v50 = vpop.f32.mrb[11].mxu1 }
 0x381   :  { %v1972_v3 = vadd.f32 %v19872_v8, %v1919_v53  ;;  %v1923_v54 = vadd.f32 %v1922_v60, %v640_v63  ;;  %v17272_v5 = vadd.f32 %v2189_v50, %v660_v44  ;;  %v1924_v7 = vpop.f32.mrb[11].mxu0 }
 0x382   :  { %v1974_v11 = vadd.f32 %v19874_v13, %v1921_v6  ;;  %v19930_v52 = vpack.c.bf16 %v17271_v59, %v17269_v4  ;;  %v1925_v15 = vadd.f32 %v1924_v7, %v644_v42 }
 0x383   :  { %v1976_v17 = vadd.f32 %v19876_v14, %v1923_v54  ;;  %v19933_v24 = vpack.c.bf16 %v17272_v5, %v17270_v1 }
 0x384   :  { %24048 = vst [vmem:[#allocation40_spill] sm:$0xff] %v19930_v52  ;;  %v1978_v25 = vadd.f32 %v19878_v16, %v1925_v15 }
 0x385   :  { %24049 = vst [vmem:[#allocation41_spill] sm:$0xff] %v19933_v24  ;;  %v19936_v26 = vpack.c.bf16 %v1976_v17, %v1972_v3  ;;  %v2193_v27 = vpop.f32.mrb[12].mxu1 }
 0x386   :  { %v19938_v28 = vpack.c.bf16 %v1978_v25, %v1974_v11  ;;  %v1928_v8 = vpop.f32.mrb[12].mxu0  ;;  %v2195_v48 = vpop.f32.mrb[13].mxu1  ;;  %v17273_v13 = vadd.f32 %v2193_v27, %v656_v41 }
 0x387   :  { %v1929_v29 = vadd.f32 %v1928_v8, %v640_v63  ;;  %v1930_v49 = vpop.f32.mrb[13].mxu0  ;;  %v2197_v47 = vpop.f32.mrb[14].mxu1  ;;  %v17274_v16 = vadd.f32 %v2195_v48, %v660_v44 }
 0x388   :  { %v1931_v57 = vadd.f32 %v1930_v49, %v644_v42  ;;  %v17275_v19 = vadd.f32 %v2197_v47, %v656_v41  ;;  %v1932_v31 = vpop.f32.mrb[14].mxu0  ;;  %v2199_v32 = vpop.f32.mrb[15].mxu1  ;;  %3542 = vrot.lane.b32.xlu1 %v19938_v28, %s19427_s14  ;;  %3538 = vrot.lane.b32.xlu0 %v19938_v28, %s19428_s27 }
 0x389   :  { %v1982_v14 = vadd.f32 %v19880_v18, %v1929_v29  ;;  %v1933_v33 = vadd.f32 %v1932_v31, %v640_v63  ;;  %v17276_v34 = vadd.f32 %v2199_v32, %v660_v44  ;;  %v1934_v35 = vpop.f32.mrb[15].mxu0  ;;  %v23891_v44 = vsub.s32 5, %v19797_v61 }
 0x38a   :  { %v1984_v36 = vadd.f32 %v19882_v20, %v1931_v57  ;;  %v19946_v37 = vpack.c.bf16 %v17275_v19, %v17273_v13  ;;  %v1935_v51 = vadd.f32 %v1934_v35, %v644_v42  ;;  %v23893_v42 = vsub.s32 4, %v19797_v61  ;;  %v15623_v13 = vld [vmem:[#allocation11 + $0x8] ss:$0 sm:$0xff] }
 0x38b   :  { %v1986_v41 = vadd.f32 %v19884_v21, %v1933_v33  ;;  %v19949_v45 = vpack.c.bf16 %v17276_v34, %v17274_v16  ;;  %v652_v4 = vrot.slane %v19891_v23, %v23891_v44 }
 0x38c   :  { %24050 = vst [vmem:[#allocation42_spill] sm:$0xff] %v19946_v37  ;;  %v1988_v46 = vadd.f32 %v19886_v22, %v1935_v51  ;;  %3546 = vrot.lane.b32.xlu1 %v19938_v28, %s19429_s10  ;;  %v648_v56 = vrot.slane %v19891_v23, %v23893_v42 }
 0x38d   :  { %24051 = vst [vmem:[#allocation43_spill] sm:$0xff] %v19949_v45  ;;  %v19954_v53 = vpack.c.bf16 %v1986_v41, %v1982_v14 }
 0x38e   :  { %v19956_v18 = vpack.c.bf16 %v1988_v46, %v1984_v36 }
 0x390   :  { %3544 = vrot.lane.b32.xlu1 %v19956_v18, %s19427_s14  ;;  %3540 = vrot.lane.b32.xlu0 %v19956_v18, %s19428_s27 }
 0x394   :  { %3548 = vrot.lane.b32.xlu0 %v19956_v18, %s19429_s10 }
 0x39d   :  { %v19964_v20 = vpop.f32.mrb[16].mxu1 }
 0x39e   :  { %v2285_v21 = vpop.f32.mrb[17].mxu1 }
 0x39f   :  { %v19966_v22 = vpop.f32.mrb[18].mxu1 }
 0x3a0   :  { %v2288_v63 = vpop.f32.mrb[19].mxu1 }
 0x3de   :  { %v2077_v58 = vpop.f32.mrb[16].mxu0 }
 0x3df   :  { %v2079_v6 = vpop.f32.mrb[17].mxu0  ;;  %v17261_v60 = vadd.f32 %v2077_v58, %v648_v56 }
 0x3e0   :  { %v2081_v59 = vpop.f32.mrb[18].mxu0  ;;  %v17262_v1 = vadd.f32 %v2079_v6, %v652_v4 }
 0x3e1   :  { %v17263_v50 = vadd.f32 %v2081_v59, %v648_v56  ;;  %v2083_v3 = vpop.f32.mrb[19].mxu0 }
 0x3e2   :  { %v17264_v54 = vadd.f32 %v2083_v3, %v652_v4  ;;  %v6004_v3 = vld [vmem:[%s23875_s1 + $0x10] sm:$0xff] }
 0x3e3   :  { %v19976_v5 = vpack.c.bf16 %v17263_v50, %v17261_v60  ;;  %v6003_v50 = vld [vmem:[%s23875_s1 + $0x8] sm:$0xff] }
 0x3e4   :  { %v19978_v7 = vpack.c.bf16 %v17264_v54, %v17262_v1  ;;  %v2313_v1 = vpop.permute.xlu1 %2312  ;;  %v2309_v54 = vpop.permute.xlu0 %2308 }
 0x3e5   :  { %3552 = vrot.lane.b32.xlu1 %v19976_v5, %s19428_s27  ;;  %3556 = vrot.lane.b32.xlu0 %v19976_v5, %s19427_s14  ;;  %v3598_v44 = vshrl.u32 %v19976_v5, 16 }
 0x3e6   :  { %v2087_v11 = vpop.f32.mrb[20].mxu0 }
 0x3e7   :  { %v2089_v15 = vpop.f32.mrb[21].mxu0  ;;  %v17265_v17 = vadd.f32 %v2087_v11, %v648_v56 }
 0x3e8   :  { %v2091_v23 = vpop.f32.mrb[22].mxu0  ;;  %v17266_v8 = vadd.f32 %v2089_v15, %v652_v4  ;;  %v2323_v11 = vpop.permute.xlu1 %2322 }
 0x3e9   :  { %v17267_v25 = vadd.f32 %v2091_v23, %v648_v56  ;;  %v2093_v27 = vpop.f32.mrb[23].mxu0  ;;  %2330 = vrot.lane.b32.xlu1 %v19899_v62, %s19429_s10  ;;  %2326 = vrot.lane.b32.xlu0 %v19899_v62, %s19427_s14  ;;  %v2317_v15 = vpop.permute.xlu0 %2316 }
 0x3ea   :  { %v17268_v48 = vadd.f32 %v2093_v27, %v652_v4 }
 0x3eb   :  { %v19988_v29 = vpack.c.bf16 %v17267_v25, %v17265_v17 }
 0x3ec   :  { %v19990_v49 = vpack.c.bf16 %v17268_v48, %v17266_v8 }
 0x3ed   :  { %3560 = vrot.lane.b32.xlu1 %v19976_v5, %s19429_s10  ;;  %3558 = vrot.lane.b32.xlu0 %v19988_v29, %s19427_s14 }
 0x3f1   :  { %3554 = vrot.lane.b32.xlu1 %v19988_v29, %s19428_s27  ;;  %2310 = vrot.lane.b32.xlu0 %v19909_v38, %s19428_s27 }
 0x3f5   :  { %3562 = vrot.lane.b32.xlu1 %v19988_v29, %s19429_s10  ;;  %2318 = vrot.lane.b32.xlu0 %v19909_v38, %s19429_s10 }
 0x3f9   :  { %2314 = vrot.lane.b32.xlu1 %v19909_v38, %s19427_s14  ;;  %2328 = vrot.lane.b32.xlu0 %v19911_v0, %s19427_s14 }
 0x3fa   :  { %v20084_v23 = vpop.permute.xlu1 %3542  ;;  %v20086_v17 = vpop.permute.xlu0 %3538 }
 0x3fd   :  { %2324 = vrot.lane.b32.xlu1 %v19911_v0, %s19428_s27  ;;  %3566 = vrot.lane.b32.xlu0 %v19978_v7, %s19428_s27 }
 0x3fe   :  { %v16681_v47 = vpop.f32.mrb[24].mxu0  ;;  %v20088_v25 = vpop.permute.xlu1 %3546 }
 0x3ff   :  { %v16682_v57 = vpop.f32.mrb[25].mxu0  ;;  %v3591_v40 = vshrl.u32 %v20088_v25, 16 }
 0x400   :  { %v16683_v19 = vadd.f32 %v16682_v57, %v16681_v47  ;;  %v16684_v31 = vpop.f32.mrb[26].mxu0  ;;  %v19430_v47 = vmov 1983009808   ;;  %v2369_v57 = vshrl.u32 %v2323_v11, 16 }
 0x401   :  { %v16685_v32 = vpop.f32.mrb[27].mxu0  ;;  %2332 = vrot.lane.b32.xlu1 %v19911_v0, %s19429_s10  ;;  %3574 = vrot.lane.b32.xlu0 %v19978_v7, %s19429_s10 }
 0x402   :  { %v2237_v14 = vadd.f32 %v16683_v19, %v15623_v13  ;;  %v16686_v16 = vadd.f32 %v16685_v32, %v16684_v31  ;;  %v20090_v27 = vpop.permute.xlu0 %3540  ;;  %v20092_v8 = vpop.permute.xlu1 %3544  ;;  %v2353_v32 = vshrl.u32 %v2309_v54, 16 }
 0x404   :  { %v2286_v33 = vadd.f32 %v2285_v21, %v2237_v14  ;;  %v2240_v34 = vadd.f32 %v16686_v16, %v15623_v13  ;;  %v2368_v14 = vshrl.u32 %v19899_v62, 16 }
 0x405   :  { %3570 = vrot.lane.b32.xlu1 %v19978_v7, %s19427_s14  ;;  %3572 = vrot.lane.b32.xlu0 %v19990_v49, %s19427_s14 }
 0x406   :  { %v2289_v35 = vadd.f32 %v2288_v63, %v2240_v34  ;;  %v16687_v36 = vpop.f32.mrb[28].mxu0  ;;  %v20094_v48 = vpop.permute.xlu0 %3548  ;;  %v2366_v34 = vpack.i.b16 %v2323_v11, %v19899_v62 }
 0x407   :  { %v16688_v51 = vpop.f32.mrb[29].mxu0 }
 0x408   :  { %v20020_v41 = vpack.c.bf16 %v2289_v35, %v2286_v33  ;;  %v16689_v46 = vadd.f32 %v16688_v51, %v16687_v36  ;;  %v16690_v56 = vpop.f32.mrb[30].mxu0  ;;  %v2352_v33 = vshrl.u32 %v19897_v30, 16  ;;  %v2370_v35 = vpack.i.b16 %v2369_v57, %v2368_v14 }
 0x409   :  { %v16691_v58 = vpop.f32.mrb[31].mxu0  ;;  %3568 = vrot.lane.b32.xlu1 %v19990_v49, %s19428_s27  ;;  %2336 = vrot.lane.b32.xlu0 %v19936_v26, %s19428_s27  ;;  %v2350_v36 = vpack.i.b16 %v2309_v54, %v19897_v30  ;;  %v2361_v30 = vshrl.u32 %v2317_v15, 16  ;;  %v2358_v14 = vpack.i.b16 %v2317_v15, %v2313_v1 }
 0x40a   :  { %24052 = vst [vmem:[#allocation44_spill] sm:$0xff] %v20020_v41  ;;  %v2245_v21 = vadd.f32 %v16689_v46, %v15623_v13  ;;  %v16692_v4 = vadd.f32 %v16691_v58, %v16690_v56  ;;  %v2354_v51 = vpack.i.b16 %v2353_v32, %v2352_v33  ;;  %v19431_v56 = vmov 1934713408  }
 0x40b   :  { %v2515_v58 = vunpack.c.l.s4 %v19431_v56  ;;  %v2450_v62 = vcombine.low %v2350_v36, %v2366_v34  ;;  %v3630_v33 = vshrl.u32 %v19956_v18, 16  ;;  %v3638_v56 = vshrl.u32 %v20092_v8, 16 }
 0x40c   :  { %v2294_v6 = vadd.f32 %v19964_v20, %v2245_v21  ;;  %v2248_v59 = vadd.f32 %v16692_v4, %v15623_v13  ;;  %v6002_v20 = vld [vmem:[%s23875_s1] sm:$0xff]  ;;  %v2453_v13 = vunpack.c.l.s4 %v19430_v47  ;;  %v20106_v4 = vpack.i.b16 %v23894_v43, %v23894_v43 }
 0x40d   :  { %3576 = vrot.lane.b32.xlu1 %v19990_v49, %s19429_s10  ;;  %2344 = vrot.lane.b32.xlu0 %v19936_v26, %s19429_s10  ;;  %v2360_v47 = vshrl.u32 %v2313_v1, 16  ;;  %v3583_v1 = vshrl.u32 %v20086_v17, 16 }
 0x40e   :  { %v2297_v63 = vadd.f32 %v19966_v22, %v2248_v59  ;;  %v6005_v22 = vld [vmem:[%s23875_s1 + $0x18] sm:$0xff]  ;;  %v2454_v16 = vunpack.c.0.s8 %v2453_v13  ;;  %24054 = vst [vmem:[#allocation46_spill] sm:$0xff] %v20106_v4  ;;  %v2406_v59 = vshrl.u32 %v19909_v38, 16  ;;  %v2516_v13 = vunpack.c.0.s8 %v2515_v58  ;;  %s19432_s1 = smov [#allocation25]  }
 0x40f   :  { %s15604_s8 = sshll.u32 %s19432_s1, 4  ;;  %s15605_s8 = int_to_ptr.vmem [resolvable:$true] %s15604_s8 }
 0x410   :  { %v20032_v60 = vpack.c.bf16 %v2297_v63, %v2294_v6  ;;  %v20109_v6 = vsub.s32 %v2454_v16, %v19797_v61  ;;  %v3582_v16 = vshrl.u32 %v19938_v28, 16  ;;  %s19364_s17 = scalar_lea.vmem %s15605_s8, 1536  ;;  %p19369_p1 = scmp.lt.s32.totalorder %s15605_s8, %s15605_s8 }
 0x411   :  { %2340 = vrot.lane.b32.xlu1 %v19936_v26, %s19427_s14  ;;  %2342 = vrot.lane.b32.xlu0 %v19954_v53, %s19427_s14  ;;  %p19365_p0 = scmp.ne.s32.totalorder %s15605_s8, %s19364_s17  ;;  %p19370_p2 = scmp.lt.s32.totalorder %s19364_s17, %s19364_s17 }
 0x412   :  { %24053 = vst [vmem:[#allocation45_spill] sm:$0xff] %v20032_v60  ;;  %24055 = vst [vmem:[#allocation47_spill] sm:$0xff] %v20109_v6  ;;  %v3584_v43 = vpack.i.b16 %v3583_v1, %v3582_v16  ;;  %v3639_v16 = vshrl.u32 %v20094_v48, 16 }
 0x413   :  { %p19371_p3 = por %p19370_p2, %p19369_p1 }
 0x415   :  { %2338 = vrot.lane.b32.xlu1 %v19954_v53, %s19428_s27  ;;  %6023 = vperm.xlu0 %17514, %v6002_v20   ;;  %v2451_v20 = vcombine.high %v2350_v36, %v2366_v34  ;;  %v2458_v34 = vrot.slane %v2450_v62, %v20109_v6  ;;  %p19372_p4 = pnand %p19371_p3, %p19365_p0 }
 0x419   :  { %2346 = vrot.lane.b32.xlu1 %v19954_v53, %s19429_s10  ;;  %6032 = vperm.xlu0 %17514, %v6005_v22   ;;  %v2584_v22 = vcombine.low %v2354_v51, %v2370_v35 }
 0x41b   :  { %v20123_v36 = vrot.slane %v2584_v22, %v20109_v6  ;;  %v3631_v22 = vshrl.u32 %v20090_v27, 16 }
 0x41d   :  { %6026 = vperm.xlu1 %17515, %v6003_v50   ;;  %4766 = vrot.lane.b32.xlu0 %v19930_v52, %s19427_s14  ;;  %v2585_v50 = vcombine.high %v2354_v51, %v2370_v35  ;;  %v20120_v35 = vrot.slane %v2451_v20, %v20109_v6  ;;  %v2362_v51 = vpack.i.b16 %v2361_v30, %v2360_v47 }
 0x41e   :  { %v20133_v20 = vsub.s32 %v2516_v13, %v19797_v61  ;;  %v3580_v13 = vpack.i.b16 %v20086_v17, %v19938_v28 }
 0x420   :  { %24056 = vst [vmem:[#allocation48_spill] sm:$0xff] %v20133_v20 }
 0x421   :  { %6029 = vperm.xlu1 %17515, %v6004_v3   ;;  %4776 = vrot.lane.b32.xlu0 %v19933_v24, %s19428_s27 }
 0x425   :  { %4762 = vrot.lane.b32.xlu1 %v19930_v52, %s19428_s27  ;;  %4784 = vrot.lane.b32.xlu0 %v19933_v24, %s19429_s10 }
 0x429   :  { %4770 = vrot.lane.b32.xlu1 %v19930_v52, %s19429_s10  ;;  %4768 = vrot.lane.b32.xlu0 %v19946_v37, %s19427_s14 }
 0x42d   :  { %4780 = vrot.lane.b32.xlu1 %v19933_v24, %s19427_s14  ;;  %4786 = vrot.lane.b32.xlu0 %v19949_v45, %s19429_s10 }
 0x431   :  { %4764 = vrot.lane.b32.xlu1 %v19946_v37, %s19428_s27  ;;  %4794 = vrot.lane.b32.xlu0 %v20020_v41, %s19427_s14 }
 0x435   :  { %4772 = vrot.lane.b32.xlu1 %v19946_v37, %s19429_s10 }
 0x439   :  { %4778 = vrot.lane.b32.xlu1 %v19949_v45, %s19428_s27 }
 0x43d   :  { %4782 = vrot.lane.b32.xlu1 %v19949_v45, %s19427_s14 }
 0x441   :  { %4790 = vrot.lane.b32.xlu1 %v20020_v41, %s19428_s27 }
 0x445   :  { %4798 = vrot.lane.b32.xlu1 %v20020_v41, %s19429_s10 }
 0x457   :  { %v20096_v19 = vpop.permute.xlu1 %3552  ;;  %v20098_v31 = vpop.permute.xlu0 %3556 }
 0x458   :  { %v3599_v62 = vshrl.u32 %v20096_v19, 16 }
 0x45a   :  { %v3600_v57 = vpack.i.b16 %v3599_v62, %v3598_v44 }
 0x45b   :  { %v2331_v46 = vpop.permute.xlu1 %2330  ;;  %v2327_v21 = vpop.permute.xlu0 %2326 }
 0x45c   :  { %v2377_v3 = vshrl.u32 %v2331_v46, 16  ;;  %v2374_v54 = vpack.i.b16 %v2331_v46, %v2327_v21  ;;  %v2376_v11 = vshrl.u32 %v2327_v21, 16  ;;  %v20126_v46 = vrot.slane %v2585_v50, %v20109_v6 }
 0x45d   :  { %v3646_v50 = vshrl.u32 %v19988_v29, 16 }
 0x45e   :  { %v2378_v15 = vpack.i.b16 %v2377_v3, %v2376_v11  ;;  %v2466_v58 = vcombine.low %v2358_v14, %v2374_v54  ;;  %v2467_v30 = vcombine.high %v2358_v14, %v2374_v54  ;;  %v3590_v3 = vshrl.u32 %v20084_v23, 16 }
 0x45f   :  { %v3561_v21 = vpop.permute.xlu1 %3560  ;;  %v3596_v11 = vpack.i.b16 %v20096_v19, %v19976_v5  ;;  %v3588_v14 = vpack.i.b16 %v20088_v25, %v20084_v23  ;;  %v20153_v5 = vpack.i.b16 %v20090_v27, %v19956_v18  ;;  %v20155_v19 = vpack.i.b16 %v3631_v22, %v3630_v33 }
 0x460   :  { %v3604_v39 = vpack.i.b16 %v3561_v21, %v20098_v31  ;;  %v2474_v55 = vrot.slane %v2466_v58, %v20109_v6  ;;  %v2600_v54 = vcombine.low %v2362_v51, %v2378_v15  ;;  %v20148_v32 = vpack.i.b16 %v3591_v40, %v3590_v3 }
 0x461   :  { %v2481_v28 = vrot.slane %v2467_v30, %v20109_v6  ;;  %v2601_v17 = vcombine.high %v2362_v51, %v2378_v15  ;;  %v3674_v1 = vcombine.low %v3580_v13, %v3596_v11  ;;  %v3607_v58 = vshrl.u32 %v3561_v21, 16 }
 0x462   :  { %v3690_v42 = vcombine.low %v3588_v14, %v3604_v39  ;;  %v3606_v40 = vshrl.u32 %v20098_v31, 16  ;;  %v2512_v23 = vcombine.low %v2458_v34, %v2474_v55  ;;  %v2513_v25 = vcombine.high %v2458_v34, %v2474_v55 }
 0x463   :  { %v2608_v44 = vrot.slane %v2600_v54, %v20109_v6  ;;  %v3555_v62 = vpop.permute.xlu1 %3554  ;;  %v3675_v3 = vcombine.high %v3580_v13, %v3596_v11  ;;  %v3808_v18 = vcombine.low %v3584_v43, %v3600_v57  ;;  %v3809_v27 = vcombine.high %v3584_v43, %v3600_v57  ;;  %v3559_v57 = vpop.permute.xlu0 %3558 }
 0x464   :  { %v3691_v33 = vcombine.high %v3588_v14, %v3604_v39  ;;  %v20163_v22 = vpack.i.b16 %v20094_v48, %v20092_v8  ;;  %v2528_v51 = vcombine.low %v20120_v35, %v2481_v28  ;;  %v2529_v15 = vcombine.high %v20120_v35, %v2481_v28 }
 0x465   :  { %v2615_v21 = vrot.slane %v2601_v17, %v20109_v6  ;;  %v20168_v31 = vpack.i.b16 %v3639_v16, %v3638_v56  ;;  %v3682_v55 = vrot.slane %v3674_v1, %v20109_v6  ;;  %v3608_v34 = vpack.i.b16 %v3607_v58, %v3606_v40 }
 0x466   :  { %v3698_v30 = vrot.slane %v3690_v42, %v20109_v6  ;;  %v20173_v43 = vrot.slane %v2512_v23, %v20133_v20  ;;  %v20176_v39 = vrot.slane %v2513_v25, %v20133_v20  ;;  %v2646_v8 = vcombine.low %v20123_v36, %v2608_v44 }
 0x467   :  { %v2647_v48 = vcombine.high %v20123_v36, %v2608_v44  ;;  %v3689_v35 = vrot.slane %v3675_v3, %v20109_v6  ;;  %v3816_v56 = vrot.slane %v3808_v18, %v20109_v6  ;;  %v20183_v11 = vrot.slane %v3809_v27, %v20109_v6  ;;  %v3563_v28 = vpop.permute.xlu1 %3562 }
 0x468   :  { %v3705_v42 = vrot.slane %v3691_v33, %v20109_v6  ;;  %v20187_v13 = vrot.slane %v2528_v51, %v20133_v20  ;;  %v20190_v54 = vrot.slane %v2529_v15, %v20133_v20  ;;  %v2662_v14 = vcombine.low %v20126_v46, %v2615_v21 }
 0x469   :  { %v2663_v36 = vcombine.high %v20126_v46, %v2615_v21  ;;  %v3736_v17 = vcombine.low %v3682_v55, %v3698_v30  ;;  %v3737_v16 = vcombine.high %v3682_v55, %v3698_v30  ;;  %v3824_v1 = vcombine.low %v20148_v32, %v3608_v34 }
 0x46a   :  { %v3654_v58 = vshrl.u32 %v3559_v57, 16  ;;  %v20196_v40 = vrot.slane %v2646_v8, %v20133_v20  ;;  %v20199_v23 = vrot.slane %v2647_v48, %v20133_v20  ;;  %v3825_v44 = vcombine.high %v20148_v32, %v3608_v34 }
 0x46b   :  { %v3752_v3 = vcombine.low %v3689_v35, %v3705_v42  ;;  %v3753_v18 = vcombine.high %v3689_v35, %v3705_v42  ;;  %v3652_v27 = vpack.i.b16 %v3563_v28, %v3559_v57  ;;  %v20207_v33 = vrot.slane %v2662_v14, %v20133_v20  ;;  %v2311_v35 = vpop.permute.xlu0 %2310  ;;  %v2315_v14 = vpop.permute.xlu1 %2314 }
 0x46c   :  { %v20210_v51 = vrot.slane %v2663_v36, %v20133_v20  ;;  %v3647_v21 = vshrl.u32 %v3555_v62, 16  ;;  %v20215_v55 = vrot.slane %v3736_v17, %v20133_v20  ;;  %v20218_v32 = vrot.slane %v3737_v16, %v20133_v20 }
 0x46d   :  { %v3832_v34 = vrot.slane %v3824_v1, %v20109_v6  ;;  %v3644_v30 = vpack.i.b16 %v3555_v62, %v19988_v29  ;;  %v3839_v57 = vrot.slane %v3825_v44, %v20109_v6  ;;  %v3655_v42 = vshrl.u32 %v3563_v28, 16 }
 0x46e   :  { %v20230_v17 = vrot.slane %v3752_v3, %v20133_v20  ;;  %v20233_v16 = vrot.slane %v3753_v18, %v20133_v20  ;;  %v3958_v62 = vcombine.low %v20163_v22, %v3652_v27  ;;  %v3648_v28 = vpack.i.b16 %v3647_v21, %v3646_v50 }
 0x46f   :  { %v3959_v47 = vcombine.high %v20163_v22, %v3652_v27  ;;  %v3870_v36 = vcombine.low %v3816_v56, %v3832_v34  ;;  %v3871_v48 = vcombine.high %v3816_v56, %v3832_v34  ;;  %v3942_v18 = vcombine.low %v20153_v5, %v3644_v30  ;;  %v2325_v34 = vpop.permute.xlu1 %2324 }
 0x470   :  { %v3886_v8 = vcombine.low %v20183_v11, %v3839_v57  ;;  %v3887_v15 = vcombine.high %v20183_v11, %v3839_v57  ;;  %v3943_v1 = vcombine.high %v20153_v5, %v3644_v30  ;;  %v3656_v46 = vpack.i.b16 %v3655_v42, %v3654_v58  ;;  %v2319_v58 = vpop.permute.xlu0 %2318 }
 0x471   :  { %v3966_v56 = vrot.slane %v3958_v62, %v20109_v6  ;;  %v4076_v27 = vcombine.low %v20155_v19, %v3648_v28  ;;  %v4077_v21 = vcombine.high %v20155_v19, %v3648_v28  ;;  %v20259_v11 = vpack.i.b16 %v2311_v35, %v19909_v38 }
 0x472   :  { %v3973_v5 = vrot.slane %v3959_v47, %v20109_v6  ;;  %v20263_v30 = vrot.slane %v3870_v36, %v20133_v20  ;;  %v20266_v57 = vrot.slane %v3871_v48, %v20133_v20  ;;  %v3950_v42 = vrot.slane %v3942_v18, %v20109_v6 }
 0x473   :  { %v2407_v62 = vshrl.u32 %v2311_v35, 16  ;;  %v20270_v22 = vrot.slane %v3886_v8, %v20133_v20  ;;  %v20273_v19 = vrot.slane %v3887_v15, %v20133_v20  ;;  %v3957_v28 = vrot.slane %v3943_v1, %v20109_v6 }
 0x474   :  { %v4092_v47 = vcombine.low %v20168_v31, %v3656_v46  ;;  %v4004_v50 = vcombine.low %v3950_v42, %v3966_v56  ;;  %v4005_v29 = vcombine.high %v3950_v42, %v3966_v56  ;;  %v4093_v36 = vcombine.high %v20168_v31, %v3656_v46 }
 0x475   :  { %v2420_v48 = vpack.i.b16 %v2325_v34, %v19911_v0  ;;  %v4084_v3 = vrot.slane %v4076_v27, %v20109_v6  ;;  %v4091_v35 = vrot.slane %v4077_v21, %v20109_v6  ;;  %v4020_v18 = vcombine.low %v3957_v28, %v3973_v5  ;;  %v2329_v21 = vpop.permute.xlu0 %2328 }
 0x476   :  { %v4021_v8 = vcombine.high %v3957_v28, %v3973_v5  ;;  %v20287_v44 = vpack.i.b16 %v2407_v62, %v2406_v59  ;;  %v2414_v56 = vshrl.u32 %v2315_v14, 16  ;;  %v4100_v46 = vrot.slane %v4092_v47, %v20109_v6  ;;  %v2333_v5 = vpop.permute.xlu1 %2332 }
 0x477   :  { %v2415_v27 = vshrl.u32 %v2319_v58, 16  ;;  %v2423_v42 = vshrl.u32 %v2325_v34, 16  ;;  %v20293_v28 = vrot.slane %v4004_v50, %v20133_v20  ;;  %v20296_v15 = vrot.slane %v4005_v29, %v20133_v20 }
 0x478   :  { %v4107_v38 = vrot.slane %v4093_v36, %v20109_v6  ;;  %v2718_v59 = vcombine.low %v20259_v11, %v2420_v48  ;;  %v20303_v31 = vrot.slane %v4020_v18, %v20133_v20  ;;  %v20306_v47 = vrot.slane %v4021_v8, %v20133_v20 }
 0x479   :  { %v2412_v34 = vpack.i.b16 %v2319_v58, %v2315_v14  ;;  %v20308_v1 = vpack.i.b16 %v2415_v27, %v2414_v56  ;;  %v2430_v50 = vshrl.u32 %v2329_v21, 16  ;;  %v2719_v29 = vcombine.high %v20259_v11, %v2420_v48 }
 0x47a   :  { %v2428_v25 = vpack.i.b16 %v2333_v5, %v2329_v21  ;;  %v4138_v63 = vcombine.low %v4084_v3, %v4100_v46  ;;  %v4139_v36 = vcombine.high %v4084_v3, %v4100_v46  ;;  %v2424_v10 = vpack.i.b16 %v2423_v42, %v24057_v2  ;;  %v3571_v41 = vpop.permute.xlu1 %3570 }
 0x47b   :  { %v2431_v9 = vshrl.u32 %v2333_v5, 16  ;;  %v4154_v62 = vcombine.low %v4091_v35, %v4107_v38  ;;  %v4155_v12 = vcombine.high %v4091_v35, %v4107_v38  ;;  %v2726_v8 = vrot.slane %v2718_v59, %v20109_v6  ;;  %v3567_v35 = vpop.permute.xlu0 %3566 }
 0x47c   :  { %v24058_v3 = vcombine.low %v20173_v43, %v20176_v39  ;;  %v24059_v2 = vcombine.high %v20173_v43, %v20176_v39  ;;  %v2734_v56 = vcombine.low %v2412_v34, %v2428_v25  ;;  %v24060_v46 = vcombine.low %v20187_v13, %v20190_v54 }
 0x47d   :  { %v24062_v21 = vcombine.high %v20187_v13, %v20190_v54  ;;  %v20347_v43 = vrot.slane %v4138_v63, %v20133_v20  ;;  %v20350_v39 = vrot.slane %v4139_v36, %v20133_v20  ;;  %v2432_v5 = vpack.i.b16 %v2431_v9, %v2430_v50 }
 0x47e   :  { %v20324_v0 = vrot.slane %v24058_v3, %v20109_v6  ;;  %v20330_v58 = vrot.slane %v24059_v2, %v20109_v6  ;;  %v20338_v27 = vrot.slane %v24060_v46, %v20109_v6  ;;  %v2735_v38 = vcombine.high %v2412_v34, %v2428_v25 }
 0x47f   :  { %v20344_v42 = vrot.slane %v24062_v21, %v20109_v6  ;;  %v20353_v59 = vrot.slane %v4154_v62, %v20133_v20  ;;  %v20356_v3 = vrot.slane %v4155_v12, %v20133_v20  ;;  %v2733_v2 = vrot.slane %v2719_v29, %v20109_v6  ;;  %v3575_v21 = vpop.permute.xlu0 %3574 }
 0x480   :  { %24061 = vst [vmem:[#allocation49_spill] sm:$0xff] %v20338_v27  ;;  %v2852_v13 = vcombine.low %v20287_v44, %v2424_v10  ;;  %v2853_v54 = vcombine.high %v20287_v44, %v2424_v10  ;;  %v3612_v63 = vpack.i.b16 %v3567_v35, %v19978_v7  ;;  %v3615_v46 = vshrl.u32 %v3567_v35, 16 }
 0x481   :  { %v3050_v36 = vcombine.low %v20324_v0, %v20330_v58  ;;  %v2742_v9 = vrot.slane %v2734_v56, %v20109_v6  ;;  %v3074_v25 = vcombine.low %v20338_v27, %v20344_v42  ;;  %v24063_v12 = vcombine.low %v20196_v40, %v20199_v23 }
 0x482   :  { %v24065_v10 = vcombine.high %v20196_v40, %v20199_v23  ;;  %v2749_v29 = vrot.slane %v2735_v38, %v20109_v6  ;;  %v2868_v35 = vcombine.low %v20308_v1, %v2432_v5  ;;  %v2860_v40 = vrot.slane %v2852_v13, %v20109_v6 }
 0x483   :  { %v20371_v62 = vrot.slane %v24063_v12, %v20109_v6  ;;  %v24067_v23 = vcombine.low %v20207_v33, %v20210_v51  ;;  %v3706_v38 = vcombine.high %v3612_v63, %v20106_v4  ;;  %v2869_v34 = vcombine.high %v20308_v1, %v2432_v5 }
 0x484   :  { %v20377_v44 = vrot.slane %v24065_v10, %v20109_v6  ;;  %v24069_v10 = vshrl.u32 %v19978_v7, 16  ;;  %v3058_v56 = vrot.slane %v3050_v36, %v20133_v20  ;;  %v2780_v48 = vcombine.low %v2726_v8, %v2742_v9 }
 0x485   :  { %24064 = vst [vmem:[#allocation50_spill] sm:$0xff] %v20371_v62  ;;  %v20394_v12 = vrot.slane %v24067_v23, %v20109_v6  ;;  %v3082_v13 = vrot.slane %v3074_v25, %v20133_v20  ;;  %v24070_v11 = vcombine.high %v20207_v33, %v20210_v51  ;;  %v2797_v14 = vcombine.high %v2733_v2, %v2749_v29 }
 0x486   :  { %24066 = vst [vmem:[#allocation51_spill] sm:$0xff] %v20377_v44  ;;  %v3616_v50 = vpack.i.b16 %v3615_v46, %v24069_v10  ;;  %v3168_v7 = vcombine.low %v20371_v62, %v20377_v44  ;;  %v2781_v46 = vcombine.high %v2726_v8, %v2742_v9  ;;  %v2796_v10 = vcombine.low %v2733_v2, %v2749_v29 }
 0x487   :  { %24068 = vst [vmem:[#allocation52_spill] sm:$0xff] %v20394_v12  ;;  %v20406_v23 = vrot.slane %v24070_v11, %v20109_v6  ;;  %v2876_v1 = vrot.slane %v2868_v35, %v20109_v6  ;;  %v2867_v5 = vrot.slane %v2853_v54, %v20109_v6  ;;  %v20413_v36 = vrot.slane %v3612_v63, %v20109_v6 }
 0x488   :  { %v3176_v25 = vrot.slane %v3168_v7, %v20133_v20  ;;  %v20419_v51 = vrot.slane %v3706_v38, %v20109_v6  ;;  %v3840_v11 = vcombine.high %v3616_v50, %v20106_v4  ;;  %v2883_v8 = vrot.slane %v2869_v34, %v20109_v6 }
 0x489   :  { %24071 = vst [vmem:[#allocation53_spill] sm:$0xff] %v20406_v23  ;;  %v3192_v33 = vcombine.low %v20394_v12, %v20406_v23  ;;  %v3623_v2 = vshrl.u32 %v3575_v21, 16  ;;  %v20424_v9 = vrot.slane %v3616_v50, %v20109_v6  ;;  %v2788_v54 = vrot.slane %v2780_v48, %v20133_v20 }
 0x48a   :  { %v20428_v29 = vcombine.high %v3058_v56, %v3082_v13  ;;  %v2795_v35 = vrot.slane %v2781_v46, %v20133_v20  ;;  %v2804_v7 = vrot.slane %v2796_v10, %v20133_v20  ;;  %v2811_v38 = vrot.slane %v2797_v14, %v20133_v20 }
 0x48b   :  { %v3200_v63 = vrot.slane %v3192_v33, %v20133_v20  ;;  %v2914_v18 = vcombine.low %v2860_v40, %v2876_v1  ;;  %v2915_v60 = vcombine.high %v2860_v40, %v2876_v1  ;;  %v20433_v34 = vcombine.low %v3058_v56, %v3082_v13 }
 0x48c   :  { %24072 = vst [vmem:[#allocation54_spill] sm:$0xff] %v20428_v29  ;;  %v2930_v48 = vcombine.low %v2867_v5, %v2883_v8  ;;  %v2931_v52 = vcombine.high %v2867_v5, %v2883_v8  ;;  %v24074_v33 = vcombine.low %v20215_v55, %v20218_v32  ;;  %v24075_v14 = vcombine.high %v20215_v55, %v20218_v32 }
 0x48d   :  { %v20435_v61 = vcombine.low %v3176_v25, %v3200_v63  ;;  %v20437_v50 = vcombine.high %v3176_v25, %v3200_v63  ;;  %v3467_v40 = vshrl.u32 %v20428_v29, 16  ;;  %v3620_v1 = vpack.i.b16 %v3575_v21, %v3571_v41 }
 0x48e   :  { %v20443_v46 = vrot.slane %v24074_v33, %v20109_v6  ;;  %v20449_v10 = vrot.slane %v24075_v14, %v20109_v6  ;;  %v15856_v5 = vcombine.low %v2788_v54, %v2795_v35  ;;  %v15858_v25 = vcombine.high %v2788_v54, %v2795_v35 }
 0x48f   :  { %24073 = vst [vmem:[#allocation55_spill] sm:$0xff] %v20437_v50  ;;  %v3460_v56 = vpack.i.b16 %v20435_v61, %v20433_v34  ;;  %v3468_v13 = vshrl.u32 %v20437_v50, 16  ;;  %v15860_v8 = vcombine.low %v2804_v7, %v2811_v38  ;;  %v3622_v63 = vshrl.u32 %v3571_v41, 16 }
 0x490   :  { %v15862_v33 = vcombine.high %v2804_v7, %v2811_v38  ;;  %v24076_v55 = vcombine.low %v20230_v17, %v20233_v16  ;;  %v24077_v14 = vcombine.high %v20230_v17, %v20233_v16  ;;  %v20469_v21 = vrot.slane %v3840_v11, %v20109_v6 }
 0x491   :  { %17029 = vmatprep.mubr.msk.bf16.mxu0 %vm6042_vm0, %v3460_v56  ;;  %v3469_v45 = vpack.i.b16 %v3468_v13, %v3467_v40  ;;  %v2922_v41 = vrot.slane %v2914_v18, %v20133_v20  ;;  %v2929_v54 = vrot.slane %v2915_v60, %v20133_v20  ;;  %v4274_v35 = vcombine.low %v20443_v46, %v20449_v10 }
 0x492   :  { %v20460_v32 = vrot.slane %v24076_v55, %v20109_v6  ;;  %v20466_v37 = vrot.slane %v24077_v14, %v20109_v6  ;;  %v2938_v7 = vrot.slane %v2930_v48, %v20133_v20  ;;  %v2945_v38 = vrot.slane %v2931_v52, %v20133_v20 }
 0x493   :  { %17053 = vmatprep.mubr.msk.bf16.mxu1 %vm6042_vm0, %v3469_v45  ;;  %v3721_v17 = vcombine.high %v3620_v1, %v20106_v4  ;;  %v24078_v16 = vcombine.low %v20263_v30, %v20266_v57  ;;  %v20486_v18 = vrot.slane %v15856_v5, %v20109_v6  ;;  %v20489_v60 = vrot.slane %v15858_v25, %v20109_v6 }
 0x494   :  { %v20492_v48 = vrot.slane %v15860_v8, %v20109_v6  ;;  %v3624_v52 = vpack.i.b16 %v3623_v2, %v3622_v63  ;;  %v20495_v45 = vrot.slane %v15862_v33, %v20109_v6  ;;  %v4298_v56 = vcombine.low %v20460_v32, %v20466_v37 }
 0x495   :  { %v20483_v11 = vrot.slane %v24078_v16, %v20109_v6  ;;  %24079 = vst [vmem:[#allocation56_spill] sm:$0xff] %v20486_v18  ;;  %24080 = vst [vmem:[#allocation57_spill] sm:$0xff] %v20489_v60  ;;  %v24083_v40 = vcombine.high %v20263_v30, %v20266_v57  ;;  %v24084_v5 = vcombine.low %v20270_v22, %v20273_v19 }
 0x496   :  { %24081 = vst [vmem:[#allocation58_spill] sm:$0xff] %v20492_v48  ;;  %24082 = vst [vmem:[#allocation59_spill] sm:$0xff] %v20495_v45  ;;  %v15864_v8 = vcombine.low %v2922_v41, %v2929_v54  ;;  %v3728_v2 = vrot.slane %v3620_v1, %v20109_v6  ;;  %v4282_v63 = vrot.slane %v4274_v35, %v20133_v20 }
 0x497   :  { %v20503_v13 = vrot.slane %v24083_v40, %v20109_v6  ;;  %v20509_v25 = vrot.slane %v24084_v5, %v20109_v6  ;;  %v24085_v33 = vcombine.high %v20270_v22, %v20273_v19  ;;  %v15866_v30 = vcombine.high %v2922_v41, %v2929_v54 }
 0x498   :  { %v3735_v57 = vrot.slane %v3721_v17, %v20109_v6  ;;  %v4306_v14 = vrot.slane %v4298_v56, %v20133_v20  ;;  %v15868_v40 = vcombine.low %v2938_v7, %v2945_v38  ;;  %v15870_v5 = vcombine.high %v2938_v7, %v2945_v38 }
 0x499   :  { %v20517_v55 = vrot.slane %v24085_v33, %v20109_v6  ;;  %v4392_v16 = vcombine.low %v20483_v11, %v20503_v13  ;;  %v3855_v1 = vcombine.high %v3624_v52, %v20106_v4  ;;  %v3286_v22 = vcombine.low %v20486_v18, %v20489_v60 }
 0x49a   :  { %v3310_v41 = vcombine.low %v20492_v48, %v20495_v45  ;;  %v3768_v7 = vcombine.low %v20413_v36, %v3728_v2  ;;  %v20537_v56 = vcombine.high %v4282_v63, %v4306_v14  ;;  %v3769_v33 = vcombine.high %v20413_v36, %v3728_v2 }
 0x49b   :  { %v4416_v35 = vcombine.low %v20509_v25, %v20517_v55  ;;  %v4400_v54 = vrot.slane %v4392_v16, %v20133_v20  ;;  %v3784_v50 = vcombine.low %v20419_v51, %v3735_v57  ;;  %v3785_v19 = vcombine.high %v20419_v51, %v3735_v57 }
 0x49c   :  { %24086 = vst [vmem:[#allocation60_spill] sm:$0xff] %v20537_v56  ;;  %v3862_v29 = vrot.slane %v3624_v52, %v20109_v6  ;;  %v3869_v60 = vrot.slane %v3855_v1, %v20109_v6  ;;  %v20544_v16 = vcombine.low %v4282_v63, %v4306_v14  ;;  %v20554_v45 = vrot.slane %v15866_v30, %v20109_v6  ;;  %v20571_v1 = vpop.permute.xlu0 %3572 }
 0x49d   :  { %v4424_v38 = vrot.slane %v4416_v35, %v20133_v20  ;;  %v20551_v35 = vrot.slane %v15864_v8, %v20109_v6  ;;  %v20557_v36 = vrot.slane %v15868_v40, %v20109_v6  ;;  %v20560_v51 = vrot.slane %v15870_v5, %v20109_v6  ;;  %v3569_v5 = vpop.permute.xlu1 %3568 }
 0x49e   :  { %v3776_v52 = vrot.slane %v3768_v7, %v20133_v20  ;;  %v4691_v63 = vshrl.u32 %v20537_v56, 16  ;;  %v3783_v8 = vrot.slane %v3769_v33, %v20133_v20  ;;  %v3792_v30 = vrot.slane %v3784_v50, %v20133_v20 }
 0x49f   :  { %v20546_v18 = vcombine.low %v4400_v54, %v4424_v38  ;;  %v20548_v17 = vcombine.high %v4400_v54, %v4424_v38  ;;  %v3799_v14 = vrot.slane %v3785_v19, %v20133_v20  ;;  %v3902_v40 = vcombine.low %v20424_v9, %v3862_v29 }
 0x4a0   :  { %v3903_v54 = vcombine.high %v20424_v9, %v3862_v29  ;;  %v3918_v7 = vcombine.low %v20469_v21, %v3869_v60  ;;  %v20578_v33 = vrot.slane %v3286_v22, %v20133_v20  ;;  %v20581_v50 = vrot.slane %v3310_v41, %v20133_v20 }
 0x4a1   :  { %24087 = vst [vmem:[#allocation61_spill] sm:$0xff] %v20548_v17  ;;  %v4684_v2 = vpack.i.b16 %v20546_v18, %v20544_v16  ;;  %v4692_v57 = vshrl.u32 %v20548_v17, 16  ;;  %v3919_v17 = vcombine.high %v20469_v21, %v3869_v60  ;;  %v24088_v22 = vcombine.low %v20293_v28, %v20296_v15 }
 0x4a2   :  { %v24089_v41 = vcombine.high %v20293_v28, %v20296_v15  ;;  %v15873_v21 = vcombine.low %v3776_v52, %v3783_v8  ;;  %v15875_v60 = vcombine.high %v3776_v52, %v3783_v8  ;;  %v3910_v9 = vrot.slane %v3902_v40, %v20133_v20  ;;  %v2337_v28 = vpop.permute.xlu0 %2336  ;;  %v3577_v52 = vpop.permute.xlu1 %3576 }
 0x4a3   :  { %17461 = vmatprep.subr.msk.bf16.mxu0 %vm6042_vm0, %v4684_v2  ;;  %v6050_v38 = vsel %vm6042_vm0, %v4684_v2, 0  ;;  %v4693_v48 = vpack.i.b16 %v4692_v57, %v4691_v63  ;;  %v20594_v2 = vrot.slane %v24088_v22, %v20109_v6  ;;  %v15877_v57 = vcombine.low %v3792_v30, %v3799_v14 }
 0x4a4   :  { %17026 = vmatpush3.bf16.xpose.msra.mxu0 %v6050_v38  ;;  %v20600_v63 = vrot.slane %v24089_v41, %v20109_v6  ;;  %v15879_v38 = vcombine.high %v3792_v30, %v3799_v14  ;;  %v3917_v19 = vrot.slane %v3903_v54, %v20133_v20  ;;  %v20607_v22 = vrot.slane %v3918_v7, %v20133_v20 }
 0x4a5   :  { %17467 = vmatprep.subr.msk.bf16.mxu1 %vm6042_vm0, %v4693_v48  ;;  %v6233_v29 = vsel %vm6042_vm0, %v4693_v48, 0  ;;  %v20610_v56 = vrot.slane %v3919_v17, %v20133_v20  ;;  %v3660_v15 = vpack.i.b16 %v3569_v5, %v19990_v49  ;;  %v24092_v8 = vcombine.low %v20303_v31, %v20306_v47 }
 0x4a6   :  { %17050 = vmatpush3.bf16.xpose.msra.mxu1 %v6233_v29  ;;  %24090 = vst [vmem:[#allocation62_spill] sm:$0xff] %v20607_v22  ;;  %v24093_v14 = vcombine.high %v20303_v31, %v20306_v47  ;;  %v3670_v54 = vshrl.u32 %v20571_v1, 16  ;;  %v3663_v7 = vshrl.u32 %v3569_v5, 16  ;;  %v4510_v29 = vcombine.low %v20594_v2, %v20600_v63  ;;  %v2345_v22 = vpop.permute.xlu0 %2344 }
 0x4a7   :  { %24091 = vst [vmem:[#allocation63_spill] sm:$0xff] %v20610_v56  ;;  %v20617_v30 = vrot.slane %v24092_v8, %v20109_v6  ;;  %v20631_v41 = vrot.slane %v15873_v21, %v20109_v6  ;;  %v20634_v8 = vrot.slane %v15875_v60, %v20109_v6  ;;  %v20637_v48 = vrot.slane %v15877_v57, %v20109_v6 }
 0x4a8   :  { %v20623_v40 = vrot.slane %v24093_v14, %v20109_v6  ;;  %v20640_v31 = vrot.slane %v15879_v38, %v20109_v6  ;;  %v15881_v47 = vcombine.low %v3910_v9, %v3917_v19  ;;  %v15883_v14 = vcombine.high %v3910_v9, %v3917_v19 }
 0x4a9   :  { %24094 = vst [vmem:[#allocation64_spill] sm:$0xff] %v20631_v41  ;;  %24095 = vst [vmem:[#allocation65_spill] sm:$0xff] %v20634_v8  ;;  %v2382_v17 = vpack.i.b16 %v2337_v28, %v19936_v26  ;;  %v3668_v5 = vpack.i.b16 %v3577_v52, %v20571_v1  ;;  %v3974_v21 = vcombine.high %v3660_v15, %v20106_v4  ;;  %v24099_v19 = vshrl.u32 %v19990_v49, 16 }
 0x4aa   :  { %24096 = vst [vmem:[#allocation66_spill] sm:$0xff] %v20637_v48  ;;  %24097 = vst [vmem:[#allocation67_spill] sm:$0xff] %v20640_v31  ;;  %v4534_v60 = vcombine.low %v20617_v30, %v20623_v40  ;;  %v24098_v57 = vcombine.low %v20347_v43, %v20350_v39  ;;  %v2385_v48 = vshrl.u32 %v2337_v28, 16  ;;  %v3671_v31 = vshrl.u32 %v3577_v52, 16 }
 0x4ab   :  { %v3664_v9 = vpack.i.b16 %v3663_v7, %v24099_v19  ;;  %v4518_v1 = vrot.slane %v4510_v29, %v20133_v20  ;;  %v24100_v41 = vcombine.high %v20347_v43, %v20350_v39  ;;  %v24102_v49 = vcombine.high %v20353_v59, %v20356_v3 }
 0x4ac   :  { %v20653_v38 = vrot.slane %v24098_v57, %v20109_v6  ;;  %v4542_v12 = vrot.slane %v4534_v60, %v20133_v20  ;;  %v24101_v57 = vcombine.low %v20353_v59, %v20356_v3  ;;  %v20678_v52 = vrot.slane %v15881_v47, %v20109_v6 }
 0x4ad   :  { %v20663_v8 = vrot.slane %v24100_v41, %v20109_v6  ;;  %v20675_v28 = vrot.slane %v24102_v49, %v20109_v6  ;;  %v2482_v39 = vcombine.high %v2382_v17, %v20106_v4  ;;  %v3989_v7 = vcombine.high %v3668_v5, %v20106_v4 }
 0x4ae   :  { %v20669_v23 = vrot.slane %v24101_v57, %v20109_v6  ;;  %24103 = vst [vmem:[#allocation68_spill] sm:$0xff] %v20678_v52  ;;  %v20685_v29 = vrot.slane %v15883_v14, %v20109_v6  ;;  %v3981_v41 = vrot.slane %v3660_v15, %v20109_v6  ;;  %v3988_v47 = vrot.slane %v3974_v21, %v20109_v6 }
 0x4af   :  { %v4628_v59 = vcombine.low %v20653_v38, %v20663_v8  ;;  %v24105_v60 = vshrl.u32 %v19936_v26, 16  ;;  %v3672_v57 = vpack.i.b16 %v3671_v31, %v3670_v54  ;;  %v3996_v49 = vrot.slane %v3668_v5, %v20109_v6 }
 0x4b0   :  { %24104 = vst [vmem:[#allocation69_spill] sm:$0xff] %v20685_v29  ;;  %v4652_v3 = vcombine.low %v20669_v23, %v20675_v28  ;;  %v4108_v43 = vcombine.high %v3664_v9, %v20106_v4  ;;  %v20699_v52 = vcombine.high %v4518_v1, %v4542_v12  ;;  %v4115_v29 = vrot.slane %v3664_v9, %v20109_v6 }
 0x4b1   :  { %v2386_v19 = vpack.i.b16 %v2385_v48, %v24105_v60  ;;  %v4636_v14 = vrot.slane %v4628_v59, %v20133_v20  ;;  %v20703_v56 = vrot.slane %v2382_v17, %v20109_v6  ;;  %v20706_v21 = vrot.slane %v2482_v39, %v20109_v6  ;;  %v2341_v59 = vpop.permute.xlu1 %2340 }
 0x4b2   :  { %v4660_v15 = vrot.slane %v4652_v3, %v20133_v20  ;;  %24106 = vst [vmem:[#allocation70_spill] sm:$0xff] %v20699_v52  ;;  %v4003_v26 = vrot.slane %v3989_v7, %v20109_v6  ;;  %v20709_v48 = vcombine.low %v4518_v1, %v4542_v12  ;;  %v4686_v31 = vshrl.u32 %v20546_v18, 16 }
 0x4b3   :  { %v2616_v3 = vcombine.high %v2386_v19, %v20106_v4  ;;  %v4036_v9 = vcombine.low %v3981_v41, %v3996_v49  ;;  %v4037_v60 = vcombine.high %v3981_v41, %v3996_v49  ;;  %v4123_v17 = vcombine.high %v3672_v57, %v20106_v4 }
 0x4b4   :  { %v20711_v54 = vcombine.low %v4636_v14, %v4660_v15  ;;  %v20714_v5 = vcombine.high %v4636_v14, %v4660_v15  ;;  %v4685_v12 = vshrl.u32 %v20544_v16, 16  ;;  %v4727_v1 = vshrl.u32 %v20699_v52, 16 }
 0x4b5   :  { %v4052_v18 = vcombine.low %v3988_v47, %v4003_v26  ;;  %v4130_v14 = vrot.slane %v3672_v57, %v20109_v6  ;;  %v2390_v15 = vpack.i.b16 %v2345_v22, %v2341_v59  ;;  %v2392_v62 = vshrl.u32 %v2341_v59, 16 }
 0x4b6   :  { %24107 = vst [vmem:[#allocation71_spill] sm:$0xff] %v20714_v5  ;;  %v4720_v39 = vpack.i.b16 %v20711_v54, %v20709_v48  ;;  %v4728_v7 = vshrl.u32 %v20714_v5, 16  ;;  %v20726_v49 = vpack.i.b16 %v4686_v31, %v4685_v12  ;;  %v4275_v24 = vcombine.high %v20443_v46, %v20449_v10 }
 0x4b7   :  { %v4044_v16 = vrot.slane %v4036_v9, %v20133_v20  ;;  %v4051_v52 = vrot.slane %v4037_v60, %v20133_v20  ;;  %v4053_v5 = vcombine.high %v3988_v47, %v4003_v26  ;;  %v4137_v27 = vrot.slane %v4123_v17, %v20109_v6 }
 0x4b8   :  { %17462 = vmatprep.subr.msk.bf16.mxu0 %vm6042_vm0, %v4720_v39  ;;  %v6053_v41 = vsel %vm6042_vm0, %v4720_v39, 0  ;;  %v4729_v44 = vpack.i.b16 %v4728_v7, %v4727_v1  ;;  %v4122_v57 = vrot.slane %v4108_v43, %v20109_v6  ;;  %v20735_v59 = vrot.slane %v2386_v19, %v20109_v6 }
 0x4b9   :  { %17028 = vmatpush3.bf16.xpose.msra.mxu0 %v6053_v41  ;;  %v2393_v39 = vshrl.u32 %v2345_v22, 16  ;;  %v20742_v10 = vrot.slane %v2616_v3, %v20109_v6  ;;  %v4170_v47 = vcombine.low %v4115_v29, %v4130_v14  ;;  %v4171_v26 = vcombine.high %v4115_v29, %v4130_v14 }
 0x4ba   :  { %17463 = vmatprep.subr.msk.bf16.mxu0 %vm6042_vm0, %v20726_v49  ;;  %17468 = vmatprep.subr.msk.bf16.mxu1 %vm6042_vm0, %v4729_v44  ;;  %v6236_v46 = vsel %vm6042_vm0, %v4729_v44, 0  ;;  %v2504_v31 = vrot.slane %v2390_v15, %v20109_v6  ;;  %v4060_v43 = vrot.slane %v4052_v18, %v20133_v20  ;;  %v20747_v22 = vrot.slane %v4275_v24, %v20133_v20 }
 0x4bb   :  { %17052 = vmatpush3.bf16.xpose.msra.mxu1 %v6236_v46  ;;  %v2394_v19 = vpack.i.b16 %v2393_v39, %v2392_v62  ;;  %v4299_v9 = vcombine.high %v20460_v32, %v20466_v37  ;;  %v4067_v60 = vrot.slane %v4053_v5, %v20133_v20  ;;  %v4186_v44 = vcombine.low %v4122_v57, %v4137_v27  ;;  %v2339_v62 = vpop.permute.xlu1 %2338 }
 0x4bc   :  { %v15889_v17 = vcombine.low %v4044_v16, %v4051_v52  ;;  %v2497_v3 = vcombine.high %v2390_v15, %v20106_v4  ;;  %v4187_v12 = vcombine.high %v4122_v57, %v4137_v27  ;;  %v4393_v1 = vcombine.high %v20483_v11, %v20503_v13 }
 0x4bd   :  { %v20754_v29 = vrot.slane %v4299_v9, %v20133_v20  ;;  %v4417_v24 = vcombine.high %v20509_v25, %v20517_v55  ;;  %v4178_v7 = vrot.slane %v4170_v47, %v20133_v20  ;;  %v4185_v37 = vrot.slane %v4171_v26, %v20133_v20 }
 0x4be   :  { %v2544_v32 = vcombine.low %v20703_v56, %v2504_v31  ;;  %v2545_v5 = vcombine.high %v20703_v56, %v2504_v31  ;;  %v2631_v27 = vcombine.high %v2394_v19, %v20106_v4  ;;  %v20770_v11 = vrot.slane %v4393_v1, %v20133_v20  ;;  %v2343_v1 = vpop.permute.xlu0 %2342 }
 0x4bf   :  { %v20767_v18 = vcombine.low %v20747_v22, %v20754_v29  ;;  %v20773_v13 = vrot.slane %v4417_v24, %v20133_v20  ;;  %v20776_v25 = vrot.slane %v15889_v17, %v20109_v6  ;;  %v15891_v55 = vcombine.high %v4044_v16, %v4051_v52 }
 0x4c0   :  { %v15893_v14 = vcombine.low %v4060_v43, %v4067_v60  ;;  %v2511_v15 = vrot.slane %v2497_v3, %v20109_v6  ;;  %v20780_v56 = vrot.slane %v4186_v44, %v20133_v20  ;;  %v20783_v41 = vrot.slane %v4187_v12, %v20133_v20 }
 0x4c1   :  { %24108 = vst [vmem:[#allocation72_spill] sm:$0xff] %v20776_v25  ;;  %v15895_v57 = vcombine.high %v4060_v43, %v4067_v60  ;;  %v20787_v39 = vcombine.low %v20770_v11, %v20773_v13  ;;  %v15897_v46 = vcombine.low %v4178_v7, %v4185_v37  ;;  %v15899_v47 = vcombine.high %v4178_v7, %v4185_v37  ;;  %v2347_v60 = vpop.permute.xlu1 %2346 }
 0x4c2   :  { %24109 = vst [vmem:[#allocation73_spill] sm:$0xff] %v20780_v56  ;;  %24110 = vst [vmem:[#allocation74_spill] sm:$0xff] %v20783_v41  ;;  %v20790_v26 = vrot.slane %v2544_v32, %v20133_v20  ;;  %v2638_v52 = vrot.slane %v2394_v19, %v20109_v6  ;;  %v20794_v16 = vrot.slane %v2545_v5, %v20133_v20  ;;  %v4697_v9 = vshrl.u32 %v20767_v18, 16 }
 0x4c3   :  { %v20797_v31 = vrot.slane %v2631_v27, %v20109_v6  ;;  %v4698_v43 = vshrl.u32 %v20787_v39, 16  ;;  %v20802_v44 = vrot.slane %v15891_v55, %v20109_v6  ;;  %v20805_v17 = vrot.slane %v15893_v14, %v20109_v6 }
 0x4c4   :  { %v2560_v3 = vcombine.low %v20706_v21, %v2511_v15  ;;  %v2561_v19 = vcombine.high %v20706_v21, %v2511_v15  ;;  %v20810_v12 = vrot.slane %v15895_v57, %v20109_v6  ;;  %v2436_v7 = vpack.i.b16 %v2339_v62, %v19954_v53 }
 0x4c5   :  { %24111 = vst [vmem:[#allocation75_spill] sm:$0xff] %v20805_v17  ;;  %v20812_v24 = vpack.i.b16 %v4698_v43, %v4697_v9  ;;  %v2439_v37 = vshrl.u32 %v2339_v62, 16  ;;  %v20816_v32 = vrot.slane %v15897_v46, %v20109_v6  ;;  %v2678_v5 = vcombine.low %v20735_v59, %v2638_v52 }
 0x4c6   :  { %24112 = vst [vmem:[#allocation76_spill] sm:$0xff] %v20810_v12  ;;  %v2679_v27 = vcombine.high %v20735_v59, %v2638_v52  ;;  %v2444_v55 = vpack.i.b16 %v2347_v60, %v2343_v1  ;;  %v20821_v14 = vrot.slane %v15899_v47, %v20109_v6  ;;  %v2694_v15 = vcombine.low %v20742_v10, %v20797_v31 }
 0x4c7   :  { %24113 = vst [vmem:[#allocation77_spill] sm:$0xff] %v20816_v32  ;;  %v15841_v62 = vcombine.low %v20790_v26, %v20794_v16  ;;  %17471 = vmatprep.subr.msk.bf16.mxu1 %vm6042_vm0, %v20812_v24  ;;  %v20834_v59 = vrot.slane %v2560_v3, %v20133_v20  ;;  %v20837_v46 = vrot.slane %v2561_v19, %v20133_v20  ;;  %v2447_v47 = vshrl.u32 %v2347_v60, 16 }
 0x4c8   :  { %24114 = vst [vmem:[#allocation78_spill] sm:$0xff] %v20821_v14  ;;  %v2446_v52 = vshrl.u32 %v2343_v1, 16  ;;  %v24115_v9 = vshrl.u32 %v19954_v53, 16  ;;  %v2750_v21 = vcombine.high %v2436_v7, %v20106_v4  ;;  %v24116_v32 = vcombine.low %v20551_v35, %v20554_v45 }
 0x4c9   :  { %v20849_v57 = vrot.slane %v2678_v5, %v20133_v20  ;;  %v20852_v3 = vrot.slane %v2679_v27, %v20133_v20  ;;  %v2765_v53 = vcombine.high %v2444_v55, %v20106_v4  ;;  %v20858_v19 = vrot.slane %v2694_v15, %v20133_v20 }
 0x4ca   :  { %v20841_v43 = vpack.i.b16 %v2439_v37, %v24115_v9  ;;  %v3412_v14 = vrot.slane %v24116_v32, %v20133_v20  ;;  %v20861_v1 = vrot.slane %v15841_v62, %v20109_v6  ;;  %v24117_v32 = vcombine.low %v20557_v36, %v20560_v51 }
 0x4cb   :  { %v20872_v9 = vrot.slane %v2436_v7, %v20109_v6  ;;  %v20874_v60 = vpack.i.b16 %v2447_v47, %v2446_v52  ;;  %v20878_v15 = vcombine.low %v20578_v33, %v20581_v50  ;;  %v20881_v62 = vrot.slane %v2750_v21, %v20109_v6 }
 0x4cc   :  { %v3436_v5 = vrot.slane %v24117_v32, %v20133_v20  ;;  %v2884_v37 = vcombine.high %v20841_v43, %v20106_v4  ;;  %v20886_v32 = vrot.slane %v2444_v55, %v20109_v6  ;;  %v20892_v7 = vrot.slane %v20841_v43, %v20109_v6 }
 0x4cd   :  { %v20895_v47 = vrot.slane %v2765_v53, %v20109_v6  ;;  %v4721_v52 = vshrl.u32 %v20709_v48, 16  ;;  %v4722_v21 = vshrl.u32 %v20711_v54, 16  ;;  %v3461_v56 = vshrl.u32 %v20433_v34, 16 }
 0x4ce   :  { %v20888_v41 = vcombine.low %v3412_v14, %v3436_v5  ;;  %v3462_v55 = vshrl.u32 %v20435_v61, 16  ;;  %v20905_v17 = vcombine.high %v20578_v33, %v20581_v50  ;;  %v6111_v43 = vsel %vm6042_vm0, %v20726_v49, 0 }
 0x4cf   :  { %v4723_v53 = vpack.i.b16 %v4722_v21, %v4721_v52  ;;  %v20909_v12 = vcombine.high %v3412_v14, %v3436_v5  ;;  %v4511_v48 = vcombine.high %v20594_v2, %v20600_v63  ;;  %v4535_v61 = vcombine.high %v20617_v30, %v20623_v40 }
 0x4d0   :  { %v3496_v27 = vpack.i.b16 %v20888_v41, %v20878_v15  ;;  %v3463_v54 = vpack.i.b16 %v3462_v55, %v3461_v56  ;;  %v3503_v34 = vshrl.u32 %v20905_v17, 16  ;;  %v4629_v33 = vcombine.high %v20653_v38, %v20663_v8  ;;  %v24118_v8 = vld [vmem:[#allocation49_spill] sm:$0xff] }
 0x4d1   :  { %v3504_v50 = vshrl.u32 %v20909_v12, 16  ;;  %v20921_v49 = vrot.slane %v4511_v48, %v20133_v20  ;;  %v4653_v2 = vcombine.high %v20669_v23, %v20675_v28  ;;  %v3051_v63 = vcombine.high %v20324_v0, %v20330_v58  ;;  %v24119_v56 = vld [vmem:[#allocation41_spill] sm:$0xff]  ;;  %v24120_v58 = vld [vmem:[#allocation51_spill] sm:$0xff]  ;;  %v24121_v28 = vld [vmem:[#allocation50_spill] sm:$0xff] }
 0x4d2   :  { %17030 = vmatmul.mubr.msk.bf16.vlgmr.msra.gmra.mrb[32].mxu0 %vm6042_vm0, %v3496_v27  ;;  %v20930_v30 = vrot.slane %v4535_v61, %v20133_v20  ;;  %v20933_v40 = vrot.slane %v4629_v33, %v20133_v20  ;;  %v3075_v38 = vcombine.high %v24118_v8, %v20344_v42  ;;  %v3169_v27 = vcombine.high %v24121_v28, %v24120_v58  ;;  %v24122_v42 = vld [vmem:[#allocation53_spill] sm:$0xff] }
 0x4d3   :  { %17034 = vmatpush3.bf16.xpose.msra.mxu0 %v6111_v43  ;;  %17037 = vmatprep.mubr.msk.bf16.mxu0 %vm6042_vm0, %v3463_v54  ;;  %v3505_v5 = vpack.i.b16 %v3504_v50, %v3503_v34  ;;  %v4667_v23 = vrot.slane %v4653_v2, %v20133_v20  ;;  %v3065_v0 = vrot.slane %v3051_v63, %v20133_v20  ;;  %v24123_v43 = vld [vmem:[#allocation52_spill] sm:$0xff]  ;;  %v20951_v54 = vpop.permute.xlu1 %6026  ;;  %v6355_v61 = vsel %vm6042_vm0, %v20812_v24, 0 }
 0x4d4   :  { %17464 = vmatprep.subr.msk.bf16.mxu0 %vm6042_vm0, %v4723_v53  ;;  %v2899_v52 = vcombine.high %v20874_v60, %v20106_v4  ;;  %v20946_v21 = vcombine.low %v20921_v49, %v20930_v30  ;;  %v3089_v55 = vrot.slane %v3075_v38, %v20133_v20  ;;  %v3193_v48 = vcombine.high %v24123_v43, %v24122_v42  ;;  %v24128_v42 = vld [vmem:[#allocation61_spill] sm:$0xff] }
 0x4d5   :  { %24124 = vst [vmem:[#allocation49_spill] sm:$0xff] %v20951_v54  ;;  %v2812_v34 = vcombine.low %v20872_v9, %v20886_v32  ;;  %17054 = vmatmul.mubr.msk.bf16.vlgmr.msra.gmra.mrb[20].mxu1 %vm6042_vm0, %v3505_v5  ;;  %v20959_v33 = vcombine.low %v20933_v40, %v4667_v23  ;;  %v3183_v50 = vrot.slane %v3169_v27, %v20133_v20  ;;  %v6114_v28 = vsel %vm6042_vm0, %v4723_v53, 0  ;;  %v24127_v27 = vld [vmem:[#allocation60_spill] sm:$0xff] }
 0x4d6   :  { %v2813_v2 = vcombine.high %v20872_v9, %v20886_v32  ;;  %v20966_v63 = vrot.slane %v20874_v60, %v20109_v6  ;;  %17066 = vmatpush3.bf16.xpose.msra.mxu1 %v6355_v61  ;;  %v20968_v8 = vcombine.low %v3065_v0, %v3089_v55  ;;  %v3207_v38 = vrot.slane %v3193_v48, %v20133_v20  ;;  %v20996_v61 = vpop.permute.xlu0 %6023 }
 0x4d7   :  { %v4733_v5 = vshrl.u32 %v20946_v21, 16  ;;  %v4734_v24 = vshrl.u32 %v20959_v33, 16  ;;  %v20975_v58 = vcombine.high %v20747_v22, %v20754_v29  ;;  %v20979_v9 = vcombine.high %v20770_v11, %v20773_v13  ;;  %24129 = vst [vmem:[#allocation50_spill] sm:$0xff] %v20996_v61  ;;  %v24132_v61 = vld [vmem:[#allocation57_spill] sm:$0xff] }
 0x4d8   :  { %v20982_v60 = vrot.slane %v2884_v37, %v20109_v6  ;;  %v20984_v32 = vcombine.low %v3183_v50, %v3207_v38  ;;  %v4690_v43 = vpack.i.b16 %v24128_v42, %v24127_v27  ;;  %v2828_v48 = vcombine.low %v20881_v62, %v20895_v47  ;;  %v21001_v42 = vpop.permute.xlu1 %6029 }
 0x4d9   :  { %24125 = vst [vmem:[#allocation41_spill] sm:$0xff] %v20975_v58  ;;  %24126 = vst [vmem:[#allocation51_spill] sm:$0xff] %v20979_v9  ;;  %v2829_v22 = vcombine.high %v20881_v62, %v20895_v47  ;;  %v4735_v29 = vpack.i.b16 %v4734_v24, %v4733_v5  ;;  %v4704_v11 = vshrl.u32 %v20979_v9, 16  ;;  %v3473_v13 = vshrl.u32 %v20968_v8, 16  ;;  %v24135_v9 = vld [vmem:[#allocation59_spill] sm:$0xff] }
 0x4da   :  { %v3474_v37 = vshrl.u32 %v20984_v32, 16  ;;  %v4703_v53 = vshrl.u32 %v20975_v58, 16  ;;  %v3498_v27 = vshrl.u32 %v20888_v41, 16  ;;  %24130 = vst [vmem:[#allocation53_spill] sm:$0xff] %v21001_v42  ;;  %v21004_v62 = vrot.slane %v2812_v34, %v20133_v20  ;;  %v24131_v34 = vld [vmem:[#allocation56_spill] sm:$0xff] }
 0x4db   :  { %17036 = vmatpush3.bf16.xpose.msra.mxu0 %v6114_v28  ;;  %v21007_v47 = vrot.slane %v2813_v2, %v20133_v20  ;;  %v2913_v5 = vrot.slane %v2899_v52, %v20109_v6  ;;  %17472 = vmatprep.subr.msk.bf16.mxu1 %vm6042_vm0, %v4735_v29  ;;  %v3497_v24 = vshrl.u32 %v20878_v15, 16  ;;  %v2946_v28 = vcombine.low %v20892_v7, %v20966_v63  ;;  %v24134_v52 = vld [vmem:[#allocation58_spill] sm:$0xff] }
 0x4dc   :  { %17465 = vmatprep.subr.msk.bf16.mxu0 %vm6042_vm0, %v4690_v43  ;;  %v3475_v14 = vpack.i.b16 %v3474_v37, %v3473_v13  ;;  %v6358_v41 = vsel %vm6042_vm0, %v4735_v29, 0  ;;  %v4705_v4 = vpack.i.b16 %v4704_v11, %v4703_v53  ;;  %v24133_v42 = vcombine.high %v24131_v34, %v24132_v61  ;;  %v24138_v29 = vld [vmem:[#allocation54_spill] sm:$0xff]  ;;  %v24139_v11 = vld [vmem:[#allocation55_spill] sm:$0xff] }
 0x4dd   :  { %v3499_v54 = vpack.i.b16 %v3498_v27, %v3497_v24  ;;  %v24136_v58 = vcombine.high %v24134_v52, %v24135_v9  ;;  %v24137_v15 = vcombine.high %v20551_v35, %v20554_v45  ;;  %v3466_v37 = vpack.i.b16 %v24139_v11, %v24138_v29  ;;  %v24141_v9 = vld [vmem:[#allocation42_spill] sm:$0xff]  ;;  %v24144_v24 = vld [vmem:[#allocation71_spill] sm:$0xff] }
 0x4de   :  { %v21019_v2 = vrot.slane %v24133_v42, %v20133_v20  ;;  %17069 = vmatprep.mubr.msk.bf16.mxu1 %vm6042_vm0, %v3475_v14  ;;  %17068 = vmatpush3.bf16.xpose.msra.mxu1 %v6358_v41  ;;  %v24140_v61 = vcombine.high %v20557_v36, %v20560_v51  ;;  %v21050_v35 = vcombine.high %v3065_v0, %v3089_v55  ;;  %v24143_v42 = vld [vmem:[#allocation70_spill] sm:$0xff]  ;;  %v24147_v27 = vld [vmem:[#allocation67_spill] sm:$0xff] }
 0x4df   :  { %v21025_v25 = vrot.slane %v24136_v58, %v20133_v20  ;;  %v21031_v13 = vrot.slane %v24137_v15, %v20133_v20  ;;  %v21042_v58 = vcombine.high %v3183_v50, %v3207_v38  ;;  %17475 = vmatprep.subr.msk.bf16.mxu1 %vm6042_vm0, %v4705_v4  ;;  %v21054_v14 = vcombine.high %v20921_v49, %v20930_v30  ;;  %v21061_v50 = vpop.permute.xlu0 %6032  ;;  %v21071_v49 = vpop.permute.xlu1 %4762  ;;  %v24148_v30 = vld [vmem:[#allocation66_spill] sm:$0xff] }
 0x4e0   :  { %v21040_v53 = vrot.slane %v24140_v61, %v20133_v20  ;;  %v21057_v36 = vcombine.high %v20933_v40, %v4667_v23  ;;  %v2947_v51 = vcombine.high %v20892_v7, %v20966_v63  ;;  %24142 = vst [vmem:[#allocation52_spill] sm:$0xff] %v21061_v50  ;;  %v6172_v38 = vsel %vm6042_vm0, %v4690_v43, 0 }
 0x4e1   :  { %v21048_v45 = vcombine.low %v21019_v2, %v21025_v25  ;;  %v4726_v0 = vpack.i.b16 %v24144_v24, %v24143_v42  ;;  %v2962_v7 = vcombine.low %v20982_v60, %v2913_v5  ;;  %v3480_v40 = vshrl.u32 %v21042_v58, 16  ;;  %v24145_v42 = vld [vmem:[#allocation65_spill] sm:$0xff] }
 0x4e2   :  { %17038 = vmatmul.mubr.msk.bf16.vlgmr.msra.gmra.mrb[36].mxu0 %vm6042_vm0, %v3499_v54  ;;  %v21069_v55 = vcombine.low %v21031_v13, %v21040_v53  ;;  %v4740_v23 = vshrl.u32 %v21057_v36, 16  ;;  %v2836_v54 = vrot.slane %v2828_v48, %v20133_v20  ;;  %v2843_v63 = vrot.slane %v2829_v22, %v20133_v20 }
 0x4e3   :  { %17042 = vmatpush3.bf16.xpose.msra.mxu0 %v6172_v38  ;;  %17045 = vmatprep.mubr.msk.bf16.mxu0 %vm6042_vm0, %v3466_v37  ;;  %v3509_v43 = vshrl.u32 %v21048_v45, 16  ;;  %v2954_v34 = vrot.slane %v2946_v28, %v20133_v20  ;;  %v2963_v52 = vcombine.high %v20982_v60, %v2913_v5  ;;  %v3479_v15 = vshrl.u32 %v21050_v35, 16  ;;  %v21097_v5 = vpop.permute.xlu0 %4766 }
 0x4e4   :  { %17466 = vmatprep.subr.msk.bf16.mxu0 %vm6042_vm0, %v4726_v0  ;;  %v3510_v41 = vshrl.u32 %v21069_v55, 16  ;;  %v4739_v29 = vshrl.u32 %v21054_v14, 16  ;;  %v2961_v11 = vrot.slane %v2947_v51, %v20133_v20  ;;  %v15857_v48 = vcombine.low %v21004_v62, %v21007_v47  ;;  %v24146_v51 = vld [vmem:[#allocation64_spill] sm:$0xff] }
 0x4e5   :  { %v15859_v22 = vcombine.high %v21004_v62, %v21007_v47  ;;  %v21094_v61 = vrot.slane %v2962_v7, %v20133_v20  ;;  %v6477_v28 = vsel %vm6042_vm0, %v4705_v4, 0  ;;  %v3481_v38 = vpack.i.b16 %v3480_v40, %v3479_v15  ;;  %v24149_v62 = vld [vmem:[#allocation62_spill] sm:$0xff]  ;;  %v24150_v47 = vld [vmem:[#allocation63_spill] sm:$0xff] }
 0x4e6   :  { %v3511_v37 = vpack.i.b16 %v3510_v41, %v3509_v43  ;;  %v4741_v60 = vpack.i.b16 %v4740_v23, %v4739_v29  ;;  %v4290_v24 = vcombine.low %v24146_v51, %v24145_v42  ;;  %v4314_v50 = vcombine.low %v24148_v30, %v24147_v27  ;;  %v21112_v23 = vpop.permute.xlu1 %4770  ;;  %v24153_v27 = vld [vmem:[#allocation43_spill] sm:$0xff] }
 0x4e7   :  { %v24151_v43 = vcombine.low %v24149_v62, %v24150_v47  ;;  %v24152_v4 = vcombine.high %v24149_v62, %v24150_v47  ;;  %v2977_v41 = vrot.slane %v2963_v52, %v20133_v20  ;;  %v15861_v15 = vcombine.low %v2836_v54, %v2843_v63  ;;  %v24154_v62 = vld [vmem:[#allocation69_spill] sm:$0xff]  ;;  %v24155_v47 = vld [vmem:[#allocation68_spill] sm:$0xff] }
 0x4e8   :  { %17070 = vmatmul.mubr.msk.bf16.vlgmr.msra.gmra.mrb[24].mxu1 %vm6042_vm0, %v3511_v37  ;;  %v15863_v29 = vcombine.high %v2836_v54, %v2843_v63  ;;  %v6175_v37 = vsel %vm6042_vm0, %v4726_v0, 0  ;;  %v4696_v42 = vpack.i.b16 %v20787_v39, %v20767_v18  ;;  %v21122_v51 = vrot.slane %v4314_v50, %v20133_v20 }
 0x4e9   :  { %v4375_v7 = vrot.slane %v24151_v43, %v20109_v6  ;;  %v4391_v40 = vrot.slane %v24152_v4, %v20109_v6  ;;  %17082 = vmatpush3.bf16.xpose.msra.mxu1 %v6477_v28  ;;  %17085 = vmatprep.mubr.msk.bf16.mxu1 %vm6042_vm0, %v3481_v38  ;;  %v4408_v52 = vcombine.low %v24155_v47, %v24154_v62  ;;  %v4777_v4 = vpop.permute.xlu0 %4776 }
 0x4ea   :  { %17476 = vmatprep.subr.msk.bf16.mxu1 %vm6042_vm0, %v4741_v60  ;;  %v3237_v54 = vrot.slane %v15857_v48, %v20109_v6  ;;  %v3253_v63 = vrot.slane %v15859_v22, %v20109_v6  ;;  %v21129_v28 = vrot.slane %v4290_v24, %v20133_v20  ;;  %v24156_v0 = vcombine.high %v20742_v10, %v20797_v31 }
 0x4eb   :  { %17044 = vmatpush3.bf16.xpose.msra.mxu0 %v6175_v37  ;;  %v4432_v38 = vcombine.low %v4375_v7, %v4391_v40  ;;  %v24157_v39 = vcombine.high %v20790_v26, %v20794_v16  ;;  %v15849_v48 = vcombine.low %v20849_v57, %v20852_v3  ;;  %v15865_v22 = vcombine.low %v2954_v34, %v2961_v11  ;;  %v21170_v40 = vpop.permute.xlu1 %4780 }
 0x4ec   :  { %v21135_v18 = vrot.slane %v24156_v0, %v20133_v20  ;;  %17469 = vmatprep.subr.msk.bf16.mxu0 %vm6042_vm0, %v4696_v42  ;;  %v15867_v24 = vcombine.high %v2954_v34, %v2961_v11  ;;  %v21148_v43 = vcombine.low %v21129_v28, %v21122_v51  ;;  %v21151_v10 = vrot.slane %v4408_v52, %v20133_v20 }
 0x4ed   :  { %v21141_v50 = vrot.slane %v24157_v39, %v20109_v6  ;;  %v21154_v31 = vrot.slane %v4432_v38, %v20133_v20  ;;  %v24158_v26 = vcombine.low %v20834_v59, %v20837_v46  ;;  %v15851_v7 = vcombine.high %v20849_v57, %v20852_v3 }
 0x4ee   :  { %v21165_v34 = vrot.slane %v15861_v15, %v20109_v6  ;;  %v21168_v11 = vrot.slane %v15863_v29, %v20109_v6  ;;  %v3302_v37 = vcombine.low %v3237_v54, %v3253_v63  ;;  %v15869_v62 = vcombine.low %v21094_v61, %v2977_v41 }
 0x4ef   :  { %v21160_v16 = vrot.slane %v24158_v26, %v20109_v6  ;;  %v15871_v47 = vcombine.high %v21094_v61, %v2977_v41  ;;  %v21176_v52 = vcombine.low %v21151_v10, %v21154_v31  ;;  %v6480_v57 = vsel %vm6042_vm0, %v4741_v60, 0 }
 0x4f0   :  { %v3502_v3 = vpack.i.b16 %v20909_v12, %v20905_v17  ;;  %v21183_v15 = vcombine.high %v21019_v2, %v21025_v25  ;;  %v21187_v29 = vcombine.high %v21031_v13, %v21040_v53  ;;  %v21190_v54 = vrot.slane %v15865_v22, %v20109_v6  ;;  %v24160_v22 = vld [vmem:[#allocation40_spill] sm:$0xff] }
 0x4f1   :  { %v21193_v61 = vrot.slane %v15867_v24, %v20109_v6  ;;  %17084 = vmatpush3.bf16.xpose.msra.mxu1 %v6480_v57  ;;  %v4709_v60 = vshrl.u32 %v21148_v43, 16  ;;  %v4710_v41 = vshrl.u32 %v21176_v52, 16  ;;  %v6294_v25 = vsel %vm6042_vm0, %v4696_v42, 0 }
 0x4f2   :  { %17046 = vmatmul.mubr.msk.bf16.vlgmr.msra.gmra.mrb[40].mxu0 %vm6042_vm0, %v3502_v3  ;;  %v3472_v17 = vpack.i.b16 %v20984_v32, %v20968_v8  ;;  %v21203_v12 = vpack.i.b16 %v20959_v33, %v20946_v21  ;;  %v3516_v2 = vshrl.u32 %v21187_v29, 16  ;;  %v24159_v13 = vcombine.high %v20834_v59, %v20837_v46  ;;  %v4785_v33 = vpop.permute.xlu0 %4784  ;;  %v21222_v46 = vpop.permute.xlu1 %4764 }
 0x4f3   :  { %v21211_v63 = vrot.slane %v15869_v62, %v20109_v6  ;;  %v21214_v38 = vrot.slane %v15871_v47, %v20109_v6  ;;  %v4711_v42 = vpack.i.b16 %v4710_v41, %v4709_v60  ;;  %17058 = vmatpush3.bf16.xpose.msra.mxu0 %v6294_v25  ;;  %v3119_v8 = vrot.slane %v15849_v48, %v20109_v6 }
 0x4f4   :  { %v3049_v53 = vrot.slane %v24159_v13, %v20109_v6  ;;  %v4823_v32 = vshrl.u32 %v4777_v4, 16  ;;  %v4807_v21 = vshrl.u32 %v21071_v49, 16  ;;  %17061 = vmatprep.mubr.msk.bf16.mxu0 %vm6042_vm0, %v3472_v17  ;;  %17470 = vmatprep.subr.msk.bf16.mxu0 %vm6042_vm0, %v21203_v12  ;;  %v3515_v59 = vshrl.u32 %v21183_v15, 16 }
 0x4f5   :  { %v3135_v0 = vrot.slane %v15851_v7, %v20109_v6  ;;  %v15853_v39 = vcombine.low %v20858_v19, %v21135_v18  ;;  %v15855_v48 = vcombine.high %v20858_v19, %v21135_v18  ;;  %v21231_v24 = vpack.i.b16 %v21071_v49, %v24160_v22  ;;  %17479 = vmatprep.subr.msk.bf16.mxu1 %vm6042_vm0, %v4711_v42 }
 0x4f6   :  { %v21235_v26 = vrot.slane %v3302_v37, %v20133_v20  ;;  %v3517_v47 = vpack.i.b16 %v3516_v2, %v3515_v59  ;;  %v4814_v19 = vshrl.u32 %v21097_v5, 16  ;;  %v4820_v49 = vpack.i.b16 %v4777_v4, %v24119_v56 }
 0x4f7   :  { %v4831_v18 = vshrl.u32 %v4785_v33, 16  ;;  %v24161_v3 = vshrl.u32 %v24119_v56, 16  ;;  %v24162_v37 = vshrl.u32 %v24160_v22, 16  ;;  %v6599_v25 = vsel %vm6042_vm0, %v4711_v42, 0  ;;  %v21264_v42 = vpop.permute.xlu1 %4772 }
 0x4f8   :  { %17086 = vmatmul.mubr.msk.bf16.vlgmr.msra.gmra.mrb[28].mxu1 %vm6042_vm0, %v3517_v47  ;;  %v3066_v17 = vcombine.low %v20861_v1, %v21141_v50  ;;  %v4898_v2 = vcombine.low %v21231_v24, %v4820_v49  ;;  %v4828_v4 = vpack.i.b16 %v4785_v33, %v21170_v40  ;;  %v3090_v56 = vcombine.low %v21160_v16, %v3049_v53  ;;  %v24163_v16 = vld [vmem:[#allocation72_spill] sm:$0xff] }
 0x4f9   :  { %v21247_v60 = vpack.i.b16 %v4823_v32, %v24161_v3  ;;  %v21251_v41 = vpack.i.b16 %v4807_v21, %v24162_v37  ;;  %17098 = vmatpush3.bf16.xpose.msra.mxu1 %v6599_v25  ;;  %v3151_v13 = vrot.slane %v15853_v39, %v20109_v6  ;;  %v4899_v32 = vcombine.high %v21231_v24, %v4820_v49  ;;  %v24164_v47 = vld [vmem:[#allocation76_spill] sm:$0xff]  ;;  %v24167_v49 = vld [vmem:[#allocation74_spill] sm:$0xff] }
 0x4fa   :  { %v4815_v21 = vshrl.u32 %v21112_v23, 16  ;;  %v3167_v59 = vrot.slane %v15855_v48, %v20109_v6  ;;  %v3184_v22 = vcombine.low %v3119_v8, %v3135_v0  ;;  %v4812_v1 = vpack.i.b16 %v21112_v23, %v21097_v5  ;;  %v24165_v48 = vld [vmem:[#allocation75_spill] sm:$0xff]  ;;  %v24166_v0 = vld [vmem:[#allocation73_spill] sm:$0xff]  ;;  %v24170_v25 = vld [vmem:[#allocation78_spill] sm:$0xff] }
 0x4fb   :  { %v4830_v50 = vshrl.u32 %v21170_v40, 16  ;;  %v21270_v33 = vrot.slane %v3090_v56, %v20133_v20  ;;  %v4526_v53 = vcombine.low %v24163_v16, %v20802_v44  ;;  %v21275_v39 = vrot.slane %v3066_v17, %v20133_v20  ;;  %v24171_v17 = vld [vmem:[#allocation77_spill] sm:$0xff] }
 0x4fc   :  { %v3208_v24 = vcombine.low %v3151_v13, %v3167_v59  ;;  %v4550_v8 = vcombine.low %v24165_v48, %v24164_v47  ;;  %v24168_v3 = vcombine.low %v24166_v0, %v24167_v49  ;;  %v5032_v23 = vcombine.low %v21251_v41, %v21247_v60 }
 0x4fd   :  { %v4914_v40 = vcombine.low %v4812_v1, %v4828_v4  ;;  %v24169_v44 = vcombine.high %v24166_v0, %v24167_v49  ;;  %v4644_v56 = vcombine.low %v24171_v17, %v24170_v25  ;;  %v21293_v13 = vcombine.low %v21275_v39, %v21270_v33  ;;  %v21306_v0 = vpop.permute.xlu0 %4768 }
 0x4fe   :  { %v4611_v5 = vrot.slane %v24168_v3, %v20109_v6  ;;  %v21296_v59 = vrot.slane %v3184_v22, %v20133_v20  ;;  %v21299_v16 = vrot.slane %v3208_v24, %v20133_v20  ;;  %v21302_v47 = vrot.slane %v4550_v8, %v20133_v20  ;;  %v4779_v8 = vpop.permute.xlu1 %4778 }
 0x4ff   :  { %v4627_v37 = vrot.slane %v24169_v44, %v20109_v6  ;;  %v5033_v48 = vcombine.high %v21251_v41, %v21247_v60  ;;  %v4915_v49 = vcombine.high %v4812_v1, %v4828_v4  ;;  %v21309_v3 = vrot.slane %v4526_v53, %v20133_v20 }
 0x500   :  { %v4816_v25 = vpack.i.b16 %v4815_v21, %v4814_v19  ;;  %v4832_v17 = vpack.i.b16 %v4831_v18, %v4830_v50  ;;  %v21313_v22 = vcombine.low %v21296_v59, %v21299_v16  ;;  %v21316_v24 = vrot.slane %v4644_v56, %v20133_v20  ;;  %v24172_v19 = vld [vmem:[#allocation41_spill] sm:$0xff]  ;;  %v24173_v18 = vld [vmem:[#allocation51_spill] sm:$0xff] }
 0x501   :  { %v4668_v44 = vcombine.low %v4611_v5, %v4627_v37  ;;  %v21320_v60 = vcombine.low %v21309_v3, %v21302_v47  ;;  %v6297_v4 = vsel %vm6042_vm0, %v21203_v12, 0  ;;  %v4702_v21 = vpack.i.b16 %v24173_v18, %v24172_v19 }
 0x502   :  { %v4922_v1 = vrot.slane %v4914_v40, %v20109_v6  ;;  %v3485_v50 = vshrl.u32 %v21293_v13, 16  ;;  %v3486_v53 = vshrl.u32 %v21313_v22, 16  ;;  %17060 = vmatpush3.bf16.xpose.msra.mxu0 %v6297_v4  ;;  %v21334_v5 = vcombine.high %v21151_v10, %v21154_v31 }
 0x503   :  { %v21323_v41 = vrot.slane %v4668_v44, %v20133_v20  ;;  %v4906_v37 = vrot.slane %v4898_v2, %v20109_v6  ;;  %v4929_v56 = vrot.slane %v4915_v49, %v20109_v6  ;;  %17473 = vmatprep.subr.msk.bf16.mxu0 %vm6042_vm0, %v4702_v21  ;;  %v21345_v40 = vcombine.high %v21129_v28, %v21122_v51  ;;  %v4787_v2 = vpop.permute.xlu0 %4786 }
 0x504   :  { %24174 = vst [vmem:[#allocation60_spill] sm:$0xff] %v21334_v5  ;;  %v4913_v44 = vrot.slane %v4899_v32, %v20109_v6  ;;  %v5048_v4 = vcombine.low %v4816_v25, %v4832_v17  ;;  %v5049_v19 = vcombine.high %v4816_v25, %v4832_v17  ;;  %v3487_v10 = vpack.i.b16 %v3486_v53, %v3485_v50  ;;  %v4783_v25 = vpop.permute.xlu1 %4782 }
 0x505   :  { %v21340_v12 = vcombine.low %v21316_v24, %v21323_v41  ;;  %v21349_v31 = vrot.slane %v5032_v23, %v20109_v6  ;;  %v4745_v49 = vshrl.u32 %v21320_v60, 16  ;;  %v4716_v57 = vshrl.u32 %v21334_v5, 16 }
 0x506   :  { %v21355_v7 = vrot.slane %v5033_v48, %v20109_v6  ;;  %v4862_v51 = vshrl.u32 %v21306_v0, 16  ;;  %v4960_v28 = vcombine.low %v4906_v37, %v4922_v1  ;;  %v4961_v32 = vcombine.high %v4906_v37, %v4922_v1  ;;  %17101 = vmatprep.mubr.msk.bf16.mxu1 %vm6042_vm0, %v3487_v10 }
 0x507   :  { %v4746_v18 = vshrl.u32 %v21340_v12, 16  ;;  %v4976_v17 = vcombine.low %v4913_v44, %v4929_v56  ;;  %v4715_v50 = vshrl.u32 %v21345_v40, 16  ;;  %v3508_v53 = vpack.i.b16 %v21069_v55, %v21048_v45 }
 0x508   :  { %v4977_v62 = vcombine.high %v4913_v44, %v4929_v56  ;;  %v21363_v30 = vrot.slane %v5048_v4, %v20109_v6  ;;  %v21366_v48 = vrot.slane %v5049_v19, %v20109_v6  ;;  %v4879_v5 = vshrl.u32 %v4787_v2, 16 }
 0x509   :  { %v4747_v23 = vpack.i.b16 %v4746_v18, %v4745_v49  ;;  %v4717_v37 = vpack.i.b16 %v4716_v57, %v4715_v50  ;;  %v4871_v10 = vshrl.u32 %v4779_v8, 16  ;;  %17062 = vmatmul.mubr.msk.bf16.vlgmr.msra.gmra.mrb[44].mxu0 %vm6042_vm0, %v3508_v53  ;;  %v4878_v49 = vshrl.u32 %v4783_v25, 16 }
 0x50a   :  { %v21372_v18 = vrot.slane %v4960_v28, %v20133_v20  ;;  %v4855_v45 = vshrl.u32 %v21222_v46, 16  ;;  %v6416_v55 = vsel %vm6042_vm0, %v4702_v21, 0  ;;  %v3478_v56 = vpack.i.b16 %v21042_v58, %v21050_v35 }
 0x50b   :  { %17480 = vmatprep.subr.msk.bf16.mxu1 %vm6042_vm0, %v4747_v23  ;;  %v6602_v1 = vsel %vm6042_vm0, %v4747_v23, 0  ;;  %v21379_v44 = vrot.slane %v4961_v32, %v20133_v20  ;;  %v21382_v57 = vrot.slane %v4976_v17, %v20133_v20  ;;  %v4863_v4 = vshrl.u32 %v21264_v42, 16  ;;  %17074 = vmatpush3.bf16.xpose.msra.mxu0 %v6416_v55 }
 0x50c   :  { %17100 = vmatpush3.bf16.xpose.msra.mxu1 %v6602_v1  ;;  %v4876_v19 = vpack.i.b16 %v4787_v2, %v4783_v25  ;;  %v21387_v28 = vrot.slane %v4977_v62, %v20133_v20  ;;  %v5094_v21 = vcombine.low %v21349_v31, %v21363_v30  ;;  %v4860_v58 = vpack.i.b16 %v21264_v42, %v21306_v0 }
 0x50d   :  { %17483 = vmatprep.subr.msk.bf16.mxu1 %vm6042_vm0, %v4717_v37  ;;  %17077 = vmatprep.mubr.msk.bf16.mxu0 %vm6042_vm0, %v3478_v56  ;;  %v4738_v35 = vpack.i.b16 %v21057_v36, %v21054_v14  ;;  %v4868_v32 = vpack.i.b16 %v4779_v8, %v24153_v27  ;;  %v24175_v17 = vshrl.u32 %v24153_v27, 16  ;;  %v4880_v25 = vpack.i.b16 %v4879_v5, %v4878_v49 }
 0x50e   :  { %v24176_v62 = vcombine.low %v21165_v34, %v21168_v11  ;;  %v5095_v42 = vcombine.high %v21349_v31, %v21363_v30  ;;  %v4852_v0 = vpack.i.b16 %v21222_v46, %v24141_v9  ;;  %v24177_v14 = vcombine.low %v21190_v54, %v21193_v61 }
 0x50f   :  { %v4872_v2 = vpack.i.b16 %v4871_v10, %v24175_v17  ;;  %17474 = vmatprep.subr.msk.bf16.mxu0 %vm6042_vm0, %v4738_v35  ;;  %v24178_v27 = vcombine.low %v21211_v63, %v21214_v38  ;;  %v24179_v11 = vshrl.u32 %v24141_v9, 16  ;;  %v4864_v8 = vpack.i.b16 %v4863_v4, %v4862_v51 }
 0x510   :  { %v21403_v23 = vrot.slane %v24176_v62, %v20133_v20  ;;  %v21414_v36 = vrot.slane %v24177_v14, %v20133_v20  ;;  %v5182_v5 = vcombine.low %v4860_v58, %v4876_v19  ;;  %v5183_v46 = vcombine.high %v4860_v58, %v4876_v19 }
 0x511   :  { %v21420_v34 = vrot.slane %v24178_v27, %v20133_v20  ;;  %v4856_v30 = vpack.i.b16 %v4855_v45, %v24179_v11  ;;  %v5110_v31 = vcombine.low %v21355_v7, %v21366_v48  ;;  %v5111_v54 = vcombine.high %v21355_v7, %v21366_v48 }
 0x512   :  { %v21430_v61 = vcombine.low %v21235_v26, %v21403_v23  ;;  %v5166_v38 = vcombine.low %v4852_v0, %v4868_v32  ;;  %v5167_v9 = vcombine.high %v4852_v0, %v4868_v32  ;;  %v5316_v51 = vcombine.low %v4864_v8, %v4880_v25 }
 0x513   :  { %v21434_v63 = vcombine.low %v21414_v36, %v21420_v34  ;;  %v5300_v50 = vcombine.low %v4856_v30, %v4872_v2  ;;  %v21440_v10 = vcombine.high %v21275_v39, %v21270_v33  ;;  %v21444_v7 = vcombine.high %v21296_v59, %v21299_v16 }
 0x514   :  { %v3521_v53 = vshrl.u32 %v21430_v61, 16  ;;  %v5301_v48 = vcombine.high %v4856_v30, %v4872_v2  ;;  %v5190_v49 = vrot.slane %v5182_v5, %v20109_v6  ;;  %v5197_v45 = vrot.slane %v5183_v46, %v20109_v6 }
 0x515   :  { %v3522_v1 = vshrl.u32 %v21434_v63, 16  ;;  %v5317_v55 = vcombine.high %v4864_v8, %v4880_v25  ;;  %v3491_v4 = vshrl.u32 %v21440_v10, 16  ;;  %v3492_v19 = vshrl.u32 %v21444_v7, 16 }
 0x516   :  { %v21452_v58 = vcombine.high %v21309_v3, %v21302_v47  ;;  %v5174_v33 = vrot.slane %v5166_v38, %v20109_v6  ;;  %v5181_v39 = vrot.slane %v5167_v9, %v20109_v6  ;;  %v5324_v59 = vrot.slane %v5316_v51, %v20109_v6 }
 0x517   :  { %v3523_v56 = vpack.i.b16 %v3522_v1, %v3521_v53  ;;  %v21459_v16 = vcombine.high %v21316_v24, %v21323_v41  ;;  %v5308_v32 = vrot.slane %v5300_v50, %v20109_v6  ;;  %v6721_v17 = vsel %vm6042_vm0, %v4717_v37, 0 }
 0x518   :  { %v3493_v2 = vpack.i.b16 %v3492_v19, %v3491_v4  ;;  %v6419_v47 = vsel %vm6042_vm0, %v4738_v35, 0  ;;  %v5315_v3 = vrot.slane %v5301_v48, %v20109_v6  ;;  %v5331_v25 = vrot.slane %v5317_v55, %v20109_v6 }
 0x519   :  { %17102 = vmatmul.mubr.msk.bf16.vlgmr.msra.gmra.mrb[32].mxu1 %vm6042_vm0, %v3523_v56  ;;  %v4751_v62 = vshrl.u32 %v21452_v58, 16  ;;  %v4752_v0 = vshrl.u32 %v21459_v16, 16  ;;  %17076 = vmatpush3.bf16.xpose.msra.mxu0 %v6419_v47  ;;  %v5228_v24 = vcombine.low %v5174_v33, %v5190_v49  ;;  %v5229_v41 = vcombine.high %v5174_v33, %v5190_v49 }
 0x51a   :  { %17114 = vmatpush3.bf16.xpose.msra.mxu1 %v6721_v17  ;;  %v5244_v14 = vcombine.low %v5181_v39, %v5197_v45  ;;  %17117 = vmatprep.mubr.msk.bf16.mxu1 %vm6042_vm0, %v3493_v2  ;;  %v4708_v37 = vpack.i.b16 %v21176_v52, %v21148_v43  ;;  %v5245_v27 = vcombine.high %v5181_v39, %v5197_v45 }
 0x51b   :  { %v5362_v35 = vcombine.low %v5308_v32, %v5324_v59  ;;  %v5363_v11 = vcombine.high %v5308_v32, %v5324_v59  ;;  %v4753_v30 = vpack.i.b16 %v4752_v0, %v4751_v62  ;;  %v5102_v8 = vrot.slane %v5094_v21, %v20133_v20 }
 0x51c   :  { %v5109_v5 = vrot.slane %v5095_v42, %v20133_v20  ;;  %v15904_v46 = vcombine.low %v21372_v18, %v21379_v44  ;;  %v15906_v38 = vcombine.high %v21372_v18, %v21379_v44  ;;  %17477 = vmatprep.subr.msk.bf16.mxu0 %vm6042_vm0, %v4708_v37  ;;  %v5118_v9 = vrot.slane %v5110_v31, %v20133_v20 }
 0x51d   :  { %v5125_v43 = vrot.slane %v5111_v54, %v20133_v20  ;;  %v5378_v52 = vcombine.low %v5315_v3, %v5331_v25  ;;  %v5379_v50 = vcombine.high %v5315_v3, %v5331_v25  ;;  %17484 = vmatprep.subr.msk.bf16.mxu1 %vm6042_vm0, %v4753_v30  ;;  %v15908_v21 = vcombine.low %v21382_v57, %v21387_v28 }
 0x51e   :  { %v15910_v42 = vcombine.high %v21382_v57, %v21387_v28  ;;  %v5236_v51 = vrot.slane %v5228_v24, %v20133_v20  ;;  %v5243_v18 = vrot.slane %v5229_v41, %v20133_v20  ;;  %v5252_v44 = vrot.slane %v5244_v14, %v20133_v20 }
 0x51f   :  { %v5259_v31 = vrot.slane %v5245_v27, %v20133_v20  ;;  %v5370_v54 = vrot.slane %v5362_v35, %v20133_v20  ;;  %v5377_v53 = vrot.slane %v5363_v11, %v20133_v20  ;;  %v15912_v1 = vcombine.low %v5102_v8, %v5109_v5 }
 0x520   :  { %v6724_v48 = vsel %vm6042_vm0, %v4753_v30, 0  ;;  %v21494_v49 = vrot.slane %v15904_v46, %v20109_v6  ;;  %v21497_v57 = vrot.slane %v15906_v38, %v20109_v6  ;;  %v15914_v28 = vcombine.high %v5102_v8, %v5109_v5 }
 0x521   :  { %v15916_v45 = vcombine.low %v5118_v9, %v5125_v43  ;;  %v5386_v55 = vrot.slane %v5378_v52, %v20133_v20  ;;  %v5393_v56 = vrot.slane %v5379_v50, %v20133_v20  ;;  %v15918_v4 = vcombine.high %v5118_v9, %v5125_v43 }
 0x522   :  { %17116 = vmatpush3.bf16.xpose.msra.mxu1 %v6724_v48  ;;  %v15920_v19 = vcombine.low %v5236_v51, %v5243_v18  ;;  %v15922_v33 = vcombine.high %v5236_v51, %v5243_v18  ;;  %v15924_v39 = vcombine.low %v5252_v44, %v5259_v31  ;;  %v15926_v59 = vcombine.high %v5252_v44, %v5259_v31 }
 0x523   :  { %v15928_v32 = vcombine.low %v5370_v54, %v5377_v53  ;;  %v21502_v17 = vrot.slane %v15908_v21, %v20109_v6  ;;  %v21505_v2 = vrot.slane %v15910_v42, %v20109_v6  ;;  %v5498_v47 = vcombine.low %v21494_v49, %v21497_v57 }
 0x524   :  { %v21510_v3 = vrot.slane %v15912_v1, %v20109_v6  ;;  %v15930_v25 = vcombine.high %v5370_v54, %v5377_v53  ;;  %v15932_v62 = vcombine.low %v5386_v55, %v5393_v56  ;;  %v21513_v0 = vrot.slane %v15914_v28, %v20109_v6  ;;  %v24180_v28 = vld [vmem:[#allocation60_spill] sm:$0xff] }
 0x525   :  { %v21516_v24 = vrot.slane %v15916_v45, %v20109_v6  ;;  %v5506_v41 = vrot.slane %v5498_v47, %v20133_v20  ;;  %v5522_v14 = vcombine.low %v21502_v17, %v21505_v2  ;;  %v21522_v27 = vrot.slane %v15918_v4, %v20109_v6 }
 0x526   :  { %v3514_v35 = vpack.i.b16 %v21187_v29, %v21183_v15  ;;  %v5616_v11 = vcombine.low %v21510_v3, %v21513_v0  ;;  %v6538_v30 = vsel %vm6042_vm0, %v4708_v37, 0  ;;  %v3484_v8 = vpack.i.b16 %v21313_v22, %v21293_v13 }
 0x527   :  { %v4744_v5 = vpack.i.b16 %v21340_v12, %v21320_v60  ;;  %v5530_v46 = vrot.slane %v5522_v14, %v20133_v20  ;;  %v5640_v38 = vcombine.low %v21516_v24, %v21522_v27  ;;  %v21539_v15 = vcombine.high %v21235_v26, %v21403_v23 }
 0x528   :  { %17078 = vmatmul.mubr.msk.bf16.vlgmr.msra.gmra.mrb[48].mxu0 %vm6042_vm0, %v3514_v35  ;;  %v21543_v29 = vcombine.high %v21414_v36, %v21420_v34  ;;  %v15934_v37 = vcombine.high %v5386_v55, %v5393_v56  ;;  %v5624_v13 = vrot.slane %v5616_v11, %v20133_v20  ;;  %v21548_v22 = vrot.slane %v15920_v19, %v20109_v6 }
 0x529   :  { %17090 = vmatpush3.bf16.xpose.msra.mxu0 %v6538_v30  ;;  %17093 = vmatprep.mubr.msk.bf16.mxu0 %vm6042_vm0, %v3484_v8  ;;  %v21550_v60 = vcombine.low %v5506_v41, %v5530_v46  ;;  %v5648_v12 = vrot.slane %v5640_v38, %v20133_v20  ;;  %v3527_v26 = vshrl.u32 %v21539_v15, 16  ;;  %v21557_v36 = vrot.slane %v15922_v33, %v20109_v6 }
 0x52a   :  { %17478 = vmatprep.subr.msk.bf16.mxu0 %vm6042_vm0, %v4744_v5  ;;  %v3528_v23 = vshrl.u32 %v21543_v29, 16  ;;  %v21560_v34 = vrot.slane %v15924_v39, %v20109_v6  ;;  %v21563_v9 = vrot.slane %v15926_v59, %v20109_v6  ;;  %v21566_v43 = vrot.slane %v15928_v32, %v20109_v6 }
 0x52b   :  { %v21568_v52 = vcombine.low %v5624_v13, %v5648_v12  ;;  %v5910_v50 = vshrl.u32 %v21550_v60, 16  ;;  %v21572_v42 = vrot.slane %v15930_v25, %v20109_v6  ;;  %v5734_v51 = vcombine.low %v21548_v22, %v21557_v36 }
 0x52c   :  { %v3529_v21 = vpack.i.b16 %v3528_v23, %v3527_v26  ;;  %v5758_v18 = vcombine.low %v21560_v34, %v21563_v9  ;;  %v21579_v44 = vrot.slane %v15932_v62, %v20109_v6  ;;  %v5844_v31 = vrot.slane %v15934_v37, %v20109_v6 }
 0x52d   :  { %v5911_v54 = vshrl.u32 %v21568_v52, 16  ;;  %v5852_v53 = vcombine.low %v21566_v43, %v21572_v42  ;;  %v21586_v1 = vcombine.high %v5506_v41, %v5530_v46  ;;  %v21588_v48 = vcombine.high %v5624_v13, %v5648_v12 }
 0x52e   :  { %17118 = vmatmul.mubr.msk.bf16.vlgmr.msra.gmra.mrb[36].mxu1 %vm6042_vm0, %v3529_v21  ;;  %v4714_v45 = vpack.i.b16 %v24180_v28, %v21345_v40  ;;  %v5742_v55 = vrot.slane %v5734_v51, %v20133_v20  ;;  %v5766_v56 = vrot.slane %v5758_v18, %v20133_v20  ;;  %v5876_v4 = vcombine.low %v21579_v44, %v5844_v31 }
 0x52f   :  { %v5912_v19 = vpack.i.b16 %v5911_v54, %v5910_v50  ;;  %v6541_v33 = vsel %vm6042_vm0, %v4744_v5, 0  ;;  %v5860_v39 = vrot.slane %v5852_v53, %v20133_v20  ;;  %v5919_v59 = vshrl.u32 %v21588_v48, 16 }
 0x530   :  { %v21598_v32 = vcombine.low %v5742_v55, %v5766_v56  ;;  %v5884_v47 = vrot.slane %v5876_v4, %v20133_v20  ;;  %v5918_v40 = vshrl.u32 %v21586_v1, 16  ;;  %v3520_v25 = vpack.i.b16 %v21434_v63, %v21430_v61 }
 0x531   :  { %17092 = vmatpush3.bf16.xpose.msra.mxu0 %v6541_v33  ;;  %17129 = vmatprep.subr.bf16.mxu1 %v5912_v19  ;;  %v6660_v14 = vsel %vm6042_vm0, %v4714_v45, 0  ;;  %v3490_v35 = vpack.i.b16 %v21444_v7, %v21440_v10  ;;  %v4750_v11 = vpack.i.b16 %v21459_v16, %v21452_v58  ;;  %v5783_v30 = vcombine.high %v5742_v55, %v5766_v56 }
 0x532   :  { %17481 = vmatprep.subr.msk.bf16.mxu0 %vm6042_vm0, %v4714_v45  ;;  %17130 = vmatpush3.bf16.msra.mxu1 %v5912_v19  ;;  %v21605_v62 = vcombine.low %v5860_v39, %v5884_v47  ;;  %v21607_v41 = vpack.i.b16 %v5919_v59, %v5918_v40  ;;  %v5901_v8 = vcombine.high %v5860_v39, %v5884_v47  ;;  %v5958_v61 = vshrl.u32 %v21598_v32, 16 }
 0x533   :  { %v5499_v5 = vcombine.high %v21494_v49, %v21497_v57  ;;  %v5523_v46 = vcombine.high %v21502_v17, %v21505_v2  ;;  %v5617_v38 = vcombine.high %v21510_v3, %v21513_v0  ;;  %v5641_v7 = vcombine.high %v21516_v24, %v21522_v27 }
 0x534   :  { %v5959_v63 = vshrl.u32 %v21605_v62, 16  ;;  %v21622_v37 = vpack.i.b16 %v5901_v8, %v5783_v30  ;;  %v5966_v58 = vshrl.u32 %v5783_v30, 16  ;;  %v5967_v13 = vshrl.u32 %v5901_v8, 16 }
 0x535   :  { %v5513_v10 = vrot.slane %v5499_v5, %v20133_v20  ;;  %v5537_v49 = vrot.slane %v5523_v46, %v20133_v20  ;;  %v5631_v57 = vrot.slane %v5617_v38, %v20133_v20  ;;  %v5655_v17 = vrot.slane %v5641_v7, %v20133_v20 }
 0x536   :  { %v5960_v16 = vpack.i.b16 %v5959_v63, %v5958_v61  ;;  %v5735_v2 = vcombine.high %v21548_v22, %v21557_v36  ;;  %v5759_v3 = vcombine.high %v21560_v34, %v21563_v9  ;;  %v5853_v0 = vcombine.high %v21566_v43, %v21572_v42  ;;  %v15936_v61 = vld [vmem:[#allocation5] ss:$0 sm:$0xff] }
 0x537   :  { %v5548_v24 = vcombine.low %v5513_v10, %v5537_v49  ;;  %v21637_v27 = vpack.i.b16 %v5967_v13, %v5966_v58  ;;  %v5877_v12 = vcombine.high %v21579_v44, %v5844_v31  ;;  %v5666_v26 = vcombine.low %v5631_v57, %v5655_v17  ;;  %v24193_v63 = vld [vmem:[#allocation49_spill] sm:$0xff] }
 0x538   :  { %17094 = vmatmul.mubr.msk.bf16.vlgmr.msra.gmra.mrb[52].mxu0 %vm6042_vm0, %v3520_v25  ;;  %17131 = vmatprep.subr.bf16.mxu1 %v5960_v16  ;;  %v5749_v23 = vrot.slane %v5735_v2, %v20133_v20  ;;  %v5773_v22 = vrot.slane %v5759_v3, %v20133_v20  ;;  %v5867_v34 = vrot.slane %v5853_v0, %v20133_v20  ;;  %v6663_v39 = vsel %vm6042_vm0, %v4750_v11, 0 }
 0x539   :  { %17106 = vmatpush3.bf16.xpose.msra.mxu0 %v6660_v14  ;;  %17132 = vmatpush3.bf16.msra.mxu1 %v5960_v16  ;;  %v5926_v36 = vshrl.u32 %v5548_v24, 16  ;;  %v5891_v9 = vrot.slane %v5877_v12, %v20133_v20  ;;  %v5549_v43 = vcombine.high %v5513_v10, %v5537_v49  ;;  %v21647_v50 = vpack.i.b16 %v5666_v26, %v5548_v24  ;;  %v24222_v10 = vld [vmem:[#allocation44_spill] sm:$0xff] }
 0x53a   :  { %17109 = vmatprep.mubr.msk.bf16.mxu0 %vm6042_vm0, %v3490_v35  ;;  %17145 = vmatprep.subr.bf16.mxu1 %v21607_v41  ;;  %v5927_v21 = vshrl.u32 %v5666_v26, 16  ;;  %v5784_v42 = vcombine.low %v5749_v23, %v5773_v22  ;;  %v5667_v51 = vcombine.high %v5631_v57, %v5655_v17  ;;  %v5785_v31 = vcombine.high %v5749_v23, %v5773_v22 }
 0x53b   :  { %17482 = vmatprep.subr.msk.bf16.mxu0 %vm6042_vm0, %v4750_v11  ;;  %v5902_v18 = vcombine.low %v5867_v34, %v5891_v9  ;;  %v5934_v44 = vshrl.u32 %v5549_v43, 16  ;;  %v5903_v54 = vcombine.high %v5867_v34, %v5891_v9  ;;  %v5908_v59 = vpack.i.b16 %v21568_v52, %v21550_v60  ;;  %v24186_v52 = vld [vmem:[#allocation35_spill] sm:$0xff] }
 0x53c   :  { %v21649_v53 = vpack.i.b16 %v5927_v21, %v5926_v36  ;;  %v5974_v28 = vshrl.u32 %v5784_v42, 16  ;;  %v5935_v45 = vshrl.u32 %v5667_v51, 16  ;;  %v21651_v55 = vpack.i.b16 %v5667_v51, %v5549_v43 }
 0x53d   :  { %v5975_v56 = vshrl.u32 %v5902_v18, 16  ;;  %v21653_v4 = vpack.i.b16 %v5902_v18, %v5784_v42  ;;  %v5982_v19 = vshrl.u32 %v5785_v31, 16  ;;  %v5983_v33 = vshrl.u32 %v5903_v54, 16 }
 0x53e   :  { %24181 = vst [vmem:[#allocation61_spill] sm:$0xff] %v21651_v55  ;;  %v21658_v47 = vpack.i.b16 %v5935_v45, %v5934_v44  ;;  %v21664_v14 = vpack.i.b16 %v5903_v54, %v5785_v31  ;;  %v3526_v35 = vpack.i.b16 %v21543_v29, %v21539_v15  ;;  %v5956_v11 = vpack.i.b16 %v21605_v62, %v21598_v32  ;;  %v24188_v32 = vld [vmem:[#allocation53_spill] sm:$0xff]  ;;  %v24189_v62 = vld [vmem:[#allocation50_spill] sm:$0xff] }
 0x53f   :  { %24182 = vst [vmem:[#allocation56_spill] sm:$0xff] %v21653_v4  ;;  %v21660_v40 = vpack.i.b16 %v5975_v56, %v5974_v28  ;;  %v21662_v25 = vpack.i.b16 %v5983_v33, %v5982_v19  ;;  %v21673_v60 = vpack.i.b16 %v21588_v48, %v21586_v1  ;;  %v6010_v30 = vadd.s32 16, %v24186_v52  ;;  %v24190_v1 = vld [vmem:[#allocation52_spill] sm:$0xff] }
 0x540   :  { %24183 = vst [vmem:[#allocation57_spill] sm:$0xff] %v21658_v47  ;;  %24185 = vst [vmem:[#allocation59_spill] sm:$0xff] %v21664_v14  ;;  %v24187_v8 = vlaneseq  ;;  %v6011_v15 = vadd.s32 24, %v24186_v52  ;;  %v6009_v29 = vadd.s32 8, %v24186_v52  ;;  %vm6036_vm2 = vcmp.eq.s32.totalorder %v15936_v61, %v24188_v32 }
 0x541   :  { %17108 = vmatpush3.bf16.xpose.msra.mxu0 %v6663_v39  ;;  %24184 = vst [vmem:[#allocation58_spill] sm:$0xff] %v21662_v25  ;;  %vm6034_vm4 = vcmp.eq.s32.totalorder %v15936_v61, %v24189_v62  ;;  %vm6037_vm6 = vcmp.eq.s32.totalorder %v15936_v61, %v24190_v1  ;;  %vm6035_vm9 = vcmp.eq.s32.totalorder %v15936_v61, %v24193_v63 }
 0x542   :  { %17121 = vmatprep.subr.bf16.mxu0 %v5908_v59  ;;  %v6013_v5 = vand.u32 127, %v24187_v8 }
 0x544   :  { %vm6016_vm1 = vcmp.le.s32.totalorder %v6013_v5, %v6010_v30  ;;  %vm6014_vm3 = vcmp.le.s32.totalorder %v6013_v5, %v24186_v52  ;;  %vm6017_vm5 = vcmp.le.s32.totalorder %v6013_v5, %v6011_v15  ;;  %vm6015_vm8 = vcmp.le.s32.totalorder %v6013_v5, %v6009_v29 }
 0x545   :  { %vm21684_vm7 = vmand %vm6016_vm1, %vm6036_vm2 }
 0x546   :  { %vm21689_vm10 = vmand %vm6014_vm3, %vm6034_vm4 }
 0x547   :  { %vm21693_vm11 = vmand %vm6017_vm5, %vm6037_vm6 }
 0x548   :  { %17110 = vmatmul.mubr.msk.bf16.vlgmr.msra.gmra.mrb[56].mxu0 %vm6042_vm0, %v3526_v35  ;;  %vm21701_vm12 = vmand %vm6015_vm8, %vm6035_vm9 }
 0x549   :  { %17122 = vmatpush3.bf16.msra.mxu0 %v5908_v59 }
 0x54a   :  { %17123 = vmatprep.subr.bf16.mxu0 %v5956_v11 }
 0x54d   :  { %17124 = vmatpush3.bf16.msra.mxu0 %v5956_v11 }
 0x54e   :  { %17137 = vmatprep.subr.bf16.mxu0 %v21673_v60 }
 0x5a5   :  { %v17031_v38 = vpop.f32.mrb[32].mxu0 }
 0x5a6   :  { %v21699_v7 = vsel %vm21684_vm7, %v17031_v38, -1e+30  ;;  %v6089_v58 = vpop.f32.mrb[33].mxu0 }
 0x5a7   :  { %v17032_v49 = vpop.f32.mrb[34].mxu0  ;;  %v6837_v57 = vsel %vm6042_vm0, %v21699_v7, -inf  ;;  %v21709_v13 = vsel %vm21689_vm10, %v6089_v58, -1e+30 }
 0x5a8   :  { %v21713_v17 = vsel %vm21693_vm11, %v17032_v49, -1e+30  ;;  %6838 = vmax.xlane.f32.xlu1 %v6837_v57  ;;  %v6092_v2 = vpop.f32.mrb[35].mxu0  ;;  %v17055_v0 = vpop.f32.mrb[20].mxu1  ;;  %v6831_v26 = vsel %vm6042_vm0, %v21709_v13, -inf }
 0x5a9   :  { %v6840_v3 = vsel %vm6042_vm0, %v21713_v17, -inf  ;;  %v21719_v24 = vsel %vm21701_vm12, %v6092_v2, -1e+30  ;;  %v6272_v12 = vpop.f32.mrb[21].mxu1  ;;  %v21725_v23 = vsel %vm21684_vm7, %v17055_v0, -1e+30 }
 0x5aa   :  { %6841 = vmax.xlane.f32.xlu0 %v6840_v3  ;;  %v17056_v22 = vpop.f32.mrb[22].mxu1  ;;  %v6834_v34 = vsel %vm6042_vm0, %v21719_v24, -inf  ;;  %v21731_v9 = vsel %vm21689_vm10, %v6272_v12, -1e+30  ;;  %v6873_v43 = vsel %vm6042_vm0, %v21725_v23, -inf }
 0x5ab   :  { %v6275_v36 = vpop.f32.mrb[23].mxu1  ;;  %v6867_v21 = vsel %vm6042_vm0, %v21731_v9, -inf  ;;  %v21739_v42 = vsel %vm21693_vm11, %v17056_v22, -1e+30 }
 0x5ac   :  { %6832 = vmax.xlane.f32.xlu1 %v6831_v26  ;;  %v6876_v18 = vsel %vm6042_vm0, %v21739_v42, -inf  ;;  %v21745_v44 = vsel %vm21701_vm12, %v6275_v36, -1e+30 }
 0x5ad   :  { %v6870_v19 = vsel %vm6042_vm0, %v21745_v44, -inf }
 0x5ae   :  { %6835 = vmax.xlane.f32.xlu0 %v6834_v34 }
 0x5b0   :  { %6874 = vmax.xlane.f32.xlu1 %v6873_v43 }
 0x5b2   :  { %6868 = vmax.xlane.f32.xlu0 %v6867_v21 }
 0x5b5   :  { %v17039_v51 = vpop.f32.mrb[36].mxu0 }
 0x5b6   :  { %v21749_v31 = vsel %vm21684_vm7, %v17039_v51, -1e+30  ;;  %v6150_v54 = vpop.f32.mrb[37].mxu0  ;;  %6877 = vmax.xlane.f32.xlu0 %v6876_v18 }
 0x5b7   :  { %v17040_v28 = vpop.f32.mrb[38].mxu0  ;;  %v6849_v45 = vsel %vm6042_vm0, %v21749_v31, -inf  ;;  %v21757_v33 = vsel %vm21689_vm10, %v6150_v54, -1e+30 }
 0x5b8   :  { %6850 = vmax.xlane.f32.xlu1 %v6849_v45  ;;  %v6153_v56 = vpop.f32.mrb[39].mxu0  ;;  %v6843_v8 = vsel %vm6042_vm0, %v21757_v33, -inf  ;;  %v21769_v5 = vsel %vm21693_vm11, %v17040_v28, -1e+30 }
 0x5b9   :  { %v6852_v32 = vsel %vm6042_vm0, %v21769_v5, -inf  ;;  %v21781_v62 = vsel %vm21701_vm12, %v6153_v56, -1e+30 }
 0x5ba   :  { %6871 = vmax.xlane.f32.xlu0 %v6870_v19  ;;  %v6846_v63 = vsel %vm6042_vm0, %v21781_v62, -inf }
 0x5bb   :  { %v17071_v39 = vpop.f32.mrb[24].mxu1 }
 0x5bc   :  { %v21761_v59 = vsel %vm21684_vm7, %v17071_v39, -1e+30  ;;  %v6394_v35 = vpop.f32.mrb[25].mxu1 }
 0x5bd   :  { %v17072_v11 = vpop.f32.mrb[26].mxu1  ;;  %v6897_v30 = vsel %vm6042_vm0, %v21761_v59, -inf  ;;  %v21773_v61 = vsel %vm21689_vm10, %v6394_v35, -1e+30 }
 0x5be   :  { %v6397_v15 = vpop.f32.mrb[27].mxu1  ;;  %6898 = vmax.xlane.f32.xlu1 %v6897_v30  ;;  %6844 = vmax.xlane.f32.xlu0 %v6843_v8  ;;  %v6891_v29 = vsel %vm6042_vm0, %v21773_v61, -inf  ;;  %v21787_v38 = vsel %vm21693_vm11, %v17072_v11, -1e+30 }
 0x5bf   :  { %v6900_v12 = vsel %vm6042_vm0, %v21787_v38, -inf  ;;  %v21803_v26 = vsel %vm21701_vm12, %v6397_v15, -1e+30 }
 0x5c0   :  { %v6894_v51 = vsel %vm6042_vm0, %v21803_v26, -inf }
 0x5c2   :  { %6892 = vmax.xlane.f32.xlu1 %v6891_v29  ;;  %6853 = vmax.xlane.f32.xlu0 %v6852_v32 }
 0x5c5   :  { %v17047_v1 = vpop.f32.mrb[40].mxu0 }
 0x5c6   :  { %v21791_v58 = vsel %vm21684_vm7, %v17047_v1, -1e+30  ;;  %v6211_v49 = vpop.f32.mrb[41].mxu0  ;;  %6847 = vmax.xlane.f32.xlu0 %v6846_v63 }
 0x5c7   :  { %v17048_v57 = vpop.f32.mrb[42].mxu0  ;;  %v6861_v2 = vsel %vm6042_vm0, %v21791_v58, -inf  ;;  %v21797_v3 = vsel %vm21689_vm10, %v6211_v49, -1e+30 }
 0x5c8   :  { %6862 = vmax.xlane.f32.xlu1 %v6861_v2  ;;  %v6214_v0 = vpop.f32.mrb[43].mxu0  ;;  %v6855_v36 = vsel %vm6042_vm0, %v21797_v3, -inf  ;;  %v21815_v18 = vsel %vm21693_vm11, %v17048_v57, -1e+30 }
 0x5c9   :  { %v6864_v56 = vsel %vm6042_vm0, %v21815_v18, -inf  ;;  %v21827_v19 = vsel %vm21701_vm12, %v6214_v0, -1e+30 }
 0x5ca   :  { %6901 = vmax.xlane.f32.xlu0 %v6900_v12  ;;  %v6858_v35 = vsel %vm6042_vm0, %v21827_v19, -inf }
 0x5cb   :  { %v17087_v22 = vpop.f32.mrb[28].mxu1 }
 0x5cc   :  { %v21809_v34 = vsel %vm21684_vm7, %v17087_v22, -1e+30  ;;  %v6516_v43 = vpop.f32.mrb[29].mxu1  ;;  %6856 = vmax.xlane.f32.xlu1 %v6855_v36 }
 0x5cd   :  { %v17088_v21 = vpop.f32.mrb[30].mxu1  ;;  %v6921_v28 = vsel %vm6042_vm0, %v21809_v34, -inf  ;;  %v21821_v45 = vsel %vm21689_vm10, %v6516_v43, -1e+30 }
 0x5ce   :  { %v6519_v54 = vpop.f32.mrb[31].mxu1  ;;  %6895 = vmax.xlane.f32.xlu0 %v6894_v51  ;;  %v6915_v39 = vsel %vm6042_vm0, %v21821_v45, -inf  ;;  %v21835_v11 = vsel %vm21693_vm11, %v17088_v21, -1e+30 }
 0x5cf   :  { %v6924_v30 = vsel %vm6042_vm0, %v21835_v11, -inf  ;;  %v21841_v8 = vsel %vm21701_vm12, %v6519_v54, -1e+30 }
 0x5d0   :  { %6922 = vmax.xlane.f32.xlu1 %v6921_v28  ;;  %v6918_v1 = vsel %vm6042_vm0, %v21841_v8, -inf }
 0x5d2   :  { %6865 = vmax.xlane.f32.xlu0 %v6864_v56 }
 0x5d4   :  { %6916 = vmax.xlane.f32.xlu1 %v6915_v39 }
 0x5d6   :  { %6859 = vmax.xlane.f32.xlu0 %v6858_v35 }
 0x5da   :  { %6925 = vmax.xlane.f32.xlu0 %v6924_v30 }
 0x5dc   :  { %v17063_v15 = vpop.f32.mrb[44].mxu0 }
 0x5dd   :  { %v21845_v29 = vsel %vm21684_vm7, %v17063_v15, -1e+30  ;;  %v6333_v32 = vpop.f32.mrb[45].mxu0 }
 0x5de   :  { %v17064_v63 = vpop.f32.mrb[46].mxu0  ;;  %v6885_v49 = vsel %vm6042_vm0, %v21845_v29, -inf  ;;  %6919 = vmax.xlane.f32.xlu0 %v6918_v1  ;;  %v21853_v57 = vsel %vm21689_vm10, %v6333_v32, -1e+30 }
 0x5df   :  { %v21857_v2 = vsel %vm21693_vm11, %v17064_v63, -1e+30  ;;  %6886 = vmax.xlane.f32.xlu1 %v6885_v49  ;;  %v6336_v0 = vpop.f32.mrb[47].mxu0  ;;  %v6879_v22 = vsel %vm6042_vm0, %v21853_v57, -inf }
 0x5e0   :  { %v6888_v12 = vsel %vm6042_vm0, %v21857_v2, -inf  ;;  %v21871_v28 = vsel %vm21701_vm12, %v6336_v0, -1e+30 }
 0x5e1   :  { %24201 = vst [vmem:[#allocation55_spill] sm:$0xff] %v21871_v28  ;;  %v6882_v15 = vsel %vm6042_vm0, %v21871_v28, -inf }
 0x5e2   :  { %6889 = vmax.xlane.f32.xlu0 %v6888_v12 }
 0x5e3   :  { %6880 = vmax.xlane.f32.xlu1 %v6879_v22 }
 0x5ec   :  { %v17103_v36 = vpop.f32.mrb[32].mxu1 }
 0x5ed   :  { %v21865_v43 = vsel %vm21684_vm7, %v17103_v36, -1e+30  ;;  %v6638_v21 = vpop.f32.mrb[33].mxu1 }
 0x5ee   :  { %24200 = vst [vmem:[#allocation54_spill] sm:$0xff] %v21865_v43  ;;  %v17104_v51 = vpop.f32.mrb[34].mxu1  ;;  %v6945_v54 = vsel %vm6042_vm0, %v21865_v43, -inf  ;;  %v21887_v32 = vsel %vm21689_vm10, %v6638_v21, -1e+30 }
 0x5ef   :  { %v21875_v56 = vsel %vm21693_vm11, %v17104_v51, -1e+30  ;;  %v6641_v39 = vpop.f32.mrb[35].mxu1  ;;  %6946 = vmax.xlane.f32.xlu0 %v6945_v54  ;;  %24204 = vst [vmem:[#allocation71_spill] sm:$0xff] %v21887_v32  ;;  %v6939_v63 = vsel %vm6042_vm0, %v21887_v32, -inf }
 0x5f0   :  { %24202 = vst [vmem:[#allocation42_spill] sm:$0xff] %v21875_v56  ;;  %v6948_v35 = vsel %vm6042_vm0, %v21875_v56, -inf  ;;  %v21881_v30 = vsel %vm21701_vm12, %v6641_v39, -1e+30 }
 0x5f1   :  { %24203 = vst [vmem:[#allocation70_spill] sm:$0xff] %v21881_v30  ;;  %6949 = vmax.xlane.f32.xlu1 %v6948_v35  ;;  %v6942_v1 = vsel %vm6042_vm0, %v21881_v30, -inf }
 0x5f3   :  { %6883 = vmax.xlane.f32.xlu0 %v6882_v15 }
 0x5f5   :  { %6943 = vmax.xlane.f32.xlu1 %v6942_v1 }
 0x5f7   :  { %6940 = vmax.xlane.f32.xlu0 %v6939_v63 }
 0x5fb   :  { %v17079_v49 = vpop.f32.mrb[48].mxu0 }
 0x5fc   :  { %v21895_v0 = vsel %vm21684_vm7, %v17079_v49, -1e+30  ;;  %v6455_v12 = vpop.f32.mrb[49].mxu0 }
 0x5fd   :  { %24205 = vst [vmem:[#allocation65_spill] sm:$0xff] %v21895_v0  ;;  %v17080_v22 = vpop.f32.mrb[50].mxu0  ;;  %v6909_v36 = vsel %vm6042_vm0, %v21895_v0, -inf  ;;  %v21901_v21 = vsel %vm21689_vm10, %v6455_v12, -1e+30 }
 0x5fe   :  { %24206 = vst [vmem:[#allocation64_spill] sm:$0xff] %v21901_v21  ;;  %v21905_v51 = vsel %vm21693_vm11, %v17080_v22, -1e+30  ;;  %6910 = vmax.xlane.f32.xlu1 %v6909_v36  ;;  %v6458_v54 = vpop.f32.mrb[51].mxu0  ;;  %v6903_v15 = vsel %vm6042_vm0, %v21901_v21, -inf }
 0x5ff   :  { %24207 = vst [vmem:[#allocation67_spill] sm:$0xff] %v21905_v51  ;;  %v6912_v39 = vsel %vm6042_vm0, %v21905_v51, -inf  ;;  %v21911_v35 = vsel %vm21701_vm12, %v6458_v54, -1e+30  ;;  %v21933_v51 = vpop.permute.xlu0 %4794 }
 0x600   :  { %24208 = vst [vmem:[#allocation66_spill] sm:$0xff] %v21911_v35  ;;  %6913 = vmax.xlane.f32.xlu0 %v6912_v39  ;;  %v6906_v12 = vsel %vm6042_vm0, %v21911_v35, -inf  ;;  %v24209_v39 = vld [vmem:[#allocation45_spill] sm:$0xff]  ;;  %v21929_v35 = vpop.permute.xlu1 %4790 }
 0x601   :  { %v21915_v1 = vpop.f32.mrb[36].mxu1 }
 0x602   :  { %v6760_v63 = vpop.f32.mrb[37].mxu1  ;;  %6904 = vmax.xlane.f32.xlu1 %v6903_v15 }
 0x603   :  { %v21917_v49 = vpop.f32.mrb[38].mxu1  ;;  %v21937_v0 = vsel %vm21689_vm10, %v6760_v63, -1e+30 }
 0x604   :  { %v6763_v22 = vpop.f32.mrb[39].mxu1  ;;  %6907 = vmax.xlane.f32.xlu0 %v6906_v12  ;;  %v21931_v12 = vpop.permute.xlu1 %4798  ;;  %24210 = vst [vmem:[#allocation62_spill] sm:$0xff] %v21937_v0  ;;  %v6963_v30 = vsel %vm6042_vm0, %v21937_v0, -inf }
 0x605   :  { %v21950_v28 = vsel %vm21701_vm12, %v6763_v22, -1e+30 }
 0x60b   :  { %v17095_v36 = vpop.f32.mrb[52].mxu0 }
 0x60c   :  { %v6577_v52 = vpop.f32.mrb[53].mxu0 }
 0x60d   :  { %v17096_v14 = vpop.f32.mrb[54].mxu0  ;;  %v21941_v32 = vsel %vm21689_vm10, %v6577_v52, -1e+30 }
 0x60e   :  { %v6580_v54 = vpop.f32.mrb[55].mxu0  ;;  %24211 = vst [vmem:[#allocation63_spill] sm:$0xff] %v21941_v32  ;;  %v6927_v63 = vsel %vm6042_vm0, %v21941_v32, -inf  ;;  %v21962_v0 = vsel %vm21693_vm11, %v17096_v14, -1e+30 }
 0x60f   :  { %24213 = vst [vmem:[#allocation69_spill] sm:$0xff] %v21962_v0  ;;  %v21970_v32 = vsel %vm21684_vm7, %v17095_v36, -1e+30 }
 0x613   :  { %4796 = vrot.lane.b32.xlu1 %v24209_v39, %s19427_s14 }
 0x617   :  { %4800 = vrot.lane.b32.xlu1 %v24209_v39, %s19429_s10 }
 0x61a   :  { %4792 = vrot.lane.b32.xlu0 %v24209_v39, %s19428_s27 }
 0x61b   :  { %v17111_v15 = vpop.f32.mrb[56].mxu0 }
 0x61c   :  { %v6699_v56 = vpop.f32.mrb[57].mxu0 }
 0x61d   :  { %v17112_v43 = vpop.f32.mrb[58].mxu0 }
 0x61e   :  { %v21927_v21 = vpop.f32.mrb[59].mxu0 }
 0x61f   :  { %v22042_v48 = vsel %vm21701_vm12, %v21927_v21, -1e+30  ;;  %v22058_v21 = vsel %vm21693_vm11, %v21917_v49, -1e+30  ;;  %v4838_v49 = vshrl.u32 %v24222_v10, 16 }
 0x635   :  { %v21943_v39 = vpop.xlane.xlu1 %6838 }
 0x636   :  { %24212 = vst [vmem:[#allocation43_spill] sm:$0xff] %v21943_v39  ;;  %v23964_v55 = vmax.f32 %v21943_v39, -1e+30 }
 0x637   :  { %v21952_v25 = vpop.xlane.xlu0 %6841 }
 0x638   :  { %v7169_v52 = vsub.f32 %v21699_v7, %v23964_v55  ;;  %v23966_v4 = vmax.f32 %v21952_v25, -1e+30 }
 0x639   :  { %6964 = vmax.xlane.f32.xlu0 %v6963_v30  ;;  %v21964_v47 = vpop.xlane.xlu1 %6832  ;;  %v6966_v30 = vsel %vm6042_vm0, %v21950_v28, -inf }
 0x63a   :  { %24214 = vst [vmem:[#allocation68_spill] sm:$0xff] %v21964_v47  ;;  %v7219_v22 = vmul.f32 1.442695, %v7169_v52  ;;  %v7170_v7 = vsub.f32 %v21713_v17, %v23966_v4  ;;  %v23969_v55 = vmax.f32 %v21964_v47, -1e+30 }
 0x63b   :  { %6928 = vmax.xlane.f32.xlu1 %v6927_v63  ;;  %v21976_v14 = vpop.xlane.xlu0 %6835  ;;  %v6936_v63 = vsel %vm6042_vm0, %v21962_v0, -inf  ;;  %v21983_v52 = vsel %vm21684_vm7, %v17111_v15, -1e+30  ;;  %v21998_v15 = vsel %vm21701_vm12, %v6580_v54, -1e+30 }
 0x63c   :  { %24215 = vst [vmem:[#allocation40_spill] sm:$0xff] %v21976_v14  ;;  %v23976_v39 = vmax.f32 %v21976_v14, -1e+30  ;;  %18748 = vpow2.f32 %v7219_v22  ;;  %v7167_v36 = vsub.f32 %v21709_v13, %v23969_v55  ;;  %v7221_v22 = vmul.f32 1.442695, %v7170_v7 }
 0x63d   :  { %6967 = vmax.xlane.f32.xlu0 %v6966_v30  ;;  %v21988_v17 = vpop.xlane.xlu1 %6874  ;;  %v6933_v30 = vsel %vm6042_vm0, %v21970_v32, -inf  ;;  %v6957_v13 = vsel %vm6042_vm0, %v21983_v52, -inf  ;;  %v6930_v7 = vsel %vm6042_vm0, %v21998_v15, -inf }
 0x63e   :  { %v7168_v4 = vsub.f32 %v21719_v24, %v23976_v39  ;;  %v23975_v0 = vmax.f32 %v21988_v17, -1e+30  ;;  %v22009_v24 = vsel %vm21689_vm10, %v6699_v56, -1e+30 }
 0x63f   :  { %6937 = vmax.xlane.f32.xlu1 %v6936_v63  ;;  %v7215_v63 = vmul.f32 1.442695, %v7167_v36  ;;  %v22000_v47 = vpop.xlane.xlu0 %6868  ;;  %v22016_v36 = vsel %vm21693_vm11, %v17112_v43, -1e+30  ;;  %v6951_v56 = vsel %vm6042_vm0, %v22009_v24, -inf }
 0x640   :  { %24216 = vst [vmem:[#allocation72_spill] sm:$0xff] %v22000_v47  ;;  %v7217_v55 = vmul.f32 1.442695, %v7168_v4  ;;  %v7181_v14 = vsub.f32 %v21725_v23, %v23975_v0  ;;  %v23972_v54 = vmax.f32 %v22000_v47, -1e+30 }
 0x641   :  { %6934 = vmax.xlane.f32.xlu0 %v6933_v30  ;;  %18750 = vpow2.f32 %v7215_v63  ;;  %v22029_v43 = vsel %vm21684_vm7, %v21915_v1, -1e+30 }
 0x642   :  { %v7243_v4 = vmul.f32 1.442695, %v7181_v14  ;;  %18752 = vpow2.f32 %v7221_v22  ;;  %v7179_v46 = vsub.f32 %v21731_v9, %v23972_v54  ;;  %v6960_v14 = vsel %vm6042_vm0, %v22016_v36, -inf }
 0x643   :  { %6958 = vmax.xlane.f32.xlu1 %v6957_v13  ;;  %v22021_v23 = vpop.xlane.xlu0 %6877  ;;  %18754 = vpow2.f32 %v7217_v55 }
 0x644   :  { %24217 = vst [vmem:[#allocation76_spill] sm:$0xff] %v22021_v23  ;;  %v23971_v30 = vmax.f32 %v22021_v23, -1e+30  ;;  %18756 = vpow2.f32 %v7243_v4  ;;  %v7239_v9 = vmul.f32 1.442695, %v7179_v46 }
 0x645   :  { %6931 = vmax.xlane.f32.xlu0 %v6930_v7  ;;  %v22033_v22 = vpop.xlane.xlu1 %6850  ;;  %v6969_v7 = vsel %vm6042_vm0, %v22029_v43, -inf }
 0x646   :  { %24218 = vst [vmem:[#allocation75_spill] sm:$0xff] %v22033_v22  ;;  %v7182_v63 = vsub.f32 %v21739_v42, %v23971_v30  ;;  %v23973_v55 = vmax.f32 %v22033_v22, -1e+30  ;;  %v18749_v13 = vpop.eup %18748  ;;  %18758 = vpow2.f32 %v7239_v9  ;;  %v4846_v9 = vshrl.u32 %v21933_v51, 16 }
 0x647   :  { %6952 = vmax.xlane.f32.xlu1 %v6951_v56  ;;  %v22044_v1 = vpop.xlane.xlu0 %6871  ;;  %v6954_v56 = vsel %vm6042_vm0, %v22042_v48, -inf  ;;  %v7365_v16 = vsel %vm6042_vm0, %v18749_v13, 0.0 }
 0x648   :  { %24219 = vst [vmem:[#allocation73_spill] sm:$0xff] %v22044_v1  ;;  %v7245_v4 = vmul.f32 1.442695, %v7182_v63  ;;  %v7173_v42 = vsub.f32 %v21749_v31, %v23973_v55  ;;  %v23974_v46 = vmax.f32 %v22044_v1, -1e+30  ;;  %v4839_v1 = vshrl.u32 %v21929_v35, 16 }
 0x649   :  { %6961 = vmax.xlane.f32.xlu0 %v6960_v14 }
 0x64a   :  { %18760 = vpow2.f32 %v7245_v4  ;;  %v7227_v14 = vmul.f32 1.442695, %v7173_v42  ;;  %v7180_v31 = vsub.f32 %v21745_v44, %v23974_v46  ;;  %v4836_v4 = vpack.i.b16 %v21929_v35, %v24222_v10  ;;  %v24225_v35 = vld [vmem:[#allocation46_spill] sm:$0xff] }
 0x64b   :  { %6970 = vmax.xlane.f32.xlu1 %v6969_v7  ;;  %v22063_v63 = vpop.xlane.xlu1 %6898  ;;  %v22065_v7 = vpop.xlane.xlu0 %6844  ;;  %v4847_v44 = vshrl.u32 %v21931_v12, 16  ;;  %v6972_v46 = vsel %vm6042_vm0, %v22058_v21, -inf }
 0x64c   :  { %24220 = vst [vmem:[#allocation74_spill] sm:$0xff] %v22063_v63  ;;  %24221 = vst [vmem:[#allocation78_spill] sm:$0xff] %v22065_v7  ;;  %v18751_v30 = vpop.eup %18750  ;;  %v23980_v54 = vmax.f32 %v22065_v7, -1e+30  ;;  %18762 = vpow2.f32 %v7227_v14  ;;  %v7241_v42 = vmul.f32 1.442695, %v7180_v31 }
 0x64d   :  { %6955 = vmax.xlane.f32.xlu0 %v6954_v56  ;;  %v18753_v55 = vpop.eup %18752  ;;  %v7359_v39 = vsel %vm6042_vm0, %v18751_v30, 0.0  ;;  %v24223_v14 = vmax.f32 %v22063_v63, -1e+30 }
 0x64e   :  { %v18755_v56 = vpop.eup %18754  ;;  %v7171_v0 = vsub.f32 %v21757_v33, %v23980_v54  ;;  %v4844_v33 = vpack.i.b16 %v21931_v12, %v21933_v51  ;;  %18764 = vpow2.f32 %v7241_v42  ;;  %v7368_v54 = vsel %vm6042_vm0, %v18753_v55, 0.0 }
 0x64f   :  { %7366 = vadd.xlane.f32.xlu1 %v7365_v16  ;;  %v7189_v16 = vsub.f32 %v21761_v59, %v24223_v14  ;;  %v22084_v31 = vpop.xlane.xlu1 %6892  ;;  %v7551_v10 = vpack.c.bf16 %v18755_v56, %v18751_v30  ;;  %v22086_v23 = vpop.xlane.xlu0 %6853  ;;  %v7552_v7 = vpack.c.bf16 %v18753_v55, %v18749_v13  ;;  %v4848_v30 = vpack.i.b16 %v4847_v44, %v4846_v9 }
 0x650   :  { %24224 = vst [vmem:[#allocation77_spill] sm:$0xff] %v22084_v31  ;;  %v22088_v47 = vpop.eup %18756  ;;  %v7223_v22 = vmul.f32 1.442695, %v7171_v0  ;;  %v23984_v63 = vmax.f32 %v22084_v31, -1e+30  ;;  %v4840_v12 = vpack.i.b16 %v4839_v1, %v4838_v49  ;;  %v4945_v13 = vcombine.high %v4844_v33, %v24225_v35 }
 0x651   :  { %6973 = vmax.xlane.f32.xlu0 %v6972_v46  ;;  %v4930_v46 = vcombine.high %v4836_v4, %v24225_v35  ;;  %17125 = vmatprep.mubr.msk.bf16.mxu0 %vm6042_vm0, %v7551_v10  ;;  %v23986_v59 = vmax.f32 %v22086_v23, -1e+30  ;;  %v7401_v51 = vsel %vm6042_vm0, %v22088_v47, 0.0  ;;  %v7259_v42 = vmul.f32 1.442695, %v7189_v16  ;;  %v22106_v55 = vpop.eup %18758 }
 0x652   :  { %17126 = vmatmul.mubr.msk.bf16.vlgmr.msra.gmra.mrb[60].mxu0 %vm6042_vm0, %v7552_v7  ;;  %v7187_v0 = vsub.f32 %v21773_v61, %v23984_v63  ;;  %v7362_v7 = vsel %vm6042_vm0, %v18755_v56, 0.0  ;;  %v4952_v49 = vrot.slane %v4844_v33, %v20109_v6  ;;  %18766 = vpow2.f32 %v7223_v22 }
 0x653   :  { %7360 = vadd.xlane.f32.xlu1 %v7359_v39  ;;  %17138 = vmatpush3.bf16.msra.mxu0 %v21673_v60  ;;  %v22104_v39 = vpop.xlane.xlu0 %6847  ;;  %v7174_v1 = vsub.f32 %v21769_v5, %v23986_v59  ;;  %v4937_v60 = vrot.slane %v4836_v4, %v20109_v6  ;;  %v22119_v61 = vrot.slane %v4930_v46, %v20109_v6  ;;  %18768 = vpow2.f32 %v7259_v42 }
 0x654   :  { %24226 = vst [vmem:[#allocation41_spill] sm:$0xff] %v22104_v39  ;;  %17139 = vmatprep.subr.bf16.mxu0 %v21622_v37  ;;  %v22115_v9 = vpop.eup %18760  ;;  %v5079_v44 = vcombine.high %v4848_v30, %v24225_v35  ;;  %v5064_v4 = vcombine.high %v4840_v12, %v24225_v35  ;;  %v22133_v46 = vrot.slane %v4840_v12, %v20109_v6  ;;  %v7255_v22 = vmul.f32 1.442695, %v7187_v0 }
 0x655   :  { %7369 = vadd.xlane.f32.xlu0 %v7368_v54  ;;  %v23985_v54 = vmax.f32 %v22104_v39, -1e+30  ;;  %v22122_v56 = vpop.xlane.xlu1 %6862  ;;  %v7229_v5 = vmul.f32 1.442695, %v7174_v1  ;;  %v7404_v63 = vsel %vm6042_vm0, %v22115_v9, 0.0  ;;  %v4992_v12 = vcombine.low %v4937_v60, %v4952_v49 }
 0x656   :  { %24227 = vst [vmem:[#allocation51_spill] sm:$0xff] %v22122_v56  ;;  %v23988_v16 = vmax.f32 %v22122_v56, -1e+30  ;;  %v22129_v10 = vpop.eup %18762  ;;  %v5086_v42 = vrot.slane %v4848_v30, %v20109_v6  ;;  %v4993_v30 = vcombine.high %v4937_v60, %v4952_v49 }
 0x657   :  { %7402 = vadd.xlane.f32.xlu1 %v7401_v51  ;;  %v7172_v14 = vsub.f32 %v21781_v62, %v23985_v54  ;;  %17140 = vmatpush3.bf16.msra.mxu0 %v21622_v37  ;;  %v22136_v33 = vpop.xlane.xlu0 %6901  ;;  %v4959_v51 = vrot.slane %v4945_v13, %v20109_v6  ;;  %v7395_v62 = vsel %vm6042_vm0, %v22106_v55, 0.0  ;;  %18770 = vpow2.f32 %v7229_v5 }
 0x658   :  { %24228 = vst [vmem:[#allocation60_spill] sm:$0xff] %v22136_v33  ;;  %17153 = vmatprep.subr.bf16.mxu0 %v21647_v50  ;;  %v7177_v37 = vsub.f32 %v21791_v58, %v23988_v16  ;;  %v23989_v0 = vmax.f32 %v22136_v33, -1e+30  ;;  %v7377_v59 = vsel %vm6042_vm0, %v22129_v10, 0.0  ;;  %18772 = vpow2.f32 %v7255_v22 }
 0x659   :  { %7363 = vadd.xlane.f32.xlu0 %v7362_v7  ;;  %v7225_v1 = vmul.f32 1.442695, %v7172_v14  ;;  %v22149_v13 = vpop.xlane.xlu1 %6856  ;;  %v22151_v7 = vpop.eup %18764  ;;  %v5093_v14 = vrot.slane %v5079_v44, %v20109_v6  ;;  %v5078_v16 = vrot.slane %v5064_v4, %v20109_v6  ;;  %v5008_v60 = vcombine.low %v22119_v61, %v4959_v51 }
 0x65a   :  { %24229 = vst [vmem:[#allocation53_spill] sm:$0xff] %v22149_v13  ;;  %v23990_v54 = vmax.f32 %v22149_v13, -1e+30  ;;  %v7235_v56 = vmul.f32 1.442695, %v7177_v37  ;;  %v7190_v58 = vsub.f32 %v21787_v38, %v23989_v0  ;;  %v7398_v5 = vsel %vm6042_vm0, %v22151_v7, 0.0 }
 0x65b   :  { %7396 = vadd.xlane.f32.xlu1 %v7395_v62  ;;  %v22160_v62 = vpop.xlane.xlu0 %6895  ;;  %18774 = vpow2.f32 %v7225_v1  ;;  %v5126_v4 = vcombine.low %v22133_v46, %v5086_v42  ;;  %v5142_v1 = vcombine.low %v5078_v16, %v5093_v14  ;;  %v5143_v37 = vcombine.high %v5078_v16, %v5093_v14 }
 0x65c   :  { %24230 = vst [vmem:[#allocation50_spill] sm:$0xff] %v22160_v62  ;;  %v7175_v44 = vsub.f32 %v21797_v3, %v23990_v54  ;;  %v7261_v49 = vmul.f32 1.442695, %v7190_v58  ;;  %v23991_v38 = vmax.f32 %v22160_v62, -1e+30  ;;  %v18767_v0 = vpop.eup %18766  ;;  %v5127_v3 = vcombine.high %v22133_v46, %v5086_v42 }
 0x65d   :  { %7405 = vadd.xlane.f32.xlu0 %v7404_v63  ;;  %v5009_v63 = vcombine.high %v22119_v61, %v4959_v51  ;;  %v22171_v22 = vpop.xlane.xlu1 %6922  ;;  %18776 = vpow2.f32 %v7235_v56  ;;  %v22184_v58 = vrot.slane %v4993_v30, %v20133_v20  ;;  %v7371_v16 = vsel %vm6042_vm0, %v18767_v0, 0.0  ;;  %v22187_v14 = vpop.eup %18768 }
 0x65e   :  { %v7231_v54 = vmul.f32 1.442695, %v7175_v44  ;;  %v7188_v61 = vsub.f32 %v21803_v26, %v23991_v38  ;;  %18778 = vpow2.f32 %v7261_v49  ;;  %v5016_v56 = vrot.slane %v5008_v60, %v20133_v20 }
 0x65f   :  { %7378 = vadd.xlane.f32.xlu1 %v7377_v59  ;;  %v22178_v51 = vpop.xlane.xlu0 %6865  ;;  %v22181_v59 = vrot.slane %v4992_v12, %v20133_v20  ;;  %v5023_v46 = vrot.slane %v5009_v63, %v20133_v20  ;;  %v5150_v12 = vrot.slane %v5142_v1, %v20133_v20  ;;  %v5157_v30 = vrot.slane %v5143_v37, %v20133_v20 }
 0x660   :  { %24231 = vst [vmem:[#allocation52_spill] sm:$0xff] %v22178_v51  ;;  %v7257_v42 = vmul.f32 1.442695, %v7188_v61  ;;  %v23992_v26 = vmax.f32 %v22178_v51, -1e+30  ;;  %v5134_v49 = vrot.slane %v5126_v4, %v20133_v20  ;;  %v5141_v38 = vrot.slane %v5127_v3, %v20133_v20 }
 0x661   :  { %7399 = vadd.xlane.f32.xlu0 %v7398_v5  ;;  %v22192_v44 = vpop.xlane.xlu1 %6916  ;;  %18780 = vpow2.f32 %v7231_v54  ;;  %v18771_v61 = vpop.eup %18770  ;;  %v7425_v37 = vsel %vm6042_vm0, %v22187_v14, 0.0  ;;  %v15905_v54 = vcombine.low %v22181_v59, %v22184_v58  ;;  %v15909_v3 = vcombine.low %v5016_v56, %v5023_v46 }
 0x662   :  { %24232 = vst [vmem:[#allocation49_spill] sm:$0xff] %v22192_v44  ;;  %v23996_v5 = vmax.f32 %v22192_v44, -1e+30  ;;  %v7178_v60 = vsub.f32 %v21815_v18, %v23992_v26  ;;  %18782 = vpow2.f32 %v7257_v42  ;;  %v7380_v26 = vsel %vm6042_vm0, %v18771_v61, 0.0 }
 0x663   :  { %7372 = vadd.xlane.f32.xlu1 %v7371_v16  ;;  %v22202_v63 = vpop.xlane.xlu0 %6859  ;;  %v22210_v16 = vpop.eup %18772  ;;  %v15911_v51 = vcombine.high %v5016_v56, %v5023_v46  ;;  %v15917_v44 = vcombine.low %v5150_v12, %v5157_v30  ;;  %v15919_v62 = vcombine.high %v5150_v12, %v5157_v30  ;;  %v7554_v56 = vpack.c.bf16 %v18771_v61, %v22129_v10 }
 0x664   :  { %v7195_v1 = vsub.f32 %v21821_v45, %v23996_v5  ;;  %v24012_v4 = vmax.f32 %v22202_v63, -1e+30  ;;  %v7237_v18 = vmul.f32 1.442695, %v7178_v60  ;;  %v15913_v5 = vcombine.low %v5134_v49, %v5141_v38 }
 0x665   :  { %v18775_v42 = vpop.eup %18774  ;;  %7381 = vadd.xlane.f32.xlu0 %v7380_v26  ;;  %v15915_v60 = vcombine.high %v5134_v49, %v5141_v38  ;;  %v15907_v26 = vcombine.high %v22181_v59, %v22184_v58  ;;  %v5497_v10 = vrot.slane %v15911_v51, %v20109_v6  ;;  %v5599_v59 = vrot.slane %v15917_v44, %v20109_v6 }
 0x666   :  { %v7271_v45 = vmul.f32 1.442695, %v7195_v1  ;;  %v7176_v13 = vsub.f32 %v21827_v19, %v24012_v4  ;;  %v7374_v33 = vsel %vm6042_vm0, %v18775_v42, 0.0  ;;  %v7553_v31 = vpack.c.bf16 %v18775_v42, %v18767_v0 }
 0x667   :  { %7426 = vadd.xlane.f32.xlu1 %v7425_v37  ;;  %v22219_v39 = vpop.xlane.xlu0 %6925  ;;  %18784 = vpow2.f32 %v7237_v18  ;;  %v7419_v37 = vsel %vm6042_vm0, %v22210_v16, 0.0  ;;  %v22224_v46 = vpop.eup %18776  ;;  %v7557_v19 = vpack.c.bf16 %v22151_v7, %v22106_v55  ;;  %v22232_v0 = vrot.slane %v15909_v3, %v20109_v6 }
 0x668   :  { %v7233_v12 = vmul.f32 1.442695, %v7176_v13  ;;  %17133 = vmatprep.mubr.msk.bf16.mxu1 %vm6042_vm0, %v7553_v31  ;;  %v22234_v38 = vpop.eup %18778  ;;  %18786 = vpow2.f32 %v7271_v45  ;;  %v5615_v13 = vrot.slane %v15919_v62, %v20109_v6  ;;  %v24010_v31 = vmax.f32 %v22219_v39, -1e+30 }
 0x669   :  { %7375 = vadd.xlane.f32.xlu0 %v7374_v33  ;;  %17134 = vmatmul.mubr.msk.bf16.vlgmr.msra.gmra.mrb[40].mxu1 %vm6042_vm0, %v7554_v56  ;;  %v7428_v55 = vsel %vm6042_vm0, %v22234_v38, 0.0  ;;  %v5567_v33 = vrot.slane %v15913_v5, %v20109_v6  ;;  %v7389_v62 = vsel %vm6042_vm0, %v22224_v46, 0.0  ;;  %v5449_v30 = vrot.slane %v15905_v54, %v20109_v6 }
 0x66a   :  { %17146 = vmatpush3.bf16.msra.mxu1 %v21607_v41  ;;  %17149 = vmatprep.mubr.msk.bf16.mxu1 %vm6042_vm0, %v7557_v19  ;;  %18788 = vpow2.f32 %v7233_v12  ;;  %v5583_v41 = vrot.slane %v15915_v60, %v20109_v6  ;;  %v5465_v61 = vrot.slane %v15907_v26, %v20109_v6  ;;  %v5538_v3 = vcombine.low %v22232_v0, %v5497_v10 }
 0x66b   :  { %7420 = vadd.xlane.f32.xlu1 %v7419_v37  ;;  %v22245_v7 = vpop.xlane.xlu0 %6919  ;;  %17147 = vmatprep.subr.bf16.mxu1 %v21637_v27  ;;  %v22255_v44 = vpop.eup %18780  ;;  %v5656_v18 = vcombine.low %v5599_v59, %v5615_v13  ;;  %v24014_v42 = vmax.f32 %v22171_v22, -1e+30  ;;  %v7198_v45 = vsub.f32 %v21835_v11, %v24010_v31 }
 0x66c   :  { %v22248_v58 = vpop.xlane.xlu1 %6886  ;;  %v24009_v51 = vmax.f32 %v22245_v7, -1e+30  ;;  %v18783_v5 = vpop.eup %18782  ;;  %v7383_v56 = vsel %vm6042_vm0, %v22255_v44, 0.0  ;;  %v5632_v12 = vcombine.low %v5567_v33, %v5583_v41  ;;  %v5514_v13 = vcombine.low %v5449_v30, %v5465_v61 }
 0x66d   :  { %v24008_v49 = vmax.f32 %v22248_v58, -1e+30  ;;  %7429 = vadd.xlane.f32.xlu0 %v7428_v55  ;;  %v7422_v60 = vsel %vm6042_vm0, %v18783_v5, 0.0  ;;  %v7561_v0 = vpack.c.bf16 %v18783_v5, %v22210_v16  ;;  %v22290_v55 = vrot.slane %v5656_v18, %v20133_v20 }
 0x66e   :  { %v7196_v1 = vsub.f32 %v21841_v8, %v24009_v51  ;;  %17148 = vmatpush3.bf16.msra.mxu1 %v21637_v27  ;;  %v22313_v5 = vrot.slane %v5514_v13, %v20133_v20  ;;  %v24248_v51 = vld [vmem:[#allocation42_spill] sm:$0xff] }
 0x66f   :  { %7390 = vadd.xlane.f32.xlu1 %v7389_v62  ;;  %v7185_v54 = vsub.f32 %v21845_v29, %v24008_v49  ;;  %v22273_v37 = vpop.xlane.xlu0 %6889  ;;  %17161 = vmatprep.subr.bf16.mxu1 %v21649_v53  ;;  %v7558_v29 = vpack.c.bf16 %v22115_v9, %v22088_v47  ;;  %v7197_v47 = vsub.f32 %v21809_v34, %v24014_v42  ;;  %v7277_v9 = vmul.f32 1.442695, %v7198_v45 }
 0x670   :  { %v22275_v8 = vpop.xlane.xlu1 %6880  ;;  %v24006_v26 = vmax.f32 %v22273_v37, -1e+30  ;;  %v7273_v19 = vmul.f32 1.442695, %v7196_v1  ;;  %v22305_v62 = vrot.slane %v5538_v3, %v20133_v20  ;;  %v22308_v34 = vrot.slane %v5632_v12, %v20133_v20 }
 0x671   :  { %v7251_v11 = vmul.f32 1.442695, %v7185_v54  ;;  %v24005_v27 = vmax.f32 %v22275_v8, -1e+30  ;;  %v18785_v10 = vpop.eup %18784  ;;  %7423 = vadd.xlane.f32.xlu0 %v7422_v60  ;;  %17150 = vmatmul.mubr.msk.bf16.vlgmr.msra.gmra.mrb[44].mxu1 %vm6042_vm0, %v7558_v29  ;;  %v7275_v1 = vmul.f32 1.442695, %v7197_v47 }
 0x672   :  { %v7186_v59 = vsub.f32 %v21857_v2, %v24006_v26  ;;  %17162 = vmatpush3.bf16.msra.mxu1 %v21649_v53  ;;  %17165 = vmatprep.mubr.msk.bf16.mxu1 %vm6042_vm0, %v7561_v0  ;;  %v7392_v2 = vsel %vm6042_vm0, %v18785_v10, 0.0  ;;  %v22301_v33 = vpop.eup %18786  ;;  %v22317_v61 = vcombine.low %v22308_v34, %v22290_v55  ;;  %v24233_v54 = vld [vmem:[#allocation57_spill] sm:$0xff]  ;;  %v7556_v45 = vpack.c.bf16 %v18785_v10, %v22224_v46  ;;  %v24235_v29 = vld [vmem:[#allocation56_spill] sm:$0xff] }
 0x673   :  { %7384 = vadd.xlane.f32.xlu1 %v7383_v56  ;;  %v7183_v16 = vsub.f32 %v21853_v57, %v24005_v27  ;;  %18790 = vpow2.f32 %v7251_v11  ;;  %17163 = vmatprep.subr.bf16.mxu1 %v21660_v40  ;;  %v7443_v53 = vsel %vm6042_vm0, %v22301_v33, 0.0  ;;  %v7562_v56 = vpack.c.bf16 %v22234_v38, %v22187_v14  ;;  %v24236_v38 = vld [vmem:[#allocation58_spill] sm:$0xff] }
 0x674   :  { %18792 = vpow2.f32 %v7273_v19  ;;  %v7253_v57 = vmul.f32 1.442695, %v7186_v59  ;;  %v18789_v30 = vpop.eup %18788  ;;  %v5943_v46 = vshrl.u32 %v22317_v61, 16 }
 0x675   :  { %v7247_v41 = vmul.f32 1.442695, %v7183_v16  ;;  %7393 = vadd.xlane.f32.xlu0 %v7392_v2  ;;  %18794 = vpow2.f32 %v7277_v9  ;;  %v7386_v3 = vsel %vm6042_vm0, %v18789_v30, 0.0  ;;  %v7555_v18 = vpack.c.bf16 %v18789_v30, %v22255_v44  ;;  %v24238_v9 = vld [vmem:[#allocation55_spill] sm:$0xff]  ;;  %v24240_v30 = vld [vmem:[#allocation70_spill] sm:$0xff] }
 0x676   :  { %17164 = vmatpush3.bf16.msra.mxu1 %v21660_v40  ;;  %v22331_v40 = vcombine.low %v22313_v5, %v22305_v62 }
 0x677   :  { %7444 = vadd.xlane.f32.xlu1 %v7443_v53  ;;  %18796 = vpow2.f32 %v7247_v41  ;;  %17177 = vmatprep.subr.bf16.mxu1 %v24233_v54  ;;  %v24239_v41 = vld [vmem:[#allocation61_spill] sm:$0xff] }
 0x678   :  { %18798 = vpow2.f32 %v7253_v57  ;;  %17141 = vmatprep.mubr.msk.bf16.mxu0 %vm6042_vm0, %v7555_v18  ;;  %v5942_v12 = vshrl.u32 %v22331_v40, 16 }
 0x679   :  { %7387 = vadd.xlane.f32.xlu0 %v7386_v3  ;;  %17142 = vmatmul.mubr.msk.bf16.vlgmr.msra.gmra.mrb[64].mxu0 %vm6042_vm0, %v7556_v45  ;;  %18800 = vpow2.f32 %v7275_v1 }
 0x67a   :  { %17154 = vmatpush3.bf16.msra.mxu0 %v21647_v50  ;;  %17166 = vmatmul.mubr.msk.bf16.vlgmr.msra.gmra.mrb[48].mxu1 %vm6042_vm0, %v7562_v56  ;;  %v5944_v59 = vpack.i.b16 %v5943_v46, %v5942_v12  ;;  %v24241_v56 = vld [vmem:[#allocation71_spill] sm:$0xff] }
 0x67b   :  { %17178 = vmatpush3.bf16.msra.mxu1 %v24233_v54  ;;  %17155 = vmatprep.subr.bf16.mxu0 %v24235_v29 }
 0x67c   :  { %v22324_v60 = vpop.xlane.xlu0 %6946  ;;  %17179 = vmatprep.subr.bf16.mxu1 %v24236_v38 }
 0x67d   :  { %v22345_v11 = vpop.eup %18790 }
 0x67e   :  { %v22334_v44 = vpop.xlane.xlu1 %6949  ;;  %v18793_v19 = vpop.eup %18792  ;;  %v7413_v10 = vsel %vm6042_vm0, %v22345_v11, 0.0  ;;  %17156 = vmatpush3.bf16.msra.mxu0 %v24235_v29 }
 0x67f   :  { %24234 = vst [vmem:[#allocation44_spill] sm:$0xff] %v22334_v44  ;;  %7414 = vadd.xlane.f32.xlu1 %v7413_v10  ;;  %17180 = vmatpush3.bf16.msra.mxu1 %v24236_v38  ;;  %v22355_v47 = vpop.eup %18794  ;;  %v7446_v57 = vsel %vm6042_vm0, %v18793_v19, 0.0  ;;  %v7565_v12 = vpack.c.bf16 %v18793_v19, %v22301_v33  ;;  %v24242_v19 = vld [vmem:[#allocation65_spill] sm:$0xff] }
 0x680   :  { %v22341_v14 = vpop.xlane.xlu0 %6883  ;;  %17169 = vmatprep.subr.bf16.mxu0 %v24239_v41  ;;  %17193 = vmatprep.subr.bf16.mxu1 %v5944_v59 }
 0x681   :  { %v24004_v50 = vmax.f32 %v22341_v14, -1e+30  ;;  %v22364_v53 = vpop.eup %18796  ;;  %7447 = vadd.xlane.f32.xlu0 %v7446_v57  ;;  %17181 = vmatprep.mubr.msk.bf16.mxu1 %vm6042_vm0, %v7565_v12 }
 0x682   :  { %v22347_v0 = vpop.xlane.xlu1 %6943  ;;  %v22370_v18 = vpop.eup %18798  ;;  %v7407_v54 = vsel %vm6042_vm0, %v22364_v53, 0.0 }
 0x683   :  { %24237 = vst [vmem:[#allocation57_spill] sm:$0xff] %v22347_v0  ;;  %v24001_v13 = vmax.f32 %v22347_v0, -1e+30  ;;  %v7184_v16 = vsub.f32 %v24238_v9, %v24004_v50  ;;  %7408 = vadd.xlane.f32.xlu1 %v7407_v54  ;;  %v22377_v29 = vpop.eup %18800  ;;  %v7416_v10 = vsel %vm6042_vm0, %v22370_v18, 0.0  ;;  %v24246_v50 = vld [vmem:[#allocation54_spill] sm:$0xff]  ;;  %v7560_v4 = vpack.c.bf16 %v22370_v18, %v22345_v11 }
 0x684   :  { %v22360_v2 = vpop.xlane.xlu0 %6940  ;;  %v7566_v57 = vpack.c.bf16 %v22355_v47, %v22377_v29 }
 0x685   :  { %v7204_v1 = vsub.f32 %v24240_v30, %v24001_v13  ;;  %v24003_v3 = vmax.f32 %v22360_v2, -1e+30  ;;  %v7249_v45 = vmul.f32 1.442695, %v7184_v16  ;;  %7417 = vadd.xlane.f32.xlu0 %v7416_v10  ;;  %v24015_v10 = vmax.f32 %v22334_v44, -1e+30 }
 0x686   :  { %17182 = vmatmul.mubr.msk.bf16.vlgmr.msra.gmra.mrb[52].mxu1 %vm6042_vm0, %v7566_v57  ;;  %v24245_v57 = vld [vmem:[#allocation64_spill] sm:$0xff] }
 0x687   :  { %v7203_v46 = vsub.f32 %v24241_v56, %v24003_v3  ;;  %v7289_v38 = vmul.f32 1.442695, %v7204_v1  ;;  %18802 = vpow2.f32 %v7249_v45  ;;  %17194 = vmatpush3.bf16.msra.mxu1 %v5944_v59  ;;  %v24013_v45 = vmax.f32 %v22324_v60, -1e+30  ;;  %v24243_v59 = vld [vmem:[#allocation67_spill] sm:$0xff] }
 0x688   :  { %v7206_v31 = vsub.f32 %v24248_v51, %v24015_v10 }
 0x689   :  { %v7287_v9 = vmul.f32 1.442695, %v7203_v46  ;;  %18804 = vpow2.f32 %v7289_v38  ;;  %v7205_v27 = vsub.f32 %v24246_v50, %v24013_v45 }
 0x68b   :  { %v22386_v16 = vpop.xlane.xlu1 %6910  ;;  %18806 = vpow2.f32 %v7287_v9 }
 0x68c   :  { %v24002_v30 = vmax.f32 %v22386_v16, -1e+30 }
 0x68d   :  { %v22389_v33 = vpop.xlane.xlu0 %6913 }
 0x68e   :  { %v7193_v1 = vsub.f32 %v24242_v19, %v24002_v30  ;;  %v24007_v54 = vmax.f32 %v22389_v33, -1e+30 }
 0x68f   :  { %v22395_v56 = vpop.xlane.xlu1 %6904 }
 0x690   :  { %v7267_v46 = vmul.f32 1.442695, %v7193_v1  ;;  %v24011_v38 = vmax.f32 %v22395_v56, -1e+30  ;;  %v7194_v12 = vsub.f32 %v24243_v59, %v24007_v54  ;;  %v24247_v59 = vld [vmem:[#allocation45_spill] sm:$0xff] }
 0x691   :  { %v22403_v9 = vpop.xlane.xlu0 %6907  ;;  %v18803_v1 = vpop.eup %18802  ;;  %v4886_v54 = vshrl.u32 %v24247_v59, 16 }
 0x692   :  { %24244 = vst [vmem:[#allocation56_spill] sm:$0xff] %v22403_v9  ;;  %v7191_v19 = vsub.f32 %v24245_v57, %v24011_v38  ;;  %v7269_v13 = vmul.f32 1.442695, %v7194_v12  ;;  %18808 = vpow2.f32 %v7267_v46  ;;  %v24017_v3 = vmax.f32 %v22403_v9, -1e+30  ;;  %v24249_v46 = vld [vmem:[#allocation66_spill] sm:$0xff] }
 0x693   :  { %v4797_v30 = vpop.permute.xlu1 %4796  ;;  %v22413_v49 = vpop.eup %18804  ;;  %v7410_v38 = vsel %vm6042_vm0, %v18803_v1, 0.0  ;;  %v7559_v42 = vpack.c.bf16 %v18803_v1, %v22364_v53 }
 0x694   :  { %v7263_v26 = vmul.f32 1.442695, %v7191_v19  ;;  %v7192_v12 = vsub.f32 %v24249_v46, %v24017_v3  ;;  %18810 = vpow2.f32 %v7269_v13  ;;  %7411 = vadd.xlane.f32.xlu0 %v7410_v38  ;;  %v4894_v51 = vshrl.u32 %v4797_v30, 16 }
 0x695   :  { %v4793_v57 = vpop.permute.xlu0 %4792  ;;  %v22424_v50 = vpop.eup %18806  ;;  %17157 = vmatprep.mubr.msk.bf16.mxu0 %vm6042_vm0, %v7559_v42  ;;  %v7291_v13 = vmul.f32 1.442695, %v7205_v27  ;;  %v24250_v27 = vld [vmem:[#allocation59_spill] sm:$0xff] }
 0x696   :  { %v4884_v19 = vpack.i.b16 %v4793_v57, %v24247_v59  ;;  %v4887_v45 = vshrl.u32 %v4793_v57, 16  ;;  %18812 = vpow2.f32 %v7263_v26  ;;  %v7265_v0 = vmul.f32 1.442695, %v7192_v12  ;;  %17158 = vmatmul.mubr.msk.bf16.vlgmr.msra.gmra.mrb[68].mxu0 %vm6042_vm0, %v7560_v4 }
 0x697   :  { %v4801_v10 = vpop.permute.xlu1 %4800  ;;  %v7569_v46 = vpack.c.bf16 %v22413_v49, %v22424_v50  ;;  %17170 = vmatpush3.bf16.msra.mxu0 %v24239_v41  ;;  %v22444_v4 = vpack.i.b16 %v22317_v61, %v22331_v40 }
 0x698   :  { %v4892_v3 = vpack.i.b16 %v4801_v10, %v4797_v30  ;;  %v4895_v44 = vshrl.u32 %v4801_v10, 16  ;;  %v4888_v9 = vpack.i.b16 %v4887_v45, %v4886_v54  ;;  %v5198_v11 = vcombine.high %v4884_v19, %v24225_v35  ;;  %17171 = vmatprep.subr.bf16.mxu0 %v24250_v27 }
 0x699   :  { %v5205_v18 = vrot.slane %v4884_v19, %v20109_v6  ;;  %17197 = vmatprep.mubr.msk.bf16.mxu1 %vm6042_vm0, %v7569_v46  ;;  %18814 = vpow2.f32 %v7265_v0 }
 0x69a   :  { %v4896_v26 = vpack.i.b16 %v4895_v44, %v4894_v51  ;;  %v5213_v53 = vcombine.high %v4892_v3, %v24225_v35  ;;  %v5220_v38 = vrot.slane %v4892_v3, %v20109_v6  ;;  %v5212_v30 = vrot.slane %v5198_v11, %v20109_v6 }
 0x69b   :  { %v5332_v54 = vcombine.high %v4888_v9, %v24225_v35  ;;  %v5339_v42 = vrot.slane %v4888_v9, %v20109_v6  ;;  %v7293_v44 = vmul.f32 1.442695, %v7206_v31  ;;  %18816 = vpow2.f32 %v7291_v13  ;;  %17172 = vmatpush3.bf16.msra.mxu0 %v24250_v27 }
 0x69c   :  { %v5227_v45 = vrot.slane %v5213_v53, %v20109_v6  ;;  %v5347_v3 = vcombine.high %v4896_v26, %v24225_v35  ;;  %v5260_v0 = vcombine.low %v5205_v18, %v5220_v38  ;;  %v18809_v10 = vpop.eup %18808  ;;  %v5354_v41 = vrot.slane %v4896_v26, %v20109_v6  ;;  %17185 = vmatprep.subr.bf16.mxu0 %v22444_v4 }
 0x69d   :  { %v5261_v1 = vcombine.high %v5205_v18, %v5220_v38  ;;  %v5346_v59 = vrot.slane %v5332_v54, %v20109_v6  ;;  %v7437_v51 = vsel %vm6042_vm0, %v18809_v10, 0.0  ;;  %18818 = vpow2.f32 %v7293_v44 }
 0x69e   :  { %v5361_v9 = vrot.slane %v5347_v3, %v20109_v6  ;;  %v5268_v12 = vrot.slane %v5260_v0, %v20133_v20  ;;  %v5276_v57 = vcombine.low %v5212_v30, %v5227_v45  ;;  %v5277_v61 = vcombine.high %v5212_v30, %v5227_v45  ;;  %v18811_v46 = vpop.eup %18810  ;;  %7438 = vadd.xlane.f32.xlu1 %v7437_v51 }
 0x69f   :  { %v5275_v31 = vrot.slane %v5261_v1, %v20133_v20  ;;  %v5394_v40 = vcombine.low %v5339_v42, %v5354_v41  ;;  %v5395_v19 = vcombine.high %v5339_v42, %v5354_v41 }
 0x6a0   :  { %v5284_v11 = vrot.slane %v5276_v57, %v20133_v20  ;;  %v5291_v13 = vrot.slane %v5277_v61, %v20133_v20  ;;  %v5410_v18 = vcombine.low %v5346_v59, %v5361_v9  ;;  %v5411_v26 = vcombine.high %v5346_v59, %v5361_v9  ;;  %v18813_v53 = vpop.eup %18812 }
 0x6a1   :  { %v5402_v38 = vrot.slane %v5394_v40, %v20133_v20  ;;  %v5409_v30 = vrot.slane %v5395_v19, %v20133_v20  ;;  %v15921_v54 = vcombine.low %v5268_v12, %v5275_v31  ;;  %v15923_v27 = vcombine.high %v5268_v12, %v5275_v31 }
 0x6a2   :  { %v5418_v42 = vrot.slane %v5410_v18, %v20133_v20  ;;  %v5425_v45 = vrot.slane %v5411_v26, %v20133_v20  ;;  %v15925_v3 = vcombine.low %v5284_v11, %v5291_v13  ;;  %v15927_v0 = vcombine.high %v5284_v11, %v5291_v13 }
 0x6a3   :  { %v5685_v41 = vrot.slane %v15921_v54, %v20109_v6  ;;  %v5701_v1 = vrot.slane %v15923_v27, %v20109_v6  ;;  %v15929_v57 = vcombine.low %v5402_v38, %v5409_v30  ;;  %v15931_v59 = vcombine.high %v5402_v38, %v5409_v30  ;;  %v18815_v9 = vpop.eup %18814 }
 0x6a4   :  { %v15933_v61 = vcombine.low %v5418_v42, %v5425_v45  ;;  %v15935_v51 = vcombine.high %v5418_v42, %v5425_v45  ;;  %v7431_v40 = vsel %vm6042_vm0, %v18813_v53, 0.0  ;;  %v7440_v19 = vsel %vm6042_vm0, %v18811_v46, 0.0 }
 0x6a5   :  { %7432 = vadd.xlane.f32.xlu1 %v7431_v40  ;;  %7441 = vadd.xlane.f32.xlu0 %v7440_v19  ;;  %v7434_v12 = vsel %vm6042_vm0, %v18815_v9, 0.0  ;;  %v7563_v31 = vpack.c.bf16 %v18815_v9, %v18813_v53  ;;  %v7564_v18 = vpack.c.bf16 %v18811_v46, %v18809_v10  ;;  %v5717_v11 = vrot.slane %v15925_v3, %v20109_v6  ;;  %v18817_v54 = vpop.eup %18816 }
 0x6a6   :  { %v5733_v13 = vrot.slane %v15927_v0, %v20109_v6  ;;  %v5750_v26 = vcombine.low %v5685_v41, %v5701_v1  ;;  %v5803_v38 = vrot.slane %v15929_v57, %v20109_v6  ;;  %v5819_v30 = vrot.slane %v15931_v59, %v20109_v6 }
 0x6a7   :  { %17173 = vmatprep.mubr.msk.bf16.mxu0 %vm6042_vm0, %v7563_v31  ;;  %v5835_v27 = vrot.slane %v15933_v61, %v20109_v6  ;;  %v5851_v42 = vrot.slane %v15935_v51, %v20109_v6  ;;  %v7449_v10 = vsel %vm6042_vm0, %v22377_v29, 0.0  ;;  %v5669_v0 = vcombine.high %v22308_v34, %v22290_v55 }
 0x6a8   :  { %17174 = vmatmul.mubr.msk.bf16.vlgmr.msra.gmra.mrb[72].mxu0 %vm6042_vm0, %v7564_v18  ;;  %v5774_v46 = vcombine.low %v5717_v11, %v5733_v13  ;;  %v5868_v53 = vcombine.low %v5803_v38, %v5819_v30  ;;  %v5757_v44 = vrot.slane %v5750_v26, %v20133_v20  ;;  %v7467_v1 = vsel %vm6042_vm0, %v22424_v50, 0.0 }
 0x6a9   :  { %7450 = vadd.xlane.f32.xlu1 %v7449_v10  ;;  %7435 = vadd.xlane.f32.xlu0 %v7434_v12  ;;  %v5892_v45 = vcombine.low %v5835_v27, %v5851_v42  ;;  %v7452_v57 = vsel %vm6042_vm0, %v22355_v47, 0.0  ;;  %v5551_v9 = vcombine.high %v22313_v5, %v22305_v62  ;;  %v5951_v61 = vshrl.u32 %v5669_v0, 16  ;;  %v18819_v12 = vpop.eup %18818  ;;  %v24251_v27 = vld [vmem:[#allocation43_spill] sm:$0xff] }
 0x6aa   :  { %17186 = vmatpush3.bf16.msra.mxu0 %v22444_v4  ;;  %v5781_v3 = vrot.slane %v5774_v46, %v20133_v20  ;;  %v5875_v41 = vrot.slane %v5868_v53, %v20133_v20  ;;  %v7473_v19 = vsel %vm6042_vm0, %v18817_v54, 0.0  ;;  %v7470_v50 = vsel %vm6042_vm0, %v22413_v49, 0.0 }
 0x6ab   :  { %v5899_v29 = vrot.slane %v5892_v45, %v20133_v20  ;;  %v5950_v31 = vshrl.u32 %v5551_v9, 16  ;;  %v22497_v62 = vpack.i.b16 %v5669_v0, %v5551_v9  ;;  %v7476_v13 = vsel %vm6042_vm0, %v18819_v12, 0.0 }
 0x6ac   :  { %v5786_v59 = vcombine.low %v5757_v44, %v5781_v3  ;;  %v22495_v18 = vcombine.high %v5757_v44, %v5781_v3  ;;  %v7570_v49 = vpack.c.bf16 %v18819_v12, %v18817_v54  ;;  %v24252_v42 = vmax.f32 %v24251_v27, -1e+30  ;;  %v24253_v54 = vld [vmem:[#allocation62_spill] sm:$0xff] }
 0x6ad   :  { %7468 = vadd.xlane.f32.xlu1 %v7467_v1  ;;  %7453 = vadd.xlane.f32.xlu0 %v7452_v57  ;;  %v5904_v4 = vcombine.low %v5875_v41, %v5899_v29  ;;  %v22490_v40 = vcombine.high %v5875_v41, %v5899_v29  ;;  %v5952_v5 = vpack.i.b16 %v5951_v61, %v5950_v31  ;;  %v24254_v41 = vmax.f32 %v21952_v25, -1e+30  ;;  %v24255_v25 = vld [vmem:[#allocation69_spill] sm:$0xff] }
 0x6ae   :  { %v5990_v55 = vshrl.u32 %v5786_v59, 16  ;;  %v5998_v26 = vshrl.u32 %v22495_v18, 16  ;;  %v7025_v10 = vsub.f32 -1e+30, %v24252_v42 }
 0x6af   :  { %v5988_v51 = vpack.i.b16 %v5904_v4, %v5786_v59  ;;  %v5991_v34 = vshrl.u32 %v5904_v4, 16  ;;  %v5999_v11 = vshrl.u32 %v22490_v40, 16  ;;  %v7026_v29 = vsub.f32 -1e+30, %v24254_v41 }
 0x6b0   :  { %v7075_v3 = vmul.f32 1.442695, %v7025_v10 }
 0x6b1   :  { %7474 = vadd.xlane.f32.xlu1 %v7473_v19  ;;  %7471 = vadd.xlane.f32.xlu0 %v7470_v50  ;;  %v5992_v47 = vpack.i.b16 %v5991_v34, %v5990_v55  ;;  %v6000_v38 = vpack.i.b16 %v5999_v11, %v5998_v26  ;;  %v7077_v34 = vmul.f32 1.442695, %v7026_v29 }
 0x6b2   :  { %17187 = vmatprep.subr.bf16.mxu0 %v5988_v51 }
 0x6b3   :  { %17188 = vmatpush3.bf16.msra.mxu0 %v5988_v51  ;;  %17195 = vmatprep.subr.bf16.mxu1 %v5992_v47 }
 0x6b4   :  { %17201 = vmatprep.subr.bf16.mxu0 %v22497_v62  ;;  %17196 = vmatpush3.bf16.msra.mxu1 %v5992_v47  ;;  %v24256_v47 = vld [vmem:[#allocation63_spill] sm:$0xff] }
 0x6b5   :  { %7477 = vadd.xlane.f32.xlu0 %v7476_v13  ;;  %17209 = vmatprep.subr.bf16.mxu1 %v5952_v5 }
 0x6b7   :  { %17198 = vmatmul.mubr.msk.bf16.vlgmr.msra.gmra.mrb[56].mxu1 %vm6042_vm0, %v7570_v49 }
 0x6b8   :  { %17210 = vmatpush3.bf16.msra.mxu1 %v5952_v5 }
 0x6b9   :  { %17211 = vmatprep.subr.bf16.mxu1 %v6000_v38 }
 0x6bc   :  { %17212 = vmatpush3.bf16.msra.mxu1 %v6000_v38 }
 0x6c6   :  { %v22504_v30 = vpop.xlane.xlu0 %6964 }
 0x6c7   :  { %v24031_v46 = vmax.f32 %v22504_v30, -1e+30 }
 0x6c8   :  { %v22509_v53 = vpop.xlane.xlu1 %6928 }
 0x6c9   :  { %v7211_v45 = vsub.f32 %v24253_v54, %v24031_v46  ;;  %v24030_v61 = vmax.f32 %v22509_v53, -1e+30 }
 0x6ca   :  { %v22514_v44 = vpop.xlane.xlu0 %6967 }
 0x6cb   :  { %v7303_v0 = vmul.f32 1.442695, %v7211_v45  ;;  %v24029_v57 = vmax.f32 %v22514_v44, -1e+30  ;;  %v7199_v31 = vsub.f32 %v24256_v47, %v24030_v61  ;;  %v24272_v61 = vld [vmem:[#allocation41_spill] sm:$0xff] }
 0x6cc   :  { %v22518_v1 = vpop.xlane.xlu1 %6937 }
 0x6cd   :  { %v24028_v59 = vmax.f32 %v22518_v1, -1e+30  ;;  %18820 = vpow2.f32 %v7303_v0  ;;  %v7212_v4 = vsub.f32 %v21950_v28, %v24029_v57  ;;  %v7279_v42 = vmul.f32 1.442695, %v7199_v31 }
 0x6ce   :  { %v22525_v9 = vpop.xlane.xlu0 %6934  ;;  %18822 = vpow2.f32 %v7075_v3 }
 0x6cf   :  { %v7202_v51 = vsub.f32 %v24255_v25, %v24028_v59  ;;  %v24027_v55 = vmax.f32 %v22525_v9, -1e+30  ;;  %v7305_v50 = vmul.f32 1.442695, %v7212_v4  ;;  %18824 = vpow2.f32 %v7077_v34 }
 0x6d0   :  { %v22532_v19 = vpop.xlane.xlu1 %6958 }
 0x6d1   :  { %v7201_v12 = vsub.f32 %v21970_v32, %v24027_v55  ;;  %v7285_v5 = vmul.f32 1.442695, %v7202_v51  ;;  %v24026_v11 = vmax.f32 %v22532_v19, -1e+30  ;;  %18826 = vpow2.f32 %v7305_v50 }
 0x6d2   :  { %v22537_v28 = vpop.xlane.xlu0 %6931 }
 0x6d3   :  { %v24025_v49 = vmax.f32 %v22537_v28, -1e+30  ;;  %v7283_v26 = vmul.f32 1.442695, %v7201_v12  ;;  %18828 = vpow2.f32 %v7285_v5  ;;  %v7209_v10 = vsub.f32 %v21983_v52, %v24026_v11 }
 0x6d4   :  { %v22543_v13 = vpop.xlane.xlu1 %6952  ;;  %v24271_v11 = vmax.f32 %v22086_v23, -1e+30 }
 0x6d5   :  { %24257 = vst [vmem:[#allocation58_spill] sm:$0xff] %v22543_v13  ;;  %v24024_v38 = vmax.f32 %v22543_v13, -1e+30  ;;  %v7200_v32 = vsub.f32 %v21998_v15, %v24025_v49  ;;  %18830 = vpow2.f32 %v7283_v26  ;;  %v7299_v51 = vmul.f32 1.442695, %v7209_v10 }
 0x6d6   :  { %v22550_v27 = vpop.xlane.xlu0 %6961  ;;  %18832 = vpow2.f32 %v7279_v42  ;;  %v7030_v55 = vsub.f32 -1e+30, %v24271_v11 }
 0x6d7   :  { %24258 = vst [vmem:[#allocation55_spill] sm:$0xff] %v22550_v27  ;;  %v24022_v54 = vmax.f32 %v22550_v27, -1e+30  ;;  %v18821_v45 = vpop.eup %18820  ;;  %v7281_v29 = vmul.f32 1.442695, %v7200_v32  ;;  %v7207_v15 = vsub.f32 %v22009_v24, %v24024_v38 }
 0x6d8   :  { %v22556_v3 = vpop.xlane.xlu1 %6970  ;;  %v18823_v0 = vpop.eup %18822  ;;  %v7491_v52 = vsel %vm6042_vm0, %v18821_v45, 0.0 }
 0x6d9   :  { %24259 = vst [vmem:[#allocation61_spill] sm:$0xff] %v22556_v3  ;;  %v24023_v41 = vmax.f32 %v22556_v3, -1e+30  ;;  %v7210_v4 = vsub.f32 %v22016_v36, %v24022_v54  ;;  %7492 = vadd.xlane.f32.xlu1 %v7491_v52  ;;  %v22569_v50 = vmul.f32 0.0, %v18823_v0  ;;  %18834 = vpow2.f32 %v7281_v29  ;;  %v18825_v31 = vpop.eup %18824 }
 0x6da   :  { %v22566_v25 = vpop.xlane.xlu0 %6955  ;;  %v7295_v36 = vmul.f32 1.442695, %v7207_v15  ;;  %18836 = vpow2.f32 %v7299_v51  ;;  %v22587_v15 = vmul.f32 0.0, %v18825_v31 }
 0x6db   :  { %24260 = vst [vmem:[#allocation70_spill] sm:$0xff] %v22566_v25  ;;  %v24020_v34 = vmax.f32 %v22566_v25, -1e+30  ;;  %v7213_v24 = vsub.f32 %v22029_v43, %v24023_v41  ;;  %v7301_v47 = vmul.f32 1.442695, %v7210_v4  ;;  %v18827_v42 = vpop.eup %18826  ;;  %v24269_v41 = vld [vmem:[#allocation78_spill] sm:$0xff] }
 0x6dc   :  { %v7367_v12 = vpop.xlane.xlu1 %7366  ;;  %v7494_v43 = vsel %vm6042_vm0, %v18827_v42, 0.0  ;;  %v7573_v29 = vpack.c.bf16 %v18827_v42, %v18821_v45  ;;  %v24270_v38 = vmax.f32 %v24269_v41, -1e+30 }
 0x6dd   :  { %v7208_v5 = vsub.f32 %v22042_v48, %v24020_v34  ;;  %v22580_v32 = vadd.f32 %v7367_v12, %v22569_v50  ;;  %v18829_v4 = vpop.eup %18828  ;;  %v7307_v52 = vmul.f32 1.442695, %v7213_v24  ;;  %18838 = vpow2.f32 %v7301_v47  ;;  %7495 = vadd.xlane.f32.xlu0 %v7494_v43 }
 0x6de   :  { %v22577_v26 = vpop.xlane.xlu0 %6973  ;;  %18840 = vpow2.f32 %v7295_v36  ;;  %17213 = vmatprep.mubr.msk.bf16.mxu1 %vm6042_vm0, %v7573_v29  ;;  %v7464_v24 = vsel %vm6042_vm0, %v18829_v4, 0.0  ;;  %v7027_v49 = vsub.f32 -1e+30, %v24270_v38  ;;  %v24276_v38 = vld [vmem:[#allocation76_spill] sm:$0xff] }
 0x6df   :  { %24261 = vst [vmem:[#allocation71_spill] sm:$0xff] %v22577_v26  ;;  %v24021_v10 = vmax.f32 %v22577_v26, -1e+30  ;;  %v7297_v0 = vmul.f32 1.442695, %v7208_v5  ;;  %v18831_v12 = vpop.eup %18830 }
 0x6e0   :  { %v7461_v45 = vsel %vm6042_vm0, %v18831_v12, 0.0  ;;  %v18833_v47 = vpop.eup %18832  ;;  %v7568_v43 = vpack.c.bf16 %v18829_v4, %v18831_v12  ;;  %v24277_v41 = vmax.f32 %v24276_v38, -1e+30  ;;  %v7079_v11 = vmul.f32 1.442695, %v7027_v49  ;;  %v24282_v38 = vld [vmem:[#allocation77_spill] sm:$0xff] }
 0x6e1   :  { %v7214_v48 = vsub.f32 %v22058_v21, %v24021_v10  ;;  %18842 = vpow2.f32 %v7297_v0  ;;  %7462 = vadd.xlane.f32.xlu1 %v7461_v45  ;;  %7465 = vadd.xlane.f32.xlu0 %v7464_v24  ;;  %v7455_v31 = vsel %vm6042_vm0, %v18833_v47, 0.0  ;;  %v24283_v49 = vmax.f32 %v24282_v38, -1e+30  ;;  %v24288_v38 = vld [vmem:[#allocation53_spill] sm:$0xff] }
 0x6e2   :  { %v7370_v51 = vpop.xlane.xlu0 %7369  ;;  %18844 = vpow2.f32 %v7307_v52  ;;  %v5996_v52 = vpack.i.b16 %v22490_v40, %v22495_v18  ;;  %v7038_v23 = vsub.f32 -1e+30, %v24277_v41 }
 0x6e3   :  { %v7309_v5 = vmul.f32 1.442695, %v7214_v48  ;;  %v22591_v34 = vadd.f32 %v7370_v51, %v22587_v15  ;;  %v18835_v21 = vpop.eup %18834  ;;  %v7043_v41 = vsub.f32 -1e+30, %v24283_v49 }
 0x6e4   :  { %v7458_v36 = vsel %vm6042_vm0, %v18835_v21, 0.0  ;;  %v7567_v42 = vpack.c.bf16 %v18835_v21, %v18833_v47  ;;  %v18837_v0 = vpop.eup %18836 }
 0x6e5   :  { %18846 = vpow2.f32 %v7309_v5  ;;  %7456 = vadd.xlane.f32.xlu1 %v7455_v31  ;;  %7459 = vadd.xlane.f32.xlu0 %v7458_v36  ;;  %v7485_v51 = vsel %vm6042_vm0, %v18837_v0, 0.0  ;;  %v7361_v36 = vpop.xlane.xlu1 %7360 }
 0x6e6   :  { %17189 = vmatprep.mubr.msk.bf16.mxu0 %vm6042_vm0, %v7567_v42 }
 0x6e7   :  { %v18839_v29 = vpop.eup %18838  ;;  %17190 = vmatmul.mubr.msk.bf16.vlgmr.msra.gmra.mrb[76].mxu0 %vm6042_vm0, %v7568_v43  ;;  %v24262_v43 = vld [vmem:[#allocation68_spill] sm:$0xff] }
 0x6e8   :  { %v18841_v48 = vpop.eup %18840  ;;  %17202 = vmatpush3.bf16.msra.mxu0 %v22497_v62  ;;  %v7488_v5 = vsel %vm6042_vm0, %v18839_v29, 0.0  ;;  %v7572_v40 = vpack.c.bf16 %v18839_v29, %v18837_v0  ;;  %v24264_v0 = vld [vmem:[#allocation40_spill] sm:$0xff] }
 0x6e9   :  { %17203 = vmatprep.subr.bf16.mxu0 %v5996_v52  ;;  %7486 = vadd.xlane.f32.xlu1 %v7485_v51  ;;  %v7479_v21 = vsel %vm6042_vm0, %v18841_v48, 0.0  ;;  %v22611_v42 = vpop.xlane.xlu1 %7402  ;;  %v7364_v51 = vpop.xlane.xlu0 %7363  ;;  %v24265_v29 = vmax.f32 %v24264_v0, -1e+30  ;;  %v24266_v0 = vmax.f32 %v21988_v17, -1e+30 }
 0x6ea   :  { %7489 = vadd.xlane.f32.xlu0 %v7488_v5 }
 0x6eb   :  { %v18843_v45 = vpop.eup %18842  ;;  %v7024_v5 = vsub.f32 -1e+30, %v24265_v29  ;;  %v7037_v29 = vsub.f32 -1e+30, %v24266_v0  ;;  %v24274_v0 = vld [vmem:[#allocation72_spill] sm:$0xff] }
 0x6ec   :  { %v7571_v4 = vpack.c.bf16 %v18843_v45, %v18841_v48  ;;  %v18845_v12 = vpop.eup %18844  ;;  %v7482_v24 = vsel %vm6042_vm0, %v18843_v45, 0.0  ;;  %17204 = vmatpush3.bf16.msra.mxu0 %v5996_v52  ;;  %v24263_v52 = vmax.f32 %v24262_v43, -1e+30 }
 0x6ed   :  { %7480 = vadd.xlane.f32.xlu1 %v7479_v21  ;;  %v7497_v31 = vsel %vm6042_vm0, %v18845_v12, 0.0  ;;  %v7099_v57 = vmul.f32 1.442695, %v7037_v29  ;;  %v24278_v29 = vld [vmem:[#allocation73_spill] sm:$0xff] }
 0x6ee   :  { %17205 = vmatprep.mubr.msk.bf16.mxu0 %vm6042_vm0, %v7571_v4  ;;  %7483 = vadd.xlane.f32.xlu0 %v7482_v24  ;;  %v7023_v48 = vsub.f32 -1e+30, %v24263_v52  ;;  %v22617_v4 = vpop.xlane.xlu0 %7405  ;;  %v22619_v24 = vpop.xlane.xlu1 %7396 }
 0x6ef   :  { %v18847_v47 = vpop.eup %18846  ;;  %17206 = vmatmul.mubr.msk.bf16.vlgmr.msra.gmra.mrb[80].mxu0 %vm6042_vm0, %v7572_v40 }
 0x6f0   :  { %v7574_v18 = vpack.c.bf16 %v18847_v47, %v18845_v12  ;;  %v7500_v62 = vsel %vm6042_vm0, %v18847_v47, 0.0  ;;  %v7071_v45 = vmul.f32 1.442695, %v7023_v48  ;;  %v7073_v47 = vmul.f32 1.442695, %v7024_v5  ;;  %v24267_v5 = vld [vmem:[#allocation75_spill] sm:$0xff] }
 0x6f1   :  { %7498 = vadd.xlane.f32.xlu1 %v7497_v31 }
 0x6f2   :  { %17214 = vmatmul.mubr.msk.bf16.vlgmr.msra.gmra.mrb[60].mxu1 %vm6042_vm0, %v7574_v18  ;;  %7501 = vadd.xlane.f32.xlu0 %v7500_v62  ;;  %18848 = vpow2.f32 %v7071_v45  ;;  %v22621_v12 = vpop.xlane.xlu0 %7399  ;;  %v22623_v21 = vpop.xlane.xlu1 %7378  ;;  %v24268_v45 = vmax.f32 %v24267_v5, -1e+30  ;;  %v24275_v5 = vmax.f32 %v24274_v0, -1e+30 }
 0x6f3   :  { %18850 = vpow2.f32 %v7073_v47 }
 0x6f4   :  { %v7029_v47 = vsub.f32 -1e+30, %v24268_v45  ;;  %18852 = vrcp.f32 %v22580_v32  ;;  %v7035_v45 = vsub.f32 -1e+30, %v24275_v5  ;;  %v7101_v5 = vmul.f32 1.442695, %v7038_v23 }
 0x6f6   :  { %v22625_v40 = vpop.xlane.xlu0 %7381  ;;  %v22627_v18 = vpop.xlane.xlu1 %7372  ;;  %v7095_v32 = vmul.f32 1.442695, %v7035_v45 }
 0x6fa   :  { %v22629_v43 = vpop.xlane.xlu0 %7375  ;;  %v22631_v48 = vpop.xlane.xlu1 %7426 }
 0x6fc   :  { %v18849_v62 = vpop.eup %18848 }
 0x6fd   :  { %v18851_v31 = vpop.eup %18850  ;;  %v7311_v52 = vmul.f32 0.0, %v18849_v62  ;;  %v24273_v62 = vmax.f32 %v24272_v61, -1e+30 }
 0x6fe   :  { %v7312_v54 = vmul.f32 0.0, %v18851_v31  ;;  %v22644_v17 = vpop.xlane.xlu0 %7429  ;;  %v22648_v31 = vpop.xlane.xlu1 %7420 }
 0x6ff   :  { %v7503_v10 = vadd.f32 %v7361_v36, %v7311_v52  ;;  %v7028_v46 = vsub.f32 -1e+30, %v24273_v62  ;;  %v7083_v36 = vmul.f32 1.442695, %v7029_v47  ;;  %v24279_v62 = vmax.f32 %v24278_v29, -1e+30 }
 0x700   :  { %v7504_v59 = vadd.f32 %v7364_v51, %v7312_v54  ;;  %v7085_v51 = vmul.f32 1.442695, %v7030_v55  ;;  %v24280_v47 = vld [vmem:[#allocation74_spill] sm:$0xff] }
 0x701   :  { %18854 = vrcp.f32 %v7503_v10  ;;  %v7081_v61 = vmul.f32 1.442695, %v7028_v46  ;;  %v7036_v0 = vsub.f32 -1e+30, %v24279_v62  ;;  %v24281_v10 = vmax.f32 %v24280_v47, -1e+30  ;;  %v18853_v47 = vpop.eup %18852 }
 0x702   :  { %18856 = vrcp.f32 %v22591_v34  ;;  %v22657_v20 = vpop.xlane.xlu0 %7423  ;;  %v22661_v55 = vpop.xlane.xlu1 %7390  ;;  %v24284_v46 = vld [vmem:[#allocation51_spill] sm:$0xff] }
 0x703   :  { %18858 = vrcp.f32 %v7504_v59  ;;  %v7045_v35 = vsub.f32 -1e+30, %v24281_v10  ;;  %v7097_v45 = vmul.f32 1.442695, %v7036_v0 }
 0x704   :  { %18860 = vpow2.f32 %v7099_v57  ;;  %v24285_v57 = vmax.f32 %v24284_v46, -1e+30  ;;  %v7111_v46 = vmul.f32 1.442695, %v7043_v41  ;;  %v24294_v41 = vmax.f32 %v22171_v22, -1e+30 }
 0x705   :  { %18862 = vpow2.f32 %v7083_v36  ;;  %v24286_v36 = vld [vmem:[#allocation60_spill] sm:$0xff]  ;;  %v7115_v10 = vmul.f32 1.442695, %v7045_v35 }
 0x706   :  { %18864 = vpow2.f32 %v7079_v11  ;;  %v7033_v59 = vsub.f32 -1e+30, %v24285_v57  ;;  %v24287_v23 = vmax.f32 %v24286_v36, -1e+30  ;;  %v24290_v57 = vld [vmem:[#allocation50_spill] sm:$0xff]  ;;  %v22675_v35 = vpop.xlane.xlu0 %7393 }
 0x707   :  { %18866 = vpow2.f32 %v7085_v51  ;;  %v24289_v51 = vmax.f32 %v24288_v38, -1e+30  ;;  %v24291_v25 = vmax.f32 %v24290_v57, -1e+30  ;;  %v7053_v57 = vsub.f32 -1e+30, %v24294_v41 }
 0x708   :  { %18868 = vpow2.f32 %v7081_v61  ;;  %v7046_v29 = vsub.f32 -1e+30, %v24287_v23 }
 0x709   :  { %18870 = vpow2.f32 %v7095_v32  ;;  %v7031_v49 = vsub.f32 -1e+30, %v24289_v51  ;;  %v7044_v32 = vsub.f32 -1e+30, %v24291_v25  ;;  %v22679_v25 = vpop.xlane.xlu1 %7384 }
 0x70a   :  { %18872 = vpow2.f32 %v7101_v5 }
 0x70b   :  { %v18855_v26 = vpop.eup %18854  ;;  %18874 = vpow2.f32 %v7097_v45 }
 0x70c   :  { %v18857_v27 = vpop.eup %18856  ;;  %18876 = vpow2.f32 %v7115_v10  ;;  %v7131_v10 = vmul.f32 1.442695, %v7053_v57 }
 0x70d   :  { %18878 = vpow2.f32 %v7111_v46  ;;  %v22691_v46 = vpop.xlane.xlu0 %7387 }
 0x725   :  { %v17127_v34 = vpop.f32.mrb[60].mxu0 }
 0x726   :  { %v8237_v11 = vadd.f32 %v17127_v34, %v22569_v50  ;;  %v7615_v62 = vpop.f32.mrb[61].mxu0  ;;  %v7091_v50 = vmul.f32 1.442695, %v7033_v59  ;;  %v24292_v34 = vld [vmem:[#allocation52_spill] sm:$0xff]  ;;  %v24295_v59 = vld [vmem:[#allocation49_spill] sm:$0xff] }
 0x727   :  { %v8235_v6 = vadd.f32 %v7615_v62, %v7311_v52  ;;  %v17128_v61 = vpop.f32.mrb[62].mxu0  ;;  %v24293_v3 = vmax.f32 %v24292_v34, -1e+30  ;;  %v18859_v52 = vpop.eup %18858  ;;  %v7117_v62 = vmul.f32 1.442695, %v7046_v29 }
 0x728   :  { %v8333_v0 = vmul.f32 %v18853_v47, %v8237_v11  ;;  %v8238_v36 = vadd.f32 %v17128_v61, %v22587_v15  ;;  %v7618_v23 = vpop.f32.mrb[63].mxu0  ;;  %v18861_v15 = vpop.eup %18860  ;;  %v7087_v47 = vmul.f32 1.442695, %v7031_v49  ;;  %v24296_v61 = vmax.f32 %v24295_v59, -1e+30 }
 0x729   :  { %v7034_v5 = vsub.f32 -1e+30, %v24293_v3  ;;  %v8331_v38 = vmul.f32 %v18855_v26, %v8235_v6  ;;  %v8236_v51 = vadd.f32 %v7618_v23, %v7312_v54  ;;  %v18863_v13 = vpop.eup %18862  ;;  %v7113_v6 = vmul.f32 1.442695, %v7044_v32 }
 0x72a   :  { %v8334_v11 = vmul.f32 %v18857_v27, %v8238_v36  ;;  %v7051_v34 = vsub.f32 -1e+30, %v24296_v61  ;;  %v24297_v54 = vmax.f32 %v22202_v63, -1e+30  ;;  %v18865_v22 = vpop.eup %18864  ;;  %18880 = vpow2.f32 %v7091_v50 }
 0x72b   :  { %v8332_v3 = vmul.f32 %v18859_v52, %v8236_v51  ;;  %v7093_v29 = vmul.f32 1.442695, %v7034_v5  ;;  %v18867_v27 = vpop.eup %18866  ;;  %18882 = vpow2.f32 %v7117_v62  ;;  %v22689_v51 = vmul.f32 0.0, %v18863_v13  ;;  %v22695_v52 = vpop.xlane.xlu1 %7444 }
 0x72c   :  { %v7032_v26 = vsub.f32 -1e+30, %v24297_v54  ;;  %v22685_v45 = vpack.c.bf16 %v8334_v11, %v8333_v0  ;;  %v18869_v49 = vpop.eup %18868  ;;  %18884 = vpow2.f32 %v7087_v47  ;;  %v7127_v36 = vmul.f32 1.442695, %v7051_v34  ;;  %v22713_v34 = vpop.xlane.xlu0 %7447 }
 0x72d   :  { %v22687_v23 = vpack.c.bf16 %v8332_v3, %v8331_v38  ;;  %v18871_v32 = vpop.eup %18870  ;;  %18886 = vpow2.f32 %v7113_v6  ;;  %v22693_v0 = vmul.f32 0.0, %v18865_v22  ;;  %v24298_v5 = vmax.f32 %v22219_v39, -1e+30 }
 0x72e   :  { %v7089_v63 = vmul.f32 1.442695, %v7032_v26  ;;  %v18873_v50 = vpop.eup %18872  ;;  %18888 = vpow2.f32 %v7093_v29  ;;  %v7509_v62 = vadd.f32 %v22623_v21, %v22689_v51  ;;  %v22701_v41 = vmul.f32 0.0, %v18867_v27 }
 0x72f   :  { %v7054_v38 = vsub.f32 -1e+30, %v24298_v5  ;;  %18890 = vpow2.f32 %v7131_v10  ;;  %v24299_v13 = vmax.f32 %v22245_v7, -1e+30  ;;  %v7507_v11 = vadd.f32 %v22627_v18, %v22693_v0  ;;  %v18875_v21 = vpop.eup %18874 }
 0x730   :  { %v22707_v47 = vmul.f32 0.0, %v18869_v49  ;;  %18892 = vpow2.f32 %v7127_v36  ;;  %v24300_v59 = vmax.f32 %v22248_v58, -1e+30  ;;  %v7510_v39 = vadd.f32 %v22625_v40, %v22701_v41  ;;  %v18877_v3 = vpop.eup %18876  ;;  %v22719_v58 = vpop.xlane.xlu1 %7414 }
 0x731   :  { %v7052_v57 = vsub.f32 -1e+30, %v24299_v13  ;;  %18894 = vpow2.f32 %v7089_v63  ;;  %v7133_v6 = vmul.f32 1.442695, %v7054_v38  ;;  %v18879_v18 = vpop.eup %18878  ;;  %v22717_v26 = vmul.f32 0.0, %v18861_v15  ;;  %v22731_v63 = vpop.xlane.xlu0 %7417 }
 0x732   :  { %v7041_v61 = vsub.f32 -1e+30, %v24300_v59  ;;  %v7508_v7 = vadd.f32 %v22629_v43, %v22707_v47  ;;  %18896 = vrcp.f32 %v7509_v62  ;;  %v22721_v40 = vmul.f32 0.0, %v18871_v32 }
 0x733   :  { %v7129_v54 = vmul.f32 1.442695, %v7052_v57  ;;  %18898 = vrcp.f32 %v7507_v11  ;;  %v7517_v10 = vadd.f32 %v22611_v42, %v22717_v26  ;;  %v22725_v43 = vmul.f32 0.0, %v18873_v50 }
 0x734   :  { %v18881_v22 = vpop.eup %18880  ;;  %v7107_v29 = vmul.f32 1.442695, %v7041_v61  ;;  %18900 = vrcp.f32 %v7510_v39  ;;  %v7515_v15 = vadd.f32 %v22619_v24, %v22721_v40  ;;  %v22729_v36 = vmul.f32 0.0, %v18875_v21  ;;  %v22751_v39 = vpop.xlane.xlu1 %7408 }
 0x735   :  { %v18883_v27 = vpop.eup %18882  ;;  %18902 = vrcp.f32 %v7508_v7  ;;  %v7518_v32 = vadd.f32 %v22617_v4, %v22725_v43  ;;  %v22735_v38 = vmul.f32 0.0, %v18877_v3  ;;  %v24301_v50 = vmax.f32 %v22273_v37, -1e+30 }
 0x736   :  { %v18885_v49 = vpop.eup %18884  ;;  %18904 = vpow2.f32 %v7133_v6  ;;  %v7516_v13 = vadd.f32 %v22621_v12, %v22729_v36  ;;  %v22741_v24 = vmul.f32 0.0, %v18879_v18  ;;  %v24302_v11 = vmax.f32 %v22275_v8, -1e+30  ;;  %v22761_v8 = vpop.xlane.xlu0 %7411 }
 0x737   :  { %v18887_v5 = vpop.eup %18886  ;;  %18906 = vpow2.f32 %v7129_v54  ;;  %v7042_v62 = vsub.f32 -1e+30, %v24301_v50  ;;  %v7525_v4 = vadd.f32 %v22631_v48, %v22735_v38  ;;  %v22749_v61 = vmul.f32 0.0, %v18881_v22 }
 0x738   :  { %v18889_v42 = vpop.eup %18888  ;;  %18908 = vpow2.f32 %v7107_v29  ;;  %v7039_v59 = vsub.f32 -1e+30, %v24302_v11  ;;  %v7523_v12 = vadd.f32 %v22648_v31, %v22741_v24  ;;  %v22757_v21 = vmul.f32 0.0, %v18883_v27 }
 0x739   :  { %v22743_v57 = vpop.eup %18890  ;;  %18910 = vrcp.f32 %v7517_v10  ;;  %v22759_v7 = vmul.f32 0.0, %v18885_v49  ;;  %v7513_v48 = vadd.f32 %v22661_v55, %v22749_v61  ;;  %v22765_v18 = vmul.f32 0.0, %v18889_v42  ;;  %v22775_v42 = vpop.xlane.xlu1 %7438 }
 0x73a   :  { %v22753_v37 = vpop.eup %18892  ;;  %18912 = vrcp.f32 %v7515_v15  ;;  %v24303_v31 = vmax.f32 %v22341_v14, -1e+30  ;;  %v7526_v10 = vadd.f32 %v22644_v17, %v22757_v21  ;;  %24304 = vst [vmem:[#allocation65_spill] sm:$0xff] %v22775_v42  ;;  %v22780_v17 = vpop.xlane.xlu0 %7441 }
 0x73b   :  { %v18895_v6 = vpop.eup %18894  ;;  %18914 = vrcp.f32 %v7518_v32  ;;  %v7511_v55 = vadd.f32 %v22679_v25, %v22759_v7 }
 0x73c   :  { %v17135_v3 = vpop.f32.mrb[40].mxu1  ;;  %v18897_v29 = vpop.eup %18896  ;;  %v7040_v27 = vsub.f32 -1e+30, %v24303_v31  ;;  %18916 = vrcp.f32 %v7516_v13  ;;  %v7514_v13 = vadd.f32 %v22675_v35, %v22765_v18  ;;  %v22783_v25 = vmul.f32 0.0, %v18895_v6 }
 0x73d   :  { %v8241_v54 = vadd.f32 %v17135_v3, %v22689_v51  ;;  %v7670_v22 = vpop.f32.mrb[41].mxu1  ;;  %v18899_v32 = vpop.eup %18898  ;;  %18918 = vrcp.f32 %v7525_v4  ;;  %v24305_v35 = vmax.f32 %v22324_v60, -1e+30  ;;  %v8455_v60 = vshrl.u32 %v22685_v45, 16 }
 0x73e   :  { %v8239_v49 = vadd.f32 %v7670_v22, %v22693_v0  ;;  %v17136_v15 = vpop.f32.mrb[42].mxu1  ;;  %v18901_v14 = vpop.eup %18900  ;;  %18920 = vrcp.f32 %v7523_v12  ;;  %v7109_v22 = vmul.f32 1.442695, %v7042_v62  ;;  %v7105_v6 = vmul.f32 1.442695, %v7040_v27 }
 0x73f   :  { %v8337_v51 = vmul.f32 %v18897_v29, %v8241_v54  ;;  %v8242_v50 = vadd.f32 %v17136_v15, %v22701_v41  ;;  %v7673_v11 = vpop.f32.mrb[43].mxu1  ;;  %v18903_v4 = vpop.eup %18902  ;;  %18922 = vrcp.f32 %v7513_v48  ;;  %v7103_v29 = vmul.f32 1.442695, %v7039_v59 }
 0x740   :  { %v8335_v0 = vmul.f32 %v18899_v32, %v8239_v49  ;;  %v8240_v3 = vadd.f32 %v7673_v11, %v22707_v47  ;;  %v18905_v54 = vpop.eup %18904  ;;  %18924 = vrcp.f32 %v7526_v10  ;;  %v22785_v41 = vmul.f32 0.0, %v18887_v5  ;;  %v22795_v32 = vpop.xlane.xlu1 %7432 }
 0x741   :  { %v8338_v31 = vmul.f32 %v18901_v14, %v8242_v50  ;;  %v18907_v15 = vpop.eup %18906  ;;  %v7061_v42 = vsub.f32 -1e+30, %v24305_v35  ;;  %18926 = vrcp.f32 %v7511_v55  ;;  %v7512_v47 = vadd.f32 %v22691_v46, %v22783_v25  ;;  %v22802_v27 = vpop.xlane.xlu0 %7435 }
 0x742   :  { %v8336_v12 = vmul.f32 %v18903_v4, %v8240_v3  ;;  %v22791_v62 = vpop.eup %18908  ;;  %v7524_v48 = vadd.f32 %v22657_v20, %v22785_v41  ;;  %18928 = vrcp.f32 %v7514_v13  ;;  %v8407_v20 = vshrl.u32 %v22687_v23, 16 }
 0x743   :  { %v8382_v49 = vpack.c.bf16 %v8338_v31, %v8337_v51  ;;  %v18911_v10 = vpop.eup %18910  ;;  %18930 = vrcp.f32 %v7512_v47 }
 0x744   :  { %v8381_v59 = vpack.c.bf16 %v8336_v12, %v8335_v0  ;;  %v17151_v5 = vpop.f32.mrb[44].mxu1  ;;  %v18913_v11 = vpop.eup %18912  ;;  %18932 = vrcp.f32 %v7524_v48  ;;  %v22821_v48 = vmul.f32 0.0, %v22743_v57 }
 0x745   :  { %v22799_v55 = vpack.i.b16 %v8382_v49, %v22685_v45  ;;  %v8456_v50 = vshrl.u32 %v8382_v49, 16  ;;  %v8249_v46 = vadd.f32 %v17151_v5, %v22717_v26  ;;  %v7780_v51 = vpop.f32.mrb[45].mxu1  ;;  %v18915_v4 = vpop.eup %18914  ;;  %18934 = vpow2.f32 %v7109_v22 }
 0x746   :  { %v22806_v14 = vpack.i.b16 %v8381_v59, %v22687_v23  ;;  %v8408_v13 = vshrl.u32 %v8381_v59, 16  ;;  %v8247_v0 = vadd.f32 %v7780_v51, %v22721_v40  ;;  %v17152_v3 = vpop.f32.mrb[46].mxu1  ;;  %v18917_v35 = vpop.eup %18916  ;;  %v24307_v40 = vmax.f32 %v22360_v2, -1e+30 }
 0x747   :  { %v22809_v45 = vpack.i.b16 %v8456_v50, %v8455_v60  ;;  %v8345_v31 = vmul.f32 %v18911_v10, %v8249_v46  ;;  %v8250_v26 = vadd.f32 %v17152_v3, %v22725_v43  ;;  %v7783_v12 = vpop.f32.mrb[47].mxu1  ;;  %18936 = vpow2.f32 %v7103_v29  ;;  %v7451_v50 = vpop.xlane.xlu1 %7450 }
 0x748   :  { %24306 = vst [vmem:[#allocation67_spill] sm:$0xff] %v22806_v14  ;;  %v22812_v49 = vpack.i.b16 %v8408_v13, %v8407_v20  ;;  %v8343_v5 = vmul.f32 %v18913_v11, %v8247_v0  ;;  %v8248_v23 = vadd.f32 %v7783_v12, %v22729_v36  ;;  %v18919_v14 = vpop.eup %18918  ;;  %v7059_v59 = vsub.f32 -1e+30, %v24307_v40  ;;  %v7454_v20 = vpop.xlane.xlu0 %7453 }
 0x749   :  { %v8346_v51 = vmul.f32 %v18915_v4, %v8250_v26  ;;  %v18921_v47 = vpop.eup %18920  ;;  %v22818_v43 = vmul.f32 0.0, %v22753_v37  ;;  %v22823_v46 = vmul.f32 0.0, %v18905_v54  ;;  %v7147_v11 = vmul.f32 1.442695, %v7061_v42 }
 0x74a   :  { %v8344_v60 = vmul.f32 %v18917_v35, %v8248_v23  ;;  %v18923_v10 = vpop.eup %18922  ;;  %18938 = vpow2.f32 %v7105_v6  ;;  %v22827_v2 = vmul.f32 0.0, %v18907_v15  ;;  %v24308_v37 = vmax.f32 %v22386_v16, -1e+30 }
 0x74b   :  { %v22825_v36 = vpack.c.bf16 %v8346_v51, %v8345_v31  ;;  %v18925_v22 = vpop.eup %18924  ;;  %v7143_v4 = vmul.f32 1.442695, %v7059_v59  ;;  %v7531_v57 = vadd.f32 %v22695_v52, %v22818_v43  ;;  %v7533_v15 = vadd.f32 %v7451_v50, %v22821_v48 }
 0x74c   :  { %v8385_v29 = vpack.c.bf16 %v8344_v60, %v8343_v5  ;;  %v17143_v13 = vpop.f32.mrb[64].mxu0  ;;  %v18927_v0 = vpop.eup %18926  ;;  %v7049_v3 = vsub.f32 -1e+30, %v24308_v37  ;;  %v7532_v42 = vadd.f32 %v22713_v34, %v22827_v2  ;;  %v7534_v23 = vadd.f32 %v7454_v20, %v22823_v46 }
 0x74d   :  { %v8245_v54 = vadd.f32 %v17143_v13, %v22749_v61  ;;  %v17167_v31 = vpop.f32.mrb[48].mxu1  ;;  %v7725_v26 = vpop.f32.mrb[65].mxu0  ;;  %18940 = vrcp.f32 %v7531_v57 }
 0x74e   :  { %v18929_v12 = vpop.eup %18928  ;;  %v8257_v6 = vadd.f32 %v17167_v31, %v22735_v38  ;;  %v8243_v35 = vadd.f32 %v7725_v26, %v22759_v7  ;;  %v7890_v16 = vpop.f32.mrb[49].mxu1  ;;  %18942 = vrcp.f32 %v7533_v15 }
 0x74f   :  { %v17144_v5 = vpop.f32.mrb[66].mxu0  ;;  %v8341_v40 = vmul.f32 %v18923_v10, %v8245_v54  ;;  %v8255_v52 = vadd.f32 %v7890_v16, %v22741_v24  ;;  %v17168_v59 = vpop.f32.mrb[50].mxu1  ;;  %v7123_v54 = vmul.f32 1.442695, %v7049_v3  ;;  %18944 = vrcp.f32 %v7532_v42  ;;  %v24311_v42 = vld [vmem:[#allocation56_spill] sm:$0xff] }
 0x750   :  { %v8246_v61 = vadd.f32 %v17144_v5, %v22765_v18  ;;  %v7728_v51 = vpop.f32.mrb[67].mxu0  ;;  %v8353_v60 = vmul.f32 %v18919_v14, %v8257_v6  ;;  %v8339_v13 = vmul.f32 %v18927_v0, %v8243_v35  ;;  %v8258_v34 = vadd.f32 %v17168_v59, %v22757_v21  ;;  %v7893_v38 = vpop.f32.mrb[51].mxu1 }
 0x751   :  { %v8244_v50 = vadd.f32 %v7728_v51, %v22783_v25  ;;  %v18931_v37 = vpop.eup %18930  ;;  %v8351_v7 = vmul.f32 %v18921_v47, %v8255_v52  ;;  %v8256_v20 = vadd.f32 %v7893_v38, %v22785_v41  ;;  %v24309_v14 = vmax.f32 %v22389_v33, -1e+30 }
 0x752   :  { %v8342_v31 = vmul.f32 %v18929_v12, %v8246_v61  ;;  %v18933_v10 = vpop.eup %18932  ;;  %v8354_v24 = vmul.f32 %v18925_v22, %v8258_v34  ;;  %v24310_v35 = vmax.f32 %v22395_v56, -1e+30  ;;  %18946 = vrcp.f32 %v7534_v23 }
 0x753   :  { %v8340_v18 = vmul.f32 %v18931_v37, %v8244_v50  ;;  %v18935_v26 = vpop.eup %18934  ;;  %v7050_v0 = vsub.f32 -1e+30, %v24309_v14  ;;  %v8352_v6 = vmul.f32 %v18933_v10, %v8256_v20  ;;  %v8464_v3 = vshrl.u32 %v22825_v36, 16 }
 0x754   :  { %v8384_v21 = vpack.c.bf16 %v8342_v31, %v8341_v40  ;;  %v18937_v25 = vpop.eup %18936  ;;  %v7047_v57 = vsub.f32 -1e+30, %v24310_v35  ;;  %v22849_v47 = vpack.c.bf16 %v8354_v24, %v8353_v60  ;;  %v24312_v16 = vmax.f32 %v24311_v42, -1e+30 }
 0x755   :  { %v8383_v41 = vpack.c.bf16 %v8340_v18, %v8339_v13  ;;  %v22855_v15 = vpack.c.bf16 %v8352_v6, %v8351_v7  ;;  %v18939_v33 = vpop.eup %18938  ;;  %v8416_v40 = vshrl.u32 %v8385_v29, 16  ;;  %v7125_v23 = vmul.f32 1.442695, %v7050_v0  ;;  %v24315_v6 = vld [vmem:[#allocation57_spill] sm:$0xff] }
 0x756   :  { %v22853_v22 = vpack.i.b16 %v22825_v36, %v8384_v21  ;;  %v8463_v12 = vshrl.u32 %v8384_v21, 16  ;;  %v7048_v5 = vsub.f32 -1e+30, %v24312_v16  ;;  %18948 = vpow2.f32 %v7147_v11 }
 0x757   :  { %v22859_v52 = vpack.i.b16 %v8385_v29, %v8383_v41  ;;  %v8415_v56 = vshrl.u32 %v8383_v41, 16  ;;  %v7119_v59 = vmul.f32 1.442695, %v7047_v57  ;;  %18950 = vpow2.f32 %v7143_v4  ;;  %v18941_v13 = vpop.eup %18940 }
 0x758   :  { %v22861_v61 = vpack.i.b16 %v8464_v3, %v8463_v12  ;;  %18952 = vpow2.f32 %v7123_v54  ;;  %v7121_v36 = vmul.f32 1.442695, %v7048_v5  ;;  %v22866_v34 = vmul.f32 0.0, %v22791_v62  ;;  %v18943_v38 = vpop.eup %18942 }
 0x759   :  { %v22863_v51 = vpack.i.b16 %v8416_v40, %v8415_v56  ;;  %v17183_v60 = vpop.f32.mrb[52].mxu1  ;;  %18954 = vpow2.f32 %v7125_v23  ;;  %v22869_v37 = vmul.f32 0.0, %v18937_v25  ;;  %v22871_v11 = vmul.f32 0.0, %v18935_v26  ;;  %v18945_v31 = vpop.eup %18944 }
 0x75a   :  { %v8265_v29 = vadd.f32 %v17183_v60, %v22821_v48  ;;  %v8000_v50 = vpop.f32.mrb[53].mxu1  ;;  %18956 = vpow2.f32 %v7119_v59  ;;  %v7521_v20 = vadd.f32 %v22719_v58, %v22866_v34  ;;  %v22876_v10 = vmul.f32 0.0, %v18939_v33  ;;  %v17828_v59 = vld [vmem:[#allocation13] ss:$12 sps:$4 sm:$0xff]  }
 0x75b   :  { %v8263_v7 = vadd.f32 %v8000_v50, %v22818_v43  ;;  %v17184_v4 = vpop.f32.mrb[54].mxu1  ;;  %18958 = vpow2.f32 %v7121_v36  ;;  %v7519_v18 = vadd.f32 %v22751_v39, %v22869_v37  ;;  %v24313_v43 = vld [vmem:[#allocation44_spill] sm:$0xff]  ;;  %v24316_v25 = vmax.f32 %v24315_v6, -1e+30 }
 0x75c   :  { %v8361_v62 = vmul.f32 %v18943_v38, %v8265_v29  ;;  %v8266_v54 = vadd.f32 %v17184_v4, %v22823_v46  ;;  %v8003_v48 = vpop.f32.mrb[55].mxu1  ;;  %v18947_v24 = vpop.eup %18946  ;;  %v24314_v0 = vmax.f32 %v24313_v43, -1e+30  ;;  %v7522_v35 = vadd.f32 %v22731_v63, %v22871_v11  ;;  %v17830_v36 = vld [vmem:[#allocation13 + $0x4] ss:$12 sps:$4 sm:$0xff]  }
 0x75d   :  { %v8359_v26 = vmul.f32 %v18941_v13, %v8263_v7  ;;  %v8264_v14 = vadd.f32 %v8003_v48, %v22827_v2  ;;  %v7060_v58 = vsub.f32 -1e+30, %v24316_v25  ;;  %v7520_v46 = vadd.f32 %v22761_v8, %v22876_v10  ;;  %v17833_v29 = vld [vmem:[#allocation13 + $0x1c] ss:$12 sps:$4 sm:$0xff]   ;;  %10162 = vmatprep.subr.bf16.mxu0 %v17830_v36 }
 0x75e   :  { %v7062_v21 = vsub.f32 -1e+30, %v24314_v0  ;;  %v8362_v57 = vmul.f32 %v18947_v24, %v8266_v54  ;;  %18960 = vrcp.f32 %v7521_v20  ;;  %v24317_v2 = vmax.f32 %v22504_v30, -1e+30  ;;  %10163 = vmatpush1.bf16.msra.mxu0 %v17828_v59  ;;  %v24325_v59 = vld [vmem:[#allocation58_spill] sm:$0xff] }
 0x75f   :  { %v8360_v41 = vmul.f32 %v18945_v31, %v8264_v14  ;;  %18962 = vrcp.f32 %v7519_v18  ;;  %v7145_v5 = vmul.f32 1.442695, %v7060_v58  ;;  %v24318_v63 = vmax.f32 %v22509_v53, -1e+30  ;;  %v17831_v31 = vld [vmem:[#allocation13 + $0x18] ss:$12 sps:$4 sm:$0xff]   ;;  %10164 = vmatprep.subr.bf16.mxu0 %v17833_v29 }
 0x760   :  { %v22890_v3 = vpack.c.bf16 %v8362_v57, %v8361_v62  ;;  %v18949_v39 = vpop.eup %18948  ;;  %v7067_v12 = vsub.f32 -1e+30, %v24317_v2  ;;  %v7149_v16 = vmul.f32 1.442695, %v7062_v21  ;;  %18964 = vrcp.f32 %v7522_v35 }
 0x761   :  { %v22894_v33 = vpack.c.bf16 %v8360_v41, %v8359_v26  ;;  %v18951_v42 = vpop.eup %18950  ;;  %v7055_v40 = vsub.f32 -1e+30, %v24318_v63  ;;  %v24319_v8 = vmax.f32 %v22514_v44, -1e+30  ;;  %18966 = vrcp.f32 %v7520_v46 }
 0x762   :  { %v18953_v56 = vpop.eup %18952  ;;  %v24320_v30 = vmax.f32 %v22518_v1, -1e+30  ;;  %v7159_v38 = vmul.f32 1.442695, %v7067_v12  ;;  %v24321_v7 = vmax.f32 %v22525_v9, -1e+30  ;;  %18968 = vpow2.f32 %v7149_v16  ;;  %10165 = vmatpush1.bf16.msra.mxu0 %v17831_v31 }
 0x763   :  { %v7068_v23 = vsub.f32 -1e+30, %v24319_v8  ;;  %v18955_v60 = vpop.eup %18954  ;;  %v7135_v53 = vmul.f32 1.442695, %v7055_v40  ;;  %18970 = vpow2.f32 %v7145_v5  ;;  %v22904_v62 = vmul.f32 0.0, %v18951_v42  ;;  %v24331_v31 = vld [vmem:[#allocation70_spill] sm:$0xff] }
 0x764   :  { %v7058_v13 = vsub.f32 -1e+30, %v24320_v30  ;;  %v18957_v50 = vpop.eup %18956  ;;  %v7057_v4 = vsub.f32 -1e+30, %v24321_v7  ;;  %v22906_v54 = vmul.f32 0.0, %v18949_v39  ;;  %v22908_v24 = vmul.f32 0.0, %v18953_v56 }
 0x765   :  { %v18959_v44 = vpop.eup %18958  ;;  %v7161_v20 = vmul.f32 1.442695, %v7068_v23  ;;  %v17836_v1 = vld [vmem:[#allocation13 + $0x34] ss:$12 sps:$4 sm:$0xff]   ;;  %v22910_v18 = vmul.f32 0.0, %v18957_v50  ;;  %v22912_v9 = vmul.f32 0.0, %v18955_v60  ;;  %18972 = vpow2.f32 %v7159_v38 }
 0x766   :  { %v7141_v48 = vmul.f32 1.442695, %v7058_v13  ;;  %v24322_v14 = vmax.f32 %v22532_v19, -1e+30  ;;  %v7139_v0 = vmul.f32 1.442695, %v7057_v4  ;;  %18974 = vpow2.f32 %v7135_v53  ;;  %10166 = vmatprep.subr.bf16.mxu0 %v17836_v1  ;;  %v7469_v4 = vpop.xlane.xlu1 %7468 }
 0x767   :  { %v24323_v58 = vmax.f32 %v22537_v28, -1e+30  ;;  %v22919_v57 = vmul.f32 0.0, %v18959_v44  ;;  %v17834_v39 = vld [vmem:[#allocation13 + $0x30] ss:$12 sps:$4 sm:$0xff]   ;;  %18976 = vpow2.f32 %v7161_v20  ;;  %v7527_v28 = vadd.f32 %v22795_v32, %v22910_v18 }
 0x768   :  { %v7065_v43 = vsub.f32 -1e+30, %v24322_v14  ;;  %v18961_v25 = vpop.eup %18960  ;;  %v24324_v19 = vld [vmem:[#allocation65_spill] sm:$0xff]  ;;  %18978 = vpow2.f32 %v7141_v48  ;;  %v7530_v8 = vadd.f32 %v22780_v17, %v22912_v9  ;;  %v24326_v36 = vmax.f32 %v24325_v59, -1e+30  ;;  %10167 = vmatpush1.bf16.msra.mxu0 %v17834_v39  ;;  %v7472_v14 = vpop.xlane.xlu0 %7471 }
 0x769   :  { %v17159_v26 = vpop.f32.mrb[68].mxu0  ;;  %v7056_v35 = vsub.f32 -1e+30, %v24323_v58  ;;  %v18963_v2 = vpop.eup %18962  ;;  %v7529_v12 = vadd.f32 %v24324_v19, %v22908_v24  ;;  %18980 = vpow2.f32 %v7139_v0  ;;  %v7528_v30 = vadd.f32 %v22802_v27, %v22919_v57  ;;  %v24327_v32 = vld [vmem:[#allocation61_spill] sm:$0xff]  ;;  %v17837_v48 = vld [vmem:[#allocation13 + $0x48] ss:$12 sps:$4 sm:$0xff]  }
 0x76a   :  { %v8253_v21 = vadd.f32 %v17159_v26, %v22866_v34  ;;  %v7835_v6 = vpop.f32.mrb[69].mxu0  ;;  %v18965_v5 = vpop.eup %18964  ;;  %v7155_v56 = vmul.f32 1.442695, %v7065_v43  ;;  %v24328_v29 = vmax.f32 %v24327_v32, -1e+30  ;;  %v8472_v43 = vshrl.u32 %v22849_v47, 16 }
 0x76b   :  { %v8251_v46 = vadd.f32 %v7835_v6, %v22869_v37  ;;  %v17160_v41 = vpop.f32.mrb[70].mxu0  ;;  %v18967_v40 = vpop.eup %18966  ;;  %v7137_v60 = vmul.f32 1.442695, %v7056_v35  ;;  %18982 = vrcp.f32 %v7529_v12  ;;  %v24332_v44 = vmax.f32 %v24331_v31, -1e+30 }
 0x76c   :  { %v8349_v42 = vmul.f32 %v18961_v25, %v8253_v21  ;;  %v8254_v34 = vadd.f32 %v17160_v41, %v22871_v11  ;;  %v7838_v16 = vpop.f32.mrb[71].mxu0  ;;  %v7063_v11 = vsub.f32 -1e+30, %v24326_v36  ;;  %v7069_v50 = vsub.f32 -1e+30, %v24328_v29  ;;  %v18969_v17 = vpop.eup %18968 }
 0x76d   :  { %v8347_v63 = vmul.f32 %v18963_v2, %v8251_v46  ;;  %v8252_v37 = vadd.f32 %v7838_v16, %v22876_v10  ;;  %v24329_v10 = vld [vmem:[#allocation55_spill] sm:$0xff]  ;;  %v7064_v20 = vsub.f32 -1e+30, %v24332_v44  ;;  %18984 = vrcp.f32 %v7527_v28  ;;  %v17839_v26 = vld [vmem:[#allocation13 + $0x4c] ss:$12 sps:$4 sm:$0xff]   ;;  %v18971_v27 = vpop.eup %18970  ;;  %v7478_v32 = vpop.xlane.xlu0 %7477 }
 0x76e   :  { %v8350_v23 = vmul.f32 %v18965_v5, %v8254_v34  ;;  %v24330_v38 = vmax.f32 %v24329_v10, -1e+30  ;;  %18986 = vrcp.f32 %v7530_v8  ;;  %v8424_v6 = vshrl.u32 %v22855_v15, 16  ;;  %10168 = vmatprep.subr.bf16.mxu0 %v17839_v26  ;;  %v17840_v16 = vld [vmem:[#allocation13 + $0x60] ss:$12 sps:$4 sm:$0xff]  }
 0x76f   :  { %v8348_v13 = vmul.f32 %v18967_v40, %v8252_v37  ;;  %18988 = vrcp.f32 %v7528_v30  ;;  %v22948_v35 = vpop.eup %18972  ;;  %v7151_v46 = vmul.f32 1.442695, %v7063_v11  ;;  %10169 = vmatpush1.bf16.msra.mxu0 %v17837_v48  ;;  %v17842_v5 = vld [vmem:[#allocation13 + $0x64] ss:$12 sps:$4 sm:$0xff]   ;;  %v7475_v37 = vpop.xlane.xlu1 %7474  ;;  %v7153_v59 = vmul.f32 1.442695, %v7064_v20 }
 0x770   :  { %v7066_v7 = vsub.f32 -1e+30, %v24330_v38  ;;  %v8388_v53 = vpack.c.bf16 %v8350_v23, %v8349_v42  ;;  %v22956_v2 = vpop.eup %18974  ;;  %18990 = vpow2.f32 %v7155_v56  ;;  %10170 = vmatprep.subr.bf16.mxu0 %v17842_v5  ;;  %v7539_v30 = vadd.f32 %v7469_v4, %v22904_v62  ;;  %v17843_v38 = vld [vmem:[#allocation13 + $0x78] ss:$12 sps:$4 sm:$0xff]  }
 0x771   :  { %v8387_v1 = vpack.c.bf16 %v8348_v13, %v8347_v63  ;;  %v22964_v28 = vpop.eup %18976  ;;  %v7163_v63 = vmul.f32 1.442695, %v7069_v50  ;;  %18992 = vpow2.f32 %v7137_v60  ;;  %v22979_v13 = vmul.f32 0.0, %v18971_v27  ;;  %v17851_v5 = vld [vmem:[#allocation13 + $0xac] ss:$12 sps:$4 sm:$0xff]  }
 0x772   :  { %v22942_v0 = vpack.i.b16 %v22849_v47, %v8388_v53  ;;  %v8471_v21 = vshrl.u32 %v8388_v53, 16  ;;  %v7157_v19 = vmul.f32 1.442695, %v7066_v7  ;;  %v22970_v23 = vpop.eup %18978  ;;  %18994 = vpow2.f32 %v7151_v46  ;;  %v17845_v7 = vld [vmem:[#allocation13 + $0x7c] ss:$12 sps:$4 sm:$0xff]  }
 0x773   :  { %v22946_v25 = vpack.i.b16 %v22855_v15, %v8387_v1  ;;  %v8423_v58 = vshrl.u32 %v8387_v1, 16  ;;  %v24333_v15 = vld [vmem:[#allocation67_spill] sm:$0xff]  ;;  %v22976_v56 = vpop.eup %18980  ;;  %10171 = vmatpush1.bf16.msra.mxu0 %v17840_v16  ;;  %v7541_v60 = vadd.f32 %v7475_v37, %v22906_v54  ;;  %v22982_v50 = vmul.f32 0.0, %v18969_v17 }
 0x774   :  { %v22950_v41 = vpack.i.b16 %v8472_v43, %v8471_v21  ;;  %v8767_v39 = vcombine.low %v22799_v55, %v22942_v0  ;;  %v8768_v47 = vcombine.high %v22799_v55, %v22942_v0  ;;  %18996 = vpow2.f32 %v7157_v19  ;;  %10172 = vmatprep.subr.bf16.mxu0 %v17845_v7  ;;  %v24334_v46 = vld [vmem:[#allocation71_spill] sm:$0xff]  ;;  %v17849_v7 = vld [vmem:[#allocation13 + $0xa8] ss:$12 sps:$4 sm:$0xff]  }
 0x775   :  { %v22958_v12 = vpack.i.b16 %v8424_v6, %v8423_v58  ;;  %v8499_v42 = vcombine.low %v24333_v15, %v22946_v25  ;;  %v8500_v34 = vcombine.high %v24333_v15, %v22946_v25  ;;  %v18983_v53 = vpop.eup %18982  ;;  %18998 = vpow2.f32 %v7163_v63  ;;  %v17848_v58 = vld [vmem:[#allocation13 + $0x94] ss:$12 sps:$4 sm:$0xff]  }
 0x776   :  { %v8901_v40 = vcombine.low %v22809_v45, %v22950_v41  ;;  %v8902_v8 = vcombine.high %v22809_v45, %v22950_v41  ;;  %v7540_v31 = vadd.f32 %v7472_v14, %v22979_v13  ;;  %19000 = vpow2.f32 %v7153_v59  ;;  %v17855_v59 = vld [vmem:[#allocation13 + $0xc8] ss:$12 sps:$4 sm:$0xff]   ;;  %v17865_v41 = vld [vmem:[#allocation13 + $0xf8] ss:$12 sps:$4 sm:$0xff]  }
 0x777   :  { %v8633_v36 = vcombine.low %v22812_v49, %v22958_v12  ;;  %v8634_v11 = vcombine.high %v22812_v49, %v22958_v12  ;;  %v18985_v1 = vpop.eup %18984  ;;  %v7542_v48 = vadd.f32 %v7478_v32, %v22982_v50  ;;  %19002 = vrcp.f32 %v7539_v30  ;;  %10173 = vmatpush1.bf16.msra.mxu0 %v17843_v38  ;;  %16799 = vmatprep.subr.bf16.mxu1 %v17855_v59  ;;  %v17859_v12 = vld [vmem:[#allocation13 + $0xdc] ss:$12 sps:$4 sm:$0xff]  }
 0x778   :  { %v18987_v27 = vpop.eup %18986  ;;  %19004 = vrcp.f32 %v7541_v60  ;;  %v24335_v19 = vmax.f32 %v24334_v46, -1e+30  ;;  %v8480_v63 = vshrl.u32 %v22890_v3, 16  ;;  %10174 = vmatprep.subr.bf16.mxu0 %v17848_v58  ;;  %v8432_v32 = vshrl.u32 %v22894_v33, 16  ;;  %v17866_v58 = vld [vmem:[#allocation13 + $0x38] ss:$12 sps:$4 sm:$0xff]  }
 0x779   :  { %v18989_v14 = vpop.eup %18988  ;;  %19006 = vrcp.f32 %v7540_v31 }
 0x77a   :  { %v22992_v16 = vsub.f32 -1e+30, %v24335_v19  ;;  %19008 = vrcp.f32 %v7542_v48  ;;  %v22995_v30 = vpop.eup %18990 }
 0x77b   :  { %v17175_v29 = vpop.f32.mrb[72].mxu0  ;;  %v23010_v31 = vpop.eup %18992 }
 0x77c   :  { %v7945_v10 = vpop.f32.mrb[73].mxu0  ;;  %v8261_v44 = vadd.f32 %v17175_v29, %v22908_v24  ;;  %v24336_v29 = vld [vmem:[#allocation47_spill] sm:$0xff] }
 0x77d   :  { %v8259_v4 = vadd.f32 %v7945_v10, %v22910_v18  ;;  %v17176_v20 = vpop.f32.mrb[74].mxu0  ;;  %v17846_v18 = vld [vmem:[#allocation13 + $0x90] ss:$12 sps:$4 sm:$0xff]   ;;  %v23002_v60 = vrot.slane %v8767_v39, %v24336_v29  ;;  %v23008_v10 = vrot.slane %v8768_v47, %v24336_v29  ;;  %v23022_v39 = vrot.slane %v8500_v34, %v24336_v29  ;;  %v17861_v34 = vld [vmem:[#allocation13 + $0x20] ss:$12 sps:$4 sm:$0xff]  }
 0x77e   :  { %v8262_v26 = vadd.f32 %v17176_v20, %v22912_v9  ;;  %v7948_v17 = vpop.f32.mrb[75].mxu0  ;;  %v8357_v43 = vmul.f32 %v18983_v53, %v8261_v44  ;;  %10175 = vmatpush1.bf16.msra.mxu0 %v17846_v18  ;;  %v17860_v53 = vld [vmem:[#allocation13 + $0xe0] ss:$12 sps:$4 sm:$0xff]   ;;  %v23016_v44 = vrot.slane %v8499_v42, %v24336_v29  ;;  %v17854_v47 = vld [vmem:[#allocation13 + $0xc4] ss:$12 sps:$4 sm:$0xff]   ;;  %v23031_v42 = vrot.slane %v8901_v40, %v24336_v29 }
 0x77f   :  { %v8355_v21 = vmul.f32 %v18985_v1, %v8259_v4  ;;  %v8260_v6 = vadd.f32 %v7948_v17, %v22919_v57  ;;  %v17856_v57 = vld [vmem:[#allocation13 + $0x8] ss:$12 sps:$4 sm:$0xff]   ;;  %10176 = vmatprep.subr.bf16.mxu0 %v17851_v5  ;;  %v23025_v4 = vpop.eup %18994  ;;  %v23037_v25 = vrot.slane %v8902_v8, %v24336_v29  ;;  %v23046_v1 = vrot.slane %v8633_v36, %v24336_v29 }
 0x780   :  { %v8358_v24 = vmul.f32 %v18987_v27, %v8262_v26  ;;  %16800 = vmatpush3.bf16.msra.mxu1 %v17856_v57  ;;  %v23040_v20 = vpop.eup %18996  ;;  %v17852_v27 = vld [vmem:[#allocation13 + $0xc0] ss:$12 sps:$4 sm:$0xff]  }
 0x781   :  { %v8356_v9 = vmul.f32 %v18989_v14, %v8260_v6  ;;  %16801 = vmatprep.subr.bf16.mxu1 %v17860_v53  ;;  %v23050_v8 = vpop.eup %18998 }
 0x782   :  { %v8392_v37 = vpack.c.bf16 %v8358_v24, %v8357_v43  ;;  %10177 = vmatpush1.bf16.msra.mxu0 %v17849_v7  ;;  %v23062_v43 = vpop.eup %19000 }
 0x783   :  { %v8391_v38 = vpack.c.bf16 %v8356_v9, %v8355_v21  ;;  %10178 = vmatprep.subr.bf16.mxu0 %v17854_v47 }
 0x784   :  { %v8477_v55 = vpack.i.b16 %v22890_v3, %v8392_v37  ;;  %v8479_v0 = vshrl.u32 %v8392_v37, 16  ;;  %16802 = vmatpush3.bf16.msra.mxu1 %v17861_v34  ;;  %v17870_v37 = vld [vmem:[#allocation13 + $0x110] ss:$12 sps:$4 sm:$0xff]  }
 0x785   :  { %v8429_v3 = vpack.i.b16 %v22894_v33, %v8391_v38  ;;  %v8431_v15 = vshrl.u32 %v8391_v38, 16  ;;  %v23056_v33 = vrot.slane %v8634_v11, %v24336_v29  ;;  %v23068_v11 = vpop.eup %19002  ;;  %16803 = vmatprep.subr.bf16.mxu1 %v17865_v41 }
 0x786   :  { %v8481_v40 = vpack.i.b16 %v8480_v63, %v8479_v0  ;;  %v8783_v48 = vcombine.low %v22853_v22, %v8477_v55  ;;  %v8784_v45 = vcombine.high %v22853_v22, %v8477_v55  ;;  %v23076_v46 = vpop.eup %19004  ;;  %10179 = vmatpush1.bf16.msra.mxu0 %v17852_v27  ;;  %v24337_v55 = vld [vmem:[#allocation48_spill] sm:$0xff] }
 0x787   :  { %v23058_v26 = vpack.i.b16 %v8432_v32, %v8431_v15  ;;  %v8515_v36 = vcombine.low %v22859_v52, %v8429_v3  ;;  %v8516_v17 = vcombine.high %v22859_v52, %v8429_v3  ;;  %v23082_v59 = vpop.eup %19006  ;;  %10180 = vmatprep.subr.bf16.mxu0 %v17859_v12  ;;  %v17862_v12 = vld [vmem:[#allocation13 + $0xf0] ss:$12 sps:$4 sm:$0xff]  }
 0x788   :  { %v8791_v22 = vrot.slane %v8783_v48, %v24336_v29  ;;  %v8798_v21 = vrot.slane %v8784_v45, %v24336_v29  ;;  %v8917_v6 = vcombine.low %v22861_v61, %v8481_v40  ;;  %v8918_v49 = vcombine.high %v22861_v61, %v8481_v40  ;;  %v23088_v53 = vpop.eup %19008  ;;  %16804 = vmatpush3.bf16.msra.mxu1 %v17866_v58 }
 0x789   :  { %v8523_v14 = vrot.slane %v8515_v36, %v24336_v29  ;;  %v8530_v52 = vrot.slane %v8516_v17, %v24336_v29  ;;  %v8649_v24 = vcombine.low %v22863_v51, %v23058_v26  ;;  %v8650_v18 = vcombine.high %v22863_v51, %v23058_v26  ;;  %v17871_v26 = vld [vmem:[#allocation13 + $0x50] ss:$12 sps:$4 sm:$0xff]   ;;  %16805 = vmatprep.subr.bf16.mxu1 %v17870_v37 }
 0x78a   :  { %v8829_v61 = vcombine.low %v23002_v60, %v8791_v22  ;;  %v8830_v19 = vcombine.high %v23002_v60, %v8791_v22  ;;  %v8845_v9 = vcombine.low %v23008_v10, %v8798_v21  ;;  %v8846_v5 = vcombine.high %v23008_v10, %v8798_v21  ;;  %v17199_v63 = vpop.f32.mrb[56].mxu1  ;;  %v17857_v60 = vld [vmem:[#allocation13 + $0xd8] ss:$12 sps:$4 sm:$0xff]  }
 0x78b   :  { %v8925_v57 = vrot.slane %v8917_v6, %v24336_v29  ;;  %v8932_v51 = vrot.slane %v8918_v49, %v24336_v29  ;;  %v8561_v32 = vcombine.low %v23016_v44, %v8523_v14  ;;  %v8562_v38 = vcombine.high %v23016_v44, %v8523_v14  ;;  %v8110_v7 = vpop.f32.mrb[57].mxu1  ;;  %v17864_v44 = vld [vmem:[#allocation13 + $0xf4] ss:$12 sps:$4 sm:$0xff]   ;;  %10181 = vmatpush1.bf16.msra.mxu0 %v17857_v60 }
 0x78c   :  { %v23091_v10 = vrot.slane %v8829_v61, %v24337_v55  ;;  %v23094_v0 = vrot.slane %v8830_v19, %v24337_v55  ;;  %v23097_v47 = vrot.slane %v8845_v9, %v24337_v55  ;;  %v23100_v3 = vrot.slane %v8846_v5, %v24337_v55  ;;  %v17200_v15 = vpop.f32.mrb[58].mxu1  ;;  %10182 = vmatprep.subr.bf16.mxu0 %v17864_v44  ;;  %v17869_v9 = vld [vmem:[#allocation13 + $0x10c] ss:$12 sps:$4 sm:$0xff]  }
 0x78d   :  { %v8963_v34 = vcombine.low %v23031_v42, %v8925_v57  ;;  %v8964_v40 = vcombine.high %v23031_v42, %v8925_v57  ;;  %v8979_v48 = vcombine.low %v23037_v25, %v8932_v51  ;;  %v8980_v45 = vcombine.high %v23037_v25, %v8932_v51  ;;  %v8113_v41 = vpop.f32.mrb[59].mxu1  ;;  %v17875_v42 = vld [vmem:[#allocation13 + $0x128] ss:$12 sps:$4 sm:$0xff]   ;;  %16806 = vmatpush3.bf16.msra.mxu1 %v17871_v26 }
 0x78e   :  { %v16001_v36 = vcombine.low %v23091_v10, %v23094_v0  ;;  %v16003_v17 = vcombine.high %v23091_v10, %v23094_v0  ;;  %v16005_v27 = vcombine.low %v23097_v47, %v23100_v3  ;;  %v16007_v22 = vcombine.high %v23097_v47, %v23100_v3  ;;  %16807 = vmatprep.subr.bf16.mxu1 %v17875_v42  ;;  %v17886_v10 = vld [vmem:[#allocation13 + $0x98] ss:$12 sps:$4 sm:$0xff]  }
 0x78f   :  { %v23115_v21 = vrot.slane %v8963_v34, %v24337_v55  ;;  %v23118_v25 = vrot.slane %v8964_v40, %v24337_v55  ;;  %v23121_v6 = vrot.slane %v8979_v48, %v24337_v55  ;;  %v23124_v49 = vrot.slane %v8980_v45, %v24337_v55  ;;  %10183 = vmatpush1.bf16.msra.mxu0 %v17862_v12  ;;  %v17867_v45 = vld [vmem:[#allocation13 + $0x108] ss:$12 sps:$4 sm:$0xff]  }
 0x790   :  { %v8569_v14 = vrot.slane %v8561_v32, %v24337_v55  ;;  %v8576_v58 = vrot.slane %v8562_v38, %v24337_v55  ;;  %v8577_v61 = vcombine.low %v23022_v39, %v8530_v52  ;;  %v8578_v19 = vcombine.high %v23022_v39, %v8530_v52  ;;  %v17876_v32 = vld [vmem:[#allocation13 + $0x68] ss:$12 sps:$4 sm:$0xff]   ;;  %10184 = vmatprep.subr.bf16.mxu0 %v17869_v9 }
 0x791   :  { %v16009_v5 = vcombine.low %v23115_v21, %v23118_v25  ;;  %v16011_v37 = vcombine.high %v23115_v21, %v23118_v25  ;;  %v16013_v57 = vcombine.low %v23121_v6, %v23124_v49  ;;  %v8657_v52 = vrot.slane %v8649_v24, %v24336_v29  ;;  %v17874_v24 = vld [vmem:[#allocation13 + $0x124] ss:$12 sps:$4 sm:$0xff]   ;;  %16808 = vmatpush3.bf16.msra.mxu1 %v17876_v32 }
 0x792   :  { %v8585_v38 = vrot.slane %v8577_v61, %v24337_v55  ;;  %v8592_v39 = vrot.slane %v8578_v19, %v24337_v55  ;;  %v8664_v60 = vrot.slane %v8650_v18, %v24336_v29  ;;  %v15985_v44 = vcombine.low %v8569_v14, %v8576_v58 }
 0x793   :  { %v15987_v34 = vcombine.high %v8569_v14, %v8576_v58  ;;  %v8273_v40 = vadd.f32 %v17199_v63, %v22906_v54  ;;  %v8271_v48 = vadd.f32 %v8110_v7, %v22904_v62  ;;  %v8695_v26 = vcombine.low %v23046_v1, %v8657_v52  ;;  %10185 = vmatpush1.bf16.msra.mxu0 %v17867_v45 }
 0x794   :  { %v8696_v51 = vcombine.high %v23046_v1, %v8657_v52  ;;  %v8711_v61 = vcombine.low %v23056_v33, %v8664_v60  ;;  %v8712_v19 = vcombine.high %v23056_v33, %v8664_v60  ;;  %v15989_v18 = vcombine.low %v8585_v38, %v8592_v39  ;;  %10186 = vmatprep.subr.bf16.mxu0 %v17874_v24  ;;  %v17879_v24 = vld [vmem:[#allocation13 + $0x13c] ss:$12 sps:$4 sm:$0xff]  }
 0x795   :  { %v15991_v42 = vcombine.high %v8585_v38, %v8592_v39  ;;  %v8369_v14 = vmul.f32 %v23076_v46, %v8273_v40  ;;  %v8367_v54 = vmul.f32 %v23068_v11, %v8271_v48  ;;  %v8703_v62 = vrot.slane %v8695_v26, %v24337_v55  ;;  %v17872_v46 = vld [vmem:[#allocation13 + $0x120] ss:$12 sps:$4 sm:$0xff]  }
 0x796   :  { %v8710_v63 = vrot.slane %v8696_v51, %v24337_v55  ;;  %v8719_v7 = vrot.slane %v8711_v61, %v24337_v55  ;;  %v8726_v1 = vrot.slane %v8712_v19, %v24337_v55  ;;  %v8274_v12 = vadd.f32 %v17200_v15, %v22982_v50  ;;  %v17877_v19 = vld [vmem:[#allocation13 + $0x138] ss:$12 sps:$4 sm:$0xff]  }
 0x797   :  { %v8272_v33 = vadd.f32 %v8113_v41, %v22979_v13  ;;  %v9043_v58 = vrot.slane %v15985_v44, %v24336_v29  ;;  %v9059_v9 = vrot.slane %v15987_v34, %v24336_v29  ;;  %v9075_v11 = vrot.slane %v15989_v18, %v24336_v29  ;;  %10187 = vmatpush1.bf16.msra.mxu0 %v17872_v46  ;;  %v17880_v18 = vld [vmem:[#allocation13 + $0x140] ss:$12 sps:$4 sm:$0xff]  }
 0x798   :  { %v9091_v32 = vrot.slane %v15991_v42, %v24336_v29  ;;  %v15993_v38 = vcombine.low %v8703_v62, %v8710_v63  ;;  %v15995_v51 = vcombine.high %v8703_v62, %v8710_v63  ;;  %v8370_v39 = vmul.f32 %v23088_v53, %v8274_v12  ;;  %v17881_v63 = vld [vmem:[#allocation13 + $0x80] ss:$12 sps:$4 sm:$0xff]   ;;  %10188 = vmatprep.subr.bf16.mxu0 %v17879_v24 }
 0x799   :  { %v8368_v52 = vmul.f32 %v23082_v59, %v8272_v33  ;;  %v9100_v50 = vcombine.high %v9043_v58, %v9059_v9  ;;  %v15997_v15 = vcombine.low %v8719_v7, %v8726_v1  ;;  %v15999_v44 = vcombine.high %v8719_v7, %v8726_v1  ;;  %16809 = vmatprep.subr.bf16.mxu1 %v17880_v18 }
 0x79a   :  { %v9124_v13 = vcombine.high %v9075_v11, %v9091_v32  ;;  %v9161_v41 = vrot.slane %v15993_v38, %v24336_v29  ;;  %v9177_v60 = vrot.slane %v15995_v51, %v24336_v29  ;;  %v23164_v34 = vpack.c.bf16 %v8370_v39, %v8369_v14  ;;  %16810 = vmatpush3.bf16.msra.mxu1 %v17881_v63 }
 0x79b   :  { %v23166_v40 = vpack.c.bf16 %v8368_v52, %v8367_v54  ;;  %v9114_v48 = vrot.slane %v9100_v50, %v24337_v55  ;;  %v9193_v45 = vrot.slane %v15997_v15, %v24336_v29  ;;  %v9209_v59 = vrot.slane %v15999_v44, %v24336_v29  ;;  %10189 = vmatpush1.bf16.msra.mxu0 %v17877_v19  ;;  %v17882_v52 = vld [vmem:[#allocation13 + $0x150] ss:$12 sps:$4 sm:$0xff]   ;;  %v17884_v50 = vld [vmem:[#allocation13 + $0x154] ss:$12 sps:$4 sm:$0xff]   ;;  %v17885_v15 = vld [vmem:[#allocation13 + $0x158] ss:$12 sps:$4 sm:$0xff]  }
 0x79c   :  { %v9138_v53 = vrot.slane %v9124_v13, %v24337_v55  ;;  %v9218_v26 = vcombine.high %v9161_v41, %v9177_v60  ;;  %v9099_v61 = vcombine.low %v9043_v58, %v9059_v9  ;;  %v23173_v42 = vmul.f32 0.0, %v22976_v56  ;;  %v23182_v58 = vpop.xlane.xlu1 %7492  ;;  %10190 = vmatprep.subr.bf16.mxu0 %v17884_v50  ;;  %16811 = vmatprep.subr.bf16.mxu1 %v17885_v15 }
 0x79d   :  { %v23176_v14 = vmul.f32 0.0, %v22970_v23  ;;  %v9123_v54 = vcombine.low %v9075_v11, %v9091_v32  ;;  %v9217_v62 = vcombine.low %v9161_v41, %v9177_v60  ;;  %v9242_v12 = vcombine.high %v9193_v45, %v9209_v59  ;;  %v23188_v11 = vpop.xlane.xlu0 %7495 }
 0x79e   :  { %v23178_v7 = vcombine.high %v9114_v48, %v9138_v53  ;;  %v9232_v1 = vrot.slane %v9218_v26, %v24337_v55  ;;  %v9107_v33 = vrot.slane %v9099_v61, %v24337_v55  ;;  %v9241_v46 = vcombine.low %v9193_v45, %v9209_v59  ;;  %16812 = vmatpush3.bf16.msra.mxu1 %v17886_v10 }
 0x79f   :  { %v9131_v9 = vrot.slane %v9123_v54, %v24337_v55  ;;  %v9225_v56 = vrot.slane %v9217_v62, %v24337_v55  ;;  %v23186_v23 = vcombine.low %v9114_v48, %v9138_v53  ;;  %v9256_v32 = vrot.slane %v9242_v12, %v24337_v55  ;;  %10191 = vmatpush1.bf16.msra.mxu0 %v17882_v52 }
 0x7a0   :  { %v23195_v38 = vrot.slane %v16001_v36, %v24336_v29  ;;  %v23201_v51 = vrot.slane %v16003_v17, %v24336_v29  ;;  %v23207_v39 = vrot.slane %v16005_v27, %v24336_v29  ;;  %v9249_v36 = vrot.slane %v9241_v46, %v24337_v55  ;;  %v23221_v48 = vpop.xlane.xlu1 %7462 }
 0x7a1   :  { %v23209_v13 = vcombine.low %v9107_v33, %v9131_v9  ;;  %v9148_v41 = vcombine.high %v9107_v33, %v9131_v9  ;;  %v9522_v60 = vshrl.u32 %v23186_v23, 16  ;;  %v9268_v0 = vcombine.high %v9232_v1, %v9256_v32  ;;  %v23235_v62 = vpop.xlane.xlu0 %7465  ;;  %v17887_v9 = vld [vmem:[#allocation13 + $0x168] ss:$12 sps:$4 sm:$0xff]  }
 0x7a2   :  { %v23213_v17 = vcombine.low %v9232_v1, %v9256_v32  ;;  %v9327_v27 = vrot.slane %v16007_v22, %v24336_v29  ;;  %v9335_v44 = vcombine.low %v23195_v38, %v23201_v51  ;;  %v23223_v45 = vcombine.low %v9225_v56, %v9249_v36 }
 0x7a3   :  { %v9510_v53 = vshrl.u32 %v23209_v13, 16  ;;  %v9266_v59 = vcombine.high %v9225_v56, %v9249_v36  ;;  %v9516_v26 = vshrl.u32 %v9148_v41, 16  ;;  %v9527_v61 = vpack.i.b16 %v9268_v0, %v23178_v7  ;;  %v17890_v56 = vld [vmem:[#allocation13 + $0x170] ss:$12 sps:$4 sm:$0xff]  }
 0x7a4   :  { %v9523_v19 = vshrl.u32 %v23213_v17, 16  ;;  %v9343_v47 = vrot.slane %v9335_v44, %v24337_v55  ;;  %v9359_v3 = vcombine.low %v23207_v39, %v9327_v27  ;;  %v9511_v22 = vshrl.u32 %v23223_v45, 16  ;;  %v17891_v36 = vld [vmem:[#allocation13 + $0xb0] ss:$12 sps:$4 sm:$0xff]   ;;  %16813 = vmatprep.subr.bf16.mxu1 %v17890_v56 }
 0x7a5   :  { %v9515_v24 = vpack.i.b16 %v9266_v59, %v9148_v41  ;;  %v9517_v18 = vshrl.u32 %v9266_v59, 16  ;;  %v9397_v54 = vrot.slane %v16009_v5, %v24336_v29  ;;  %9595 = vrot.lane.b32.xlu1 %v9527_v61, %s19427_s14  ;;  %v9413_v12 = vrot.slane %v16011_v37, %v24336_v29  ;;  %v17889_v5 = vld [vmem:[#allocation13 + $0x16c] ss:$12 sps:$4 sm:$0xff]   ;;  %16814 = vmatpush3.bf16.msra.mxu1 %v17891_v36 }
 0x7a6   :  { %v9524_v63 = vpack.i.b16 %v9523_v19, %v9522_v60  ;;  %v9367_v1 = vrot.slane %v9359_v3, %v24337_v55  ;;  %v9429_v33 = vrot.slane %v16013_v57, %v24336_v29  ;;  %v9512_v46 = vpack.i.b16 %v9511_v22, %v9510_v53  ;;  %10192 = vmatprep.subr.bf16.mxu0 %v17889_v5  ;;  %v7457_v57 = vpop.xlane.xlu1 %7456 }
 0x7a7   :  { %v9518_v32 = vpack.i.b16 %v9517_v18, %v9516_v26  ;;  %v24338_v52 = vcombine.high %v23121_v6, %v23124_v49  ;;  %v9528_v15 = vshrl.u32 %v23178_v7, 16  ;;  %v9453_v25 = vcombine.low %v9397_v54, %v9413_v12  ;;  %10193 = vmatpush1.bf16.msra.mxu0 %v17887_v9 }
 0x7a8   :  { %v23252_v21 = vcombine.low %v9343_v47, %v9367_v1  ;;  %v9529_v37 = vshrl.u32 %v9268_v0, 16  ;;  %v23254_v41 = vcombine.high %v9343_v47, %v9367_v1  ;;  %9579 = vrot.lane.b32.xlu0 %v9512_v46, %s19429_s10  ;;  %v9336_v10 = vcombine.high %v23195_v38, %v23201_v51 }
 0x7a9   :  { %v9445_v50 = vrot.slane %v24338_v52, %v24336_v29  ;;  %v9360_v6 = vcombine.high %v23207_v39, %v9327_v27  ;;  %v9454_v49 = vcombine.high %v9397_v54, %v9413_v12  ;;  %v23261_v7 = vmul.f32 0.0, %v22956_v2  ;;  %9583 = vrot.lane.b32.xlu1 %v9515_v24, %s19427_s14  ;;  %v7460_v2 = vpop.xlane.xlu0 %7459 }
 0x7aa   :  { %v9461_v0 = vrot.slane %v9453_v25, %v24337_v55  ;;  %v9530_v44 = vpack.i.b16 %v9529_v37, %v9528_v15  ;;  %v9350_v26 = vrot.slane %v9336_v10, %v24337_v55  ;;  %v7165_v51 = vmul.f32 1.442695, %v22992_v16  ;;  %v7487_v12 = vpop.xlane.xlu1 %7486 }
 0x7ab   :  { %v9477_v60 = vcombine.low %v9429_v33, %v9445_v50  ;;  %v9478_v53 = vcombine.high %v9429_v33, %v9445_v50  ;;  %v9374_v61 = vrot.slane %v9360_v6, %v24337_v55  ;;  %v9468_v38 = vrot.slane %v9454_v49, %v24337_v55 }
 0x7ac   :  { %v9546_v39 = vshrl.u32 %v23252_v21, 16  ;;  %v9509_v19 = vpack.i.b16 %v23223_v45, %v23209_v13  ;;  %9587 = vrot.lane.b32.xlu0 %v9518_v32, %s19428_s27  ;;  %v9552_v16 = vshrl.u32 %v23254_v41, 16  ;;  %v9521_v1 = vpack.i.b16 %v23213_v17, %v23186_v23  ;;  %v17898_v13 = vld [vmem:[#allocation13 + $0x19c] ss:$12 sps:$4 sm:$0xff]   ;;  %v17899_v45 = vld [vmem:[#allocation13 + $0x1a0] ss:$12 sps:$4 sm:$0xff]  }
 0x7ad   :  { %v9485_v59 = vrot.slane %v9477_v60, %v24337_v55  ;;  %v9492_v27 = vrot.slane %v9478_v53, %v24337_v55  ;;  %v23277_v22 = vcombine.low %v9350_v26, %v9374_v61  ;;  %v9386_v24 = vcombine.high %v9350_v26, %v9374_v61  ;;  %9591 = vrot.lane.b32.xlu1 %v9524_v63, %s19429_s10  ;;  %v23299_v53 = vld [vmem:[#allocation13 + $0x188] ss:$12 sps:$4 sm:$0xff]   ;;  %v17896_v17 = vld [vmem:[#allocation13 + $0x198] ss:$12 sps:$4 sm:$0xff]  }
 0x7ae   :  { %19010 = vpow2.f32 %v7165_v51  ;;  %v7537_v37 = vadd.f32 %v23221_v48, %v23173_v42  ;;  %v7535_v6 = vadd.f32 %v7457_v57, %v23261_v7  ;;  %v7344_v49 = vmul.f32 0.0, %v23010_v31  ;;  %v7481_v61 = vpop.xlane.xlu1 %7480  ;;  %17217 = vmatprep.subr.bf16.mxu1 %v23299_v53 }
 0x7af   :  { %v23275_v47 = vcombine.low %v9461_v0, %v9485_v59  ;;  %v9502_v3 = vcombine.high %v9461_v0, %v9485_v59  ;;  %v23280_v18 = vcombine.low %v9468_v38, %v9492_v27  ;;  %v9504_v54 = vcombine.high %v9468_v38, %v9492_v27  ;;  %v17894_v0 = vld [vmem:[#allocation13 + $0x184] ss:$12 sps:$4 sm:$0xff]  }
 0x7b0   :  { %v9558_v5 = vshrl.u32 %v23277_v22, 16  ;;  %v9564_v63 = vshrl.u32 %v9386_v24, 16  ;;  %v7538_v59 = vadd.f32 %v23235_v62, %v23176_v14  ;;  %v7536_v26 = vadd.f32 %v7460_v2, %v7344_v49  ;;  %10215 = vmatprep.subr.bf16.mxu0 %v17894_v0 }
 0x7b1   :  { %v9547_v33 = vshrl.u32 %v23275_v47, 16  ;;  %v9551_v9 = vpack.i.b16 %v9502_v3, %v23254_v41  ;;  %v9553_v56 = vshrl.u32 %v9502_v3, 16  ;;  %v9559_v46 = vshrl.u32 %v23280_v18, 16  ;;  %v7490_v41 = vpop.xlane.xlu0 %7489  ;;  %9599 = vrot.lane.b32.xlu1 %v9530_v44, %s19428_s27 }
 0x7b2   :  { %v9563_v32 = vpack.i.b16 %v9504_v54, %v9386_v24  ;;  %v9565_v52 = vshrl.u32 %v9504_v54, 16  ;;  %v9545_v36 = vpack.i.b16 %v23275_v47, %v23252_v21  ;;  %v9557_v25 = vpack.i.b16 %v23280_v18, %v23277_v22  ;;  %v7499_v2 = vpop.xlane.xlu1 %7498  ;;  %v17910_v22 = vld [vmem:[#allocation13 + $0x1e4] ss:$12 sps:$4 sm:$0xff]   ;;  %v17911_v18 = vld [vmem:[#allocation13 + $0x1e8] ss:$12 sps:$4 sm:$0xff]  }
 0x7b3   :  { %v9548_v50 = vpack.i.b16 %v9547_v33, %v9546_v39  ;;  %v9554_v15 = vpack.i.b16 %v9553_v56, %v9552_v16  ;;  %v9560_v60 = vpack.i.b16 %v9559_v46, %v9558_v5  ;;  %19012 = vrcp.f32 %v7537_v37  ;;  %v17908_v47 = vld [vmem:[#allocation13 + $0x1e0] ss:$12 sps:$4 sm:$0xff]  }
 0x7b4   :  { %v9566_v10 = vpack.i.b16 %v9565_v52, %v9564_v63  ;;  %19014 = vrcp.f32 %v7535_v6  ;;  %v7353_v31 = vmul.f32 0.0, %v22995_v30  ;;  %v7351_v57 = vmul.f32 0.0, %v23025_v4 }
 0x7b5   :  { %9581 = vrot.lane.b32.xlu0 %v9548_v50, %s19429_s10  ;;  %9593 = vrot.lane.b32.xlu1 %v9560_v60, %s19429_s10  ;;  %19016 = vrcp.f32 %v7538_v59  ;;  %v7484_v48 = vpop.xlane.xlu0 %7483  ;;  %v7355_v62 = vmul.f32 0.0, %v22948_v35  ;;  %v23311_v38 = vmul.f32 0.0, %v23040_v20  ;;  %v7357_v30 = vmul.f32 0.0, %v23050_v8 }
 0x7b6   :  { %19018 = vrcp.f32 %v7536_v26  ;;  %v7545_v44 = vadd.f32 %v7487_v12, %v7353_v31  ;;  %v7543_v51 = vadd.f32 %v7481_v61, %v7351_v57  ;;  %v23318_v4 = vmul.f32 0.0, %v23062_v43 }
 0x7b7   :  { %v7547_v27 = vadd.f32 %v23182_v58, %v7355_v62  ;;  %v7546_v3 = vadd.f32 %v7490_v41, %v23311_v38  ;;  %v23321_v35 = vmul.f32 0.0, %v22964_v28  ;;  %v7549_v20 = vadd.f32 %v7499_v2, %v7357_v30 }
 0x7b8   :  { %v19011_v39 = vpop.eup %19010  ;;  %19020 = vrcp.f32 %v7545_v44  ;;  %v7544_v54 = vadd.f32 %v7484_v48, %v23318_v4  ;;  %v8440_v60 = vshrl.u32 %v23166_v40, 16 }
 0x7b9   :  { %9585 = vrot.lane.b32.xlu0 %v9551_v9, %s19427_s14  ;;  %9597 = vrot.lane.b32.xlu1 %v9563_v32, %s19427_s14  ;;  %v7502_v24 = vpop.xlane.xlu0 %7501  ;;  %19022 = vrcp.f32 %v7543_v51  ;;  %v7358_v58 = vmul.f32 0.0, %v19011_v39  ;;  %v7548_v43 = vadd.f32 %v23188_v11, %v23321_v35 }
 0x7ba   :  { %v17191_v16 = vpop.f32.mrb[76].mxu0  ;;  %19024 = vrcp.f32 %v7547_v27 }
 0x7bb   :  { %v8269_v8 = vadd.f32 %v17191_v16, %v23173_v42  ;;  %v8055_v12 = vpop.f32.mrb[77].mxu0  ;;  %19026 = vrcp.f32 %v7546_v3  ;;  %v7550_v56 = vadd.f32 %v7502_v24, %v7358_v58 }
 0x7bc   :  { %v8267_v28 = vadd.f32 %v8055_v12, %v23261_v7  ;;  %v17192_v9 = vpop.f32.mrb[78].mxu0  ;;  %19028 = vrcp.f32 %v7549_v20  ;;  %v8488_v7 = vshrl.u32 %v23164_v34, 16 }
 0x7bd   :  { %9589 = vrot.lane.b32.xlu0 %v9554_v15, %s19428_s27  ;;  %9601 = vrot.lane.b32.xlu1 %v9566_v10, %s19428_s27  ;;  %v19013_v33 = vpop.eup %19012  ;;  %v8270_v32 = vadd.f32 %v17192_v9, %v23176_v14  ;;  %v8058_v63 = vpop.f32.mrb[79].mxu0  ;;  %19030 = vrcp.f32 %v7544_v54 }
 0x7be   :  { %v19015_v5 = vpop.eup %19014  ;;  %v8365_v46 = vmul.f32 %v19013_v33, %v8269_v8  ;;  %v8268_v42 = vadd.f32 %v8058_v63, %v7344_v49  ;;  %19032 = vrcp.f32 %v7548_v43 }
 0x7bf   :  { %v19017_v52 = vpop.eup %19016  ;;  %v8363_v50 = vmul.f32 %v19015_v5, %v8267_v28  ;;  %19034 = vrcp.f32 %v7550_v56 }
 0x7c0   :  { %v19019_v15 = vpop.eup %19018  ;;  %v8366_v37 = vmul.f32 %v19017_v52, %v8270_v32 }
 0x7c1   :  { %v8364_v41 = vmul.f32 %v19019_v15, %v8268_v42 }
 0x7c2   :  { %v8396_v11 = vpack.c.bf16 %v8366_v37, %v8365_v46  ;;  %v17207_v6 = vpop.f32.mrb[80].mxu0  ;;  %v19021_v44 = vpop.eup %19020 }
 0x7c3   :  { %v8395_v10 = vpack.c.bf16 %v8364_v41, %v8363_v50  ;;  %v8277_v26 = vadd.f32 %v17207_v6, %v7353_v31  ;;  %v8165_v61 = vpop.f32.mrb[81].mxu0  ;;  %v19023_v24 = vpop.eup %19022  ;;  %v24339_v41 = vld [vmem:[#allocation46_spill] sm:$0xff] }
 0x7c4   :  { %v8485_v14 = vpack.i.b16 %v23164_v34, %v8396_v11  ;;  %v8487_v59 = vshrl.u32 %v8396_v11, 16  ;;  %v8275_v39 = vadd.f32 %v8165_v61, %v7351_v57  ;;  %v17208_v27 = vpop.f32.mrb[82].mxu0  ;;  %v19025_v33 = vpop.eup %19024 }
 0x7c5   :  { %v17215_v0 = vpop.f32.mrb[60].mxu1  ;;  %v8437_v51 = vpack.i.b16 %v23166_v40, %v8395_v10  ;;  %v8439_v2 = vshrl.u32 %v8395_v10, 16  ;;  %v8373_v54 = vmul.f32 %v19021_v44, %v8277_v26  ;;  %v8168_v8 = vpop.f32.mrb[83].mxu0 }
 0x7c6   :  { %v8281_v49 = vadd.f32 %v17215_v0, %v7357_v30  ;;  %v8220_v48 = vpop.f32.mrb[61].mxu1  ;;  %v8489_v16 = vpack.i.b16 %v8488_v7, %v8487_v59  ;;  %v8371_v43 = vmul.f32 %v19023_v24, %v8275_v39  ;;  %v19027_v31 = vpop.eup %19026  ;;  %v8278_v30 = vadd.f32 %v17208_v27, %v23311_v38 }
 0x7c7   :  { %v8279_v3 = vadd.f32 %v8220_v48, %v7355_v62  ;;  %v17216_v20 = vpop.f32.mrb[62].mxu1  ;;  %v8441_v34 = vpack.i.b16 %v8440_v60, %v8439_v2  ;;  %v19029_v28 = vpop.eup %19028  ;;  %v8276_v9 = vadd.f32 %v8168_v8, %v23318_v4  ;;  %v8799_v11 = vcombine.high %v8485_v14, %v24339_v41 }
 0x7c8   :  { %v8223_v12 = vpop.f32.mrb[63].mxu1  ;;  %v19031_v40 = vpop.eup %19030  ;;  %v8374_v5 = vmul.f32 %v19027_v31, %v8278_v30  ;;  %v8377_v57 = vmul.f32 %v19029_v28, %v8281_v49  ;;  %v8282_v32 = vadd.f32 %v17216_v20, %v7358_v58  ;;  %v8531_v38 = vcombine.high %v8437_v51, %v24339_v41 }
 0x7c9   :  { %v8375_v56 = vmul.f32 %v19025_v33, %v8279_v3  ;;  %v19033_v62 = vpop.eup %19032  ;;  %v8372_v46 = vmul.f32 %v19031_v40, %v8276_v9  ;;  %v8280_v63 = vadd.f32 %v8223_v12, %v23321_v35  ;;  %v8806_v4 = vrot.slane %v8485_v14, %v24336_v29 }
 0x7ca   :  { %v19035_v52 = vpop.eup %19034  ;;  %v8400_v50 = vpack.c.bf16 %v8374_v5, %v8373_v54  ;;  %v8538_v7 = vrot.slane %v8437_v51, %v24336_v29  ;;  %v8933_v6 = vcombine.high %v8489_v16, %v24339_v41  ;;  %v8665_v58 = vcombine.high %v8441_v34, %v24339_v41 }
 0x7cb   :  { %v8399_v42 = vpack.c.bf16 %v8372_v46, %v8371_v43  ;;  %v8378_v15 = vmul.f32 %v19035_v52, %v8282_v32  ;;  %v8376_v37 = vmul.f32 %v19033_v62, %v8280_v63  ;;  %v8813_v48 = vrot.slane %v8799_v11, %v24336_v29 }
 0x7cc   :  { %v8495_v35 = vshrl.u32 %v8400_v50, 16  ;;  %v8940_v44 = vrot.slane %v8489_v16, %v24336_v29  ;;  %v8545_v14 = vrot.slane %v8531_v38, %v24336_v29  ;;  %v23347_v51 = vrot.slane %v8441_v34, %v24336_v29 }
 0x7cd   :  { %v8402_v60 = vpack.c.bf16 %v8378_v15, %v8377_v57  ;;  %v8401_v10 = vpack.c.bf16 %v8376_v37, %v8375_v56  ;;  %v8447_v0 = vshrl.u32 %v8399_v42, 16  ;;  %v8947_v20 = vrot.slane %v8933_v6, %v24336_v29 }
 0x7ce   :  { %v8679_v24 = vrot.slane %v8665_v58, %v24336_v29 }
 0x7cf   :  { %v8493_v59 = vpack.i.b16 %v8402_v60, %v8400_v50  ;;  %v8496_v26 = vshrl.u32 %v8402_v60, 16  ;;  %v8445_v61 = vpack.i.b16 %v8401_v10, %v8399_v42  ;;  %v8448_v49 = vshrl.u32 %v8401_v10, 16 }
 0x7d1   :  { %v8497_v2 = vpack.i.b16 %v8496_v26, %v8495_v35  ;;  %v8814_v39 = vcombine.high %v8493_v59, %v24339_v41  ;;  %v8821_v27 = vrot.slane %v8493_v59, %v24336_v29  ;;  %v8449_v3 = vpack.i.b16 %v8448_v49, %v8447_v0 }
 0x7d2   :  { %v8546_v54 = vcombine.high %v8445_v61, %v24339_v41  ;;  %v8553_v8 = vrot.slane %v8445_v61, %v24336_v29 }
 0x7d3   :  { %v8828_v16 = vrot.slane %v8814_v39, %v24336_v29  ;;  %v8861_v12 = vcombine.low %v8806_v4, %v8821_v27  ;;  %v8862_v33 = vcombine.high %v8806_v4, %v8821_v27  ;;  %v8948_v34 = vcombine.high %v8497_v2, %v24339_v41 }
 0x7d4   :  { %v8955_v43 = vrot.slane %v8497_v2, %v24336_v29  ;;  %v8560_v31 = vrot.slane %v8546_v54, %v24336_v29  ;;  %v8593_v30 = vcombine.low %v8538_v7, %v8553_v8  ;;  %v8594_v28 = vcombine.high %v8538_v7, %v8553_v8 }
 0x7d5   :  { %v8869_v9 = vrot.slane %v8861_v12, %v24337_v55  ;;  %v8876_v40 = vrot.slane %v8862_v33, %v24337_v55  ;;  %v8877_v5 = vcombine.low %v8813_v48, %v8828_v16  ;;  %v8878_v57 = vcombine.high %v8813_v48, %v8828_v16 }
 0x7d6   :  { %v8962_v56 = vrot.slane %v8948_v34, %v24336_v29  ;;  %v8995_v62 = vcombine.low %v8940_v44, %v8955_v43  ;;  %v8996_v46 = vcombine.high %v8940_v44, %v8955_v43  ;;  %v8601_v32 = vrot.slane %v8593_v30, %v24337_v55 }
 0x7d7   :  { %v8885_v63 = vrot.slane %v8877_v5, %v24337_v55  ;;  %v8892_v52 = vrot.slane %v8878_v57, %v24337_v55  ;;  %v16002_v50 = vcombine.low %v8869_v9, %v8876_v40  ;;  %v16004_v42 = vcombine.high %v8869_v9, %v8876_v40 }
 0x7d8   :  { %v9003_v15 = vrot.slane %v8995_v62, %v24337_v55  ;;  %v9010_v37 = vrot.slane %v8996_v46, %v24337_v55  ;;  %v9011_v11 = vcombine.low %v8947_v20, %v8962_v56  ;;  %v9012_v38 = vcombine.high %v8947_v20, %v8962_v56 }
 0x7d9   :  { %v9286_v4 = vrot.slane %v16002_v50, %v24336_v29  ;;  %v9302_v7 = vrot.slane %v16004_v42, %v24336_v29  ;;  %v16006_v60 = vcombine.low %v8885_v63, %v8892_v52  ;;  %v16008_v10 = vcombine.high %v8885_v63, %v8892_v52 }
 0x7da   :  { %v9019_v6 = vrot.slane %v9011_v11, %v24337_v55  ;;  %v9026_v58 = vrot.slane %v9012_v38, %v24337_v55  ;;  %v16010_v35 = vcombine.low %v9003_v15, %v9010_v37  ;;  %v16012_v0 = vcombine.high %v9003_v15, %v9010_v37 }
 0x7db   :  { %v8608_v59 = vrot.slane %v8594_v28, %v24337_v55  ;;  %v8609_v26 = vcombine.low %v8545_v14, %v8560_v31  ;;  %v8610_v61 = vcombine.high %v8545_v14, %v8560_v31  ;;  %v8680_v49 = vcombine.high %v8449_v3, %v24339_v41 }
 0x7dc   :  { %v16014_v48 = vcombine.low %v9019_v6, %v9026_v58  ;;  %v16016_v44 = vcombine.high %v9019_v6, %v9026_v58  ;;  %v8687_v2 = vrot.slane %v8449_v3, %v24336_v29  ;;  %v9318_v39 = vrot.slane %v16006_v60, %v24336_v29 }
 0x7dd   :  { %v8617_v27 = vrot.slane %v8609_v26, %v24337_v55  ;;  %v8624_v20 = vrot.slane %v8610_v61, %v24337_v55  ;;  %v8694_v54 = vrot.slane %v8680_v49, %v24336_v29  ;;  %v15986_v8 = vcombine.low %v8601_v32, %v8608_v59 }
 0x7de   :  { %v8727_v16 = vcombine.low %v23347_v51, %v8687_v2  ;;  %v8728_v12 = vcombine.high %v23347_v51, %v8687_v2  ;;  %v15988_v14 = vcombine.high %v8601_v32, %v8608_v59  ;;  %v9334_v41 = vrot.slane %v16008_v10, %v24336_v29 }
 0x7df   :  { %v8743_v33 = vcombine.low %v8679_v24, %v8694_v54  ;;  %v8744_v34 = vcombine.high %v8679_v24, %v8694_v54  ;;  %v15990_v43 = vcombine.low %v8617_v27, %v8624_v20  ;;  %v15992_v3 = vcombine.high %v8617_v27, %v8624_v20 }
 0x7e0   :  { %v8735_v31 = vrot.slane %v8727_v16, %v24337_v55  ;;  %v8742_v30 = vrot.slane %v8728_v12, %v24337_v55  ;;  %v9050_v28 = vrot.slane %v15986_v8, %v24336_v29  ;;  %v9066_v9 = vrot.slane %v15988_v14, %v24336_v29 }
 0x7e1   :  { %v8751_v40 = vrot.slane %v8743_v33, %v24337_v55  ;;  %v8758_v5 = vrot.slane %v8744_v34, %v24337_v55  ;;  %v9082_v51 = vrot.slane %v15990_v43, %v24336_v29  ;;  %v9098_v57 = vrot.slane %v15992_v3, %v24336_v29 }
 0x7e2   :  { %v15994_v56 = vcombine.low %v8735_v31, %v8742_v30  ;;  %v15996_v24 = vcombine.high %v8735_v31, %v8742_v30  ;;  %v9115_v62 = vcombine.low %v9050_v28, %v9066_v9  ;;  %v9351_v46 = vcombine.low %v9286_v4, %v9302_v7 }
 0x7e3   :  { %v9139_v32 = vcombine.low %v9082_v51, %v9098_v57  ;;  %v15998_v63 = vcombine.low %v8751_v40, %v8758_v5  ;;  %v16000_v52 = vcombine.high %v8751_v40, %v8758_v5  ;;  %v9375_v50 = vcombine.low %v9318_v39, %v9334_v41 }
 0x7e4   :  { %v9122_v42 = vrot.slane %v9115_v62, %v24337_v55  ;;  %v9168_v15 = vrot.slane %v15994_v56, %v24336_v29  ;;  %v9184_v37 = vrot.slane %v15996_v24, %v24336_v29  ;;  %v9358_v11 = vrot.slane %v9351_v46, %v24337_v55 }
 0x7e5   :  { %v9146_v38 = vrot.slane %v9139_v32, %v24337_v55  ;;  %v9200_v60 = vrot.slane %v15998_v63, %v24336_v29  ;;  %v9216_v10 = vrot.slane %v16000_v52, %v24336_v29  ;;  %v9382_v4 = vrot.slane %v9375_v50, %v24337_v55 }
 0x7e6   :  { %v9233_v7 = vcombine.low %v9168_v15, %v9184_v37  ;;  %v9404_v6 = vrot.slane %v16010_v35, %v24336_v29  ;;  %v9420_v58 = vrot.slane %v16012_v0, %v24336_v29  ;;  %v9436_v59 = vrot.slane %v16014_v48, %v24336_v29 }
 0x7e7   :  { %v9152_v26 = vcombine.high %v9122_v42, %v9146_v38  ;;  %v9257_v61 = vcombine.low %v9200_v60, %v9216_v10  ;;  %v23400_v49 = vcombine.low %v9358_v11, %v9382_v4  ;;  %v9452_v2 = vrot.slane %v16016_v44, %v24336_v29  ;;  %v17902_v10 = vld [vmem:[#allocation13 + $0x1b4] ss:$12 sps:$4 sm:$0xff]  }
 0x7e8   :  { %v9469_v39 = vcombine.low %v9404_v6, %v9420_v58  ;;  %v23403_v27 = vcombine.low %v9122_v42, %v9146_v38  ;;  %v9388_v20 = vcombine.high %v9358_v11, %v9382_v4  ;;  %v9240_v54 = vrot.slane %v9233_v7, %v24337_v55  ;;  %v17892_v11 = vld [vmem:[#allocation13 + $0x180] ss:$12 sps:$4 sm:$0xff]   ;;  %v17903_v4 = vld [vmem:[#allocation13 + $0x1b8] ss:$12 sps:$4 sm:$0xff]   ;;  %v17900_v6 = vld [vmem:[#allocation13 + $0x1b0] ss:$12 sps:$4 sm:$0xff]  }
 0x7e9   :  { %v9264_v8 = vrot.slane %v9257_v61, %v24337_v55  ;;  %v9493_v16 = vcombine.low %v9436_v59, %v9452_v2  ;;  %v9540_v14 = vshrl.u32 %v9152_v26, 16  ;;  %v9570_v43 = vshrl.u32 %v23400_v49, 16  ;;  %v17906_v58 = vld [vmem:[#allocation13 + $0x1cc] ss:$12 sps:$4 sm:$0xff]   ;;  %v17907_v59 = vld [vmem:[#allocation13 + $0x1d0] ss:$12 sps:$4 sm:$0xff]  }
 0x7ea   :  { %v9476_v0 = vrot.slane %v9469_v39, %v24337_v55  ;;  %v9534_v41 = vshrl.u32 %v23403_v27, 16  ;;  %v9576_v40 = vshrl.u32 %v9388_v20, 16 }
 0x7eb   :  { %v9270_v35 = vcombine.high %v9240_v54, %v9264_v8  ;;  %v9500_v48 = vrot.slane %v9493_v16, %v24337_v55  ;;  %v23409_v12 = vcombine.low %v9240_v54, %v9264_v8  ;;  %v24340_v16 = vmov 0  }
 0x7ed   :  { %v9539_v29 = vpack.i.b16 %v9270_v35, %v9152_v26  ;;  %v23412_v44 = vcombine.low %v9476_v0, %v9500_v48  ;;  %v9541_v33 = vshrl.u32 %v9270_v35, 16  ;;  %v9535_v34 = vshrl.u32 %v23409_v12, 16  ;;  %v17912_v35 = vld [vmem:[#allocation13 + $0x1f8] ss:$12 sps:$4 sm:$0xff]  }
 0x7ee   :  { %v9506_v3 = vcombine.high %v9476_v0, %v9500_v48  ;;  %v9533_v31 = vpack.i.b16 %v23409_v12, %v23403_v27  ;;  %v17918_v0 = vld [vmem:[#allocation13 + $0x214] ss:$12 sps:$4 sm:$0xff]   ;;  %v17919_v48 = vld [vmem:[#allocation13 + $0x218] ss:$12 sps:$4 sm:$0xff]  }
 0x7ef   :  { %9607 = vrot.lane.b32.xlu0 %v9539_v29, %s19427_s14  ;;  %v9571_v55 = vshrl.u32 %v23412_v44, 16  ;;  %v9542_v30 = vpack.i.b16 %v9541_v33, %v9540_v14  ;;  %v9536_v28 = vpack.i.b16 %v9535_v34, %v9534_v41  ;;  %v9569_v9 = vpack.i.b16 %v23412_v44, %v23400_v49  ;;  %v17916_v14 = vld [vmem:[#allocation13 + $0x210] ss:$12 sps:$4 sm:$0xff]   ;;  %v17922_v41 = vld [vmem:[#allocation13 + $0x22c] ss:$12 sps:$4 sm:$0xff]  }
 0x7f0   :  { %v9577_v5 = vshrl.u32 %v9506_v3, 16  ;;  %v9575_v51 = vpack.i.b16 %v9506_v3, %v9388_v20  ;;  %v17904_v20 = vld [vmem:[#allocation13 + $0x1c8] ss:$12 sps:$4 sm:$0xff]   ;;  %v17923_v29 = vld [vmem:[#allocation13 + $0x230] ss:$12 sps:$4 sm:$0xff]  }
 0x7f1   :  { %v9572_v57 = vpack.i.b16 %v9571_v55, %v9570_v43  ;;  %v17920_v33 = vld [vmem:[#allocation13 + $0x228] ss:$12 sps:$4 sm:$0xff]  }
 0x7f2   :  { %v9578_v56 = vpack.i.b16 %v9577_v5, %v9576_v40 }
 0x7f3   :  { %9605 = vrot.lane.b32.xlu1 %v9572_v57, %s19429_s10  ;;  %9611 = vrot.lane.b32.xlu0 %v9542_v30, %s19428_s27 }
 0x7f7   :  { %9603 = vrot.lane.b32.xlu1 %v9536_v28, %s19429_s10  ;;  %9613 = vrot.lane.b32.xlu0 %v9578_v56, %s19428_s27 }
 0x7fb   :  { %9609 = vrot.lane.b32.xlu1 %v9575_v51, %s19427_s14 }
 0x817   :  { %v9596_v24 = vpop.permute.xlu1 %9595 }
 0x81a   :  { %v9580_v62 = vpop.permute.xlu0 %9579 }
 0x81b   :  { %v9584_v46 = vpop.permute.xlu1 %9583  ;;  %v9617_v63 = vsel %vm6042_vm0, %v9509_v19, %v9580_v62 }
 0x81c   :  { %v9623_v42 = vsel %vm9621_vm13, %v9617_v63, %v9584_v46 }
 0x81e   :  { %v9588_v32 = vpop.permute.xlu0 %9587 }
 0x81f   :  { %v9592_v52 = vpop.permute.xlu1 %9591  ;;  %v9628_v19 = vsel %vm9626_vm14, %v9623_v42, %v9588_v32  ;;  %v9761_v42 = vld [vmem:[#allocation14] sm:$0x7] }
 0x820   :  { %v9635_v50 = vsel %vm6042_vm0, %v9521_v1, %v9592_v52 }
 0x821   :  { %v9640_v37 = vsel %vm9621_vm13, %v9635_v50, %v9596_v24 }
 0x823   :  { %v9600_v15 = vpop.permute.xlu1 %9599 }
 0x824   :  { %v9644_v60 = vsel %vm9626_vm14, %v9640_v37, %v9600_v15  ;;  %v24341_v15 = vld [vmem:[#allocation38_spill] sm:$0xff] }
 0x825   :  { %10194 = vmatprep.mubr.bf16.mxu0 %v9644_v60  ;;  %10300 = vmatprep.mubr.bf16.mxu1 %v9644_v60  ;;  %v9766_v37 = vrot.slane %v9761_v42, %v24341_v15  ;;  %v24343_v60 = vld [vmem:[#allocation37_spill] sm:$0xff] }
 0x826   :  { %10195 = vmatmul.mubr.bf16.vlgmr.msra.gmra.mrb[84].mxu0 %v9628_v19  ;;  %10301 = vmatmul.mubr.bf16.vlgmr.msra.gmra.mrb[64].mxu1 %v9628_v19 }
 0x827   :  { %v9582_v38 = vpop.permute.xlu0 %9581  ;;  %v9594_v23 = vpop.permute.xlu1 %9593  ;;  %10216 = vmatpush1.bf16.msra.mxu0 %v17892_v11  ;;  %17218 = vmatpush3.bf16.msra.mxu1 %v23299_v53  ;;  %v24342_v11 = vld [vmem:[#allocation36_spill] sm:$0xff] }
 0x828   :  { %10217 = vmatprep.subr.bf16.mxu0 %v17898_v13  ;;  %17219 = vmatprep.subr.bf16.mxu1 %v17899_v45  ;;  %v9638_v26 = vsel %vm6042_vm0, %v9557_v25, %v9594_v23  ;;  %v9620_v53 = vsel %vm6042_vm0, %v9545_v36, %v9582_v38  ;;  %v17914_v36 = vld [vmem:[#allocation13 + $0x1fc] ss:$12 sps:$4 sm:$0xff]   ;;  %v17915_v25 = vld [vmem:[#allocation13 + $0x200] ss:$12 sps:$4 sm:$0xff]   ;;  %v9770_v38 = vrot.slane %v9761_v42, %v24342_v11 }
 0x829   :  { %v9774_v13 = vrot.slane %v9761_v42, %v24343_v60 }
 0x82b   :  { %v9586_v1 = vpop.permute.xlu0 %9585  ;;  %v9598_v7 = vpop.permute.xlu1 %9597  ;;  %10218 = vmatpush1.bf16.msra.mxu0 %v17896_v17  ;;  %17220 = vmatpush3.bf16.msra.mxu1 %v17899_v45 }
 0x82c   :  { %10219 = vmatprep.subr.bf16.mxu0 %v17902_v10  ;;  %17221 = vmatprep.subr.bf16.mxu1 %v17903_v4  ;;  %v9642_v2 = vsel %vm9621_vm13, %v9638_v26, %v9598_v7  ;;  %v9625_v54 = vsel %vm9621_vm13, %v9620_v53, %v9586_v1 }
 0x82f   :  { %v9590_v61 = vpop.permute.xlu0 %9589  ;;  %v9602_v39 = vpop.permute.xlu1 %9601  ;;  %10220 = vmatpush1.bf16.msra.mxu0 %v17900_v6  ;;  %17222 = vmatpush3.bf16.msra.mxu1 %v17903_v4  ;;  %v19044_v4 = vld [vmem:[#allocation2] sm:$0xff] }
 0x830   :  { %v9647_v8 = vsel %vm9626_vm14, %v9642_v2, %v9602_v39  ;;  %10221 = vmatprep.subr.bf16.mxu0 %v17906_v58  ;;  %17223 = vmatprep.subr.bf16.mxu1 %v17907_v59  ;;  %v9631_v21 = vsel %vm9626_vm14, %v9625_v54, %v9590_v61  ;;  %v19045_v61 = vld [vmem:[#allocation2 + $0x8] sm:$0xff] }
 0x831   :  { %10204 = vmatprep.mubr.bf16.mxu0 %v9647_v8  ;;  %10308 = vmatprep.mubr.bf16.mxu1 %v9647_v8  ;;  %v19046_v8 = vld [vmem:[#allocation2 + $0x18] sm:$0xff] }
 0x832   :  { %10205 = vmatmul.mubr.bf16.gmra.mrb[88].mxu0 %v9631_v21  ;;  %10309 = vmatmul.mubr.bf16.gmra.mrb[68].mxu1 %v9631_v21 }
 0x833   :  { %10222 = vmatpush1.bf16.msra.mxu0 %v17904_v20  ;;  %17224 = vmatpush3.bf16.msra.mxu1 %v17907_v59 }
 0x834   :  { %10223 = vmatprep.subr.bf16.mxu0 %v17910_v22  ;;  %17225 = vmatprep.subr.bf16.mxu1 %v17911_v18 }
 0x835   :  { %10247 = vmatprep.mubr.bf16.mxu0 %v24340_v16 }
 0x837   :  { %10224 = vmatpush1.bf16.msra.mxu0 %v17908_v47  ;;  %17226 = vmatpush3.bf16.msra.mxu1 %v17911_v18 }
 0x838   :  { %10225 = vmatprep.subr.bf16.mxu0 %v17914_v36  ;;  %17227 = vmatprep.subr.bf16.mxu1 %v17915_v25  ;;  %v19047_v36 = vld [vmem:[#allocation2 + $0x20] sm:$0xff] }
 0x83b   :  { %10226 = vmatpush1.bf16.msra.mxu0 %v17912_v35  ;;  %17228 = vmatpush3.bf16.msra.mxu1 %v17915_v25 }
 0x83c   :  { %10227 = vmatprep.subr.bf16.mxu0 %v17918_v0  ;;  %17229 = vmatprep.subr.bf16.mxu1 %v17919_v48 }
 0x83f   :  { %10228 = vmatpush1.bf16.msra.mxu0 %v17916_v14  ;;  %17230 = vmatpush3.bf16.msra.mxu1 %v17919_v48  ;;  %v19048_v14 = vld [vmem:[#allocation2 + $0x10] sm:$0xff] }
 0x840   :  { %10229 = vmatprep.subr.bf16.mxu0 %v17922_v41  ;;  %17231 = vmatprep.subr.bf16.mxu1 %v17923_v29 }
 0x843   :  { %10230 = vmatpush1.bf16.msra.mxu0 %v17920_v33  ;;  %17232 = vmatpush3.bf16.msra.mxu1 %v17923_v29 }
 0x861   :  { %v9608_v34 = vpop.permute.xlu0 %9607 }
 0x865   :  { %v9606_v43 = vpop.permute.xlu1 %9605  ;;  %v9612_v3 = vpop.permute.xlu0 %9611 }
 0x866   :  { %v9654_v5 = vsel %vm6042_vm0, %v9569_v9, %v9606_v43  ;;  %v19049_v43 = vld [vmem:[#allocation2 + $0x28] sm:$0xff] }
 0x869   :  { %v9604_v55 = vpop.permute.xlu1 %9603  ;;  %v9614_v57 = vpop.permute.xlu0 %9613 }
 0x86a   :  { %v9651_v30 = vsel %vm6042_vm0, %v9533_v31, %v9604_v55 }
 0x86b   :  { %v9656_v28 = vsel %vm9621_vm13, %v9651_v30, %v9608_v34 }
 0x86c   :  { %v9660_v40 = vsel %vm9626_vm14, %v9656_v28, %v9612_v3 }
 0x86d   :  { %v9610_v51 = vpop.permute.xlu1 %9609  ;;  %10248 = vmatmul.mubr.bf16.vlgmr.msra.gmra.mrb[84].mxu0 %v9660_v40  ;;  %17233 = vmatprep.mubr.bf16.mxu1 %v9660_v40 }
 0x86e   :  { %v9658_v56 = vsel %vm9621_vm13, %v9654_v5, %v9610_v51  ;;  %10257 = vmatprep.mubr.bf16.mxu0 %v24340_v16  ;;  %v19050_v51 = vld [vmem:[#allocation2 + $0x30] sm:$0xff] }
 0x86f   :  { %v9663_v27 = vsel %vm9626_vm14, %v9658_v56, %v9614_v57 }
 0x870   :  { %17234 = vmatmul.mubr.bf16.vlgmr.msra.gmra.mrb[72].mxu1 %v9663_v27 }
 0x875   :  { %10258 = vmatmul.mubr.bf16.gmra.mrb[88].mxu0 %v9663_v27 }
 0x8f9   :  { %v16815_v12 = vpop.f32.mrb[64].mxu1 }
 0x8fa   :  { %v16816_v31 = vpop.f32.mrb[65].mxu1 }
 0x8fb   :  { %v16817_v24 = vadd.f32 %v16816_v31, %v16815_v12  ;;  %v16818_v62 = vpop.f32.mrb[66].mxu1  ;;  %v19051_v31 = vld [vmem:[#allocation2 + $0x38] sm:$0xff] }
 0x8fc   :  { %v16819_v46 = vpop.f32.mrb[67].mxu1 }
 0x8fd   :  { %v16820_v49 = vadd.f32 %v16819_v46, %v16818_v62  ;;  %v10303_v26 = vadd.f32 %v16817_v24, %v9774_v13  ;;  %v19052_v46 = vld [vmem:[#allocation2 + $0x48] sm:$0xff] }
 0x8ff   :  { %v10306_v47 = vadd.f32 %v16820_v49, %v9774_v13 }
 0x905   :  { %v16821_v44 = vpop.f32.mrb[68].mxu1 }
 0x906   :  { %v16822_v9 = vpop.f32.mrb[69].mxu1 }
 0x907   :  { %v16823_v32 = vadd.f32 %v16822_v9, %v16821_v44  ;;  %v16824_v63 = vpop.f32.mrb[70].mxu1  ;;  %v19053_v44 = vld [vmem:[#allocation2 + $0x40] sm:$0xff] }
 0x908   :  { %v16825_v52 = vpop.f32.mrb[71].mxu1 }
 0x909   :  { %v16826_v50 = vadd.f32 %v16825_v52, %v16824_v63  ;;  %v10311_v10 = vadd.f32 %v16823_v32, %v9774_v13  ;;  %v19054_v32 = vld [vmem:[#allocation2 + $0x50] sm:$0xff] }
 0x90b   :  { %v10314_v54 = vadd.f32 %v16826_v50, %v9774_v13 }
 0x940   :  { %v10249_v45 = vpop.f32.mrb[84].mxu0 }
 0x941   :  { %v17277_v19 = vadd.f32 %v10249_v45, %v9766_v37  ;;  %v10251_v23 = vpop.f32.mrb[85].mxu0  ;;  %v17924_v45 = vld [vmem:[#allocation19] ss:$48 sps:$4 sm:$0xff]  }
 0x942   :  { %v17278_v17 = vadd.f32 %v10251_v23, %v9770_v38  ;;  %v10253_v1 = vpop.f32.mrb[86].mxu0  ;;  %v17927_v23 = vld [vmem:[#allocation19 + $0x8] ss:$48 sps:$4 sm:$0xff]  }
 0x943   :  { %v23469_v7 = vadd.f32 %v19044_v4, %v17277_v19  ;;  %v17279_v6 = vadd.f32 %v10253_v1, %v9766_v37  ;;  %v10255_v58 = vpop.f32.mrb[87].mxu0  ;;  %v17235_v59 = vpop.f32.mrb[72].mxu1  ;;  %v17926_v19 = vld [vmem:[#allocation19 + $0x4] ss:$48 sps:$4 sm:$0xff]   ;;  %v17930_v4 = vld [vmem:[#allocation19 + $0x60] ss:$48 sps:$4 sm:$0xff]  }
 0x944   :  { %v23471_v53 = vadd.f32 %v19045_v61, %v17278_v17  ;;  %v17280_v2 = vadd.f32 %v10255_v58, %v9770_v38  ;;  %v10360_v39 = vadd.f32 %v17235_v59, %v10311_v10  ;;  %v10351_v20 = vpop.f32.mrb[73].mxu1  ;;  %v17929_v17 = vld [vmem:[#allocation19 + $0xc] ss:$48 sps:$4 sm:$0xff]   ;;  %v17932_v1 = vld [vmem:[#allocation19 + $0x64] ss:$48 sps:$4 sm:$0xff]   ;;  %12318 = vmatprep.subr.bf16.mxu1 %v17926_v19 }
 0x945   :  { %v23473_v22 = vadd.f32 %v19046_v8, %v17279_v6  ;;  %v10352_v18 = vadd.f32 %v10351_v20, %v10303_v26  ;;  %v17236_v21 = vpop.f32.mrb[74].mxu1  ;;  %v17935_v10 = vld [vmem:[#allocation19 + $0x6c] ss:$48 sps:$4 sm:$0xff]   ;;  %12424 = vmatprep.subr.bf16.mxu0 %v17929_v17  ;;  %12319 = vmatpush1.bf16.msra.mxu1 %v17924_v45  ;;  %v17933_v6 = vld [vmem:[#allocation19 + $0x68] ss:$48 sps:$4 sm:$0xff]  }
 0x946   :  { %v23475_v25 = vadd.f32 %v19047_v36, %v17280_v2  ;;  %v10363_v35 = vadd.f32 %v17236_v21, %v10314_v54  ;;  %v10354_v0 = vpop.f32.mrb[75].mxu1  ;;  %v10380_v48 = vadd.f32 %v23471_v53, %v23469_v7  ;;  %v23493_v9 = vadd.f32 %v19053_v44, %v10360_v39  ;;  %12425 = vmatpush1.bf16.msra.mxu0 %v17927_v23  ;;  %v17938_v58 = vld [vmem:[#allocation19 + $0xc4] ss:$48 sps:$4 sm:$0xff]   ;;  %v17941_v59 = vld [vmem:[#allocation19 + $0xcc] ss:$48 sps:$4 sm:$0xff]  }
 0x947   :  { %v23479_v41 = vadd.f32 %v19048_v14, %v10352_v18  ;;  %v10355_v29 = vadd.f32 %v10354_v0, %v10306_v47  ;;  %12320 = vmatprep.subr.bf16.mxu1 %v17932_v1  ;;  %12426 = vmatprep.subr.bf16.mxu0 %v17935_v10  ;;  %v17936_v26 = vld [vmem:[#allocation19 + $0xc0] ss:$48 sps:$4 sm:$0xff]   ;;  %v17939_v61 = vld [vmem:[#allocation19 + $0xc8] ss:$48 sps:$4 sm:$0xff]   ;;  %v17944_v2 = vld [vmem:[#allocation19 + $0x124] ss:$48 sps:$4 sm:$0xff]  }
 0x948   :  { %v10259_v33 = vpop.f32.mrb[88].mxu0  ;;  %v10384_v34 = vadd.f32 %v23475_v25, %v23473_v22  ;;  %v17947_v39 = vld [vmem:[#allocation19 + $0x12c] ss:$48 sps:$4 sm:$0xff]   ;;  %v17942_v20 = vld [vmem:[#allocation19 + $0x120] ss:$48 sps:$4 sm:$0xff]  }
 0x949   :  { %v23483_v3 = vadd.f32 %v19049_v43, %v10355_v29  ;;  %v17281_v55 = vadd.f32 %v10259_v33, %v9766_v37  ;;  %v10261_v30 = vpop.f32.mrb[89].mxu0  ;;  %v10381_v28 = vadd.f32 %v10380_v48, %v23479_v41  ;;  %12321 = vmatpush1.bf16.msra.mxu1 %v17930_v4  ;;  %v17945_v54 = vld [vmem:[#allocation19 + $0x128] ss:$48 sps:$4 sm:$0xff]   ;;  %v17950_v8 = vld [vmem:[#allocation19 + $0x184] ss:$48 sps:$4 sm:$0xff]  }
 0x94a   :  { %v17282_v40 = vadd.f32 %v10261_v30, %v9770_v38  ;;  %v10263_v5 = vpop.f32.mrb[90].mxu0  ;;  %12427 = vmatpush1.bf16.msra.mxu0 %v17933_v6  ;;  %12322 = vmatprep.subr.bf16.mxu1 %v17938_v58  ;;  %v17953_v18 = vld [vmem:[#allocation19 + $0x18c] ss:$48 sps:$4 sm:$0xff]   ;;  %v17948_v21 = vld [vmem:[#allocation19 + $0x180] ss:$48 sps:$4 sm:$0xff]  }
 0x94b   :  { %v23486_v57 = vadd.f32 %v19050_v51, %v17281_v55  ;;  %v17283_v56 = vadd.f32 %v10263_v5, %v9766_v37  ;;  %10382 = vadd.xlane.f32.xlu1 %v10381_v28  ;;  %v10265_v27 = vpop.f32.mrb[91].mxu0  ;;  %v10385_v12 = vadd.f32 %v10384_v34, %v23483_v3  ;;  %v19055_v37 = vld [vmem:[#allocation2 + $0x58] sm:$0xff]  ;;  %12428 = vmatprep.subr.bf16.mxu0 %v17941_v59  ;;  %v17956_v36 = vld [vmem:[#allocation19 + $0x1e4] ss:$48 sps:$4 sm:$0xff]   ;;  %v17954_v0 = vld [vmem:[#allocation19 + $0x1e0] ss:$48 sps:$4 sm:$0xff]  }
 0x94c   :  { %v23489_v24 = vadd.f32 %v19051_v31, %v17282_v40  ;;  %v17284_v62 = vadd.f32 %v10265_v27, %v9770_v38  ;;  %v23502_v38 = vadd.f32 %v19055_v37, %v10363_v35  ;;  %v17951_v47 = vld [vmem:[#allocation19 + $0x188] ss:$48 sps:$4 sm:$0xff]   ;;  %v17959_v35 = vld [vmem:[#allocation19 + $0x1ec] ss:$48 sps:$4 sm:$0xff]   ;;  %v17962_v14 = vld [vmem:[#allocation19 + $0x244] ss:$48 sps:$4 sm:$0xff]  }
 0x94d   :  { %v23491_v49 = vadd.f32 %v19052_v46, %v17283_v56  ;;  %10386 = vadd.xlane.f32.xlu0 %v10385_v12  ;;  %12323 = vmatpush1.bf16.msra.mxu1 %v17936_v26  ;;  %v17957_v48 = vld [vmem:[#allocation19 + $0x1e8] ss:$48 sps:$4 sm:$0xff]   ;;  %v17965_v29 = vld [vmem:[#allocation19 + $0x24c] ss:$48 sps:$4 sm:$0xff]   ;;  %v17960_v33 = vld [vmem:[#allocation19 + $0x240] ss:$48 sps:$4 sm:$0xff]  }
 0x94e   :  { %v23495_v63 = vadd.f32 %v19054_v32, %v17284_v62  ;;  %v10388_v52 = vadd.f32 %v23489_v24, %v23486_v57  ;;  %12429 = vmatpush1.bf16.msra.mxu0 %v17939_v61  ;;  %12324 = vmatprep.subr.bf16.mxu1 %v17944_v2  ;;  %v17963_v34 = vld [vmem:[#allocation19 + $0x248] ss:$48 sps:$4 sm:$0xff]   ;;  %v17968_v43 = vld [vmem:[#allocation19 + $0x2a4] ss:$48 sps:$4 sm:$0xff]   ;;  %v17971_v55 = vld [vmem:[#allocation19 + $0x2ac] ss:$48 sps:$4 sm:$0xff]  }
 0x94f   :  { %12430 = vmatprep.subr.bf16.mxu0 %v17947_v39  ;;  %v17966_v30 = vld [vmem:[#allocation19 + $0x2a0] ss:$48 sps:$4 sm:$0xff]   ;;  %v17969_v28 = vld [vmem:[#allocation19 + $0x2a8] ss:$48 sps:$4 sm:$0xff]   ;;  %v17974_v40 = vld [vmem:[#allocation19 + $0x304] ss:$48 sps:$4 sm:$0xff]  }
 0x950   :  { %v10389_v50 = vadd.f32 %v10388_v52, %v23493_v9  ;;  %v10392_v42 = vadd.f32 %v23495_v63, %v23491_v49  ;;  %v17977_v5 = vld [vmem:[#allocation19 + $0x30c] ss:$48 sps:$4 sm:$0xff]   ;;  %v17972_v51 = vld [vmem:[#allocation19 + $0x300] ss:$48 sps:$4 sm:$0xff]   ;;  %v17975_v56 = vld [vmem:[#allocation19 + $0x308] ss:$48 sps:$4 sm:$0xff]  }
 0x951   :  { %12325 = vmatpush1.bf16.msra.mxu1 %v17942_v20  ;;  %v17980_v27 = vld [vmem:[#allocation19 + $0x364] ss:$48 sps:$4 sm:$0xff]   ;;  %v17983_v12 = vld [vmem:[#allocation19 + $0x36c] ss:$48 sps:$4 sm:$0xff]   ;;  %v17978_v31 = vld [vmem:[#allocation19 + $0x360] ss:$48 sps:$4 sm:$0xff]  }
 0x952   :  { %10390 = vadd.xlane.f32.xlu0 %v10389_v50  ;;  %v10393_v13 = vadd.f32 %v10392_v42, %v23502_v38  ;;  %12431 = vmatpush1.bf16.msra.mxu0 %v17945_v54  ;;  %v17981_v62 = vld [vmem:[#allocation19 + $0x368] ss:$48 sps:$4 sm:$0xff]  }
 0x953   :  { %12326 = vmatprep.subr.bf16.mxu1 %v17950_v8  ;;  %12432 = vmatprep.subr.bf16.mxu0 %v17953_v18 }
 0x955   :  { %12327 = vmatpush1.bf16.msra.mxu1 %v17948_v21 }
 0x956   :  { %10394 = vadd.xlane.f32.xlu0 %v10393_v13  ;;  %12433 = vmatpush1.bf16.msra.mxu0 %v17951_v47 }
 0x957   :  { %12328 = vmatprep.subr.bf16.mxu1 %v17956_v36  ;;  %12434 = vmatprep.subr.bf16.mxu0 %v17959_v35 }
 0x959   :  { %12329 = vmatpush1.bf16.msra.mxu1 %v17954_v0 }
 0x95a   :  { %12435 = vmatpush1.bf16.msra.mxu0 %v17957_v48  ;;  %12330 = vmatprep.subr.bf16.mxu1 %v17962_v14 }
 0x95b   :  { %12436 = vmatprep.subr.bf16.mxu0 %v17965_v29 }
 0x95d   :  { %12331 = vmatpush1.bf16.msra.mxu1 %v17960_v33 }
 0x95e   :  { %12437 = vmatpush1.bf16.msra.mxu0 %v17963_v34  ;;  %12332 = vmatprep.subr.bf16.mxu1 %v17968_v43 }
 0x95f   :  { %12438 = vmatprep.subr.bf16.mxu0 %v17971_v55 }
 0x961   :  { %12333 = vmatpush1.bf16.msra.mxu1 %v17966_v30 }
 0x962   :  { %12439 = vmatpush1.bf16.msra.mxu0 %v17969_v28  ;;  %12334 = vmatprep.subr.bf16.mxu1 %v17974_v40  ;;  %v17984_v40 = vld [vmem:[#allocation19 + $0x3c0] ss:$48 sps:$4 sm:$0xff]  }
 0x963   :  { %12440 = vmatprep.subr.bf16.mxu0 %v17977_v5  ;;  %v17986_v5 = vld [vmem:[#allocation19 + $0x3c4] ss:$48 sps:$4 sm:$0xff]  }
 0x965   :  { %12335 = vmatpush1.bf16.msra.mxu1 %v17972_v51  ;;  %v17987_v51 = vld [vmem:[#allocation19 + $0x3c8] ss:$48 sps:$4 sm:$0xff]  }
 0x966   :  { %12441 = vmatpush1.bf16.msra.mxu0 %v17975_v56  ;;  %12336 = vmatprep.subr.bf16.mxu1 %v17980_v27  ;;  %v17989_v56 = vld [vmem:[#allocation19 + $0x3cc] ss:$48 sps:$4 sm:$0xff]   ;;  %v17992_v27 = vld [vmem:[#allocation19 + $0x424] ss:$48 sps:$4 sm:$0xff]  }
 0x967   :  { %12442 = vmatprep.subr.bf16.mxu0 %v17983_v12  ;;  %v17990_v12 = vld [vmem:[#allocation19 + $0x420] ss:$48 sps:$4 sm:$0xff]  }
 0x969   :  { %12337 = vmatpush1.bf16.msra.mxu1 %v17978_v31  ;;  %v17995_v31 = vld [vmem:[#allocation19 + $0x42c] ss:$48 sps:$4 sm:$0xff]  }
 0x96a   :  { %12443 = vmatpush1.bf16.msra.mxu0 %v17981_v62  ;;  %12338 = vmatprep.subr.bf16.mxu1 %v17986_v5  ;;  %v17993_v62 = vld [vmem:[#allocation19 + $0x428] ss:$48 sps:$4 sm:$0xff]  }
 0x96b   :  { %12444 = vmatprep.subr.bf16.mxu0 %v17989_v56  ;;  %v23567_v56 = vld [vmem:[#allocation17] sm:$0x7] }
 0x96d   :  { %12339 = vmatpush1.bf16.msra.mxu1 %v17984_v40  ;;  %v23565_v40 = vld [vmem:[#allocation16] sm:$0x7] }
 0x96e   :  { %12445 = vmatpush1.bf16.msra.mxu0 %v17987_v51  ;;  %12340 = vmatprep.subr.bf16.mxu1 %v17992_v27  ;;  %v10472_v27 = vrot.slane %v23565_v40, %v24342_v11 }
 0x96f   :  { %12446 = vmatprep.subr.bf16.mxu0 %v17995_v31 }
 0x971   :  { %12341 = vmatpush1.bf16.msra.mxu1 %v17990_v12  ;;  %v10468_v12 = vrot.slane %v23565_v40, %v24341_v15 }
 0x972   :  { %12447 = vmatpush1.bf16.msra.mxu0 %v17993_v62 }
 0x9d8   :  { %v10383_v46 = vpop.xlane.xlu1 %10382 }
 0x9d9   :  { %v10396_v44 = vmul.f32 0.0026041667, %v10383_v46  ;;  %v17996_v46 = vld [vmem:[#allocation19 + $0x480] ss:$48 sps:$4 sm:$0xff]  }
 0x9da   :  { %v10387_v32 = vpop.xlane.xlu0 %10386 }
 0x9db   :  { %v23506_v52 = vsub.f32 %v23469_v7, %v10396_v44  ;;  %v23509_v50 = vsub.f32 %v23471_v53, %v10396_v44  ;;  %v23512_v42 = vsub.f32 %v23479_v41, %v10396_v44  ;;  %v10397_v37 = vmul.f32 0.0026041667, %v10387_v32  ;;  %v17998_v44 = vld [vmem:[#allocation19 + $0x484] ss:$48 sps:$4 sm:$0xff]   ;;  %v17999_v32 = vld [vmem:[#allocation19 + $0x488] ss:$48 sps:$4 sm:$0xff]  }
 0x9dc   :  { %12342 = vmatprep.subr.bf16.mxu1 %v17998_v44 }
 0x9dd   :  { %v10412_v13 = vmul.f32 %v23506_v52, %v23506_v52  ;;  %v10413_v45 = vmul.f32 %v23509_v50, %v23509_v50  ;;  %v23519_v19 = vsub.f32 %v23473_v22, %v10397_v37  ;;  %v23522_v23 = vsub.f32 %v23475_v25, %v10397_v37  ;;  %12343 = vmatpush1.bf16.msra.mxu1 %v17996_v46 }
 0x9de   :  { %v23525_v17 = vsub.f32 %v23483_v3, %v10397_v37  ;;  %v10414_v6 = vmul.f32 %v23512_v42, %v23512_v42  ;;  %v18001_v37 = vld [vmem:[#allocation19 + $0x48c] ss:$48 sps:$4 sm:$0xff]  }
 0x9df   :  { %v10415_v1 = vmul.f32 %v23519_v19, %v23519_v19  ;;  %v10416_v10 = vmul.f32 %v23522_v23, %v23522_v23  ;;  %v10391_v4 = vpop.xlane.xlu0 %10390  ;;  %v10424_v58 = vadd.f32 %v10413_v45, %v10412_v13  ;;  %12448 = vmatprep.subr.bf16.mxu0 %v18001_v37  ;;  %v18002_v13 = vld [vmem:[#allocation19 + $0x4e0] ss:$48 sps:$4 sm:$0xff]   ;;  %v18004_v45 = vld [vmem:[#allocation19 + $0x4e4] ss:$48 sps:$4 sm:$0xff]   ;;  %v10496_v37 = vrot.slane %v23567_v56, %v24341_v15 }
 0x9e0   :  { %v10398_v59 = vmul.f32 0.0026041667, %v10391_v4  ;;  %v10417_v61 = vmul.f32 %v23525_v17, %v23525_v17  ;;  %12449 = vmatpush1.bf16.msra.mxu0 %v17999_v32  ;;  %v18010_v4 = vld [vmem:[#allocation19 + $0x544] ss:$48 sps:$4 sm:$0xff]   ;;  %12344 = vmatprep.subr.bf16.mxu1 %v18004_v45  ;;  %v10500_v32 = vrot.slane %v23567_v56, %v24342_v11 }
 0x9e1   :  { %v10425_v26 = vadd.f32 %v10424_v58, %v10414_v6  ;;  %v10428_v2 = vadd.f32 %v10416_v10, %v10415_v1  ;;  %v18005_v1 = vld [vmem:[#allocation19 + $0x4e8] ss:$48 sps:$4 sm:$0xff]   ;;  %v18007_v10 = vld [vmem:[#allocation19 + $0x4ec] ss:$48 sps:$4 sm:$0xff]   ;;  %12345 = vmatpush1.bf16.msra.mxu1 %v18002_v13  ;;  %v18008_v58 = vld [vmem:[#allocation19 + $0x540] ss:$48 sps:$4 sm:$0xff]  }
 0x9e2   :  { %v23536_v39 = vsub.f32 %v23486_v57, %v10398_v59  ;;  %v23539_v20 = vsub.f32 %v23489_v24, %v10398_v59  ;;  %v23542_v54 = vsub.f32 %v23493_v9, %v10398_v59  ;;  %v18013_v6 = vld [vmem:[#allocation19 + $0x54c] ss:$48 sps:$4 sm:$0xff]   ;;  %12450 = vmatprep.subr.bf16.mxu0 %v18007_v10  ;;  %12346 = vmatprep.subr.bf16.mxu1 %v18010_v4  ;;  %v18011_v59 = vld [vmem:[#allocation19 + $0x548] ss:$48 sps:$4 sm:$0xff]  }
 0x9e3   :  { %10426 = vadd.xlane.f32.xlu1 %v10425_v26  ;;  %v10395_v8 = vpop.xlane.xlu0 %10394  ;;  %v10429_v18 = vadd.f32 %v10428_v2, %v10417_v61  ;;  %v18016_v26 = vld [vmem:[#allocation19 + $0x5a4] ss:$48 sps:$4 sm:$0xff]   ;;  %v18019_v61 = vld [vmem:[#allocation19 + $0x5ac] ss:$48 sps:$4 sm:$0xff]   ;;  %v18014_v2 = vld [vmem:[#allocation19 + $0x5a0] ss:$48 sps:$4 sm:$0xff]  }
 0x9e4   :  { %v10418_v21 = vmul.f32 %v23536_v39, %v23536_v39  ;;  %v10419_v47 = vmul.f32 %v23539_v20, %v23539_v20  ;;  %v10399_v36 = vmul.f32 0.0026041667, %v10395_v8  ;;  %v10420_v35 = vmul.f32 %v23542_v54, %v23542_v54  ;;  %12451 = vmatpush1.bf16.msra.mxu0 %v18005_v1  ;;  %v18017_v8 = vld [vmem:[#allocation19 + $0x5a8] ss:$48 sps:$4 sm:$0xff]  }
 0x9e5   :  { %10430 = vadd.xlane.f32.xlu0 %v10429_v18  ;;  %12452 = vmatprep.subr.bf16.mxu0 %v18013_v6  ;;  %v18022_v18 = vld [vmem:[#allocation19 + $0x604] ss:$48 sps:$4 sm:$0xff]  }
 0x9e6   :  { %v23551_v0 = vsub.f32 %v23491_v49, %v10399_v36  ;;  %v23554_v48 = vsub.f32 %v23495_v63, %v10399_v36  ;;  %v23557_v14 = vsub.f32 %v23502_v38, %v10399_v36  ;;  %v10432_v29 = vadd.f32 %v10419_v47, %v10418_v21  ;;  %12347 = vmatpush1.bf16.msra.mxu1 %v18008_v58  ;;  %v18025_v21 = vld [vmem:[#allocation19 + $0x60c] ss:$48 sps:$4 sm:$0xff]  }
 0x9e7   :  { %12348 = vmatprep.subr.bf16.mxu1 %v18016_v26 }
 0x9e8   :  { %v10421_v33 = vmul.f32 %v23551_v0, %v23551_v0  ;;  %v10422_v34 = vmul.f32 %v23554_v48, %v23554_v48  ;;  %v10433_v43 = vadd.f32 %v10432_v29, %v10420_v35  ;;  %v10423_v55 = vmul.f32 %v23557_v14, %v23557_v14  ;;  %12453 = vmatpush1.bf16.msra.mxu0 %v18011_v59 }
 0x9e9   :  { %12454 = vmatprep.subr.bf16.mxu0 %v18019_v61 }
 0x9ea   :  { %10434 = vadd.xlane.f32.xlu1 %v10433_v43  ;;  %v10436_v30 = vadd.f32 %v10422_v34, %v10421_v33  ;;  %12349 = vmatpush1.bf16.msra.mxu1 %v18014_v2 }
 0x9eb   :  { %12371 = vmatprep.subr.bf16.mxu1 %v18022_v18  ;;  %v18023_v18 = vld [vmem:[#allocation19 + $0x608] ss:$48 sps:$4 sm:$0xff]  }
 0x9ec   :  { %v10437_v28 = vadd.f32 %v10436_v30, %v10423_v55  ;;  %12455 = vmatpush1.bf16.msra.mxu0 %v18017_v8  ;;  %v18020_v8 = vld [vmem:[#allocation19 + $0x600] ss:$48 sps:$4 sm:$0xff]  }
 0x9ed   :  { %12477 = vmatprep.subr.bf16.mxu0 %v18025_v21  ;;  %v18028_v21 = vld [vmem:[#allocation19 + $0x664] ss:$48 sps:$4 sm:$0xff]  }
 0x9ee   :  { %10438 = vadd.xlane.f32.xlu0 %v10437_v28 }
 0xa70   :  { %v10427_v47 = vpop.xlane.xlu1 %10426 }
 0xa71   :  { %v10440_v36 = vmul.f32 0.0026041667, %v10427_v47  ;;  %v18031_v47 = vld [vmem:[#allocation19 + $0x66c] ss:$48 sps:$4 sm:$0xff]  }
 0xa72   :  { %v10431_v35 = vpop.xlane.xlu0 %10430 }
 0xa73   :  { %v10444_v29 = vadd.f32 1e-05, %v10440_v36  ;;  %v10441_v33 = vmul.f32 0.0026041667, %v10431_v35 }
 0xa75   :  { %19036 = vrsqrt.f32 %v10444_v29  ;;  %v10445_v34 = vadd.f32 1e-05, %v10441_v33  ;;  %v18026_v33 = vld [vmem:[#allocation19 + $0x660] ss:$48 sps:$4 sm:$0xff]  }
 0xa77   :  { %19038 = vrsqrt.f32 %v10445_v34  ;;  %v10435_v43 = vpop.xlane.xlu1 %10434  ;;  %v18029_v34 = vld [vmem:[#allocation19 + $0x668] ss:$48 sps:$4 sm:$0xff]  }
 0xa78   :  { %v10442_v55 = vmul.f32 0.0026041667, %v10435_v43  ;;  %v18034_v43 = vld [vmem:[#allocation19 + $0x6c4] ss:$48 sps:$4 sm:$0xff]  }
 0xa7a   :  { %v10446_v30 = vadd.f32 1e-05, %v10442_v55  ;;  %v18037_v55 = vld [vmem:[#allocation19 + $0x6cc] ss:$48 sps:$4 sm:$0xff]  }
 0xa7b   :  { %v10439_v28 = vpop.xlane.xlu0 %10438 }
 0xa7c   :  { %19040 = vrsqrt.f32 %v10446_v30  ;;  %v10443_v5 = vmul.f32 0.0026041667, %v10439_v28 }
 0xa7e   :  { %v10447_v51 = vadd.f32 1e-05, %v10443_v5 }
 0xa7f   :  { %v23573_v31 = vpop.eup %19036 }
 0xa80   :  { %19042 = vrsqrt.f32 %v10447_v51  ;;  %v10453_v62 = vmul.f32 %v23573_v31, %v23509_v50  ;;  %v10452_v46 = vmul.f32 %v23573_v31, %v23506_v52 }
 0xa81   :  { %v23579_v44 = vpop.eup %19038 }
 0xa82   :  { %v10456_v13 = vmul.f32 %v23579_v44, %v23522_v23  ;;  %v10481_v45 = vmul.f32 %v10472_v27, %v10453_v62  ;;  %v10455_v1 = vmul.f32 %v23579_v44, %v23519_v19  ;;  %v10480_v10 = vmul.f32 %v10468_v12, %v10452_v46 }
 0xa84   :  { %v10484_v50 = vmul.f32 %v10472_v27, %v10456_v13  ;;  %v10483_v4 = vmul.f32 %v10468_v12, %v10455_v1  ;;  %v10509_v52 = vadd.f32 %v10500_v32, %v10481_v45  ;;  %v10508_v59 = vadd.f32 %v10496_v37, %v10480_v10  ;;  %v18035_v13 = vld [vmem:[#allocation19 + $0x6c8] ss:$48 sps:$4 sm:$0xff]   ;;  %v18040_v1 = vld [vmem:[#allocation19 + $0x724] ss:$48 sps:$4 sm:$0xff]   ;;  %v18043_v10 = vld [vmem:[#allocation19 + $0x72c] ss:$48 sps:$4 sm:$0xff]  }
 0xa86   :  { %v23589_v6 = vpop.eup %19040  ;;  %v10512_v58 = vadd.f32 %v10500_v32, %v10484_v50  ;;  %v10511_v26 = vadd.f32 %v10496_v37, %v10483_v4  ;;  %v18044_v50 = vld [vmem:[#allocation19 + $0x780] ss:$48 sps:$4 sm:$0xff]   ;;  %v18047_v4 = vld [vmem:[#allocation19 + $0x788] ss:$48 sps:$4 sm:$0xff]  }
 0xa87   :  { %v10459_v61 = vmul.f32 %v23589_v6, %v23539_v20  ;;  %v10458_v2 = vmul.f32 %v23589_v6, %v23536_v39 }
 0xa88   :  { %v23595_v23 = vpack.c.bf16 %v10512_v58, %v10509_v52  ;;  %v23597_v19 = vpack.c.bf16 %v10511_v26, %v10508_v59  ;;  %v18052_v52 = vld [vmem:[#allocation19 + $0x7e4] ss:$48 sps:$4 sm:$0xff]   ;;  %v18055_v58 = vld [vmem:[#allocation19 + $0x7ec] ss:$48 sps:$4 sm:$0xff]   ;;  %v18050_v59 = vld [vmem:[#allocation19 + $0x7e0] ss:$48 sps:$4 sm:$0xff]  }
 0xa89   :  { %v10487_v35 = vmul.f32 %v10472_v27, %v10459_v61  ;;  %v10486_v29 = vmul.f32 %v10468_v12, %v10458_v2  ;;  %v18053_v26 = vld [vmem:[#allocation19 + $0x7e8] ss:$48 sps:$4 sm:$0xff]   ;;  %v18058_v61 = vld [vmem:[#allocation19 + $0x844] ss:$48 sps:$4 sm:$0xff]   ;;  %v18061_v2 = vld [vmem:[#allocation19 + $0x84c] ss:$48 sps:$4 sm:$0xff]  }
 0xa8a   :  { %v23599_v36 = vpop.eup %19042  ;;  %12350 = vmatprep.mubr.bf16.mxu1 %v23595_v23  ;;  %12456 = vmatprep.mubr.bf16.mxu0 %v23595_v23 }
 0xa8b   :  { %12351 = vmatmul.mubr.bf16.vlgmr.msra.gmra.mrb[76].mxu1 %v23597_v19  ;;  %12457 = vmatmul.mubr.bf16.vlgmr.msra.gmra.mrb[92].mxu0 %v23597_v19  ;;  %v10462_v39 = vmul.f32 %v23599_v36, %v23554_v48  ;;  %v10461_v20 = vmul.f32 %v23599_v36, %v23551_v0  ;;  %v10515_v5 = vadd.f32 %v10500_v32, %v10487_v35  ;;  %v18032_v48 = vld [vmem:[#allocation19 + $0x6c0] ss:$48 sps:$4 sm:$0xff]   ;;  %v18059_v35 = vld [vmem:[#allocation19 + $0x848] ss:$48 sps:$4 sm:$0xff]  }
 0xa8c   :  { %12372 = vmatpush1.bf16.msra.mxu1 %v18020_v8  ;;  %12478 = vmatpush1.bf16.msra.mxu0 %v18023_v18  ;;  %v10514_v62 = vadd.f32 %v10496_v37, %v10486_v29  ;;  %v10457_v8 = vmul.f32 %v23579_v44, %v23525_v17  ;;  %v10454_v18 = vmul.f32 %v23573_v31, %v23512_v42  ;;  %v18062_v17 = vld [vmem:[#allocation19 + $0x8a0] ss:$48 sps:$4 sm:$0xff]   ;;  %v18065_v42 = vld [vmem:[#allocation19 + $0x8a8] ss:$48 sps:$4 sm:$0xff]   ;;  %v18070_v31 = vld [vmem:[#allocation19 + $0x14] ss:$48 sps:$4 sm:$0xff]  }
 0xa8d   :  { %12373 = vmatprep.subr.bf16.mxu1 %v18028_v21  ;;  %12479 = vmatprep.subr.bf16.mxu0 %v18031_v47  ;;  %v10490_v30 = vmul.f32 %v10472_v27, %v10462_v39  ;;  %v10489_v28 = vmul.f32 %v10468_v12, %v10461_v20  ;;  %v18038_v27 = vld [vmem:[#allocation19 + $0x720] ss:$48 sps:$4 sm:$0xff]   ;;  %v18041_v12 = vld [vmem:[#allocation19 + $0x728] ss:$48 sps:$4 sm:$0xff]   ;;  %v10476_v21 = vrot.slane %v23565_v40, %v24343_v60  ;;  %v18064_v39 = vld [vmem:[#allocation19 + $0x8a4] ss:$48 sps:$4 sm:$0xff]  }
 0xa8e   :  { %v18056_v47 = vld [vmem:[#allocation19 + $0x840] ss:$48 sps:$4 sm:$0xff]   ;;  %v18067_v20 = vld [vmem:[#allocation19 + $0x8ac] ss:$48 sps:$4 sm:$0xff]  }
 0xa8f   :  { %v10518_v51 = vadd.f32 %v10500_v32, %v10490_v30  ;;  %v10517_v46 = vadd.f32 %v10496_v37, %v10489_v28  ;;  %v18046_v32 = vld [vmem:[#allocation19 + $0x784] ss:$48 sps:$4 sm:$0xff]   ;;  %v18049_v37 = vld [vmem:[#allocation19 + $0x78c] ss:$48 sps:$4 sm:$0xff]   ;;  %v10485_v29 = vmul.f32 %v10476_v21, %v10457_v8  ;;  %v10460_v30 = vmul.f32 %v23589_v6, %v23542_v54  ;;  %v18068_v28 = vld [vmem:[#allocation19 + $0x10] ss:$48 sps:$4 sm:$0xff]  }
 0xa90   :  { %12374 = vmatpush1.bf16.msra.mxu1 %v18026_v33  ;;  %12480 = vmatpush1.bf16.msra.mxu0 %v18029_v34  ;;  %v10482_v33 = vmul.f32 %v10476_v21, %v10454_v18  ;;  %v10504_v34 = vrot.slane %v23567_v56, %v24343_v60  ;;  %v18073_v44 = vld [vmem:[#allocation19 + $0x1c] ss:$48 sps:$4 sm:$0xff]   ;;  %v18071_v56 = vld [vmem:[#allocation19 + $0x18] ss:$48 sps:$4 sm:$0xff]   ;;  %v18098_v8 = vld [vmem:[#allocation19 + $0x1f0] ss:$48 sps:$4 sm:$0xff]  }
 0xa91   :  { %12375 = vmatprep.subr.bf16.mxu1 %v18034_v43  ;;  %12481 = vmatprep.subr.bf16.mxu0 %v18037_v55  ;;  %v23609_v0 = vpack.c.bf16 %v10518_v51, %v10515_v5  ;;  %v23611_v45 = vpack.c.bf16 %v10517_v46, %v10514_v62  ;;  %v10463_v43 = vmul.f32 %v23599_v36, %v23557_v14  ;;  %v18076_v51 = vld [vmem:[#allocation19 + $0x74] ss:$48 sps:$4 sm:$0xff]   ;;  %v18079_v62 = vld [vmem:[#allocation19 + $0x7c] ss:$48 sps:$4 sm:$0xff]   ;;  %v18074_v36 = vld [vmem:[#allocation19 + $0x70] ss:$48 sps:$4 sm:$0xff]  }
 0xa92   :  { %v10513_v40 = vadd.f32 %v10504_v34, %v10485_v29  ;;  %v10510_v55 = vadd.f32 %v10504_v34, %v10482_v33  ;;  %v10488_v14 = vmul.f32 %v10476_v21, %v10460_v30  ;;  %v18077_v54 = vld [vmem:[#allocation19 + $0x78] ss:$48 sps:$4 sm:$0xff]   ;;  %v18115_v29 = vld [vmem:[#allocation19 + $0x2bc] ss:$48 sps:$4 sm:$0xff]   ;;  %v18110_v33 = vld [vmem:[#allocation19 + $0x2b0] ss:$48 sps:$4 sm:$0xff]  }
 0xa93   :  { %12360 = vmatprep.mubr.bf16.mxu1 %v23609_v0  ;;  %12466 = vmatprep.mubr.bf16.mxu0 %v23609_v0  ;;  %v10491_v46 = vmul.f32 %v10476_v21, %v10463_v43  ;;  %v18101_v18 = vld [vmem:[#allocation19 + $0x1f8] ss:$48 sps:$4 sm:$0xff]   ;;  %v18106_v21 = vld [vmem:[#allocation19 + $0x254] ss:$48 sps:$4 sm:$0xff]   ;;  %v18127_v43 = vld [vmem:[#allocation19 + $0x37c] ss:$48 sps:$4 sm:$0xff]  }
 0xa94   :  { %12376 = vmatpush1.bf16.msra.mxu1 %v18032_v48  ;;  %12482 = vmatpush1.bf16.msra.mxu0 %v18035_v13  ;;  %v23631_v5 = vpack.c.bf16 %v10513_v40, %v10510_v55  ;;  %v18082_v48 = vld [vmem:[#allocation19 + $0xd4] ss:$48 sps:$4 sm:$0xff]   ;;  %v18085_v13 = vld [vmem:[#allocation19 + $0xdc] ss:$48 sps:$4 sm:$0xff]   ;;  %v18116_v40 = vld [vmem:[#allocation19 + $0x310] ss:$48 sps:$4 sm:$0xff]  }
 0xa95   :  { %12361 = vmatmul.mubr.bf16.gmra.mrb[80].mxu1 %v23611_v45  ;;  %12467 = vmatmul.mubr.bf16.gmra.mrb[96].mxu0 %v23611_v45  ;;  %v10519_v6 = vadd.f32 %v10504_v34, %v10491_v46  ;;  %v18122_v55 = vld [vmem:[#allocation19 + $0x370] ss:$48 sps:$4 sm:$0xff]   ;;  %v18125_v30 = vld [vmem:[#allocation19 + $0x378] ss:$48 sps:$4 sm:$0xff]   ;;  %v18136_v46 = vld [vmem:[#allocation19 + $0x434] ss:$48 sps:$4 sm:$0xff]  }
 0xa96   :  { %12377 = vmatprep.subr.bf16.mxu1 %v18040_v1  ;;  %12483 = vmatprep.subr.bf16.mxu0 %v18043_v10  ;;  %v10516_v1 = vadd.f32 %v10504_v34, %v10488_v14  ;;  %v18080_v10 = vld [vmem:[#allocation19 + $0xd0] ss:$48 sps:$4 sm:$0xff]   ;;  %v18113_v34 = vld [vmem:[#allocation19 + $0x2b8] ss:$48 sps:$4 sm:$0xff]   ;;  %v18139_v14 = vld [vmem:[#allocation19 + $0x43c] ss:$48 sps:$4 sm:$0xff]  }
 0xa97   :  { %12403 = vmatprep.mubr.bf16.mxu1 %v24340_v16  ;;  %12509 = vmatprep.mubr.bf16.mxu0 %v24340_v16 }
 0xa98   :  { %12378 = vmatpush1.bf16.msra.mxu1 %v18038_v27  ;;  %12484 = vmatpush1.bf16.msra.mxu0 %v18041_v12  ;;  %v23637_v27 = vpack.c.bf16 %v10519_v6, %v10516_v1  ;;  %v18083_v12 = vld [vmem:[#allocation19 + $0xd8] ss:$48 sps:$4 sm:$0xff]   ;;  %v18142_v6 = vld [vmem:[#allocation19 + $0x494] ss:$48 sps:$4 sm:$0xff]  }
 0xa99   :  { %12379 = vmatprep.subr.bf16.mxu1 %v18046_v32  ;;  %12485 = vmatprep.subr.bf16.mxu0 %v18049_v37  ;;  %v18088_v32 = vld [vmem:[#allocation19 + $0x134] ss:$48 sps:$4 sm:$0xff]   ;;  %v18091_v37 = vld [vmem:[#allocation19 + $0x13c] ss:$48 sps:$4 sm:$0xff]   ;;  %v18143_v1 = vld [vmem:[#allocation19 + $0x498] ss:$48 sps:$4 sm:$0xff]  }
 0xa9c   :  { %12380 = vmatpush1.bf16.msra.mxu1 %v18044_v50  ;;  %12486 = vmatpush1.bf16.msra.mxu0 %v18047_v4  ;;  %v18086_v50 = vld [vmem:[#allocation19 + $0x130] ss:$48 sps:$4 sm:$0xff]   ;;  %v18089_v4 = vld [vmem:[#allocation19 + $0x138] ss:$48 sps:$4 sm:$0xff]  }
 0xa9d   :  { %12381 = vmatprep.subr.bf16.mxu1 %v18052_v52  ;;  %12487 = vmatprep.subr.bf16.mxu0 %v18055_v58  ;;  %v18094_v52 = vld [vmem:[#allocation19 + $0x194] ss:$48 sps:$4 sm:$0xff]   ;;  %v18097_v58 = vld [vmem:[#allocation19 + $0x19c] ss:$48 sps:$4 sm:$0xff]  }
 0xaa0   :  { %12382 = vmatpush1.bf16.msra.mxu1 %v18050_v59  ;;  %12488 = vmatpush1.bf16.msra.mxu0 %v18053_v26  ;;  %v18092_v59 = vld [vmem:[#allocation19 + $0x190] ss:$48 sps:$4 sm:$0xff]   ;;  %v18095_v26 = vld [vmem:[#allocation19 + $0x198] ss:$48 sps:$4 sm:$0xff]  }
 0xaa1   :  { %12383 = vmatprep.subr.bf16.mxu1 %v18058_v61  ;;  %12489 = vmatprep.subr.bf16.mxu0 %v18061_v2  ;;  %v18100_v61 = vld [vmem:[#allocation19 + $0x1f4] ss:$48 sps:$4 sm:$0xff]   ;;  %v18103_v2 = vld [vmem:[#allocation19 + $0x1fc] ss:$48 sps:$4 sm:$0xff]  }
 0xaa4   :  { %12384 = vmatpush1.bf16.msra.mxu1 %v18056_v47  ;;  %12490 = vmatpush1.bf16.msra.mxu0 %v18059_v35  ;;  %v18109_v47 = vld [vmem:[#allocation19 + $0x25c] ss:$48 sps:$4 sm:$0xff]   ;;  %v18104_v35 = vld [vmem:[#allocation19 + $0x250] ss:$48 sps:$4 sm:$0xff]  }
 0xaa5   :  { %12385 = vmatprep.subr.bf16.mxu1 %v18064_v39  ;;  %12491 = vmatprep.subr.bf16.mxu0 %v18067_v20  ;;  %v18107_v39 = vld [vmem:[#allocation19 + $0x258] ss:$48 sps:$4 sm:$0xff]   ;;  %v18112_v20 = vld [vmem:[#allocation19 + $0x2b4] ss:$48 sps:$4 sm:$0xff]  }
 0xaa8   :  { %12386 = vmatpush1.bf16.msra.mxu1 %v18062_v17  ;;  %12492 = vmatpush1.bf16.msra.mxu0 %v18065_v42  ;;  %v18118_v17 = vld [vmem:[#allocation19 + $0x314] ss:$48 sps:$4 sm:$0xff]   ;;  %v18121_v42 = vld [vmem:[#allocation19 + $0x31c] ss:$48 sps:$4 sm:$0xff]  }
 0xaa9   :  { %12530 = vmatprep.subr.bf16.mxu1 %v18070_v31  ;;  %12636 = vmatprep.subr.bf16.mxu0 %v18073_v44  ;;  %v18119_v31 = vld [vmem:[#allocation19 + $0x318] ss:$48 sps:$4 sm:$0xff]   ;;  %v18124_v44 = vld [vmem:[#allocation19 + $0x374] ss:$48 sps:$4 sm:$0xff]  }
 0xaab   :  { %12404 = vmatmul.mubr.bf16.vlgmr.msra.gmra.mrb[76].mxu1 %v23631_v5  ;;  %12510 = vmatmul.mubr.bf16.vlgmr.msra.gmra.mrb[92].mxu0 %v23631_v5 }
 0xaac   :  { %12531 = vmatpush1.bf16.msra.mxu1 %v18068_v28  ;;  %12637 = vmatpush1.bf16.msra.mxu0 %v18071_v56  ;;  %v18130_v28 = vld [vmem:[#allocation19 + $0x3d4] ss:$48 sps:$4 sm:$0xff]   ;;  %v18133_v56 = vld [vmem:[#allocation19 + $0x3dc] ss:$48 sps:$4 sm:$0xff]  }
 0xaad   :  { %12532 = vmatprep.subr.bf16.mxu1 %v18076_v51  ;;  %12638 = vmatprep.subr.bf16.mxu0 %v18079_v62  ;;  %v18128_v51 = vld [vmem:[#allocation19 + $0x3d0] ss:$48 sps:$4 sm:$0xff]   ;;  %v18131_v62 = vld [vmem:[#allocation19 + $0x3d8] ss:$48 sps:$4 sm:$0xff]  }
 0xaae   :  { %12413 = vmatprep.mubr.bf16.mxu1 %v24340_v16  ;;  %12519 = vmatprep.mubr.bf16.mxu0 %v24340_v16 }
 0xab0   :  { %12533 = vmatpush1.bf16.msra.mxu1 %v18074_v36  ;;  %12639 = vmatpush1.bf16.msra.mxu0 %v18077_v54  ;;  %v18134_v36 = vld [vmem:[#allocation19 + $0x430] ss:$48 sps:$4 sm:$0xff]   ;;  %v18137_v54 = vld [vmem:[#allocation19 + $0x438] ss:$48 sps:$4 sm:$0xff]  }
 0xab1   :  { %12534 = vmatprep.subr.bf16.mxu1 %v18082_v48  ;;  %12640 = vmatprep.subr.bf16.mxu0 %v18085_v13  ;;  %v18145_v48 = vld [vmem:[#allocation19 + $0x49c] ss:$48 sps:$4 sm:$0xff]   ;;  %v18140_v13 = vld [vmem:[#allocation19 + $0x490] ss:$48 sps:$4 sm:$0xff]  }
 0xab3   :  { %12414 = vmatmul.mubr.bf16.gmra.mrb[80].mxu1 %v23637_v27  ;;  %12520 = vmatmul.mubr.bf16.gmra.mrb[96].mxu0 %v23637_v27 }
 0xab4   :  { %12535 = vmatpush1.bf16.msra.mxu1 %v18080_v10  ;;  %12562 = vmatprep.mubr.bf16.mxu1 %v23595_v23  ;;  %v18148_v10 = vld [vmem:[#allocation19 + $0x4f4] ss:$48 sps:$4 sm:$0xff]  }
 0xab5   :  { %12641 = vmatpush1.bf16.msra.mxu0 %v18083_v12  ;;  %12668 = vmatprep.mubr.bf16.mxu0 %v23595_v23  ;;  %v18151_v12 = vld [vmem:[#allocation19 + $0x4fc] ss:$48 sps:$4 sm:$0xff]  }
 0xab6   :  { %12536 = vmatprep.subr.bf16.mxu1 %v18088_v32  ;;  %12642 = vmatprep.subr.bf16.mxu0 %v18091_v37  ;;  %v18146_v32 = vld [vmem:[#allocation19 + $0x4f0] ss:$48 sps:$4 sm:$0xff]   ;;  %v18149_v37 = vld [vmem:[#allocation19 + $0x4f8] ss:$48 sps:$4 sm:$0xff]  }
 0xab8   :  { %12537 = vmatpush1.bf16.msra.mxu1 %v18086_v50  ;;  %v18154_v50 = vld [vmem:[#allocation19 + $0x554] ss:$48 sps:$4 sm:$0xff]  }
 0xab9   :  { %12643 = vmatpush1.bf16.msra.mxu0 %v18089_v4  ;;  %12538 = vmatprep.subr.bf16.mxu1 %v18094_v52  ;;  %v18157_v4 = vld [vmem:[#allocation19 + $0x55c] ss:$48 sps:$4 sm:$0xff]   ;;  %v18152_v52 = vld [vmem:[#allocation19 + $0x550] ss:$48 sps:$4 sm:$0xff]  }
 0xaba   :  { %12644 = vmatprep.subr.bf16.mxu0 %v18097_v58  ;;  %v18155_v58 = vld [vmem:[#allocation19 + $0x558] ss:$48 sps:$4 sm:$0xff]  }
 0xabc   :  { %12539 = vmatpush1.bf16.msra.mxu1 %v18092_v59  ;;  %v18160_v59 = vld [vmem:[#allocation19 + $0x5b4] ss:$48 sps:$4 sm:$0xff]  }
 0xabd   :  { %12645 = vmatpush1.bf16.msra.mxu0 %v18095_v26  ;;  %12540 = vmatprep.subr.bf16.mxu1 %v18100_v61  ;;  %v18163_v26 = vld [vmem:[#allocation19 + $0x5bc] ss:$48 sps:$4 sm:$0xff]   ;;  %v18158_v61 = vld [vmem:[#allocation19 + $0x5b0] ss:$48 sps:$4 sm:$0xff]  }
 0xabe   :  { %12646 = vmatprep.subr.bf16.mxu0 %v18103_v2  ;;  %v18161_v2 = vld [vmem:[#allocation19 + $0x5b8] ss:$48 sps:$4 sm:$0xff]  }
 0xac0   :  { %12541 = vmatpush1.bf16.msra.mxu1 %v18098_v8  ;;  %v18166_v8 = vld [vmem:[#allocation19 + $0x614] ss:$48 sps:$4 sm:$0xff]  }
 0xac1   :  { %12647 = vmatpush1.bf16.msra.mxu0 %v18101_v18  ;;  %12542 = vmatprep.subr.bf16.mxu1 %v18106_v21  ;;  %v18169_v18 = vld [vmem:[#allocation19 + $0x61c] ss:$48 sps:$4 sm:$0xff]   ;;  %v18164_v21 = vld [vmem:[#allocation19 + $0x610] ss:$48 sps:$4 sm:$0xff]  }
 0xac2   :  { %12648 = vmatprep.subr.bf16.mxu0 %v18109_v47  ;;  %v18167_v47 = vld [vmem:[#allocation19 + $0x618] ss:$48 sps:$4 sm:$0xff]  }
 0xac4   :  { %12543 = vmatpush1.bf16.msra.mxu1 %v18104_v35  ;;  %v18172_v35 = vld [vmem:[#allocation19 + $0x674] ss:$48 sps:$4 sm:$0xff]  }
 0xac5   :  { %12649 = vmatpush1.bf16.msra.mxu0 %v18107_v39  ;;  %12544 = vmatprep.subr.bf16.mxu1 %v18112_v20  ;;  %v18175_v39 = vld [vmem:[#allocation19 + $0x67c] ss:$48 sps:$4 sm:$0xff]   ;;  %v18170_v20 = vld [vmem:[#allocation19 + $0x670] ss:$48 sps:$4 sm:$0xff]  }
 0xac6   :  { %12650 = vmatprep.subr.bf16.mxu0 %v18115_v29  ;;  %v18173_v29 = vld [vmem:[#allocation19 + $0x678] ss:$48 sps:$4 sm:$0xff]  }
 0xac8   :  { %12545 = vmatpush1.bf16.msra.mxu1 %v18110_v33  ;;  %v18178_v33 = vld [vmem:[#allocation19 + $0x6d4] ss:$48 sps:$4 sm:$0xff]  }
 0xac9   :  { %12651 = vmatpush1.bf16.msra.mxu0 %v18113_v34  ;;  %12546 = vmatprep.subr.bf16.mxu1 %v18118_v17  ;;  %v18181_v34 = vld [vmem:[#allocation19 + $0x6dc] ss:$48 sps:$4 sm:$0xff]   ;;  %v18176_v17 = vld [vmem:[#allocation19 + $0x6d0] ss:$48 sps:$4 sm:$0xff]  }
 0xaca   :  { %12652 = vmatprep.subr.bf16.mxu0 %v18121_v42  ;;  %v18179_v42 = vld [vmem:[#allocation19 + $0x6d8] ss:$48 sps:$4 sm:$0xff]  }
 0xacc   :  { %12547 = vmatpush1.bf16.msra.mxu1 %v18116_v40  ;;  %v18184_v40 = vld [vmem:[#allocation19 + $0x734] ss:$48 sps:$4 sm:$0xff]  }
 0xacd   :  { %12653 = vmatpush1.bf16.msra.mxu0 %v18119_v31  ;;  %12548 = vmatprep.subr.bf16.mxu1 %v18124_v44  ;;  %v18187_v31 = vld [vmem:[#allocation19 + $0x73c] ss:$48 sps:$4 sm:$0xff]   ;;  %v18182_v44 = vld [vmem:[#allocation19 + $0x730] ss:$48 sps:$4 sm:$0xff]  }
 0xace   :  { %12654 = vmatprep.subr.bf16.mxu0 %v18127_v43  ;;  %v18185_v43 = vld [vmem:[#allocation19 + $0x738] ss:$48 sps:$4 sm:$0xff]  }
 0xad0   :  { %12549 = vmatpush1.bf16.msra.mxu1 %v18122_v55  ;;  %v18190_v55 = vld [vmem:[#allocation19 + $0x794] ss:$48 sps:$4 sm:$0xff]  }
 0xad1   :  { %12655 = vmatpush1.bf16.msra.mxu0 %v18125_v30  ;;  %12550 = vmatprep.subr.bf16.mxu1 %v18130_v28  ;;  %v18193_v30 = vld [vmem:[#allocation19 + $0x79c] ss:$48 sps:$4 sm:$0xff]   ;;  %v18188_v28 = vld [vmem:[#allocation19 + $0x790] ss:$48 sps:$4 sm:$0xff]  }
 0xad2   :  { %12656 = vmatprep.subr.bf16.mxu0 %v18133_v56  ;;  %v18191_v56 = vld [vmem:[#allocation19 + $0x798] ss:$48 sps:$4 sm:$0xff]  }
 0xad4   :  { %12551 = vmatpush1.bf16.msra.mxu1 %v18128_v51  ;;  %v18196_v51 = vld [vmem:[#allocation19 + $0x7f4] ss:$48 sps:$4 sm:$0xff]  }
 0xad5   :  { %12657 = vmatpush1.bf16.msra.mxu0 %v18131_v62  ;;  %12552 = vmatprep.subr.bf16.mxu1 %v18136_v46  ;;  %v18199_v62 = vld [vmem:[#allocation19 + $0x7fc] ss:$48 sps:$4 sm:$0xff]   ;;  %v18194_v46 = vld [vmem:[#allocation19 + $0x7f0] ss:$48 sps:$4 sm:$0xff]  }
 0xad6   :  { %12658 = vmatprep.subr.bf16.mxu0 %v18139_v14  ;;  %v18197_v14 = vld [vmem:[#allocation19 + $0x7f8] ss:$48 sps:$4 sm:$0xff]  }
 0xad8   :  { %12553 = vmatpush1.bf16.msra.mxu1 %v18134_v36  ;;  %v18202_v36 = vld [vmem:[#allocation19 + $0x854] ss:$48 sps:$4 sm:$0xff]  }
 0xad9   :  { %12659 = vmatpush1.bf16.msra.mxu0 %v18137_v54  ;;  %12554 = vmatprep.subr.bf16.mxu1 %v18142_v6  ;;  %v18205_v54 = vld [vmem:[#allocation19 + $0x85c] ss:$48 sps:$4 sm:$0xff]   ;;  %v18200_v6 = vld [vmem:[#allocation19 + $0x850] ss:$48 sps:$4 sm:$0xff]  }
 0xada   :  { %12660 = vmatprep.subr.bf16.mxu0 %v18145_v48  ;;  %v18203_v48 = vld [vmem:[#allocation19 + $0x858] ss:$48 sps:$4 sm:$0xff]  }
 0xadc   :  { %12555 = vmatpush1.bf16.msra.mxu1 %v18140_v13  ;;  %v18208_v13 = vld [vmem:[#allocation19 + $0x8b4] ss:$48 sps:$4 sm:$0xff]  }
 0xadd   :  { %12661 = vmatpush1.bf16.msra.mxu0 %v18143_v1  ;;  %12556 = vmatprep.subr.bf16.mxu1 %v18148_v10  ;;  %v18211_v1 = vld [vmem:[#allocation19 + $0x8bc] ss:$48 sps:$4 sm:$0xff]   ;;  %v18206_v10 = vld [vmem:[#allocation19 + $0x8b0] ss:$48 sps:$4 sm:$0xff]  }
 0xade   :  { %12662 = vmatprep.subr.bf16.mxu0 %v18151_v12  ;;  %v18209_v12 = vld [vmem:[#allocation19 + $0x8b8] ss:$48 sps:$4 sm:$0xff]  }
 0xae0   :  { %12557 = vmatpush1.bf16.msra.mxu1 %v18146_v32  ;;  %v18214_v32 = vld [vmem:[#allocation19 + $0x24] ss:$48 sps:$4 sm:$0xff]  }
 0xae1   :  { %12663 = vmatpush1.bf16.msra.mxu0 %v18149_v37  ;;  %12558 = vmatprep.subr.bf16.mxu1 %v18154_v50  ;;  %v18217_v37 = vld [vmem:[#allocation19 + $0x2c] ss:$48 sps:$4 sm:$0xff]   ;;  %v18212_v50 = vld [vmem:[#allocation19 + $0x20] ss:$48 sps:$4 sm:$0xff]  }
 0xae2   :  { %12664 = vmatprep.subr.bf16.mxu0 %v18157_v4  ;;  %v18215_v4 = vld [vmem:[#allocation19 + $0x28] ss:$48 sps:$4 sm:$0xff]  }
 0xae4   :  { %12559 = vmatpush1.bf16.msra.mxu1 %v18152_v52  ;;  %v18220_v52 = vld [vmem:[#allocation19 + $0x84] ss:$48 sps:$4 sm:$0xff]  }
 0xae5   :  { %12665 = vmatpush1.bf16.msra.mxu0 %v18155_v58  ;;  %12560 = vmatprep.subr.bf16.mxu1 %v18160_v59  ;;  %v18223_v58 = vld [vmem:[#allocation19 + $0x8c] ss:$48 sps:$4 sm:$0xff]   ;;  %v18218_v59 = vld [vmem:[#allocation19 + $0x80] ss:$48 sps:$4 sm:$0xff]  }
 0xae6   :  { %12666 = vmatprep.subr.bf16.mxu0 %v18163_v26  ;;  %v18221_v26 = vld [vmem:[#allocation19 + $0x88] ss:$48 sps:$4 sm:$0xff]  }
 0xae8   :  { %12561 = vmatpush1.bf16.msra.mxu1 %v18158_v61  ;;  %v18226_v61 = vld [vmem:[#allocation19 + $0xe4] ss:$48 sps:$4 sm:$0xff]  }
 0xae9   :  { %12667 = vmatpush1.bf16.msra.mxu0 %v18161_v2  ;;  %12583 = vmatprep.subr.bf16.mxu1 %v18166_v8  ;;  %v18229_v2 = vld [vmem:[#allocation19 + $0xec] ss:$48 sps:$4 sm:$0xff]   ;;  %v18224_v8 = vld [vmem:[#allocation19 + $0xe0] ss:$48 sps:$4 sm:$0xff]  }
 0xaea   :  { %12689 = vmatprep.subr.bf16.mxu0 %v18169_v18  ;;  %v18227_v18 = vld [vmem:[#allocation19 + $0xe8] ss:$48 sps:$4 sm:$0xff]  }
 0xaeb   :  { %12563 = vmatmul.mubr.bf16.vlgmr.msra.gmra.mrb[84].mxu1 %v23597_v19 }
 0xaec   :  { %12669 = vmatmul.mubr.bf16.vlgmr.msra.gmra.mrb[100].mxu0 %v23597_v19  ;;  %12572 = vmatprep.mubr.bf16.mxu1 %v23609_v0 }
 0xaed   :  { %12584 = vmatpush1.bf16.msra.mxu1 %v18164_v21  ;;  %12678 = vmatprep.mubr.bf16.mxu0 %v23609_v0  ;;  %v18232_v21 = vld [vmem:[#allocation19 + $0x144] ss:$48 sps:$4 sm:$0xff]  }
 0xaee   :  { %12690 = vmatpush1.bf16.msra.mxu0 %v18167_v47  ;;  %12585 = vmatprep.subr.bf16.mxu1 %v18172_v35  ;;  %v18235_v47 = vld [vmem:[#allocation19 + $0x14c] ss:$48 sps:$4 sm:$0xff]   ;;  %v18230_v35 = vld [vmem:[#allocation19 + $0x140] ss:$48 sps:$4 sm:$0xff]  }
 0xaef   :  { %12691 = vmatprep.subr.bf16.mxu0 %v18175_v39  ;;  %v18233_v39 = vld [vmem:[#allocation19 + $0x148] ss:$48 sps:$4 sm:$0xff]  }
 0xaf1   :  { %12586 = vmatpush1.bf16.msra.mxu1 %v18170_v20  ;;  %v18238_v20 = vld [vmem:[#allocation19 + $0x1a4] ss:$48 sps:$4 sm:$0xff]  }
 0xaf2   :  { %12692 = vmatpush1.bf16.msra.mxu0 %v18173_v29  ;;  %12587 = vmatprep.subr.bf16.mxu1 %v18178_v33  ;;  %v18241_v29 = vld [vmem:[#allocation19 + $0x1ac] ss:$48 sps:$4 sm:$0xff]   ;;  %v18236_v33 = vld [vmem:[#allocation19 + $0x1a0] ss:$48 sps:$4 sm:$0xff]  }
 0xaf3   :  { %12573 = vmatmul.mubr.bf16.gmra.mrb[88].mxu1 %v23611_v45  ;;  %12693 = vmatprep.subr.bf16.mxu0 %v18181_v34  ;;  %v18239_v34 = vld [vmem:[#allocation19 + $0x1a8] ss:$48 sps:$4 sm:$0xff]  }
 0xaf4   :  { %12679 = vmatmul.mubr.bf16.gmra.mrb[104].mxu0 %v23611_v45  ;;  %12615 = vmatprep.mubr.bf16.mxu1 %v24340_v16 }
 0xaf5   :  { %12588 = vmatpush1.bf16.msra.mxu1 %v18176_v17  ;;  %12721 = vmatprep.mubr.bf16.mxu0 %v24340_v16  ;;  %v18244_v17 = vld [vmem:[#allocation19 + $0x204] ss:$48 sps:$4 sm:$0xff]  }
 0xaf6   :  { %12694 = vmatpush1.bf16.msra.mxu0 %v18179_v42  ;;  %12589 = vmatprep.subr.bf16.mxu1 %v18184_v40  ;;  %v18247_v42 = vld [vmem:[#allocation19 + $0x20c] ss:$48 sps:$4 sm:$0xff]   ;;  %v18242_v40 = vld [vmem:[#allocation19 + $0x200] ss:$48 sps:$4 sm:$0xff]  }
 0xaf7   :  { %12695 = vmatprep.subr.bf16.mxu0 %v18187_v31  ;;  %v18245_v31 = vld [vmem:[#allocation19 + $0x208] ss:$48 sps:$4 sm:$0xff]  }
 0xaf9   :  { %12590 = vmatpush1.bf16.msra.mxu1 %v18182_v44  ;;  %v18250_v44 = vld [vmem:[#allocation19 + $0x264] ss:$48 sps:$4 sm:$0xff]  }
 0xafa   :  { %12696 = vmatpush1.bf16.msra.mxu0 %v18185_v43  ;;  %12591 = vmatprep.subr.bf16.mxu1 %v18190_v55  ;;  %v18253_v43 = vld [vmem:[#allocation19 + $0x26c] ss:$48 sps:$4 sm:$0xff]   ;;  %v18251_v55 = vld [vmem:[#allocation19 + $0x268] ss:$48 sps:$4 sm:$0xff]  }
 0xafb   :  { %12697 = vmatprep.subr.bf16.mxu0 %v18193_v30  ;;  %v18256_v30 = vld [vmem:[#allocation19 + $0x2c4] ss:$48 sps:$4 sm:$0xff]  }
 0xafd   :  { %12592 = vmatpush1.bf16.msra.mxu1 %v18188_v28  ;;  %v18259_v28 = vld [vmem:[#allocation19 + $0x2cc] ss:$48 sps:$4 sm:$0xff]  }
 0xafe   :  { %12698 = vmatpush1.bf16.msra.mxu0 %v18191_v56  ;;  %12593 = vmatprep.subr.bf16.mxu1 %v18196_v51  ;;  %v18254_v56 = vld [vmem:[#allocation19 + $0x2c0] ss:$48 sps:$4 sm:$0xff]   ;;  %v18257_v51 = vld [vmem:[#allocation19 + $0x2c8] ss:$48 sps:$4 sm:$0xff]  }
 0xaff   :  { %12699 = vmatprep.subr.bf16.mxu0 %v18199_v62  ;;  %v18262_v62 = vld [vmem:[#allocation19 + $0x324] ss:$48 sps:$4 sm:$0xff]  }
 0xb01   :  { %12594 = vmatpush1.bf16.msra.mxu1 %v18194_v46  ;;  %v18265_v46 = vld [vmem:[#allocation19 + $0x32c] ss:$48 sps:$4 sm:$0xff]  }
 0xb02   :  { %12700 = vmatpush1.bf16.msra.mxu0 %v18197_v14  ;;  %12595 = vmatprep.subr.bf16.mxu1 %v18202_v36  ;;  %v18260_v14 = vld [vmem:[#allocation19 + $0x320] ss:$48 sps:$4 sm:$0xff]   ;;  %v18263_v36 = vld [vmem:[#allocation19 + $0x328] ss:$48 sps:$4 sm:$0xff]  }
 0xb03   :  { %12701 = vmatprep.subr.bf16.mxu0 %v18205_v54  ;;  %v18268_v54 = vld [vmem:[#allocation19 + $0x384] ss:$48 sps:$4 sm:$0xff]  }
 0xb05   :  { %12596 = vmatpush1.bf16.msra.mxu1 %v18200_v6  ;;  %v18271_v6 = vld [vmem:[#allocation19 + $0x38c] ss:$48 sps:$4 sm:$0xff]  }
 0xb06   :  { %12702 = vmatpush1.bf16.msra.mxu0 %v18203_v48  ;;  %12597 = vmatprep.subr.bf16.mxu1 %v18208_v13  ;;  %v18266_v48 = vld [vmem:[#allocation19 + $0x380] ss:$48 sps:$4 sm:$0xff]   ;;  %v18269_v13 = vld [vmem:[#allocation19 + $0x388] ss:$48 sps:$4 sm:$0xff]  }
 0xb07   :  { %12703 = vmatprep.subr.bf16.mxu0 %v18211_v1  ;;  %v18274_v1 = vld [vmem:[#allocation19 + $0x3e4] ss:$48 sps:$4 sm:$0xff]  }
 0xb09   :  { %12598 = vmatpush1.bf16.msra.mxu1 %v18206_v10  ;;  %v18277_v10 = vld [vmem:[#allocation19 + $0x3ec] ss:$48 sps:$4 sm:$0xff]  }
 0xb0a   :  { %12704 = vmatpush1.bf16.msra.mxu0 %v18209_v12  ;;  %12742 = vmatprep.subr.bf16.mxu1 %v18214_v32  ;;  %v18272_v12 = vld [vmem:[#allocation19 + $0x3e0] ss:$48 sps:$4 sm:$0xff]   ;;  %v18275_v32 = vld [vmem:[#allocation19 + $0x3e8] ss:$48 sps:$4 sm:$0xff]  }
 0xb0b   :  { %12848 = vmatprep.subr.bf16.mxu0 %v18217_v37  ;;  %v18280_v37 = vld [vmem:[#allocation19 + $0x444] ss:$48 sps:$4 sm:$0xff]  }
 0xb0c   :  { %12616 = vmatmul.mubr.bf16.vlgmr.msra.gmra.mrb[84].mxu1 %v23631_v5 }
 0xb0d   :  { %12722 = vmatmul.mubr.bf16.vlgmr.msra.gmra.mrb[100].mxu0 %v23631_v5  ;;  %12743 = vmatpush1.bf16.msra.mxu1 %v18212_v50  ;;  %v18283_v50 = vld [vmem:[#allocation19 + $0x44c] ss:$48 sps:$4 sm:$0xff]  }
 0xb0e   :  { %12849 = vmatpush1.bf16.msra.mxu0 %v18215_v4  ;;  %12744 = vmatprep.subr.bf16.mxu1 %v18220_v52  ;;  %v18278_v4 = vld [vmem:[#allocation19 + $0x440] ss:$48 sps:$4 sm:$0xff]   ;;  %v18281_v52 = vld [vmem:[#allocation19 + $0x448] ss:$48 sps:$4 sm:$0xff]  }
 0xb0f   :  { %12850 = vmatprep.subr.bf16.mxu0 %v18223_v58  ;;  %12625 = vmatprep.mubr.bf16.mxu1 %v24340_v16  ;;  %v18286_v58 = vld [vmem:[#allocation19 + $0x4a4] ss:$48 sps:$4 sm:$0xff]  }
 0xb10   :  { %12731 = vmatprep.mubr.bf16.mxu0 %v24340_v16 }
 0xb11   :  { %12745 = vmatpush1.bf16.msra.mxu1 %v18218_v59  ;;  %v18289_v59 = vld [vmem:[#allocation19 + $0x4ac] ss:$48 sps:$4 sm:$0xff]  }
 0xb12   :  { %12851 = vmatpush1.bf16.msra.mxu0 %v18221_v26  ;;  %12746 = vmatprep.subr.bf16.mxu1 %v18226_v61  ;;  %v18284_v26 = vld [vmem:[#allocation19 + $0x4a0] ss:$48 sps:$4 sm:$0xff]   ;;  %v18287_v61 = vld [vmem:[#allocation19 + $0x4a8] ss:$48 sps:$4 sm:$0xff]  }
 0xb13   :  { %12852 = vmatprep.subr.bf16.mxu0 %v18229_v2  ;;  %v18292_v2 = vld [vmem:[#allocation19 + $0x504] ss:$48 sps:$4 sm:$0xff]  }
 0xb14   :  { %12626 = vmatmul.mubr.bf16.gmra.mrb[88].mxu1 %v23637_v27 }
 0xb15   :  { %12732 = vmatmul.mubr.bf16.gmra.mrb[104].mxu0 %v23637_v27  ;;  %12747 = vmatpush1.bf16.msra.mxu1 %v18224_v8  ;;  %v18295_v8 = vld [vmem:[#allocation19 + $0x50c] ss:$48 sps:$4 sm:$0xff]  }
 0xb16   :  { %12774 = vmatprep.mubr.bf16.mxu1 %v23595_v23  ;;  %12853 = vmatpush1.bf16.msra.mxu0 %v18227_v18  ;;  %v18290_v18 = vld [vmem:[#allocation19 + $0x500] ss:$48 sps:$4 sm:$0xff]  }
 0xb17   :  { %12880 = vmatprep.mubr.bf16.mxu0 %v23595_v23  ;;  %12748 = vmatprep.subr.bf16.mxu1 %v18232_v21  ;;  %v18248_v23 = vld [vmem:[#allocation19 + $0x260] ss:$48 sps:$4 sm:$0xff]   ;;  %v18293_v21 = vld [vmem:[#allocation19 + $0x508] ss:$48 sps:$4 sm:$0xff]  }
 0xb18   :  { %12854 = vmatprep.subr.bf16.mxu0 %v18235_v47  ;;  %v18298_v47 = vld [vmem:[#allocation19 + $0x564] ss:$48 sps:$4 sm:$0xff]  }
 0xb19   :  { %12749 = vmatpush1.bf16.msra.mxu1 %v18230_v35  ;;  %v18301_v35 = vld [vmem:[#allocation19 + $0x56c] ss:$48 sps:$4 sm:$0xff]  }
 0xb1a   :  { %12855 = vmatpush1.bf16.msra.mxu0 %v18233_v39  ;;  %12750 = vmatprep.subr.bf16.mxu1 %v18238_v20  ;;  %v18296_v39 = vld [vmem:[#allocation19 + $0x560] ss:$48 sps:$4 sm:$0xff]   ;;  %v18299_v20 = vld [vmem:[#allocation19 + $0x568] ss:$48 sps:$4 sm:$0xff]  }
 0xb1b   :  { %12856 = vmatprep.subr.bf16.mxu0 %v18241_v29  ;;  %v18304_v29 = vld [vmem:[#allocation19 + $0x5c4] ss:$48 sps:$4 sm:$0xff]  }
 0xb1d   :  { %12751 = vmatpush1.bf16.msra.mxu1 %v18236_v33  ;;  %v18307_v33 = vld [vmem:[#allocation19 + $0x5cc] ss:$48 sps:$4 sm:$0xff]  }
 0xb1e   :  { %12857 = vmatpush1.bf16.msra.mxu0 %v18239_v34  ;;  %12752 = vmatprep.subr.bf16.mxu1 %v18244_v17  ;;  %v18302_v34 = vld [vmem:[#allocation19 + $0x5c0] ss:$48 sps:$4 sm:$0xff]   ;;  %v18305_v17 = vld [vmem:[#allocation19 + $0x5c8] ss:$48 sps:$4 sm:$0xff]  }
 0xb1f   :  { %12858 = vmatprep.subr.bf16.mxu0 %v18247_v42  ;;  %v18310_v42 = vld [vmem:[#allocation19 + $0x624] ss:$48 sps:$4 sm:$0xff]  }
 0xb21   :  { %12753 = vmatpush1.bf16.msra.mxu1 %v18242_v40  ;;  %v18313_v40 = vld [vmem:[#allocation19 + $0x62c] ss:$48 sps:$4 sm:$0xff]  }
 0xb22   :  { %12859 = vmatpush1.bf16.msra.mxu0 %v18245_v31  ;;  %12754 = vmatprep.subr.bf16.mxu1 %v18250_v44  ;;  %v18308_v31 = vld [vmem:[#allocation19 + $0x620] ss:$48 sps:$4 sm:$0xff]   ;;  %v18311_v44 = vld [vmem:[#allocation19 + $0x628] ss:$48 sps:$4 sm:$0xff]  }
 0xb23   :  { %12860 = vmatprep.subr.bf16.mxu0 %v18253_v43  ;;  %v18316_v43 = vld [vmem:[#allocation19 + $0x684] ss:$48 sps:$4 sm:$0xff]  }
 0xb25   :  { %12755 = vmatpush1.bf16.msra.mxu1 %v18248_v23  ;;  %v18319_v23 = vld [vmem:[#allocation19 + $0x68c] ss:$48 sps:$4 sm:$0xff]  }
 0xb26   :  { %12861 = vmatpush1.bf16.msra.mxu0 %v18251_v55  ;;  %12756 = vmatprep.subr.bf16.mxu1 %v18256_v30  ;;  %v18314_v55 = vld [vmem:[#allocation19 + $0x680] ss:$48 sps:$4 sm:$0xff]   ;;  %v18317_v30 = vld [vmem:[#allocation19 + $0x688] ss:$48 sps:$4 sm:$0xff]  }
 0xb27   :  { %12862 = vmatprep.subr.bf16.mxu0 %v18259_v28  ;;  %v18322_v28 = vld [vmem:[#allocation19 + $0x6e4] ss:$48 sps:$4 sm:$0xff]  }
 0xb29   :  { %12757 = vmatpush1.bf16.msra.mxu1 %v18254_v56  ;;  %v18325_v56 = vld [vmem:[#allocation19 + $0x6ec] ss:$48 sps:$4 sm:$0xff]  }
 0xb2a   :  { %12863 = vmatpush1.bf16.msra.mxu0 %v18257_v51  ;;  %12758 = vmatprep.subr.bf16.mxu1 %v18262_v62  ;;  %v18320_v51 = vld [vmem:[#allocation19 + $0x6e0] ss:$48 sps:$4 sm:$0xff]   ;;  %v18323_v62 = vld [vmem:[#allocation19 + $0x6e8] ss:$48 sps:$4 sm:$0xff]  }
 0xb2b   :  { %12864 = vmatprep.subr.bf16.mxu0 %v18265_v46  ;;  %v18328_v46 = vld [vmem:[#allocation19 + $0x744] ss:$48 sps:$4 sm:$0xff]  }
 0xb2d   :  { %12759 = vmatpush1.bf16.msra.mxu1 %v18260_v14  ;;  %v18329_v14 = vld [vmem:[#allocation19 + $0x748] ss:$48 sps:$4 sm:$0xff]  }
 0xb2e   :  { %12865 = vmatpush1.bf16.msra.mxu0 %v18263_v36  ;;  %12760 = vmatprep.subr.bf16.mxu1 %v18268_v54  ;;  %v18334_v36 = vld [vmem:[#allocation19 + $0x7a4] ss:$48 sps:$4 sm:$0xff]   ;;  %v18337_v54 = vld [vmem:[#allocation19 + $0x7ac] ss:$48 sps:$4 sm:$0xff]  }
 0xb2f   :  { %12866 = vmatprep.subr.bf16.mxu0 %v18271_v6  ;;  %v18332_v6 = vld [vmem:[#allocation19 + $0x7a0] ss:$48 sps:$4 sm:$0xff]  }
 0xb31   :  { %12761 = vmatpush1.bf16.msra.mxu1 %v18266_v48  ;;  %v18335_v48 = vld [vmem:[#allocation19 + $0x7a8] ss:$48 sps:$4 sm:$0xff]  }
 0xb32   :  { %12867 = vmatpush1.bf16.msra.mxu0 %v18269_v13  ;;  %12762 = vmatprep.subr.bf16.mxu1 %v18274_v1  ;;  %v18340_v13 = vld [vmem:[#allocation19 + $0x804] ss:$48 sps:$4 sm:$0xff]   ;;  %v18338_v1 = vld [vmem:[#allocation19 + $0x800] ss:$48 sps:$4 sm:$0xff]  }
 0xb33   :  { %12868 = vmatprep.subr.bf16.mxu0 %v18277_v10  ;;  %v18341_v10 = vld [vmem:[#allocation19 + $0x808] ss:$48 sps:$4 sm:$0xff]  }
 0xb35   :  { %12763 = vmatpush1.bf16.msra.mxu1 %v18272_v12  ;;  %v18346_v12 = vld [vmem:[#allocation19 + $0x864] ss:$48 sps:$4 sm:$0xff]  }
 0xb36   :  { %12869 = vmatpush1.bf16.msra.mxu0 %v18275_v32  ;;  %12764 = vmatprep.subr.bf16.mxu1 %v18280_v37  ;;  %v18349_v32 = vld [vmem:[#allocation19 + $0x86c] ss:$48 sps:$4 sm:$0xff]   ;;  %v18344_v37 = vld [vmem:[#allocation19 + $0x860] ss:$48 sps:$4 sm:$0xff]  }
 0xb37   :  { %12870 = vmatprep.subr.bf16.mxu0 %v18283_v50  ;;  %v18347_v50 = vld [vmem:[#allocation19 + $0x868] ss:$48 sps:$4 sm:$0xff]  }
 0xb39   :  { %12765 = vmatpush1.bf16.msra.mxu1 %v18278_v4  ;;  %v18352_v4 = vld [vmem:[#allocation19 + $0x8c4] ss:$48 sps:$4 sm:$0xff]  }
 0xb3a   :  { %12871 = vmatpush1.bf16.msra.mxu0 %v18281_v52  ;;  %12766 = vmatprep.subr.bf16.mxu1 %v18286_v58  ;;  %v18355_v52 = vld [vmem:[#allocation19 + $0x8cc] ss:$48 sps:$4 sm:$0xff]   ;;  %v18350_v58 = vld [vmem:[#allocation19 + $0x8c0] ss:$48 sps:$4 sm:$0xff]  }
 0xb3b   :  { %12872 = vmatprep.subr.bf16.mxu0 %v18289_v59  ;;  %v18353_v59 = vld [vmem:[#allocation19 + $0x8c8] ss:$48 sps:$4 sm:$0xff]  }
 0xb3d   :  { %12767 = vmatpush1.bf16.msra.mxu1 %v18284_v26  ;;  %v18358_v26 = vld [vmem:[#allocation22 + $0x4] ss:$12 sps:$4 sm:$0xff]  }
 0xb3e   :  { %12873 = vmatpush1.bf16.msra.mxu0 %v18287_v61  ;;  %12768 = vmatprep.subr.bf16.mxu1 %v18292_v2  ;;  %v18359_v61 = vld [vmem:[#allocation22 + $0xc8] ss:$12 sps:$4 sm:$0xff]   ;;  %v18356_v2 = vld [vmem:[#allocation22] ss:$12 sps:$4 sm:$0xff]  }
 0xb3f   :  { %12874 = vmatprep.subr.bf16.mxu0 %v18295_v8  ;;  %v18360_v8 = vld [vmem:[#allocation22 + $0x8] ss:$12 sps:$4 sm:$0xff]  }
 0xb41   :  { %12769 = vmatpush1.bf16.msra.mxu1 %v18290_v18  ;;  %v18363_v18 = vld [vmem:[#allocation22 + $0x1c] ss:$12 sps:$4 sm:$0xff]  }
 0xb42   :  { %12875 = vmatpush1.bf16.msra.mxu0 %v18293_v21  ;;  %12770 = vmatprep.subr.bf16.mxu1 %v18298_v47  ;;  %v18364_v21 = vld [vmem:[#allocation22 + $0xe0] ss:$12 sps:$4 sm:$0xff]   ;;  %v18361_v47 = vld [vmem:[#allocation22 + $0x18] ss:$12 sps:$4 sm:$0xff]  }
 0xb43   :  { %12876 = vmatprep.subr.bf16.mxu0 %v18301_v35  ;;  %v18365_v35 = vld [vmem:[#allocation22 + $0x20] ss:$12 sps:$4 sm:$0xff]  }
 0xb45   :  { %12771 = vmatpush1.bf16.msra.mxu1 %v18296_v39  ;;  %v18368_v39 = vld [vmem:[#allocation22 + $0x34] ss:$12 sps:$4 sm:$0xff]  }
 0xb46   :  { %12877 = vmatpush1.bf16.msra.mxu0 %v18299_v20  ;;  %12772 = vmatprep.subr.bf16.mxu1 %v18304_v29  ;;  %v18369_v20 = vld [vmem:[#allocation22 + $0xf8] ss:$12 sps:$4 sm:$0xff]   ;;  %v18366_v29 = vld [vmem:[#allocation22 + $0x30] ss:$12 sps:$4 sm:$0xff]  }
 0xb47   :  { %12878 = vmatprep.subr.bf16.mxu0 %v18307_v33  ;;  %v18370_v33 = vld [vmem:[#allocation22 + $0x38] ss:$12 sps:$4 sm:$0xff]  }
 0xb49   :  { %12773 = vmatpush1.bf16.msra.mxu1 %v18302_v34  ;;  %v18373_v34 = vld [vmem:[#allocation22 + $0x4c] ss:$12 sps:$4 sm:$0xff]  }
 0xb4a   :  { %12879 = vmatpush1.bf16.msra.mxu0 %v18305_v17  ;;  %12795 = vmatprep.subr.bf16.mxu1 %v18310_v42  ;;  %v18371_v17 = vld [vmem:[#allocation22 + $0x48] ss:$12 sps:$4 sm:$0xff]   ;;  %v18375_v42 = vld [vmem:[#allocation22 + $0x50] ss:$12 sps:$4 sm:$0xff]  }
 0xb4b   :  { %12901 = vmatprep.subr.bf16.mxu0 %v18313_v40  ;;  %v18378_v40 = vld [vmem:[#allocation22 + $0x64] ss:$12 sps:$4 sm:$0xff]  }
 0xb4c   :  { %12775 = vmatmul.mubr.bf16.vlgmr.msra.gmra.mrb[92].mxu1 %v23597_v19 }
 0xb4d   :  { %12881 = vmatmul.mubr.bf16.vlgmr.msra.gmra.mrb[108].mxu0 %v23597_v19  ;;  %12784 = vmatprep.mubr.bf16.mxu1 %v23609_v0  ;;  %v18331_v19 = vld [vmem:[#allocation19 + $0x74c] ss:$48 sps:$4 sm:$0xff]  }
 0xb4e   :  { %12796 = vmatpush1.bf16.msra.mxu1 %v18308_v31  ;;  %12890 = vmatprep.mubr.bf16.mxu0 %v23609_v0  ;;  %v18326_v0 = vld [vmem:[#allocation19 + $0x740] ss:$48 sps:$4 sm:$0xff]  }
 0xb4f   :  { %12902 = vmatpush1.bf16.msra.mxu0 %v18311_v44  ;;  %12797 = vmatprep.subr.bf16.mxu1 %v18316_v43  ;;  %v23673_v31 = vld [vmem:[#allocation20] sm:$0xff]  ;;  %v18376_v44 = vld [vmem:[#allocation22 + $0x60] ss:$12 sps:$4 sm:$0xff]  }
 0xb50   :  { %12903 = vmatprep.subr.bf16.mxu0 %v18319_v23  ;;  %v18380_v43 = vld [vmem:[#allocation22 + $0x68] ss:$12 sps:$4 sm:$0xff]   ;;  %v23677_v23 = vrot.slane %v23673_v31, %v24341_v15 }
 0xb52   :  { %12798 = vmatpush1.bf16.msra.mxu1 %v18314_v55  ;;  %v18383_v55 = vld [vmem:[#allocation22 + $0x7c] ss:$12 sps:$4 sm:$0xff]  }
 0xb53   :  { %12904 = vmatpush1.bf16.msra.mxu0 %v18317_v30  ;;  %12799 = vmatprep.subr.bf16.mxu1 %v18322_v28  ;;  %v23685_v30 = vrot.slane %v23673_v31, %v24342_v11  ;;  %v24344_v28 = vld [vmem:[#allocation39_spill] sm:$0xff] }
 0xb54   :  { %12785 = vmatmul.mubr.bf16.gmra.mrb[96].mxu1 %v23611_v45  ;;  %12905 = vmatprep.subr.bf16.mxu0 %v18325_v56  ;;  %v23689_v56 = vrot.slane %v23673_v31, %v24344_v28 }
 0xb55   :  { %12891 = vmatmul.mubr.bf16.gmra.mrb[112].mxu0 %v23611_v45  ;;  %12827 = vmatprep.mubr.bf16.mxu1 %v24340_v16  ;;  %v18343_v45 = vld [vmem:[#allocation19 + $0x80c] ss:$48 sps:$4 sm:$0xff]  }
 0xb56   :  { %12800 = vmatpush1.bf16.msra.mxu1 %v18320_v51  ;;  %12933 = vmatprep.mubr.bf16.mxu0 %v24340_v16  ;;  %v18384_v51 = vld [vmem:[#allocation22 + $0x140] ss:$12 sps:$4 sm:$0xff]  }
 0xb57   :  { %12906 = vmatpush1.bf16.msra.mxu0 %v18323_v62  ;;  %12801 = vmatprep.subr.bf16.mxu1 %v18328_v46 }
 0xb58   :  { %12907 = vmatprep.subr.bf16.mxu0 %v18331_v19  ;;  %v18381_v19 = vld [vmem:[#allocation22 + $0x78] ss:$12 sps:$4 sm:$0xff]  }
 0xb5a   :  { %12802 = vmatpush1.bf16.msra.mxu1 %v18326_v0 }
 0xb5b   :  { %12908 = vmatpush1.bf16.msra.mxu0 %v18329_v14  ;;  %12803 = vmatprep.subr.bf16.mxu1 %v18334_v36 }
 0xb5c   :  { %12909 = vmatprep.subr.bf16.mxu0 %v18337_v54 }
 0xb5e   :  { %12804 = vmatpush1.bf16.msra.mxu1 %v18332_v6  ;;  %v18385_v6 = vld [vmem:[#allocation22 + $0x80] ss:$12 sps:$4 sm:$0xff]  }
 0xb5f   :  { %12910 = vmatpush1.bf16.msra.mxu0 %v18335_v48  ;;  %12805 = vmatprep.subr.bf16.mxu1 %v18340_v13  ;;  %v18388_v48 = vld [vmem:[#allocation22 + $0x94] ss:$12 sps:$4 sm:$0xff]  }
 0xb60   :  { %12911 = vmatprep.subr.bf16.mxu0 %v18343_v45 }
 0xb62   :  { %12806 = vmatpush1.bf16.msra.mxu1 %v18338_v1 }
 0xb63   :  { %12912 = vmatpush1.bf16.msra.mxu0 %v18341_v10  ;;  %12807 = vmatprep.subr.bf16.mxu1 %v18346_v12  ;;  %v18389_v12 = vld [vmem:[#allocation22 + $0x158] ss:$12 sps:$4 sm:$0xff]  }
 0xb64   :  { %12913 = vmatprep.subr.bf16.mxu0 %v18349_v32 }
 0xb66   :  { %12808 = vmatpush1.bf16.msra.mxu1 %v18344_v37 }
 0xb67   :  { %12914 = vmatpush1.bf16.msra.mxu0 %v18347_v50  ;;  %12809 = vmatprep.subr.bf16.mxu1 %v18352_v4 }
 0xb68   :  { %12915 = vmatprep.subr.bf16.mxu0 %v18355_v52 }
 0xb6a   :  { %12810 = vmatpush1.bf16.msra.mxu1 %v18350_v58 }
 0xb6b   :  { %12916 = vmatpush1.bf16.msra.mxu0 %v18353_v59  ;;  %14963 = vmatprep.subr.bf16.mxu1 %v18358_v26  ;;  %v18386_v59 = vld [vmem:[#allocation22 + $0x90] ss:$12 sps:$4 sm:$0xff]   ;;  %v18390_v26 = vld [vmem:[#allocation22 + $0x98] ss:$12 sps:$4 sm:$0xff]  }
 0xb6c   :  { %16837 = vmatprep.subr.bf16.mxu0 %v18359_v61 }
 0xb6d   :  { %12828 = vmatmul.mubr.bf16.vlgmr.msra.gmra.mrb[92].mxu1 %v23631_v5 }
 0xb6e   :  { %12934 = vmatmul.mubr.bf16.vlgmr.msra.gmra.mrb[108].mxu0 %v23631_v5  ;;  %14964 = vmatpush1.bf16.msra.mxu1 %v18356_v2  ;;  %v18374_v5 = vld [vmem:[#allocation22 + $0x110] ss:$12 sps:$4 sm:$0xff]  }
 0xb6f   :  { %16838 = vmatpush3.bf16.msra.mxu0 %v18360_v8  ;;  %14965 = vmatprep.subr.bf16.mxu1 %v18363_v18 }
 0xb70   :  { %16839 = vmatprep.subr.bf16.mxu0 %v18364_v21  ;;  %12837 = vmatprep.mubr.bf16.mxu1 %v24340_v16  ;;  %v18393_v21 = vld [vmem:[#allocation22 + $0xac] ss:$12 sps:$4 sm:$0xff]  }
 0xb71   :  { %12943 = vmatprep.mubr.bf16.mxu0 %v24340_v16  ;;  %v18379_v16 = vld [vmem:[#allocation22 + $0x128] ss:$12 sps:$4 sm:$0xff]  }
 0xb72   :  { %14966 = vmatpush1.bf16.msra.mxu1 %v18361_v47 }
 0xb73   :  { %16840 = vmatpush3.bf16.msra.mxu0 %v18365_v35  ;;  %14967 = vmatprep.subr.bf16.mxu1 %v18368_v39 }
 0xb74   :  { %16841 = vmatprep.subr.bf16.mxu0 %v18369_v20 }
 0xb75   :  { %12838 = vmatmul.mubr.bf16.gmra.mrb[96].mxu1 %v23637_v27 }
 0xb76   :  { %12944 = vmatmul.mubr.bf16.gmra.mrb[112].mxu0 %v23637_v27  ;;  %14968 = vmatpush1.bf16.msra.mxu1 %v18366_v29  ;;  %v23681_v27 = vrot.slane %v23673_v31, %v24343_v60  ;;  %v18394_v29 = vld [vmem:[#allocation22 + $0x170] ss:$12 sps:$4 sm:$0xff]  }
 0xb77   :  { %16842 = vmatpush3.bf16.msra.mxu0 %v18370_v33  ;;  %14969 = vmatprep.subr.bf16.mxu1 %v18373_v34 }
 0xb78   :  { %16843 = vmatprep.subr.bf16.mxu0 %v18374_v5 }
 0xb7a   :  { %14970 = vmatpush1.bf16.msra.mxu1 %v18371_v17 }
 0xb7b   :  { %16844 = vmatpush3.bf16.msra.mxu0 %v18375_v42  ;;  %14971 = vmatprep.subr.bf16.mxu1 %v18378_v40 }
 0xb7c   :  { %16845 = vmatprep.subr.bf16.mxu0 %v18379_v16  ;;  %v18391_v16 = vld [vmem:[#allocation22 + $0xa8] ss:$12 sps:$4 sm:$0xff]  }
 0xb7e   :  { %14972 = vmatpush1.bf16.msra.mxu1 %v18376_v44  ;;  %v12405_v62 = vpop.f32.mrb[76].mxu1  ;;  %v12511_v46 = vpop.f32.mrb[92].mxu0 }
 0xb7f   :  { %16846 = vmatpush3.bf16.msra.mxu0 %v18380_v43  ;;  %v17285_v0 = vadd.f32 %v12405_v62, %v23677_v23  ;;  %v17293_v14 = vadd.f32 %v12511_v46, %v23681_v27  ;;  %v12407_v36 = vpop.f32.mrb[77].mxu1  ;;  %v12513_v54 = vpop.f32.mrb[93].mxu0  ;;  %14973 = vmatprep.subr.bf16.mxu1 %v18383_v55  ;;  %v18395_v62 = vld [vmem:[#allocation22 + $0xb0] ss:$12 sps:$4 sm:$0xff]  }
 0xb80   :  { %v17286_v13 = vadd.f32 %v12407_v36, %v23685_v30  ;;  %v17294_v45 = vadd.f32 %v12513_v54, %v23689_v56  ;;  %16847 = vmatprep.subr.bf16.mxu0 %v18384_v51  ;;  %v12409_v1 = vpop.f32.mrb[78].mxu1  ;;  %v12515_v10 = vpop.f32.mrb[94].mxu0  ;;  %v18398_v46 = vld [vmem:[#allocation22 + $0xc4] ss:$12 sps:$4 sm:$0xff]   ;;  %v18399_v54 = vld [vmem:[#allocation22 + $0x248] ss:$12 sps:$4 sm:$0xff]  }
 0xb81   :  { %v17287_v32 = vadd.f32 %v12409_v1, %v23677_v23  ;;  %v17295_v37 = vadd.f32 %v12515_v10, %v23681_v27  ;;  %v12411_v50 = vpop.f32.mrb[79].mxu1  ;;  %v12517_v4 = vpop.f32.mrb[95].mxu0  ;;  %v12954_v61 = vmax.f32 %v17285_v0, 0.0  ;;  %v12956_v2 = vmax.f32 %v17293_v14, 0.0 }
 0xb82   :  { %14974 = vmatpush1.bf16.msra.mxu1 %v18381_v19  ;;  %v17288_v52 = vadd.f32 %v12411_v50, %v23685_v30  ;;  %v17296_v58 = vadd.f32 %v12517_v4, %v23689_v56  ;;  %v12955_v47 = vmax.f32 %v17286_v13, 0.0  ;;  %v12957_v35 = vmax.f32 %v17294_v45, 0.0 }
 0xb83   :  { %v12966_v8 = vmax.f32 %v17287_v32, 0.0  ;;  %v12968_v18 = vmax.f32 %v17295_v37, 0.0  ;;  %16848 = vmatpush3.bf16.msra.mxu0 %v18385_v6  ;;  %14975 = vmatprep.subr.bf16.mxu1 %v18388_v48  ;;  %v18400_v32 = vld [vmem:[#allocation22 + $0x188] ss:$12 sps:$4 sm:$0xff]  }
 0xb84   :  { %v12967_v39 = vmax.f32 %v17288_v52, 0.0  ;;  %v12969_v20 = vmax.f32 %v17296_v58, 0.0  ;;  %16849 = vmatprep.subr.bf16.mxu0 %v18389_v12  ;;  %v18396_v12 = vld [vmem:[#allocation22 + $0xc0] ss:$12 sps:$4 sm:$0xff]   ;;  %v18403_v58 = vld [vmem:[#allocation22 + $0xdc] ss:$12 sps:$4 sm:$0xff]  }
 0xb85   :  { %v23699_v33 = vpack.c.bf16 %v12966_v8, %v12954_v61  ;;  %v23701_v34 = vpack.c.bf16 %v12968_v18, %v12956_v2  ;;  %v18404_v61 = vld [vmem:[#allocation22 + $0x260] ss:$12 sps:$4 sm:$0xff]   ;;  %v18401_v18 = vld [vmem:[#allocation22 + $0xd8] ss:$12 sps:$4 sm:$0xff]  }
 0xb86   :  { %v13003_v5 = vpack.c.bf16 %v12967_v39, %v12955_v47  ;;  %v23703_v17 = vpack.c.bf16 %v12969_v20, %v12957_v35  ;;  %14976 = vmatpush1.bf16.msra.mxu1 %v18386_v59  ;;  %v12415_v42 = vpop.f32.mrb[80].mxu1  ;;  %v12521_v40 = vpop.f32.mrb[96].mxu0  ;;  %v18408_v47 = vld [vmem:[#allocation22 + $0xf4] ss:$12 sps:$4 sm:$0xff]   ;;  %v18409_v35 = vld [vmem:[#allocation22 + $0x278] ss:$12 sps:$4 sm:$0xff]  }
 0xb87   :  { %16850 = vmatpush3.bf16.msra.mxu0 %v18390_v26  ;;  %v17289_v44 = vadd.f32 %v12415_v42, %v23677_v23  ;;  %v17297_v43 = vadd.f32 %v12521_v40, %v23681_v27  ;;  %v12417_v55 = vpop.f32.mrb[81].mxu1  ;;  %v12523_v51 = vpop.f32.mrb[97].mxu0  ;;  %14977 = vmatprep.subr.bf16.mxu1 %v18393_v21  ;;  %v18405_v21 = vld [vmem:[#allocation22 + $0x1a0] ss:$12 sps:$4 sm:$0xff]   ;;  %v18406_v39 = vld [vmem:[#allocation22 + $0xf0] ss:$12 sps:$4 sm:$0xff]  }
 0xb88   :  { %v17290_v19 = vadd.f32 %v12417_v55, %v23685_v30  ;;  %v17298_v0 = vadd.f32 %v12523_v51, %v23689_v56  ;;  %16851 = vmatprep.subr.bf16.mxu0 %v18394_v29  ;;  %v12419_v14 = vpop.f32.mrb[82].mxu1  ;;  %v12525_v36 = vpop.f32.mrb[98].mxu0  ;;  %14995 = vmatprep.mubr.bf16.mxu1 %v13003_v5  ;;  %v18410_v20 = vld [vmem:[#allocation22 + $0x1b8] ss:$12 sps:$4 sm:$0xff]   ;;  %v18411_v42 = vld [vmem:[#allocation22 + $0x108] ss:$12 sps:$4 sm:$0xff]  }
 0xb89   :  { %v17291_v6 = vadd.f32 %v12419_v14, %v23677_v23  ;;  %v17299_v48 = vadd.f32 %v12525_v36, %v23681_v27  ;;  %15313 = vmatprep.mubr.bf16.mxu0 %v13003_v5  ;;  %v12421_v13 = vpop.f32.mrb[83].mxu1  ;;  %v12527_v45 = vpop.f32.mrb[99].mxu0  ;;  %v12978_v37 = vmax.f32 %v17289_v44, 0.0  ;;  %v12980_v50 = vmax.f32 %v17297_v43, 0.0  ;;  %v18413_v29 = vld [vmem:[#allocation22 + $0x10c] ss:$12 sps:$4 sm:$0xff]  }
 0xb8a   :  { %14978 = vmatpush1.bf16.msra.mxu1 %v18391_v16  ;;  %v17292_v1 = vadd.f32 %v12421_v13, %v23685_v30  ;;  %v17300_v10 = vadd.f32 %v12527_v45, %v23689_v56  ;;  %v12979_v23 = vmax.f32 %v17290_v19, 0.0  ;;  %v12981_v59 = vmax.f32 %v17298_v0, 0.0  ;;  %v18414_v5 = vld [vmem:[#allocation22 + $0x290] ss:$12 sps:$4 sm:$0xff]   ;;  %v18419_v44 = vld [vmem:[#allocation22 + $0x2a8] ss:$12 sps:$4 sm:$0xff]  }
 0xb8b   :  { %v12990_v4 = vmax.f32 %v17291_v6, 0.0  ;;  %v12992_v52 = vmax.f32 %v17299_v48, 0.0  ;;  %16852 = vmatpush3.bf16.msra.mxu0 %v18395_v62  ;;  %14979 = vmatprep.subr.bf16.mxu1 %v18398_v46  ;;  %v18415_v40 = vld [vmem:[#allocation22 + $0x1d0] ss:$12 sps:$4 sm:$0xff]   ;;  %v18416_v43 = vld [vmem:[#allocation22 + $0x120] ss:$12 sps:$4 sm:$0xff]  }
 0xb8c   :  { %v12991_v27 = vmax.f32 %v17292_v1, 0.0  ;;  %v12993_v26 = vmax.f32 %v17300_v10, 0.0  ;;  %16865 = vmatprep.subr.bf16.mxu0 %v18399_v54  ;;  %v18418_v16 = vld [vmem:[#allocation22 + $0x124] ss:$12 sps:$4 sm:$0xff]   ;;  %v18420_v55 = vld [vmem:[#allocation22 + $0x1e8] ss:$12 sps:$4 sm:$0xff]  }
 0xb8d   :  { %v23713_v2 = vpack.c.bf16 %v12990_v4, %v12978_v37  ;;  %v23715_v30 = vpack.c.bf16 %v12992_v52, %v12980_v50  ;;  %v18423_v51 = vld [vmem:[#allocation22 + $0x13c] ss:$12 sps:$4 sm:$0xff]   ;;  %v18424_v62 = vld [vmem:[#allocation22 + $0x2c0] ss:$12 sps:$4 sm:$0xff]   ;;  %v18421_v46 = vld [vmem:[#allocation22 + $0x138] ss:$12 sps:$4 sm:$0xff]  }
 0xb8e   :  { %v23717_v56 = vpack.c.bf16 %v12991_v27, %v12979_v23  ;;  %v23719_v8 = vpack.c.bf16 %v12993_v26, %v12981_v59  ;;  %15314 = vmatmul.mubr.bf16.vlgmr.msra.gmra.mrb[116].mxu0 %v23699_v33  ;;  %14980 = vmatpush1.bf16.msra.mxu1 %v18396_v12  ;;  %v18425_v19 = vld [vmem:[#allocation22 + $0x200] ss:$12 sps:$4 sm:$0xff]   ;;  %v18429_v14 = vld [vmem:[#allocation22 + $0x2d8] ss:$12 sps:$4 sm:$0xff]   ;;  %v18426_v36 = vld [vmem:[#allocation22 + $0x150] ss:$12 sps:$4 sm:$0xff]  }
 0xb8f   :  { %16866 = vmatpush3.bf16.msra.mxu0 %v18400_v32  ;;  %14981 = vmatprep.subr.bf16.mxu1 %v18403_v58  ;;  %v18428_v0 = vld [vmem:[#allocation22 + $0x154] ss:$12 sps:$4 sm:$0xff]   ;;  %v18430_v54 = vld [vmem:[#allocation22 + $0x218] ss:$12 sps:$4 sm:$0xff]   ;;  %v18434_v48 = vld [vmem:[#allocation22 + $0x2f0] ss:$12 sps:$4 sm:$0xff]  }
 0xb90   :  { %16867 = vmatprep.subr.bf16.mxu0 %v18404_v61  ;;  %15321 = vmatprep.mubr.bf16.mxu0 %v23717_v56  ;;  %v18433_v6 = vld [vmem:[#allocation22 + $0x16c] ss:$12 sps:$4 sm:$0xff]   ;;  %v18431_v13 = vld [vmem:[#allocation22 + $0x168] ss:$12 sps:$4 sm:$0xff]   ;;  %v18435_v45 = vld [vmem:[#allocation22 + $0x230] ss:$12 sps:$4 sm:$0xff]  }
 0xb91   :  { %v18438_v1 = vld [vmem:[#allocation22 + $0x184] ss:$12 sps:$4 sm:$0xff]   ;;  %v18460_v10 = vld [vmem:[#allocation22 + $0x3c8] ss:$12 sps:$4 sm:$0xff]   ;;  %v18436_v12 = vld [vmem:[#allocation22 + $0x180] ss:$12 sps:$4 sm:$0xff]  }
 0xb92   :  { %14982 = vmatpush1.bf16.msra.mxu1 %v18401_v18  ;;  %v18441_v32 = vld [vmem:[#allocation22 + $0x19c] ss:$12 sps:$4 sm:$0xff]   ;;  %v18465_v50 = vld [vmem:[#allocation22 + $0x3e0] ss:$12 sps:$4 sm:$0xff]   ;;  %v18439_v4 = vld [vmem:[#allocation22 + $0x198] ss:$12 sps:$4 sm:$0xff]  }
 0xb93   :  { %16868 = vmatpush3.bf16.msra.mxu0 %v18405_v21  ;;  %14983 = vmatprep.subr.bf16.mxu1 %v18408_v47  ;;  %v18461_v37 = vld [vmem:[#allocation22 + $0x308] ss:$12 sps:$4 sm:$0xff]   ;;  %v18466_v58 = vld [vmem:[#allocation22 + $0x320] ss:$12 sps:$4 sm:$0xff]   ;;  %v18470_v23 = vld [vmem:[#allocation22 + $0x3f8] ss:$12 sps:$4 sm:$0xff]  }
 0xb94   :  { %16869 = vmatprep.subr.bf16.mxu0 %v18409_v35  ;;  %v18444_v52 = vld [vmem:[#allocation22 + $0x1b4] ss:$12 sps:$4 sm:$0xff]   ;;  %v18442_v59 = vld [vmem:[#allocation22 + $0x1b0] ss:$12 sps:$4 sm:$0xff]   ;;  %v18447_v27 = vld [vmem:[#allocation22 + $0x1cc] ss:$12 sps:$4 sm:$0xff]  }
 0xb95   :  { %v18475_v26 = vld [vmem:[#allocation22 + $0x410] ss:$12 sps:$4 sm:$0xff]   ;;  %v18445_v61 = vld [vmem:[#allocation22 + $0x1c8] ss:$12 sps:$4 sm:$0xff]   ;;  %v18448_v47 = vld [vmem:[#allocation22 + $0x1e0] ss:$12 sps:$4 sm:$0xff]  }
 0xb96   :  { %15322 = vmatmul.mubr.bf16.gmra.mrb[120].mxu0 %v23713_v2  ;;  %14984 = vmatpush1.bf16.msra.mxu1 %v18406_v39  ;;  %v18476_v18 = vld [vmem:[#allocation22 + $0x350] ss:$12 sps:$4 sm:$0xff]   ;;  %v18480_v21 = vld [vmem:[#allocation22 + $0x428] ss:$12 sps:$4 sm:$0xff]   ;;  %v18485_v39 = vld [vmem:[#allocation22 + $0x440] ss:$12 sps:$4 sm:$0xff]  }
 0xb97   :  { %16870 = vmatpush3.bf16.msra.mxu0 %v18410_v20  ;;  %15362 = vmatprep.mubr.bf16.mxu0 %v23703_v17  ;;  %v18453_v35 = vld [vmem:[#allocation22 + $0x1fc] ss:$12 sps:$4 sm:$0xff]   ;;  %v18451_v20 = vld [vmem:[#allocation22 + $0x1f8] ss:$12 sps:$4 sm:$0xff]  }
 0xb98   :  { %14985 = vmatprep.subr.bf16.mxu1 %v18413_v29  ;;  %16871 = vmatprep.subr.bf16.mxu0 %v18414_v5  ;;  %v18486_v29 = vld [vmem:[#allocation22 + $0x380] ss:$12 sps:$4 sm:$0xff]   ;;  %v18490_v5 = vld [vmem:[#allocation22 + $0x458] ss:$12 sps:$4 sm:$0xff]  }
 0xb9a   :  { %14986 = vmatpush1.bf16.msra.mxu1 %v18411_v42  ;;  %v18454_v42 = vld [vmem:[#allocation22 + $0x210] ss:$12 sps:$4 sm:$0xff]  }
 0xb9b   :  { %16872 = vmatpush3.bf16.msra.mxu0 %v18415_v40  ;;  %14987 = vmatprep.subr.bf16.mxu1 %v18418_v16  ;;  %v18459_v40 = vld [vmem:[#allocation22 + $0x22c] ss:$12 sps:$4 sm:$0xff]  }
 0xb9c   :  { %16873 = vmatprep.subr.bf16.mxu0 %v18419_v44  ;;  %v18491_v16 = vld [vmem:[#allocation22 + $0x398] ss:$12 sps:$4 sm:$0xff]   ;;  %v18495_v44 = vld [vmem:[#allocation22 + $0x470] ss:$12 sps:$4 sm:$0xff]  }
 0xb9e   :  { %14988 = vmatpush1.bf16.msra.mxu1 %v18416_v43  ;;  %v18457_v43 = vld [vmem:[#allocation22 + $0x228] ss:$12 sps:$4 sm:$0xff]  }
 0xb9f   :  { %16874 = vmatpush3.bf16.msra.mxu0 %v18420_v55  ;;  %14989 = vmatprep.subr.bf16.mxu1 %v18423_v51  ;;  %v18464_v55 = vld [vmem:[#allocation22 + $0x244] ss:$12 sps:$4 sm:$0xff]  }
 0xba0   :  { %16875 = vmatprep.subr.bf16.mxu0 %v18424_v62  ;;  %v18496_v51 = vld [vmem:[#allocation22 + $0x3b0] ss:$12 sps:$4 sm:$0xff]   ;;  %v18500_v62 = vld [vmem:[#allocation22 + $0x548] ss:$12 sps:$4 sm:$0xff]  }
 0xba2   :  { %14990 = vmatpush1.bf16.msra.mxu1 %v18421_v46  ;;  %v18462_v46 = vld [vmem:[#allocation22 + $0x240] ss:$12 sps:$4 sm:$0xff]  }
 0xba3   :  { %16876 = vmatpush3.bf16.msra.mxu0 %v18425_v19  ;;  %14991 = vmatprep.subr.bf16.mxu1 %v18428_v0  ;;  %v18469_v19 = vld [vmem:[#allocation22 + $0x25c] ss:$12 sps:$4 sm:$0xff]   ;;  %v18467_v0 = vld [vmem:[#allocation22 + $0x258] ss:$12 sps:$4 sm:$0xff]  }
 0xba4   :  { %16877 = vmatprep.subr.bf16.mxu0 %v18429_v14  ;;  %v18474_v14 = vld [vmem:[#allocation22 + $0x274] ss:$12 sps:$4 sm:$0xff]  }
 0xba6   :  { %14992 = vmatpush1.bf16.msra.mxu1 %v18426_v36  ;;  %v18472_v36 = vld [vmem:[#allocation22 + $0x270] ss:$12 sps:$4 sm:$0xff]  }
 0xba7   :  { %16878 = vmatpush3.bf16.msra.mxu0 %v18430_v54  ;;  %14993 = vmatprep.subr.bf16.mxu1 %v18433_v6  ;;  %v18479_v54 = vld [vmem:[#allocation22 + $0x28c] ss:$12 sps:$4 sm:$0xff]   ;;  %v18477_v6 = vld [vmem:[#allocation22 + $0x288] ss:$12 sps:$4 sm:$0xff]  }
 0xba8   :  { %16879 = vmatprep.subr.bf16.mxu0 %v18434_v48  ;;  %v18484_v48 = vld [vmem:[#allocation22 + $0x2a4] ss:$12 sps:$4 sm:$0xff]  }
 0xbaa   :  { %14994 = vmatpush1.bf16.msra.mxu1 %v18431_v13  ;;  %v18482_v13 = vld [vmem:[#allocation22 + $0x2a0] ss:$12 sps:$4 sm:$0xff]  }
 0xbab   :  { %16880 = vmatpush3.bf16.msra.mxu0 %v18435_v45  ;;  %15016 = vmatprep.subr.bf16.mxu1 %v18438_v1  ;;  %v24345_v45 = vld [vmem:[#allocation35_spill] sm:$0xff] }
 0xbac   :  { %16893 = vmatprep.subr.bf16.mxu0 %v18460_v10  ;;  %v24346_v1 = vsub.s32 4, %v24345_v45 }
 0xbad   :  { %14996 = vmatmul.mubr.bf16.vlgmr.msra.gmra.mrb[100].mxu1 %v23699_v33  ;;  %v18471_v33 = vld [vmem:[#allocation22 + $0x338] ss:$12 sps:$4 sm:$0xff]  }
 0xbae   :  { %15363 = vmatmul.mubr.bf16.vlgmr.msra.gmra.mrb[124].mxu0 %v23701_v34  ;;  %15005 = vmatprep.mubr.bf16.mxu1 %v23717_v56  ;;  %v18450_v56 = vld [vmem:[#allocation22 + $0x1e4] ss:$12 sps:$4 sm:$0xff]   ;;  %v10837_v10 = vrot.slane %v23673_v31, %v24346_v1 }
 0xbaf   :  { %15017 = vmatpush1.bf16.msra.mxu1 %v18436_v12  ;;  %15370 = vmatprep.mubr.bf16.mxu0 %v23719_v8  ;;  %v18489_v12 = vld [vmem:[#allocation22 + $0x2bc] ss:$12 sps:$4 sm:$0xff]  }
 0xbb0   :  { %15018 = vmatprep.subr.bf16.mxu1 %v18441_v32  ;;  %16894 = vmatpush3.bf16.msra.mxu0 %v18461_v37  ;;  %v24347_v32 = vsub.s32 6, %v24345_v45 }
 0xbb1   :  { %16895 = vmatprep.subr.bf16.mxu0 %v18465_v50  ;;  %v24348_v50 = vsub.s32 5, %v24345_v45 }
 0xbb2   :  { %v10845_v37 = vrot.slane %v23673_v31, %v24347_v32  ;;  %v18504_v32 = vld [vmem:[#allocation22 + $0x304] ss:$12 sps:$4 sm:$0xff]  }
 0xbb3   :  { %15019 = vmatpush1.bf16.msra.mxu1 %v18439_v4  ;;  %v10841_v4 = vrot.slane %v23673_v31, %v24348_v50  ;;  %v18505_v50 = vld [vmem:[#allocation22 + $0x560] ss:$12 sps:$4 sm:$0xff]  }
 0xbb4   :  { %15020 = vmatprep.subr.bf16.mxu1 %v18444_v52  ;;  %16896 = vmatpush3.bf16.msra.mxu0 %v18466_v58  ;;  %v24349_v52 = vsub.s32 7, %v24345_v45 }
 0xbb5   :  { %15006 = vmatmul.mubr.bf16.gmra.mrb[104].mxu1 %v23713_v2  ;;  %16897 = vmatprep.subr.bf16.mxu0 %v18470_v23  ;;  %v18481_v2 = vld [vmem:[#allocation22 + $0x368] ss:$12 sps:$4 sm:$0xff]  }
 0xbb6   :  { %15371 = vmatmul.mubr.bf16.gmra.mrb[128].mxu0 %v23715_v30  ;;  %15048 = vmatprep.mubr.bf16.mxu1 %v23703_v17  ;;  %v18456_v17 = vld [vmem:[#allocation22 + $0x214] ss:$12 sps:$4 sm:$0xff]   ;;  %v23744_v58 = vrot.slane %v23673_v31, %v24349_v52 }
 0xbb7   :  { %15021 = vmatpush1.bf16.msra.mxu1 %v18442_v59  ;;  %v18487_v59 = vld [vmem:[#allocation22 + $0x2b8] ss:$12 sps:$4 sm:$0xff]  }
 0xbb8   :  { %15022 = vmatprep.subr.bf16.mxu1 %v18447_v27  ;;  %16898 = vmatpush3.bf16.msra.mxu0 %v18471_v33 }
 0xbb9   :  { %16899 = vmatprep.subr.bf16.mxu0 %v18475_v26 }
 0xbbb   :  { %15023 = vmatpush1.bf16.msra.mxu1 %v18445_v61  ;;  %v18494_v61 = vld [vmem:[#allocation22 + $0x2d4] ss:$12 sps:$4 sm:$0xff]  }
 0xbbc   :  { %15024 = vmatprep.subr.bf16.mxu1 %v18450_v56  ;;  %16900 = vmatpush3.bf16.msra.mxu0 %v18476_v18 }
 0xbbd   :  { %16901 = vmatprep.subr.bf16.mxu0 %v18480_v21 }
 0xbbf   :  { %15025 = vmatpush1.bf16.msra.mxu1 %v18448_v47 }
 0xbc0   :  { %15026 = vmatprep.subr.bf16.mxu1 %v18453_v35  ;;  %16902 = vmatpush3.bf16.msra.mxu0 %v18481_v2 }
 0xbc1   :  { %16903 = vmatprep.subr.bf16.mxu0 %v18485_v39 }
 0xbc3   :  { %15027 = vmatpush1.bf16.msra.mxu1 %v18451_v20 }
 0xbc4   :  { %15028 = vmatprep.subr.bf16.mxu1 %v18456_v17  ;;  %16904 = vmatpush3.bf16.msra.mxu0 %v18486_v29 }
 0xbc5   :  { %16905 = vmatprep.subr.bf16.mxu0 %v18490_v5  ;;  %v18492_v5 = vld [vmem:[#allocation22 + $0x2d0] ss:$12 sps:$4 sm:$0xff]  }
 0xbc7   :  { %15029 = vmatpush1.bf16.msra.mxu1 %v18454_v42 }
 0xbc8   :  { %15030 = vmatprep.subr.bf16.mxu1 %v18459_v40  ;;  %16906 = vmatpush3.bf16.msra.mxu0 %v18491_v16 }
 0xbc9   :  { %16907 = vmatprep.subr.bf16.mxu0 %v18495_v44  ;;  %v18499_v44 = vld [vmem:[#allocation22 + $0x2ec] ss:$12 sps:$4 sm:$0xff]  }
 0xbcb   :  { %15031 = vmatpush1.bf16.msra.mxu1 %v18457_v43 }
 0xbcc   :  { %15032 = vmatprep.subr.bf16.mxu1 %v18464_v55  ;;  %16908 = vmatpush3.bf16.msra.mxu0 %v18496_v51 }
 0xbcd   :  { %16921 = vmatprep.subr.bf16.mxu0 %v18500_v62 }
 0xbcf   :  { %15033 = vmatpush1.bf16.msra.mxu1 %v18462_v46 }
 0xbd0   :  { %15034 = vmatprep.subr.bf16.mxu1 %v18469_v19 }
 0xbd3   :  { %15035 = vmatpush1.bf16.msra.mxu1 %v18467_v0 }
 0xbd4   :  { %15036 = vmatprep.subr.bf16.mxu1 %v18474_v14 }
 0xbd7   :  { %15037 = vmatpush1.bf16.msra.mxu1 %v18472_v36 }
 0xbd8   :  { %15038 = vmatprep.subr.bf16.mxu1 %v18479_v54 }
 0xbdb   :  { %15039 = vmatpush1.bf16.msra.mxu1 %v18477_v6  ;;  %v18497_v6 = vld [vmem:[#allocation22 + $0x2e8] ss:$12 sps:$4 sm:$0xff]  }
 0xbdc   :  { %15040 = vmatprep.subr.bf16.mxu1 %v18484_v48  ;;  %v18501_v48 = vld [vmem:[#allocation22 + $0x488] ss:$12 sps:$4 sm:$0xff]  }
 0xbdf   :  { %15041 = vmatpush1.bf16.msra.mxu1 %v18482_v13  ;;  %v12617_v23 = vpop.f32.mrb[84].mxu1 }
 0xbe0   :  { %v17301_v27 = vadd.f32 %v12617_v23, %v10837_v10  ;;  %v12723_v33 = vpop.f32.mrb[100].mxu0  ;;  %v12619_v26 = vpop.f32.mrb[85].mxu1  ;;  %15042 = vmatprep.subr.bf16.mxu1 %v18489_v12 }
 0xbe1   :  { %v17309_v56 = vadd.f32 %v12723_v33, %v10845_v37  ;;  %v17302_v18 = vadd.f32 %v12619_v26, %v10841_v4  ;;  %v12725_v21 = vpop.f32.mrb[101].mxu0  ;;  %v12621_v47 = vpop.f32.mrb[86].mxu1 }
 0xbe2   :  { %v17310_v35 = vadd.f32 %v12725_v21, %v23744_v58  ;;  %v17303_v2 = vadd.f32 %v12621_v47, %v10837_v10  ;;  %v12727_v39 = vpop.f32.mrb[102].mxu0  ;;  %v12623_v20 = vpop.f32.mrb[87].mxu1  ;;  %v12958_v42 = vmax.f32 %v17301_v27, 0.0 }
 0xbe3   :  { %v17311_v17 = vadd.f32 %v12727_v39, %v10845_v37  ;;  %15043 = vmatpush1.bf16.msra.mxu1 %v18487_v59  ;;  %v17304_v31 = vadd.f32 %v12623_v20, %v10841_v4  ;;  %v12729_v29 = vpop.f32.mrb[103].mxu0  ;;  %v12960_v43 = vmax.f32 %v17309_v56, 0.0  ;;  %v12959_v55 = vmax.f32 %v17302_v18, 0.0 }
 0xbe4   :  { %v12970_v40 = vmax.f32 %v17303_v2, 0.0  ;;  %v17312_v16 = vadd.f32 %v12729_v29, %v23744_v58  ;;  %15044 = vmatprep.subr.bf16.mxu1 %v18494_v61  ;;  %v12961_v46 = vmax.f32 %v17310_v35, 0.0  ;;  %v18502_v35 = vld [vmem:[#allocation22 + $0x300] ss:$12 sps:$4 sm:$0xff]  }
 0xbe5   :  { %v12972_v51 = vmax.f32 %v17311_v17, 0.0  ;;  %v12971_v62 = vmax.f32 %v17304_v31, 0.0  ;;  %v18506_v17 = vld [vmem:[#allocation22 + $0x4a0] ss:$12 sps:$4 sm:$0xff]   ;;  %v18509_v31 = vld [vmem:[#allocation22 + $0x31c] ss:$12 sps:$4 sm:$0xff]  }
 0xbe6   :  { %v23748_v19 = vpack.c.bf16 %v12970_v40, %v12958_v42  ;;  %v12973_v0 = vmax.f32 %v17312_v16, 0.0  ;;  %v18510_v40 = vld [vmem:[#allocation22 + $0x578] ss:$12 sps:$4 sm:$0xff]  }
 0xbe7   :  { %v23750_v14 = vpack.c.bf16 %v12972_v51, %v12960_v43  ;;  %v23752_v36 = vpack.c.bf16 %v12971_v62, %v12959_v55  ;;  %15045 = vmatpush1.bf16.msra.mxu1 %v18492_v5  ;;  %v12627_v54 = vpop.f32.mrb[88].mxu1  ;;  %v18511_v51 = vld [vmem:[#allocation22 + $0x4b8] ss:$12 sps:$4 sm:$0xff]   ;;  %v18514_v62 = vld [vmem:[#allocation22 + $0x334] ss:$12 sps:$4 sm:$0xff]  }
 0xbe8   :  { %v23754_v13 = vpack.c.bf16 %v12973_v0, %v12961_v46  ;;  %v17305_v45 = vadd.f32 %v12627_v54, %v10837_v10  ;;  %v12733_v1 = vpop.f32.mrb[104].mxu0  ;;  %v12629_v12 = vpop.f32.mrb[89].mxu1  ;;  %15046 = vmatprep.subr.bf16.mxu1 %v18499_v44  ;;  %v18515_v46 = vld [vmem:[#allocation22 + $0x590] ss:$12 sps:$4 sm:$0xff]   ;;  %v18519_v0 = vld [vmem:[#allocation22 + $0x34c] ss:$12 sps:$4 sm:$0xff]  }
 0xbe9   :  { %v17313_v52 = vadd.f32 %v12733_v1, %v10845_v37  ;;  %v17306_v23 = vadd.f32 %v12629_v12, %v10841_v4  ;;  %v12735_v59 = vpop.f32.mrb[105].mxu0  ;;  %v12631_v27 = vpop.f32.mrb[90].mxu1  ;;  %15411 = vmatprep.mubr.bf16.mxu0 %v23752_v36  ;;  %v18520_v54 = vld [vmem:[#allocation22 + $0x5a8] ss:$12 sps:$4 sm:$0xff]   ;;  %v18525_v1 = vld [vmem:[#allocation22 + $0x5c0] ss:$12 sps:$4 sm:$0xff]  }
 0xbea   :  { %v17314_v33 = vadd.f32 %v12735_v59, %v23744_v58  ;;  %v17307_v26 = vadd.f32 %v12631_v27, %v10837_v10  ;;  %v12737_v61 = vpop.f32.mrb[106].mxu0  ;;  %v12633_v56 = vpop.f32.mrb[91].mxu1  ;;  %15412 = vmatmul.mubr.bf16.vlgmr.msra.gmra.mrb[132].mxu0 %v23748_v19  ;;  %v12982_v2 = vmax.f32 %v17305_v45, 0.0  ;;  %v18524_v45 = vld [vmem:[#allocation22 + $0x364] ss:$12 sps:$4 sm:$0xff]  }
 0xbeb   :  { %v17315_v18 = vadd.f32 %v12737_v61, %v10845_v37  ;;  %15047 = vmatpush1.bf16.msra.mxu1 %v18497_v6  ;;  %v17308_v21 = vadd.f32 %v12633_v56, %v10841_v4  ;;  %v12739_v47 = vpop.f32.mrb[107].mxu0  ;;  %16922 = vmatpush3.bf16.msra.mxu0 %v18501_v48  ;;  %v12984_v29 = vmax.f32 %v17313_v52, 0.0  ;;  %v12983_v10 = vmax.f32 %v17306_v23, 0.0  ;;  %v18517_v6 = vld [vmem:[#allocation22 + $0x348] ss:$12 sps:$4 sm:$0xff]  }
 0xbec   :  { %v12994_v39 = vmax.f32 %v17307_v26, 0.0  ;;  %v17316_v20 = vadd.f32 %v12739_v47, %v23744_v58  ;;  %15069 = vmatprep.subr.bf16.mxu1 %v18504_v32  ;;  %16923 = vmatprep.subr.bf16.mxu0 %v18505_v50  ;;  %v12985_v16 = vmax.f32 %v17314_v33, 0.0  ;;  %v18507_v58 = vld [vmem:[#allocation22 + $0x318] ss:$12 sps:$4 sm:$0xff]   ;;  %v18521_v48 = vld [vmem:[#allocation22 + $0x4e8] ss:$12 sps:$4 sm:$0xff]  }
 0xbed   :  { %v12996_v5 = vmax.f32 %v17315_v18, 0.0  ;;  %v12995_v42 = vmax.f32 %v17308_v21, 0.0  ;;  %v18522_v12 = vld [vmem:[#allocation22 + $0x360] ss:$12 sps:$4 sm:$0xff]   ;;  %v18529_v50 = vld [vmem:[#allocation22 + $0x37c] ss:$12 sps:$4 sm:$0xff]  }
 0xbee   :  { %v23760_v37 = vpack.c.bf16 %v12994_v39, %v12982_v2  ;;  %v12997_v4 = vmax.f32 %v17316_v20, 0.0  ;;  %15049 = vmatmul.mubr.bf16.vlgmr.msra.gmra.mrb[100].mxu1 %v23701_v34  ;;  %v18512_v34 = vld [vmem:[#allocation22 + $0x330] ss:$12 sps:$4 sm:$0xff]   ;;  %v18526_v32 = vld [vmem:[#allocation22 + $0x500] ss:$12 sps:$4 sm:$0xff]  }
 0xbef   :  { %v23763_v44 = vpack.c.bf16 %v12996_v5, %v12984_v29  ;;  %v23765_v43 = vpack.c.bf16 %v12995_v42, %v12983_v10  ;;  %15058 = vmatprep.mubr.bf16.mxu1 %v23719_v8  ;;  %15070 = vmatpush1.bf16.msra.mxu1 %v18502_v35  ;;  %v18516_v8 = vld [vmem:[#allocation22 + $0x4d0] ss:$12 sps:$4 sm:$0xff]   ;;  %v18530_v52 = vld [vmem:[#allocation22 + $0x5d8] ss:$12 sps:$4 sm:$0xff]   ;;  %v18534_v23 = vld [vmem:[#allocation22 + $0x394] ss:$12 sps:$4 sm:$0xff]  }
 0xbf0   :  { %v23768_v55 = vpack.c.bf16 %v12997_v4, %v12985_v16  ;;  %16924 = vmatpush3.bf16.msra.mxu0 %v18506_v17  ;;  %15071 = vmatprep.subr.bf16.mxu1 %v18509_v31  ;;  %v18535_v59 = vld [vmem:[#allocation22 + $0x5f0] ss:$12 sps:$4 sm:$0xff]   ;;  %v18539_v26 = vld [vmem:[#allocation22 + $0x3ac] ss:$12 sps:$4 sm:$0xff]   ;;  %v18564_v61 = vld [vmem:[#allocation22 + $0x6c8] ss:$12 sps:$4 sm:$0xff]  }
 0xbf1   :  { %15419 = vmatprep.mubr.bf16.mxu0 %v23765_v43  ;;  %16925 = vmatprep.subr.bf16.mxu0 %v18510_v40  ;;  %v18532_v27 = vld [vmem:[#allocation22 + $0x390] ss:$12 sps:$4 sm:$0xff]   ;;  %v18537_v56 = vld [vmem:[#allocation22 + $0x3a8] ss:$12 sps:$4 sm:$0xff]   ;;  %v18569_v47 = vld [vmem:[#allocation22 + $0x6e0] ss:$12 sps:$4 sm:$0xff]  }
 0xbf2   :  { %15420 = vmatmul.mubr.bf16.gmra.mrb[136].mxu0 %v23760_v37  ;;  %v18536_v33 = vld [vmem:[#allocation22 + $0x530] ss:$12 sps:$4 sm:$0xff]   ;;  %v18565_v21 = vld [vmem:[#allocation22 + $0x608] ss:$12 sps:$4 sm:$0xff]   ;;  %v18540_v35 = vld [vmem:[#allocation22 + $0x3c0] ss:$12 sps:$4 sm:$0xff]  }
 0xbf3   :  { %15072 = vmatpush1.bf16.msra.mxu1 %v18507_v58  ;;  %15460 = vmatprep.mubr.bf16.mxu0 %v23754_v13  ;;  %v18542_v18 = vld [vmem:[#allocation22 + $0x3c4] ss:$12 sps:$4 sm:$0xff]   ;;  %v18545_v2 = vld [vmem:[#allocation22 + $0x3dc] ss:$12 sps:$4 sm:$0xff]   ;;  %v18570_v39 = vld [vmem:[#allocation22 + $0x620] ss:$12 sps:$4 sm:$0xff]  }
 0xbf4   :  { %16926 = vmatpush3.bf16.msra.mxu0 %v18511_v51  ;;  %15073 = vmatprep.subr.bf16.mxu1 %v18514_v62  ;;  %v18574_v20 = vld [vmem:[#allocation22 + $0x6f8] ss:$12 sps:$4 sm:$0xff]   ;;  %v18548_v31 = vld [vmem:[#allocation22 + $0x3f4] ss:$12 sps:$4 sm:$0xff]   ;;  %v18579_v10 = vld [vmem:[#allocation22 + $0x710] ss:$12 sps:$4 sm:$0xff]  }
 0xbf5   :  { %16927 = vmatprep.subr.bf16.mxu0 %v18515_v46  ;;  %v18543_v17 = vld [vmem:[#allocation22 + $0x3d8] ss:$12 sps:$4 sm:$0xff]   ;;  %v18546_v5 = vld [vmem:[#allocation22 + $0x3f0] ss:$12 sps:$4 sm:$0xff]   ;;  %v18584_v16 = vld [vmem:[#allocation22 + $0x728] ss:$12 sps:$4 sm:$0xff]  }
 0xbf6   :  { %15059 = vmatmul.mubr.bf16.gmra.mrb[104].mxu1 %v23715_v30  ;;  %v18527_v30 = vld [vmem:[#allocation22 + $0x378] ss:$12 sps:$4 sm:$0xff]   ;;  %v18580_v40 = vld [vmem:[#allocation22 + $0x650] ss:$12 sps:$4 sm:$0xff]   ;;  %v18549_v4 = vld [vmem:[#allocation22 + $0x408] ss:$12 sps:$4 sm:$0xff]  }
 0xbf7   :  { %15074 = vmatpush1.bf16.msra.mxu1 %v18512_v34  ;;  %15101 = vmatprep.mubr.bf16.mxu1 %v23752_v36  ;;  %v18531_v36 = vld [vmem:[#allocation22 + $0x518] ss:$12 sps:$4 sm:$0xff]   ;;  %v18585_v51 = vld [vmem:[#allocation22 + $0x668] ss:$12 sps:$4 sm:$0xff]   ;;  %v18589_v62 = vld [vmem:[#allocation22 + $0x740] ss:$12 sps:$4 sm:$0xff]  }
 0xbf8   :  { %16928 = vmatpush3.bf16.msra.mxu0 %v18516_v8  ;;  %15075 = vmatprep.subr.bf16.mxu1 %v18519_v0  ;;  %v18575_v29 = vld [vmem:[#allocation22 + $0x638] ss:$12 sps:$4 sm:$0xff]   ;;  %v18552_v46 = vld [vmem:[#allocation22 + $0x420] ss:$12 sps:$4 sm:$0xff]   ;;  %v18557_v34 = vld [vmem:[#allocation22 + $0x43c] ss:$12 sps:$4 sm:$0xff]  }
 0xbf9   :  { %16929 = vmatprep.subr.bf16.mxu0 %v18520_v54  ;;  %v18551_v42 = vld [vmem:[#allocation22 + $0x40c] ss:$12 sps:$4 sm:$0xff]   ;;  %v18554_v58 = vld [vmem:[#allocation22 + $0x424] ss:$12 sps:$4 sm:$0xff]  }
 0xbfa   :  { %v18590_v8 = vld [vmem:[#allocation22 + $0x680] ss:$12 sps:$4 sm:$0xff]   ;;  %v18594_v0 = vld [vmem:[#allocation22 + $0x758] ss:$12 sps:$4 sm:$0xff]  }
 0xbfb   :  { %15076 = vmatpush1.bf16.msra.mxu1 %v18517_v6  ;;  %v18555_v54 = vld [vmem:[#allocation22 + $0x438] ss:$12 sps:$4 sm:$0xff]   ;;  %v18560_v6 = vld [vmem:[#allocation22 + $0x454] ss:$12 sps:$4 sm:$0xff]  }
 0xbfc   :  { %16930 = vmatpush3.bf16.msra.mxu0 %v18521_v48  ;;  %15077 = vmatprep.subr.bf16.mxu1 %v18524_v45  ;;  %v18595_v48 = vld [vmem:[#allocation22 + $0x698] ss:$12 sps:$4 sm:$0xff]   ;;  %v18599_v45 = vld [vmem:[#allocation22 + $0x770] ss:$12 sps:$4 sm:$0xff]  }
 0xbfd   :  { %16931 = vmatprep.subr.bf16.mxu0 %v18525_v1  ;;  %v18558_v1 = vld [vmem:[#allocation22 + $0x450] ss:$12 sps:$4 sm:$0xff]  }
 0xbff   :  { %15078 = vmatpush1.bf16.msra.mxu1 %v18522_v12  ;;  %v18563_v12 = vld [vmem:[#allocation22 + $0x46c] ss:$12 sps:$4 sm:$0xff]  }
 0xc00   :  { %16932 = vmatpush3.bf16.msra.mxu0 %v18526_v32  ;;  %15079 = vmatprep.subr.bf16.mxu1 %v18529_v50  ;;  %v18600_v32 = vld [vmem:[#allocation22 + $0x6b0] ss:$12 sps:$4 sm:$0xff]   ;;  %v18604_v50 = vld [vmem:[#allocation22 + $0x848] ss:$12 sps:$4 sm:$0xff]  }
 0xc01   :  { %16933 = vmatprep.subr.bf16.mxu0 %v18530_v52  ;;  %v18561_v52 = vld [vmem:[#allocation22 + $0x468] ss:$12 sps:$4 sm:$0xff]  }
 0xc03   :  { %15080 = vmatpush1.bf16.msra.mxu1 %v18527_v30  ;;  %v18568_v30 = vld [vmem:[#allocation22 + $0x484] ss:$12 sps:$4 sm:$0xff]  }
 0xc04   :  { %16934 = vmatpush3.bf16.msra.mxu0 %v18531_v36  ;;  %15081 = vmatprep.subr.bf16.mxu1 %v18534_v23  ;;  %v18566_v36 = vld [vmem:[#allocation22 + $0x480] ss:$12 sps:$4 sm:$0xff]   ;;  %v18573_v23 = vld [vmem:[#allocation22 + $0x49c] ss:$12 sps:$4 sm:$0xff]  }
 0xc05   :  { %16935 = vmatprep.subr.bf16.mxu0 %v18535_v59  ;;  %v18571_v59 = vld [vmem:[#allocation22 + $0x498] ss:$12 sps:$4 sm:$0xff]  }
 0xc07   :  { %15082 = vmatpush1.bf16.msra.mxu1 %v18532_v27  ;;  %v18578_v27 = vld [vmem:[#allocation22 + $0x4b4] ss:$12 sps:$4 sm:$0xff]  }
 0xc08   :  { %16936 = vmatpush3.bf16.msra.mxu0 %v18536_v33  ;;  %15083 = vmatprep.subr.bf16.mxu1 %v18539_v26  ;;  %v18576_v33 = vld [vmem:[#allocation22 + $0x4b0] ss:$12 sps:$4 sm:$0xff]   ;;  %v18583_v26 = vld [vmem:[#allocation22 + $0x4cc] ss:$12 sps:$4 sm:$0xff]  }
 0xc09   :  { %16949 = vmatprep.subr.bf16.mxu0 %v18564_v61  ;;  %v18581_v61 = vld [vmem:[#allocation22 + $0x4c8] ss:$12 sps:$4 sm:$0xff]  }
 0xc0b   :  { %15084 = vmatpush1.bf16.msra.mxu1 %v18537_v56  ;;  %15461 = vmatmul.mubr.bf16.vlgmr.msra.gmra.mrb[140].mxu0 %v23750_v14  ;;  %v18588_v56 = vld [vmem:[#allocation22 + $0x4e4] ss:$12 sps:$4 sm:$0xff]  }
 0xc0c   :  { %15468 = vmatprep.mubr.bf16.mxu0 %v23768_v55  ;;  %15085 = vmatprep.subr.bf16.mxu1 %v18542_v18  ;;  %v10815_v18 = vld [vmem:[#allocation20 + $0x8] sm:$0xf] }
 0xc0d   :  { %16950 = vmatpush3.bf16.msra.mxu0 %v18565_v21  ;;  %v10853_v21 = vrot.slane %v10815_v18, %v24341_v15 }
 0xc0e   :  { %16951 = vmatprep.subr.bf16.mxu0 %v18569_v47  ;;  %v10861_v47 = vrot.slane %v10815_v18, %v24343_v60 }
 0xc0f   :  { %15086 = vmatpush1.bf16.msra.mxu1 %v18540_v35  ;;  %v10857_v35 = vrot.slane %v10815_v18, %v24342_v11 }
 0xc10   :  { %15087 = vmatprep.subr.bf16.mxu1 %v18545_v2  ;;  %v18591_v2 = vld [vmem:[#allocation22 + $0x4f8] ss:$12 sps:$4 sm:$0xff]  }
 0xc11   :  { %16952 = vmatpush3.bf16.msra.mxu0 %v18570_v39  ;;  %v18598_v39 = vld [vmem:[#allocation22 + $0x514] ss:$12 sps:$4 sm:$0xff]  }
 0xc12   :  { %16953 = vmatprep.subr.bf16.mxu0 %v18574_v20 }
 0xc13   :  { %15088 = vmatpush1.bf16.msra.mxu1 %v18543_v17  ;;  %15469 = vmatmul.mubr.bf16.gmra.mrb[144].mxu0 %v23763_v44 }
 0xc14   :  { %15089 = vmatprep.subr.bf16.mxu1 %v18548_v31 }
 0xc15   :  { %16954 = vmatpush3.bf16.msra.mxu0 %v18575_v29 }
 0xc16   :  { %16955 = vmatprep.subr.bf16.mxu0 %v18579_v10 }
 0xc17   :  { %15090 = vmatpush1.bf16.msra.mxu1 %v18546_v5 }
 0xc18   :  { %15091 = vmatprep.subr.bf16.mxu1 %v18551_v42 }
 0xc19   :  { %16956 = vmatpush3.bf16.msra.mxu0 %v18580_v40 }
 0xc1a   :  { %16957 = vmatprep.subr.bf16.mxu0 %v18584_v16 }
 0xc1b   :  { %15092 = vmatpush1.bf16.msra.mxu1 %v18549_v4 }
 0xc1c   :  { %15093 = vmatprep.subr.bf16.mxu1 %v18554_v58 }
 0xc1d   :  { %16958 = vmatpush3.bf16.msra.mxu0 %v18585_v51  ;;  %v18596_v51 = vld [vmem:[#allocation22 + $0x510] ss:$12 sps:$4 sm:$0xff]  }
 0xc1e   :  { %16959 = vmatprep.subr.bf16.mxu0 %v18589_v62 }
 0xc1f   :  { %15094 = vmatpush1.bf16.msra.mxu1 %v18552_v46 }
 0xc20   :  { %15095 = vmatprep.subr.bf16.mxu1 %v18557_v34  ;;  %v18603_v34 = vld [vmem:[#allocation22 + $0x52c] ss:$12 sps:$4 sm:$0xff]  }
 0xc21   :  { %16960 = vmatpush3.bf16.msra.mxu0 %v18590_v8 }
 0xc22   :  { %16961 = vmatprep.subr.bf16.mxu0 %v18594_v0 }
 0xc23   :  { %15096 = vmatpush1.bf16.msra.mxu1 %v18555_v54 }
 0xc24   :  { %15097 = vmatprep.subr.bf16.mxu1 %v18560_v6 }
 0xc25   :  { %16962 = vmatpush3.bf16.msra.mxu0 %v18595_v48 }
 0xc26   :  { %16963 = vmatprep.subr.bf16.mxu0 %v18599_v45 }
 0xc27   :  { %15098 = vmatpush1.bf16.msra.mxu1 %v18558_v1 }
 0xc28   :  { %15099 = vmatprep.subr.bf16.mxu1 %v18563_v12 }
 0xc29   :  { %16964 = vmatpush3.bf16.msra.mxu0 %v18600_v32 }
 0xc2a   :  { %16977 = vmatprep.subr.bf16.mxu0 %v18604_v50 }
 0xc2b   :  { %15100 = vmatpush1.bf16.msra.mxu1 %v18561_v52  ;;  %v18601_v52 = vld [vmem:[#allocation22 + $0x528] ss:$12 sps:$4 sm:$0xff]  }
 0xc2c   :  { %15122 = vmatprep.subr.bf16.mxu1 %v18568_v30 }
 0xc2e   :  { %15102 = vmatmul.mubr.bf16.vlgmr.msra.gmra.mrb[100].mxu1 %v23748_v19  ;;  %v18586_v19 = vld [vmem:[#allocation22 + $0x4e0] ss:$12 sps:$4 sm:$0xff]  }
 0xc2f   :  { %15111 = vmatprep.mubr.bf16.mxu1 %v23765_v43  ;;  %15123 = vmatpush1.bf16.msra.mxu1 %v18566_v36  ;;  %v18593_v43 = vld [vmem:[#allocation22 + $0x4fc] ss:$12 sps:$4 sm:$0xff]  }
 0xc30   :  { %15124 = vmatprep.subr.bf16.mxu1 %v18573_v23 }
 0xc33   :  { %15125 = vmatpush1.bf16.msra.mxu1 %v18571_v59  ;;  %v18605_v59 = vld [vmem:[#allocation22 + $0x788] ss:$12 sps:$4 sm:$0xff]  }
 0xc34   :  { %15126 = vmatprep.subr.bf16.mxu1 %v18578_v27  ;;  %v18608_v27 = vld [vmem:[#allocation22 + $0x544] ss:$12 sps:$4 sm:$0xff]  }
 0xc36   :  { %15112 = vmatmul.mubr.bf16.gmra.mrb[104].mxu1 %v23760_v37  ;;  %v23786_v37 = vrot.slane %v10815_v18, %v24344_v28  ;;  %v18609_v18 = vld [vmem:[#allocation22 + $0x860] ss:$12 sps:$4 sm:$0xff]  }
 0xc37   :  { %15127 = vmatpush1.bf16.msra.mxu1 %v18576_v33  ;;  %15154 = vmatprep.mubr.bf16.mxu1 %v23754_v13 }
 0xc38   :  { %15128 = vmatprep.subr.bf16.mxu1 %v18583_v26 }
 0xc3b   :  { %15129 = vmatpush1.bf16.msra.mxu1 %v18581_v61 }
 0xc3c   :  { %15130 = vmatprep.subr.bf16.mxu1 %v18588_v56 }
 0xc3f   :  { %15131 = vmatpush1.bf16.msra.mxu1 %v18586_v19 }
 0xc40   :  { %v12829_v13 = vpop.f32.mrb[92].mxu1  ;;  %15132 = vmatprep.subr.bf16.mxu1 %v18593_v43 }
 0xc41   :  { %v17317_v20 = vadd.f32 %v12829_v13, %v10853_v21  ;;  %v12935_v17 = vpop.f32.mrb[108].mxu0  ;;  %v12831_v31 = vpop.f32.mrb[93].mxu1 }
 0xc42   :  { %v17325_v29 = vadd.f32 %v12935_v17, %v10861_v47  ;;  %v17318_v10 = vadd.f32 %v12831_v31, %v10857_v35  ;;  %v12937_v5 = vpop.f32.mrb[109].mxu0  ;;  %v12833_v42 = vpop.f32.mrb[94].mxu1 }
 0xc43   :  { %v17326_v40 = vadd.f32 %v12937_v5, %v23786_v37  ;;  %v17319_v16 = vadd.f32 %v12833_v42, %v10853_v21  ;;  %v12939_v4 = vpop.f32.mrb[110].mxu0  ;;  %15133 = vmatpush1.bf16.msra.mxu1 %v18591_v2  ;;  %v12835_v58 = vpop.f32.mrb[95].mxu1  ;;  %v12962_v8 = vmax.f32 %v17317_v20, 0.0 }
 0xc44   :  { %v17327_v28 = vadd.f32 %v12939_v4, %v10861_v47  ;;  %v17320_v62 = vadd.f32 %v12835_v58, %v10857_v35  ;;  %v12941_v46 = vpop.f32.mrb[111].mxu0  ;;  %15134 = vmatprep.subr.bf16.mxu1 %v18598_v39  ;;  %v12964_v6 = vmax.f32 %v17325_v29, 0.0  ;;  %v12963_v48 = vmax.f32 %v17318_v10, 0.0  ;;  %v18606_v29 = vld [vmem:[#allocation22 + $0x540] ss:$12 sps:$4 sm:$0xff]  }
 0xc45   :  { %v12974_v0 = vmax.f32 %v17319_v16, 0.0  ;;  %v17328_v54 = vadd.f32 %v12941_v46, %v23786_v37  ;;  %v12965_v12 = vmax.f32 %v17326_v40, 0.0  ;;  %v18610_v40 = vld [vmem:[#allocation22 + $0x7a0] ss:$12 sps:$4 sm:$0xff]   ;;  %v18613_v16 = vld [vmem:[#allocation22 + $0x55c] ss:$12 sps:$4 sm:$0xff]  }
 0xc46   :  { %v12976_v45 = vmax.f32 %v17327_v28, 0.0  ;;  %v12975_v1 = vmax.f32 %v17320_v62, 0.0  ;;  %v18614_v28 = vld [vmem:[#allocation22 + $0x878] ss:$12 sps:$4 sm:$0xff]  }
 0xc47   :  { %v23790_v32 = vpack.c.bf16 %v12974_v0, %v12962_v8  ;;  %v12977_v50 = vmax.f32 %v17328_v54, 0.0  ;;  %15135 = vmatpush1.bf16.msra.mxu1 %v18596_v51 }
 0xc48   :  { %v23792_v30 = vpack.c.bf16 %v12976_v45, %v12964_v6  ;;  %v23794_v36 = vpack.c.bf16 %v12975_v1, %v12963_v48  ;;  %v12839_v23 = vpop.f32.mrb[96].mxu1  ;;  %15136 = vmatprep.subr.bf16.mxu1 %v18603_v34  ;;  %v18615_v48 = vld [vmem:[#allocation22 + $0x7b8] ss:$12 sps:$4 sm:$0xff]   ;;  %v18618_v45 = vld [vmem:[#allocation22 + $0x574] ss:$12 sps:$4 sm:$0xff]  }
 0xc49   :  { %v23796_v33 = vpack.c.bf16 %v12977_v50, %v12965_v12  ;;  %v17321_v26 = vadd.f32 %v12839_v23, %v10853_v21  ;;  %v12945_v61 = vpop.f32.mrb[112].mxu0  ;;  %v12841_v56 = vpop.f32.mrb[97].mxu1  ;;  %v18619_v1 = vld [vmem:[#allocation22 + $0x890] ss:$12 sps:$4 sm:$0xff]   ;;  %v18624_v23 = vld [vmem:[#allocation22 + $0x8a8] ss:$12 sps:$4 sm:$0xff]  }
 0xc4a   :  { %v17329_v19 = vadd.f32 %v12945_v61, %v10861_v47  ;;  %v17322_v43 = vadd.f32 %v12841_v56, %v10857_v35  ;;  %v12947_v2 = vpop.f32.mrb[113].mxu0  ;;  %v12843_v13 = vpop.f32.mrb[98].mxu1  ;;  %15509 = vmatprep.mubr.bf16.mxu0 %v23794_v36  ;;  %v18616_v12 = vld [vmem:[#allocation22 + $0x570] ss:$12 sps:$4 sm:$0xff]   ;;  %v18629_v61 = vld [vmem:[#allocation22 + $0x8c0] ss:$12 sps:$4 sm:$0xff]  }
 0xc4b   :  { %v17330_v39 = vadd.f32 %v12947_v2, %v23786_v37  ;;  %v17323_v20 = vadd.f32 %v12843_v13, %v10853_v21  ;;  %v12949_v17 = vpop.f32.mrb[114].mxu0  ;;  %15137 = vmatpush1.bf16.msra.mxu1 %v18601_v52  ;;  %v12845_v31 = vpop.f32.mrb[99].mxu1  ;;  %15510 = vmatmul.mubr.bf16.vlgmr.msra.gmra.mrb[148].mxu0 %v23790_v32  ;;  %v12986_v4 = vmax.f32 %v17321_v26, 0.0  ;;  %v18620_v50 = vld [vmem:[#allocation22 + $0x7d0] ss:$12 sps:$4 sm:$0xff]  }
 0xc4c   :  { %v17331_v10 = vadd.f32 %v12949_v17, %v10861_v47  ;;  %v17324_v5 = vadd.f32 %v12845_v31, %v10857_v35  ;;  %v12951_v42 = vpop.f32.mrb[115].mxu0  ;;  %16978 = vmatpush3.bf16.msra.mxu0 %v18605_v59  ;;  %15138 = vmatprep.subr.bf16.mxu1 %v18608_v27  ;;  %v12988_v21 = vmax.f32 %v17329_v19, 0.0  ;;  %v12987_v62 = vmax.f32 %v17322_v43, 0.0  ;;  %v18611_v35 = vld [vmem:[#allocation22 + $0x558] ss:$12 sps:$4 sm:$0xff]  }
 0xc4d   :  { %v12998_v58 = vmax.f32 %v17323_v20, 0.0  ;;  %v17332_v51 = vadd.f32 %v12951_v42, %v23786_v37  ;;  %16979 = vmatprep.subr.bf16.mxu0 %v18609_v18  ;;  %v12989_v8 = vmax.f32 %v17330_v39, 0.0  ;;  %v18623_v52 = vld [vmem:[#allocation22 + $0x58c] ss:$12 sps:$4 sm:$0xff]   ;;  %v18621_v59 = vld [vmem:[#allocation22 + $0x588] ss:$12 sps:$4 sm:$0xff]  }
 0xc4e   :  { %v13000_v46 = vmax.f32 %v17331_v10, 0.0  ;;  %v12999_v34 = vmax.f32 %v17324_v5, 0.0  ;;  %v18625_v27 = vld [vmem:[#allocation22 + $0x7e8] ss:$12 sps:$4 sm:$0xff]   ;;  %v18628_v26 = vld [vmem:[#allocation22 + $0x5a4] ss:$12 sps:$4 sm:$0xff]  }
 0xc4f   :  { %v23802_v0 = vpack.c.bf16 %v12998_v58, %v12986_v4  ;;  %v13001_v47 = vmax.f32 %v17332_v51, 0.0  ;;  %15139 = vmatpush1.bf16.msra.mxu1 %v18606_v29  ;;  %v18626_v56 = vld [vmem:[#allocation22 + $0x5a0] ss:$12 sps:$4 sm:$0xff]   ;;  %v18633_v19 = vld [vmem:[#allocation22 + $0x5bc] ss:$12 sps:$4 sm:$0xff]  }
 0xc50   :  { %v23804_v54 = vpack.c.bf16 %v13000_v46, %v12988_v21  ;;  %v23806_v6 = vpack.c.bf16 %v12999_v34, %v12987_v62  ;;  %16980 = vmatpush3.bf16.msra.mxu0 %v18610_v40  ;;  %15140 = vmatprep.subr.bf16.mxu1 %v18613_v16  ;;  %v18630_v18 = vld [vmem:[#allocation22 + $0x800] ss:$12 sps:$4 sm:$0xff]   ;;  %v18634_v43 = vld [vmem:[#allocation22 + $0x8d8] ss:$12 sps:$4 sm:$0xff]   ;;  %v18639_v17 = vld [vmem:[#allocation22 + $0x8f0] ss:$12 sps:$4 sm:$0xff]  }
 0xc51   :  { %v23808_v37 = vpack.c.bf16 %v13001_v47, %v12989_v8  ;;  %16981 = vmatprep.subr.bf16.mxu0 %v18614_v28  ;;  %v18631_v2 = vld [vmem:[#allocation22 + $0x5b8] ss:$12 sps:$4 sm:$0xff]   ;;  %v18638_v39 = vld [vmem:[#allocation22 + $0x5d4] ss:$12 sps:$4 sm:$0xff]   ;;  %v18636_v5 = vld [vmem:[#allocation22 + $0x5d0] ss:$12 sps:$4 sm:$0xff]  }
 0xc52   :  { %15517 = vmatprep.mubr.bf16.mxu0 %v23806_v6  ;;  %v18635_v13 = vld [vmem:[#allocation22 + $0x818] ss:$12 sps:$4 sm:$0xff]   ;;  %v18640_v40 = vld [vmem:[#allocation22 + $0x830] ss:$12 sps:$4 sm:$0xff]   ;;  %v18641_v58 = vld [vmem:[#allocation22 + $0x5e8] ss:$12 sps:$4 sm:$0xff]  }
 0xc53   :  { %15141 = vmatpush1.bf16.msra.mxu1 %v18611_v35  ;;  %15518 = vmatmul.mubr.bf16.gmra.mrb[152].mxu0 %v23802_v0  ;;  %v18643_v16 = vld [vmem:[#allocation22 + $0x5ec] ss:$12 sps:$4 sm:$0xff]   ;;  %v18646_v51 = vld [vmem:[#allocation22 + $0x604] ss:$12 sps:$4 sm:$0xff]   ;;  %v18649_v47 = vld [vmem:[#allocation22 + $0x61c] ss:$12 sps:$4 sm:$0xff]  }
 0xc54   :  { %16982 = vmatpush3.bf16.msra.mxu0 %v18615_v48  ;;  %15558 = vmatprep.mubr.bf16.mxu0 %v23796_v33  ;;  %v18644_v34 = vld [vmem:[#allocation22 + $0x600] ss:$12 sps:$4 sm:$0xff]   ;;  %v18647_v48 = vld [vmem:[#allocation22 + $0x618] ss:$12 sps:$4 sm:$0xff]  }
 0xc55   :  { %15142 = vmatprep.subr.bf16.mxu1 %v18618_v45  ;;  %16983 = vmatprep.subr.bf16.mxu0 %v18619_v1  ;;  %v18652_v45 = vld [vmem:[#allocation22 + $0x634] ss:$12 sps:$4 sm:$0xff]   ;;  %v18650_v1 = vld [vmem:[#allocation22 + $0x630] ss:$12 sps:$4 sm:$0xff]  }
 0xc57   :  { %15143 = vmatpush1.bf16.msra.mxu1 %v18616_v12  ;;  %v18655_v12 = vld [vmem:[#allocation22 + $0x64c] ss:$12 sps:$4 sm:$0xff]  }
 0xc58   :  { %16984 = vmatpush3.bf16.msra.mxu0 %v18620_v50  ;;  %15144 = vmatprep.subr.bf16.mxu1 %v18623_v52  ;;  %v18653_v50 = vld [vmem:[#allocation22 + $0x648] ss:$12 sps:$4 sm:$0xff]   ;;  %v23820_v52 = vld [vmem:[#allocation23] sm:$0x7] }
 0xc59   :  { %16985 = vmatprep.subr.bf16.mxu0 %v18624_v23  ;;  %v18661_v23 = vld [vmem:[#allocation22 + $0x67c] ss:$12 sps:$4 sm:$0xff]  }
 0xc5b   :  { %15145 = vmatpush1.bf16.msra.mxu1 %v18621_v59  ;;  %v13423_v59 = vrot.slane %v23820_v52, %v24343_v60  ;;  %v18665_v60 = vld [vmem:[#allocation22 + $0x6a8] ss:$12 sps:$4 sm:$0xff]  }
 0xc5c   :  { %16986 = vmatpush3.bf16.msra.mxu0 %v18625_v27  ;;  %15146 = vmatprep.subr.bf16.mxu1 %v18628_v26  ;;  %v18659_v27 = vld [vmem:[#allocation22 + $0x678] ss:$12 sps:$4 sm:$0xff]   ;;  %v18664_v26 = vld [vmem:[#allocation22 + $0x694] ss:$12 sps:$4 sm:$0xff]  }
 0xc5d   :  { %16987 = vmatprep.subr.bf16.mxu0 %v18629_v61 }
 0xc5f   :  { %15147 = vmatpush1.bf16.msra.mxu1 %v18626_v56 }
 0xc60   :  { %16988 = vmatpush3.bf16.msra.mxu0 %v18630_v18  ;;  %15148 = vmatprep.subr.bf16.mxu1 %v18633_v19  ;;  %v18662_v19 = vld [vmem:[#allocation22 + $0x690] ss:$12 sps:$4 sm:$0xff]  }
 0xc61   :  { %v16853_v20 = vpop.f32.mrb[116].mxu0  ;;  %16989 = vmatprep.subr.bf16.mxu0 %v18634_v43 }
 0xc62   :  { %v16854_v31 = vpop.f32.mrb[117].mxu0 }
 0xc63   :  { %v16855_v29 = vadd.f32 %v16854_v31, %v16853_v20  ;;  %15149 = vmatpush1.bf16.msra.mxu1 %v18631_v2  ;;  %v16856_v10 = vpop.f32.mrb[118].mxu0  ;;  %v18667_v2 = vld [vmem:[#allocation22 + $0x6ac] ss:$12 sps:$4 sm:$0xff]   ;;  %v18670_v31 = vld [vmem:[#allocation22 + $0x6c4] ss:$12 sps:$4 sm:$0xff]  }
 0xc64   :  { %v16857_v42 = vpop.f32.mrb[119].mxu0  ;;  %16990 = vmatpush3.bf16.msra.mxu0 %v18635_v13  ;;  %15150 = vmatprep.subr.bf16.mxu1 %v18638_v39 }
 0xc65   :  { %v16858_v4 = vadd.f32 %v16857_v42, %v16856_v10  ;;  %16991 = vmatprep.subr.bf16.mxu0 %v18639_v17  ;;  %v15316_v56 = vadd.f32 %v16855_v29, %v13423_v59 }
 0xc67   :  { %15151 = vmatpush1.bf16.msra.mxu1 %v18636_v5  ;;  %v15319_v13 = vadd.f32 %v16858_v4, %v13423_v59 }
 0xc68   :  { %16992 = vmatpush3.bf16.msra.mxu0 %v18640_v40  ;;  %15152 = vmatprep.subr.bf16.mxu1 %v18643_v16  ;;  %v18668_v16 = vld [vmem:[#allocation22 + $0x6c0] ss:$12 sps:$4 sm:$0xff]  }
 0xc69   :  { %v16859_v28 = vpop.f32.mrb[120].mxu0 }
 0xc6a   :  { %v16860_v21 = vpop.f32.mrb[121].mxu0 }
 0xc6b   :  { %v16861_v62 = vadd.f32 %v16860_v21, %v16859_v28  ;;  %15153 = vmatpush1.bf16.msra.mxu1 %v18641_v58  ;;  %v16862_v46 = vpop.f32.mrb[122].mxu0  ;;  %15559 = vmatmul.mubr.bf16.vlgmr.msra.gmra.mrb[156].mxu0 %v23792_v30 }
 0xc6c   :  { %v16863_v8 = vpop.f32.mrb[123].mxu0  ;;  %15566 = vmatprep.mubr.bf16.mxu0 %v23808_v37  ;;  %15175 = vmatprep.subr.bf16.mxu1 %v18646_v51  ;;  %v18673_v51 = vld [vmem:[#allocation22 + $0x6dc] ss:$12 sps:$4 sm:$0xff]  }
 0xc6d   :  { %v16864_v35 = vadd.f32 %v16863_v8, %v16862_v46  ;;  %v15324_v29 = vadd.f32 %v16861_v62, %v13423_v59  ;;  %v18676_v8 = vld [vmem:[#allocation22 + $0x6f4] ss:$12 sps:$4 sm:$0xff]   ;;  %v18679_v62 = vld [vmem:[#allocation22 + $0x70c] ss:$12 sps:$4 sm:$0xff]  }
 0xc6e   :  { %15155 = vmatmul.mubr.bf16.vlgmr.msra.gmra.mrb[100].mxu1 %v23750_v14  ;;  %v18658_v14 = vld [vmem:[#allocation22 + $0x664] ss:$12 sps:$4 sm:$0xff]  }
 0xc6f   :  { %15164 = vmatprep.mubr.bf16.mxu1 %v23768_v55  ;;  %15176 = vmatpush1.bf16.msra.mxu1 %v18644_v34  ;;  %v18656_v55 = vld [vmem:[#allocation22 + $0x660] ss:$12 sps:$4 sm:$0xff]   ;;  %v15327_v4 = vadd.f32 %v16864_v35, %v13423_v59  ;;  %v18671_v34 = vld [vmem:[#allocation22 + $0x6d8] ss:$12 sps:$4 sm:$0xff]   ;;  %v18685_v35 = vld [vmem:[#allocation22 + $0x73c] ss:$12 sps:$4 sm:$0xff]  }
 0xc70   :  { %15177 = vmatprep.subr.bf16.mxu1 %v18649_v47  ;;  %v18674_v47 = vld [vmem:[#allocation22 + $0x6f0] ss:$12 sps:$4 sm:$0xff]  }
 0xc71   :  { %v18694_v59 = vld [vmem:[#allocation22 + $0x784] ss:$12 sps:$4 sm:$0xff]  }
 0xc73   :  { %15178 = vmatpush1.bf16.msra.mxu1 %v18647_v48  ;;  %15567 = vmatmul.mubr.bf16.gmra.mrb[160].mxu0 %v23804_v54  ;;  %v18677_v48 = vld [vmem:[#allocation22 + $0x708] ss:$12 sps:$4 sm:$0xff]  }
 0xc74   :  { %15179 = vmatprep.subr.bf16.mxu1 %v18652_v45  ;;  %v18682_v45 = vld [vmem:[#allocation22 + $0x724] ss:$12 sps:$4 sm:$0xff]  }
 0xc76   :  { %15165 = vmatmul.mubr.bf16.gmra.mrb[104].mxu1 %v23763_v44 }
 0xc77   :  { %15180 = vmatpush1.bf16.msra.mxu1 %v18650_v1  ;;  %15207 = vmatprep.mubr.bf16.mxu1 %v23794_v36  ;;  %v18680_v1 = vld [vmem:[#allocation22 + $0x720] ss:$12 sps:$4 sm:$0xff]  }
 0xc78   :  { %15181 = vmatprep.subr.bf16.mxu1 %v18655_v12  ;;  %v18683_v12 = vld [vmem:[#allocation22 + $0x738] ss:$12 sps:$4 sm:$0xff]  }
 0xc7b   :  { %15182 = vmatpush1.bf16.msra.mxu1 %v18653_v50  ;;  %v18688_v50 = vld [vmem:[#allocation22 + $0x754] ss:$12 sps:$4 sm:$0xff]  }
 0xc7c   :  { %15183 = vmatprep.subr.bf16.mxu1 %v18658_v14  ;;  %v18686_v14 = vld [vmem:[#allocation22 + $0x750] ss:$12 sps:$4 sm:$0xff]  }
 0xc7f   :  { %15184 = vmatpush1.bf16.msra.mxu1 %v18656_v55  ;;  %v18691_v55 = vld [vmem:[#allocation22 + $0x76c] ss:$12 sps:$4 sm:$0xff]  }
 0xc80   :  { %15185 = vmatprep.subr.bf16.mxu1 %v18661_v23  ;;  %v18689_v23 = vld [vmem:[#allocation22 + $0x768] ss:$12 sps:$4 sm:$0xff]  }
 0xc81   :  { %v16881_v44 = vpop.f32.mrb[124].mxu0 }
 0xc82   :  { %v16882_v61 = vpop.f32.mrb[125].mxu0 }
 0xc83   :  { %v16883_v36 = vadd.f32 %v16882_v61, %v16881_v44  ;;  %15186 = vmatpush1.bf16.msra.mxu1 %v18659_v27  ;;  %v16884_v18 = vpop.f32.mrb[126].mxu0  ;;  %v18692_v27 = vld [vmem:[#allocation22 + $0x780] ss:$12 sps:$4 sm:$0xff]   ;;  %v18695_v44 = vld [vmem:[#allocation22 + $0x798] ss:$12 sps:$4 sm:$0xff]  }
 0xc84   :  { %v16885_v43 = vpop.f32.mrb[127].mxu0  ;;  %15187 = vmatprep.subr.bf16.mxu1 %v18664_v26  ;;  %v18697_v26 = vld [vmem:[#allocation22 + $0x79c] ss:$12 sps:$4 sm:$0xff]   ;;  %v18700_v61 = vld [vmem:[#allocation22 + $0x7b4] ss:$12 sps:$4 sm:$0xff]  }
 0xc85   :  { %v23824_v39 = vadd.f32 %v16883_v36, %v15316_v56  ;;  %v16886_v20 = vadd.f32 %v16885_v43, %v16884_v18  ;;  %v18698_v56 = vld [vmem:[#allocation22 + $0x7b0] ss:$12 sps:$4 sm:$0xff]   ;;  %v18703_v36 = vld [vmem:[#allocation22 + $0x7cc] ss:$12 sps:$4 sm:$0xff]   ;;  %v18701_v18 = vld [vmem:[#allocation22 + $0x7c8] ss:$12 sps:$4 sm:$0xff]  }
 0xc87   :  { %v23826_v17 = vadd.f32 %v16886_v20, %v15319_v13  ;;  %15188 = vmatpush1.bf16.msra.mxu1 %v18662_v19  ;;  %v18706_v19 = vld [vmem:[#allocation22 + $0x7e4] ss:$12 sps:$4 sm:$0xff]  }
 0xc88   :  { %15189 = vmatprep.subr.bf16.mxu1 %v18667_v2 }
 0xc89   :  { %v16887_v10 = vpop.f32.mrb[128].mxu0 }
 0xc8a   :  { %v16888_v5 = vpop.f32.mrb[129].mxu0 }
 0xc8b   :  { %v16889_v42 = vadd.f32 %v16888_v5, %v16887_v10  ;;  %15190 = vmatpush1.bf16.msra.mxu1 %v18665_v60  ;;  %v16890_v40 = vpop.f32.mrb[130].mxu0  ;;  %v18707_v60 = vld [vmem:[#allocation22 + $0x7f8] ss:$12 sps:$4 sm:$0xff]   ;;  %v18712_v10 = vld [vmem:[#allocation22 + $0x814] ss:$12 sps:$4 sm:$0xff]  }
 0xc8c   :  { %v16891_v58 = vpop.f32.mrb[131].mxu0  ;;  %15191 = vmatprep.subr.bf16.mxu1 %v18670_v31 }
 0xc8d   :  { %v23828_v28 = vadd.f32 %v16889_v42, %v15324_v29  ;;  %v16892_v21 = vadd.f32 %v16891_v58, %v16890_v40  ;;  %v18710_v29 = vld [vmem:[#allocation22 + $0x810] ss:$12 sps:$4 sm:$0xff]   ;;  %v18715_v42 = vld [vmem:[#allocation22 + $0x82c] ss:$12 sps:$4 sm:$0xff]  }
 0xc8f   :  { %v23830_v46 = vadd.f32 %v16892_v21, %v15327_v4  ;;  %15192 = vmatpush1.bf16.msra.mxu1 %v18668_v16  ;;  %v18713_v4 = vld [vmem:[#allocation22 + $0x828] ss:$12 sps:$4 sm:$0xff]  }
 0xc90   :  { %15193 = vmatprep.subr.bf16.mxu1 %v18673_v51 }
 0xc93   :  { %15194 = vmatpush1.bf16.msra.mxu1 %v18671_v34  ;;  %v18718_v34 = vld [vmem:[#allocation22 + $0x844] ss:$12 sps:$4 sm:$0xff]  }
 0xc94   :  { %15195 = vmatprep.subr.bf16.mxu1 %v18676_v8 }
 0xc97   :  { %15196 = vmatpush1.bf16.msra.mxu1 %v18674_v47 }
 0xc98   :  { %15197 = vmatprep.subr.bf16.mxu1 %v18679_v62  ;;  %v18721_v62 = vld [vmem:[#allocation22 + $0x85c] ss:$12 sps:$4 sm:$0xff]  }
 0xc9b   :  { %15198 = vmatpush1.bf16.msra.mxu1 %v18677_v48  ;;  %v18719_v48 = vld [vmem:[#allocation22 + $0x858] ss:$12 sps:$4 sm:$0xff]  }
 0xc9c   :  { %15199 = vmatprep.subr.bf16.mxu1 %v18682_v45  ;;  %v18724_v45 = vld [vmem:[#allocation22 + $0x874] ss:$12 sps:$4 sm:$0xff]  }
 0xc9f   :  { %15200 = vmatpush1.bf16.msra.mxu1 %v18680_v1  ;;  %v18722_v1 = vld [vmem:[#allocation22 + $0x870] ss:$12 sps:$4 sm:$0xff]  }
 0xca0   :  { %15201 = vmatprep.subr.bf16.mxu1 %v18685_v35  ;;  %v18727_v35 = vld [vmem:[#allocation22 + $0x88c] ss:$12 sps:$4 sm:$0xff]  }
 0xca3   :  { %15202 = vmatpush1.bf16.msra.mxu1 %v18683_v12  ;;  %v18725_v12 = vld [vmem:[#allocation22 + $0x888] ss:$12 sps:$4 sm:$0xff]  }
 0xca4   :  { %15203 = vmatprep.subr.bf16.mxu1 %v18688_v50  ;;  %v18730_v50 = vld [vmem:[#allocation22 + $0x8a4] ss:$12 sps:$4 sm:$0xff]  }
 0xca7   :  { %15204 = vmatpush1.bf16.msra.mxu1 %v18686_v14 }
 0xca8   :  { %15205 = vmatprep.subr.bf16.mxu1 %v18691_v55 }
 0xcab   :  { %15206 = vmatpush1.bf16.msra.mxu1 %v18689_v23  ;;  %v18731_v23 = vld [vmem:[#allocation22 + $0x8b8] ss:$12 sps:$4 sm:$0xff]  }
 0xcac   :  { %15228 = vmatprep.subr.bf16.mxu1 %v18694_v59 }
 0xcae   :  { %15208 = vmatmul.mubr.bf16.vlgmr.msra.gmra.mrb[100].mxu1 %v23790_v32  ;;  %v18704_v32 = vld [vmem:[#allocation22 + $0x7e0] ss:$12 sps:$4 sm:$0xff]  }
 0xcaf   :  { %15217 = vmatprep.mubr.bf16.mxu1 %v23806_v6  ;;  %15229 = vmatpush1.bf16.msra.mxu1 %v18692_v27  ;;  %v18709_v6 = vld [vmem:[#allocation22 + $0x7fc] ss:$12 sps:$4 sm:$0xff]  }
 0xcb0   :  { %15230 = vmatprep.subr.bf16.mxu1 %v18697_v26  ;;  %v18736_v26 = vld [vmem:[#allocation22 + $0x8d4] ss:$12 sps:$4 sm:$0xff]  }
 0xcb3   :  { %15231 = vmatpush1.bf16.msra.mxu1 %v18695_v44 }
 0xcb4   :  { %15232 = vmatprep.subr.bf16.mxu1 %v18700_v61 }
 0xcb6   :  { %15218 = vmatmul.mubr.bf16.gmra.mrb[104].mxu1 %v23802_v0 }
 0xcb7   :  { %15233 = vmatpush1.bf16.msra.mxu1 %v18698_v56  ;;  %15260 = vmatprep.mubr.bf16.mxu1 %v23796_v33 }
 0xcb8   :  { %15234 = vmatprep.subr.bf16.mxu1 %v18703_v36  ;;  %v18734_v36 = vld [vmem:[#allocation22 + $0x8d0] ss:$12 sps:$4 sm:$0xff]  }
 0xcbb   :  { %15235 = vmatpush1.bf16.msra.mxu1 %v18701_v18 }
 0xcbc   :  { %15236 = vmatprep.subr.bf16.mxu1 %v18706_v19  ;;  %v18739_v19 = vld [vmem:[#allocation22 + $0x8ec] ss:$12 sps:$4 sm:$0xff]  }
 0xcbd   :  { %v16909_v43 = vpop.f32.mrb[132].mxu0 }
 0xcbe   :  { %v16910_v2 = vpop.f32.mrb[133].mxu0 }
 0xcbf   :  { %15237 = vmatpush1.bf16.msra.mxu1 %v18704_v32  ;;  %v16911_v13 = vadd.f32 %v16910_v2, %v16909_v43  ;;  %v16912_v20 = vpop.f32.mrb[134].mxu0  ;;  %v18737_v43 = vld [vmem:[#allocation22 + $0x8e8] ss:$12 sps:$4 sm:$0xff]  }
 0xcc0   :  { %15238 = vmatprep.subr.bf16.mxu1 %v18709_v6  ;;  %v16913_v31 = vpop.f32.mrb[135].mxu0 }
 0xcc1   :  { %v15414_v0 = vadd.f32 %v16911_v13, %v23824_v39  ;;  %v16914_v5 = vadd.f32 %v16913_v31, %v16912_v20 }
 0xcc3   :  { %v15417_v33 = vadd.f32 %v16914_v5, %v23826_v17  ;;  %15239 = vmatpush1.bf16.msra.mxu1 %v18707_v60  ;;  %v18716_v17 = vld [vmem:[#allocation22 + $0x840] ss:$12 sps:$4 sm:$0xff]  }
 0xcc4   :  { %15240 = vmatprep.subr.bf16.mxu1 %v18712_v10 }
 0xcc5   :  { %v16915_v40 = vpop.f32.mrb[136].mxu0 }
 0xcc6   :  { %v16916_v16 = vpop.f32.mrb[137].mxu0 }
 0xcc7   :  { %15241 = vmatpush1.bf16.msra.mxu1 %v18710_v29  ;;  %v16917_v58 = vadd.f32 %v16916_v16, %v16915_v40  ;;  %v16918_v51 = vpop.f32.mrb[138].mxu0 }
 0xcc8   :  { %15242 = vmatprep.subr.bf16.mxu1 %v18715_v42  ;;  %v16919_v21 = vpop.f32.mrb[139].mxu0 }
 0xcc9   :  { %v15422_v8 = vadd.f32 %v16917_v58, %v23828_v28  ;;  %v16920_v47 = vadd.f32 %v16919_v21, %v16918_v51  ;;  %v18728_v28 = vld [vmem:[#allocation22 + $0x8a0] ss:$12 sps:$4 sm:$0xff]  }
 0xccb   :  { %v15425_v39 = vadd.f32 %v16920_v47, %v23830_v46  ;;  %15243 = vmatpush1.bf16.msra.mxu1 %v18713_v4  ;;  %v18733_v46 = vld [vmem:[#allocation22 + $0x8bc] ss:$12 sps:$4 sm:$0xff]  }
 0xccc   :  { %15244 = vmatprep.subr.bf16.mxu1 %v18718_v34 }
 0xccf   :  { %15245 = vmatpush1.bf16.msra.mxu1 %v18716_v17 }
 0xcd0   :  { %15246 = vmatprep.subr.bf16.mxu1 %v18721_v62 }
 0xcd3   :  { %15247 = vmatpush1.bf16.msra.mxu1 %v18719_v48 }
 0xcd4   :  { %15248 = vmatprep.subr.bf16.mxu1 %v18724_v45 }
 0xcd7   :  { %15249 = vmatpush1.bf16.msra.mxu1 %v18722_v1 }
 0xcd8   :  { %15250 = vmatprep.subr.bf16.mxu1 %v18727_v35 }
 0xcdb   :  { %15251 = vmatpush1.bf16.msra.mxu1 %v18725_v12 }
 0xcdc   :  { %15252 = vmatprep.subr.bf16.mxu1 %v18730_v50 }
 0xcde   :  { %v16937_v14 = vpop.f32.mrb[140].mxu0 }
 0xcdf   :  { %15253 = vmatpush1.bf16.msra.mxu1 %v18728_v28  ;;  %v16938_v55 = vpop.f32.mrb[141].mxu0 }
 0xce0   :  { %v16939_v59 = vadd.f32 %v16938_v55, %v16937_v14  ;;  %v16940_v27 = vpop.f32.mrb[142].mxu0  ;;  %15254 = vmatprep.subr.bf16.mxu1 %v18733_v46 }
 0xce1   :  { %v16941_v44 = vpop.f32.mrb[143].mxu0 }
 0xce2   :  { %v15463_v61 = vadd.f32 %v16939_v59, %v15414_v0  ;;  %v16942_v56 = vadd.f32 %v16941_v44, %v16940_v27 }
 0xce3   :  { %15255 = vmatpush1.bf16.msra.mxu1 %v18731_v23 }
 0xce4   :  { %v15466_v18 = vadd.f32 %v16942_v56, %v15417_v33  ;;  %15256 = vmatprep.subr.bf16.mxu1 %v18736_v26 }
 0xce6   :  { %v16943_v32 = vpop.f32.mrb[144].mxu0 }
 0xce7   :  { %15257 = vmatpush1.bf16.msra.mxu1 %v18734_v36  ;;  %v16944_v6 = vpop.f32.mrb[145].mxu0 }
 0xce8   :  { %v16945_v2 = vadd.f32 %v16944_v6, %v16943_v32  ;;  %v16946_v13 = vpop.f32.mrb[146].mxu0  ;;  %15258 = vmatprep.subr.bf16.mxu1 %v18739_v19 }
 0xce9   :  { %v16947_v20 = vpop.f32.mrb[147].mxu0 }
 0xcea   :  { %v15471_v60 = vadd.f32 %v16945_v2, %v15422_v8  ;;  %v16948_v31 = vadd.f32 %v16947_v20, %v16946_v13 }
 0xceb   :  { %15259 = vmatpush1.bf16.msra.mxu1 %v18737_v43 }
 0xcec   :  { %v15474_v10 = vadd.f32 %v16948_v31, %v15425_v39 }
 0xcee   :  { %15261 = vmatmul.mubr.bf16.vlgmr.msra.gmra.mrb[100].mxu1 %v23792_v30 }
 0xcef   :  { %15270 = vmatprep.mubr.bf16.mxu1 %v23808_v37 }
 0xcf6   :  { %15271 = vmatmul.mubr.bf16.gmra.mrb[104].mxu1 %v23804_v54 }
 0xd1e   :  { %v16965_v0 = vpop.f32.mrb[148].mxu0 }
 0xd1f   :  { %v16966_v5 = vpop.f32.mrb[149].mxu0 }
 0xd20   :  { %v16967_v33 = vadd.f32 %v16966_v5, %v16965_v0  ;;  %v16968_v29 = vpop.f32.mrb[150].mxu0 }
 0xd21   :  { %v16969_v42 = vpop.f32.mrb[151].mxu0 }
 0xd22   :  { %v15512_v40 = vadd.f32 %v16967_v33, %v15463_v61  ;;  %v16970_v16 = vadd.f32 %v16969_v42, %v16968_v29 }
 0xd24   :  { %v15515_v58 = vadd.f32 %v16970_v16, %v15466_v18 }
 0xd26   :  { %v16971_v51 = vpop.f32.mrb[152].mxu0 }
 0xd27   :  { %v16972_v4 = vpop.f32.mrb[153].mxu0 }
 0xd28   :  { %v16973_v21 = vadd.f32 %v16972_v4, %v16971_v51  ;;  %v16974_v34 = vpop.f32.mrb[154].mxu0 }
 0xd29   :  { %v16975_v8 = vpop.f32.mrb[155].mxu0 }
 0xd2a   :  { %v15520_v47 = vadd.f32 %v16973_v21, %v15471_v60  ;;  %v16976_v39 = vadd.f32 %v16975_v8, %v16974_v34 }
 0xd2c   :  { %v15523_v30 = vadd.f32 %v16976_v39, %v15474_v10 }
 0xd3e   :  { %v16993_v17 = vpop.f32.mrb[156].mxu0 }
 0xd3f   :  { %v16994_v37 = vpop.f32.mrb[157].mxu0 }
 0xd40   :  { %v16995_v62 = vadd.f32 %v16994_v37, %v16993_v17  ;;  %v16996_v54 = vpop.f32.mrb[158].mxu0 }
 0xd41   :  { %v16997_v48 = vpop.f32.mrb[159].mxu0 }
 0xd42   :  { %v15561_v45 = vadd.f32 %v16995_v62, %v15512_v40  ;;  %v16998_v1 = vadd.f32 %v16997_v48, %v16996_v54 }
 0xd44   :  { %v15577_v35 = vadd.f32 %v15561_v45, %v23479_v41  ;;  %v15564_v12 = vadd.f32 %v16998_v1, %v15515_v58  ;;  %v13415_v41 = vrot.slane %v23820_v52, %v24341_v15 }
 0xd46   :  { %15589 = vst [vmem:[#allocation25 + $0x10] sm:$0xff] %v15577_v35  ;;  %v15580_v50 = vadd.f32 %v15564_v12, %v23483_v3  ;;  %v16999_v28 = vpop.f32.mrb[160].mxu0  ;;  %v13419_v3 = vrot.slane %v23820_v52, %v24342_v11 }
 0xd47   :  { %v17000_v46 = vpop.f32.mrb[161].mxu0 }
 0xd48   :  { %15592 = vst [vmem:[#allocation25 + $0x28] sm:$0xff] %v15580_v50  ;;  %v17001_v14 = vadd.f32 %v17000_v46, %v16999_v28  ;;  %v17002_v55 = vpop.f32.mrb[162].mxu0 }
 0xd49   :  { %v17003_v23 = vpop.f32.mrb[163].mxu0 }
 0xd4a   :  { %v15569_v59 = vadd.f32 %v17001_v14, %v15520_v47  ;;  %v17004_v27 = vadd.f32 %v17003_v23, %v17002_v55 }
 0xd4c   :  { %v15583_v26 = vadd.f32 %v15569_v59, %v23493_v9  ;;  %v15572_v44 = vadd.f32 %v17004_v27, %v15523_v30 }
 0xd4e   :  { %15595 = vst [vmem:[#allocation25 + $0x40] sm:$0xff] %v15583_v26  ;;  %v15586_v61 = vadd.f32 %v15572_v44, %v23502_v38 }
 0xd50   :  { %15598 = vst [vmem:[#allocation25 + $0x58] sm:$0xff] %v15586_v61 }
 0xdc1   :  { %v15262_v56 = vpop.f32.mrb[100].mxu1 }
 0xdc2   :  { %v17333_v36 = vadd.f32 %v15262_v56, %v13415_v41  ;;  %v15264_v18 = vpop.f32.mrb[101].mxu1 }
 0xdc3   :  { %v17334_v19 = vadd.f32 %v15264_v18, %v13419_v3  ;;  %v15266_v32 = vpop.f32.mrb[102].mxu1 }
 0xdc4   :  { %v15575_v6 = vadd.f32 %v17333_v36, %v23469_v7  ;;  %v17335_v43 = vadd.f32 %v15266_v32, %v13415_v41  ;;  %v15268_v9 = vpop.f32.mrb[103].mxu1 }
 0xdc5   :  { %v15576_v2 = vadd.f32 %v17334_v19, %v23471_v53  ;;  %v17336_v13 = vadd.f32 %v15268_v9, %v13419_v3 }
 0xdc6   :  { %15587 = vst [vmem:[#allocation25] sm:$0xff] %v15575_v6  ;;  %v15578_v38 = vadd.f32 %v17335_v43, %v23473_v22 }
 0xdc7   :  { %15588 = vst [vmem:[#allocation25 + $0x8] sm:$0xff] %v15576_v2  ;;  %v15579_v15 = vadd.f32 %v17336_v13, %v23475_v25 }
 0xdc8   :  { %15590 = vst [vmem:[#allocation25 + $0x18] sm:$0xff] %v15578_v38 }
 0xdc9   :  { %15591 = vst [vmem:[#allocation25 + $0x20] sm:$0xff] %v15579_v15  ;;  %v15272_v11 = vpop.f32.mrb[104].mxu1 }
 0xdca   :  { %v17337_v52 = vadd.f32 %v15272_v11, %v13415_v41  ;;  %v15274_v20 = vpop.f32.mrb[105].mxu1 }
 0xdcb   :  { %v17338_v60 = vadd.f32 %v15274_v20, %v13419_v3  ;;  %v15276_v31 = vpop.f32.mrb[106].mxu1 }
 0xdcc   :  { %v15581_v7 = vadd.f32 %v17337_v52, %v23486_v57  ;;  %v17339_v10 = vadd.f32 %v15276_v31, %v13415_v41  ;;  %v15278_v0 = vpop.f32.mrb[107].mxu1 }
 0xdcd   :  { %v15582_v53 = vadd.f32 %v17338_v60, %v23489_v24  ;;  %v17340_v5 = vadd.f32 %v15278_v0, %v13419_v3 }
 0xdce   :  { %15593 = vst [vmem:[#allocation25 + $0x30] sm:$0xff] %v15581_v7  ;;  %v15584_v22 = vadd.f32 %v17339_v10, %v23491_v49 }
 0xdcf   :  { %15594 = vst [vmem:[#allocation25 + $0x38] sm:$0xff] %v15582_v53  ;;  %v15585_v25 = vadd.f32 %v17340_v5, %v23495_v63 }
 0xdd0   :  { %15596 = vst [vmem:[#allocation25 + $0x48] sm:$0xff] %v15584_v22 }
 0xdd1   :  { %15597 = vst [vmem:[#allocation25 + $0x50] sm:$0xff] %v15585_v25 }
 0xdd2   :  { %19375 = shalt.err (!%p19372_p4)
}
 0xdd3   :  { %s19376_s20 = scalar_lea.hbm %s23889_s15, 1536 }
 0xdd4   :  { %p19377_p5 = scmp.ne.s32.totalorder %s23889_s15, %s19376_s20  ;;  %p19380_p6 = scmp.lt.u32.totalorder %s19376_s20, %s23889_s15 }
 0xdd6   :  { %p19382_p7 = pnand %p19380_p6, %p19377_p5 }
 0xdd8   :  { %19385 = shalt.err (!%p19382_p7)
}
 0xdd9   :  { %15610 = dma.vmem_to_hbm [thread:$0]  %s15605_s8, 1536, %s23889_s15, [#allocation4], %s19411_s12, %s19411_s12, %s19412_s21  }
 0xdda   :  { %19402 = dma.done.wait [#allocation4], 1536  }
 0xddb   :  { %19403 = vsyncadd [#allocation4], 4294965760 }
 0xddc   :  { %15614 = vsyncpa [#allocation3], 1 }
 0xddd   :  { %15615 = vsyncpa [#allocation6], 1 }
 0xdde   :  { %15616 = vsyncpa [#allocation9], 1 }
 0xddf   :  { %15617 = vsyncpa [#allocation12], 1 }
 0xde0   :  { %15618 = vsyncpa [#allocation15], 1 }
 0xde1   :  { %15619 = vsyncpa [#allocation18], 1 }
 0xde2   :  { %15620 = vsyncpa [#allocation21], 1 }
 0xde3   :  { %15621 = vsyncpa [#allocation24], 1 }
 0xde4   :  { %15622 = vsyncpa [#allocation4], 1 }

</bundles_post_ra>
